<compile_context>
chip_gen: v7x
topology: tpu7x:2x2x1
jax: 0.10.0
libtpu: 0.0.40
codegen_flags: <defaults>
</compile_context>

<pallas_src>
import functools

import numpy as np

import jax
import jax.numpy as jnp
from jax.experimental import pallas as pl
from jax.experimental.pallas import tpu as pltpu


def _round_up(x, m):
    return ((x + m - 1) // m) * m


# ---------------------------------------------------------------------------
# Fused conv3x3 + BatchNorm(batch stats) + (residual) + ReLU kernel
# ---------------------------------------------------------------------------
def _conv_bn_relu_kernel(*refs, Cin_k, Lr, Wp, inv_count, has_res, eps):
    if has_res:
        (x_ref, w_ref, g_ref, b_ref, m_ref, res_ref,
         o_ref, patches, s_sum, s_ssq) = refs
    else:
        (x_ref, w_ref, g_ref, b_ref, m_ref,
         o_ref, patches, s_sum, s_ssq) = refs
        res_ref = None

    n = pl.program_id(0)

    @pl.when(n == 0)
    def _():
        s_sum[...] = jnp.zeros_like(s_sum)
        s_ssq[...] = jnp.zeros_like(s_ssq)

    # --- K-folded im2col: stack 9 shifted bf16 slices of the padded frame ---
    # along sublanes into a single [9*Cin, Lr] operand (Lr is a multiple of
    # 128 -> lane-dense stores; Cin_k is a multiple of 16 -> aligned sublane
    # offsets for the bf16 tiling).
    for i in range(3):
        for j in range(3):
            t = i * 3 + j
            d = i * Wp + j
            patches[t * Cin_k:(t + 1) * Cin_k, :] = x_ref[0, :, d:d + Lr]

    # --- One MXU push with the full contraction dim K = 9*Cin (f32 acc) -----
    y = jnp.dot(w_ref[...], patches[...], preferred_element_type=jnp.float32)

    # --- BN batch statistics fused with the conv pass (masked to the valid,
    #     stride-surviving output positions), accumulated across the batch ---
    m = m_ref[...]                                   # [1, Lr] validity mask
    ym = y * m
    s_sum[...] += jnp.sum(ym, axis=1, keepdims=True)
    s_ssq[...] += jnp.sum(ym * y, axis=1, keepdims=True)

    # Stash the pre-BN conv output in the batch-resident output buffer.
    o_ref[n] = y.astype(o_ref.dtype)

    # --- Last batch step: stats complete -> normalize (+residual) + ReLU ----
    # over the whole resident output.  BN math stays f32; activations bf16.
    @pl.when(n == pl.num_programs(0) - 1)
    def _():
        mean = s_sum[...] * inv_count
        var = jnp.maximum(s_ssq[...] * inv_count - mean * mean, 0.0)
        scale = g_ref[...] * jax.lax.rsqrt(var + eps)      # [Cout, 1]
        shift = b_ref[...] - mean * scale                  # [Cout, 1]
        z = o_ref[...].astype(jnp.float32) * scale + shift  # [N, Cout, Lr]
        if has_res:
            z = z + res_ref[...].astype(jnp.float32)
        o_ref[...] = jnp.maximum(z, 0.0).astype(o_ref.dtype)


def _valid_mask(H, W, Wp, stride, Lr):
    """Mask of valid (stride-surviving) conv-output positions in the over frame."""
    l = np.arange(Lr)
    h = l // Wp
    w = l % Wp
    valid = (l < H * Wp) & (w < W) & (h % stride == 0) & (w % stride == 0)
    return jnp.asarray(valid.astype(np.float32)[None, :])          # [1, Lr]


def conv_bn_relu(x, w, gamma, beta, stride, residual=None, eps=1e-5):
    """x: [N, Cin, H, W], w: [Cout, Cin, 3, 3] (PyTorch layout), pad=1.

    Returns [N, Cout, H//stride, W//stride] bf16 after conv + train-mode BN +
    optional residual add + ReLU, all inside a single pallas_call.
    """
    N, Cin, H, W = x.shape
    Cout = w.shape[0]
    Wp = W + 2                          # padded width
    L = H * Wp                          # per-image over-frame length
    Lr = _round_up(L, 128)              # lane-aligned over-frame length
    P = _round_up(Lr + 2 * Wp + 2, 128)  # per-image padded flat frame length
    F = (H + 2) * Wp                    # real padded-frame length
    Ho, Wo = H // stride, W // stride
    Cin_k = _round_up(Cin, 16)          # sublane/tile-aligned K sub-dim (bf16)

    # --- wrapper glue (bf16): pad channels + spatial, flatten per image -----
    xp = jnp.pad(x.astype(jnp.bfloat16),
                 ((0, 0), (0, Cin_k - Cin), (1, 1), (1, 1)))
    xf = jnp.pad(xp.reshape(N, Cin_k, F), ((0, 0), (0, 0), (0, P - F)))

    # K-folded weight: [Cout, 9*Cin_k] bf16, K ordered (tap-major, cin-minor).
    wk = jnp.pad(w, ((0, 0), (0, Cin_k - Cin), (0, 0), (0, 0)))
    wk = jnp.transpose(wk, (0, 2, 3, 1)).reshape(Cout, 9 * Cin_k)
    wk = wk.astype(jnp.bfloat16)

    g = gamma.reshape(Cout, 1).astype(jnp.float32)
    b = beta.reshape(Cout, 1).astype(jnp.float32)
    mask = _valid_mask(H, W, Wp, stride, Lr)

    args = [xf, wk, g, b, mask]
    in_specs = [
        pl.BlockSpec((1, Cin_k, P), lambda n: (n, 0, 0)),        # stream per image
        pl.BlockSpec((Cout, 9 * Cin_k), lambda n: (0, 0)),       # resident
        pl.BlockSpec((Cout, 1), lambda n: (0, 0)),
        pl.BlockSpec((Cout, 1), lambda n: (0, 0)),
        pl.BlockSpec((1, Lr), lambda n: (0, 0)),
    ]

    has_res = residual is not None
    if has_res:
        assert stride == 1 and residual.shape == (N, Cout, H, W)
        r = jnp.pad(residual.astype(jnp.bfloat16),
                    ((0, 0), (0, 0), (0, 0), (0, Wp - W)))
        r = jnp.pad(r.reshape(N, Cout, L), ((0, 0), (0, 0), (0, Lr - L)))
        args.append(r)
        in_specs.append(pl.BlockSpec((N, Cout, Lr), lambda n: (0, 0, 0)))

    kernel = functools.partial(
        _conv_bn_relu_kernel, Cin_k=Cin_k, Lr=Lr, Wp=Wp,
        inv_count=1.0 / float(N * Ho * Wo), has_res=has_res, eps=eps)

    out = pl.pallas_call(
        kernel,
        out_shape=jax.ShapeDtypeStruct((N, Cout, Lr), jnp.bfloat16),
        grid_spec=pltpu.PrefetchScalarGridSpec(
            num_scalar_prefetch=0,
            grid=(N,),
            in_specs=in_specs,
            out_specs=pl.BlockSpec((N, Cout, Lr), lambda n: (0, 0, 0)),
            scratch_shapes=[
                pltpu.VMEM((9 * Cin_k, Lr), jnp.bfloat16),   # K-folded patches
                pltpu.VMEM((Cout, 1), jnp.float32),          # BN sum
                pltpu.VMEM((Cout, 1), jnp.float32),          # BN sum of squares
            ]),
        compiler_params=pltpu.CompilerParams(
            dimension_semantics=("arbitrary",),   # BN reduces over batch
            vmem_limit_bytes=32 * 1024 * 1024),
    )(*args)

    # Extract valid (strided) output positions from the over frame (XLA glue).
    y = out[:, :, :L].reshape(N, Cout, H, Wp)
    y = y[:, :, ::stride, ::stride][:, :, :Ho, :Wo]
    return y


# ---------------------------------------------------------------------------
# Fused global-average-pool + FC head kernel (in-kernel lane reduction)
# ---------------------------------------------------------------------------
def _pool_fc_kernel(x_ref, w_ref, b_ref, o_ref, *, inv_hw):
    pooled = jnp.sum(x_ref[...].astype(jnp.float32), axis=2) * inv_hw  # [N, C]
    o_ref[...] = jnp.dot(pooled, w_ref[...],
                         preferred_element_type=jnp.float32) + b_ref[...]


def pool_fc(x, fc_w, fc_b):
    """x: [N, C, H, W] -> logits [N, num_classes]; AvgPool2d(H) + Linear fused."""
    N, C, H, W = x.shape
    HW = H * W
    num_classes = fc_w.shape[0]
    x3 = x.reshape(N, C, HW).astype(jnp.bfloat16)
    return pl.pallas_call(
        functools.partial(_pool_fc_kernel, inv_hw=1.0 / float(HW)),
        out_shape=jax.ShapeDtypeStruct((N, num_classes), jnp.float32),
    )(x3, fc_w.T.astype(jnp.float32),
      fc_b.reshape(1, num_classes).astype(jnp.float32))


# ---------------------------------------------------------------------------
# Network glue (activations carried as bf16 NCHW between layers)
# ---------------------------------------------------------------------------
def identity_padding(x, out_channels, stride):
    """IdentityPadding shortcut: MaxPool2d(1, stride) subsample + zero channel
    padding appended after the existing channels."""
    Cin = x.shape[1]
    s = x[:, :, ::stride, ::stride]
    return jnp.pad(s, ((0, 0), (0, out_channels - Cin), (0, 0), (0, 0)))


def residual_block(x, p, stride, down_sample):
    Cout = p["conv1_w"].shape[0]
    shortcut = identity_padding(x, Cout, stride) if down_sample else x
    y = conv_bn_relu(x, p["conv1_w"], p["bn1_g"], p["bn1_b"], stride)
    y = conv_bn_relu(y, p["conv2_w"], p["bn2_g"], p["bn2_b"], 1,
                     residual=shortcut)
    return y


def resnet_forward(x_nchw, params, num_layers):
    x = conv_bn_relu(x_nchw, params["conv1_w"],
                     params["bn1_g"], params["bn1_b"], 1)
    for stage, stride in (("2n", 1), ("4n", 2), ("6n", 2)):
        for li in range(num_layers):
            blk = params[f"layers_{stage}"][li]
            x = residual_block(x, blk, stride if li == 0 else 1,
                               down_sample=(stride == 2 and li == 0))
    return pool_fc(x, params["fc_w"], params["fc_b"])


# ---------------------------------------------------------------------------
# Deterministic parameter init (Kaiming fan_out convs, ones/zeros BN,
# PyTorch-Linear-style uniform FC head).
# ---------------------------------------------------------------------------
def init_params(key, num_layers, num_classes=10):
    keys = iter(jax.random.split(key, 256))

    def conv_w(cout, cin, k=3):
        fan_out = cout * k * k
        std = (2.0 / fan_out) ** 0.5
        return jax.random.normal(next(keys), (cout, cin, k, k), jnp.float32) * std

    def bn(c):
        return jnp.ones((c,), jnp.float32), jnp.zeros((c,), jnp.float32)

    params = {"conv1_w": conv_w(16, 3)}
    params["bn1_g"], params["bn1_b"] = bn(16)

    def make_stage(cin, cout):
        blocks = []
        for li in range(num_layers):
            ci = cin if li == 0 else cout
            g1, b1 = bn(cout)
            g2, b2 = bn(cout)
            blocks.append({"conv1_w": conv_w(cout, ci), "bn1_g": g1, "bn1_b": b1,
                           "conv2_w": conv_w(cout, cout), "bn2_g": g2, "bn2_b": b2})
        return blocks

    params["layers_2n"] = make_stage(16, 16)
    params["layers_4n"] = make_stage(16, 32)
    params["layers_6n"] = make_stage(32, 64)

    bound = 1.0 / (64.0 ** 0.5)
    params["fc_w"] = jax.random.uniform(
        next(keys), (num_classes, 64), jnp.float32, -bound, bound)
    params["fc_b"] = jax.random.uniform(
        next(keys), (num_classes,), jnp.float32, -bound, bound)
    return params


if __name__ == "__main__":
    num_layers = 1  # one residual block per stage (smallest 6n+2 net, n=1)
    key = jax.random.PRNGKey(0)
    pkey, xkey = jax.random.split(key)
    params = init_params(pkey, num_layers)

    # CIFAR-style input: NCHW [batch=2, 3, 32, 32] (spatial 32 is required so
    # that AvgPool2d(8) after two stride-2 stages sees an 8x8 feature map).
    x = jax.random.normal(xkey, (2, 3, 32, 32), jnp.float32)

    fwd = jax.jit(lambda xx, pp: resnet_forward(xx, pp, num_layers))
    out = jax.block_until_ready(fwd(x, params))
    assert out.shape == (2, 10) and out.dtype == jnp.float32
    print("KERNEL_OK")
</pallas_src>

<mosaic_0001>
module attributes {stable_mosaic.version = 11 : i64} {
  func.func @_conv_bn_relu_kernel(%arg0: i32, %arg1: memref<1x16x1280xbf16, #tpu.memory_space<vmem>>, %arg2: memref<16x144xbf16, #tpu.memory_space<vmem>>, %arg3: memref<16x1xf32, #tpu.memory_space<vmem>>, %arg4: memref<16x1xf32, #tpu.memory_space<vmem>>, %arg5: memref<1x1152xf32, #tpu.memory_space<vmem>>, %arg6: memref<2x16x1152xbf16, #tpu.memory_space<vmem>>, %arg7: memref<144x1152xbf16, #tpu.memory_space<vmem>>, %arg8: memref<16x1xf32, #tpu.memory_space<vmem>>, %arg9: memref<16x1xf32, #tpu.memory_space<vmem>>) attributes {dimension_semantics = [#tpu.dimension_semantics<arbitrary>], iteration_bounds = array<i64: 2>, scalar_prefetch = 0 : i64, scratch_operands = 3 : i64, tpu.core_type = #tpu.core_type<tc>, window_params = [{transform_indices = @transform_0, window_bounds = array<i64: 1, 16, 1280>}, {pipeline_mode = #tpu.pipeline_mode<synchronous>, transform_indices = @transform_1, window_bounds = array<i64: 16, 144>}, {pipeline_mode = #tpu.pipeline_mode<synchronous>, transform_indices = @transform_2, window_bounds = array<i64: 16, 1>}, {pipeline_mode = #tpu.pipeline_mode<synchronous>, transform_indices = @transform_3, window_bounds = array<i64: 16, 1>}, {pipeline_mode = #tpu.pipeline_mode<synchronous>, transform_indices = @transform_4, window_bounds = array<i64: 1, 1152>}, {pipeline_mode = #tpu.pipeline_mode<synchronous>, transform_indices = @transform_5, window_bounds = array<i64: 2, 16, 1152>}]} {
    %c0_i32 = arith.constant 0 : i32
    %0 = arith.cmpi eq, %arg0, %c0_i32 : i32
    %1 = arith.extui %0 : i1 to i32
    %c0_i32_0 = arith.constant 0 : i32
    %2 = arith.cmpi ne, %1, %c0_i32_0 : i32
    scf.if %2 {
      %cst_48 = arith.constant 0.000000e+00 : f32
      %55 = vector.broadcast %cst_48 : f32 to vector<16x1xf32>
      %c0_49 = arith.constant 0 : index
      %c0_50 = arith.constant 0 : index
      %56 = vector.load %arg8[%c0_49, %c0_50] : memref<16x1xf32, #tpu.memory_space<vmem>>, vector<16x1xf32>
      tpu.vector_store %arg8[%c0_49, %c0_50], %55 {strides = array<i32>} : memref<16x1xf32, #tpu.memory_space<vmem>>, vector<16x1xf32>,
      %cst_51 = arith.constant 0.000000e+00 : f32
      %57 = vector.broadcast %cst_51 : f32 to vector<16x1xf32>
      %c0_52 = arith.constant 0 : index
      %c0_53 = arith.constant 0 : index
      %58 = vector.load %arg9[%c0_52, %c0_53] : memref<16x1xf32, #tpu.memory_space<vmem>>, vector<16x1xf32>
      tpu.vector_store %arg9[%c0_52, %c0_53], %57 {strides = array<i32>} : memref<16x1xf32, #tpu.memory_space<vmem>>, vector<16x1xf32>,
    } else {
    }
    %c0 = arith.constant 0 : index
    %c0_1 = arith.constant 0 : index
    %c0_2 = arith.constant 0 : index
    %3 = vector.load %arg1[%c0, %c0_1, %c0_2] : memref<1x16x1280xbf16, #tpu.memory_space<vmem>>, vector<1x16x1152xbf16>
    %4 = vector.shape_cast %3 : vector<1x16x1152xbf16> to vector<16x1152xbf16>
    %c0_3 = arith.constant 0 : index
    %c0_4 = arith.constant 0 : index
    %5 = vector.load %arg7[%c0_3, %c0_4] : memref<144x1152xbf16, #tpu.memory_space<vmem>>, vector<16x1152xbf16>
    tpu.vector_store %arg7[%c0_3, %c0_4], %4 {strides = array<i32>} : memref<144x1152xbf16, #tpu.memory_space<vmem>>, vector<16x1152xbf16>,
    %c0_5 = arith.constant 0 : index
    %c0_6 = arith.constant 0 : index
    %c1 = arith.constant 1 : index
    %6 = vector.load %arg1[%c0_5, %c0_6, %c1] : memref<1x16x1280xbf16, #tpu.memory_space<vmem>>, vector<1x16x1152xbf16>
    %7 = vector.shape_cast %6 : vector<1x16x1152xbf16> to vector<16x1152xbf16>
    %c16 = arith.constant 16 : index
    %c0_7 = arith.constant 0 : index
    %8 = vector.load %arg7[%c16, %c0_7] : memref<144x1152xbf16, #tpu.memory_space<vmem>>, vector<16x1152xbf16>
    tpu.vector_store %arg7[%c16, %c0_7], %7 {strides = array<i32>} : memref<144x1152xbf16, #tpu.memory_space<vmem>>, vector<16x1152xbf16>,
    %c0_8 = arith.constant 0 : index
    %c0_9 = arith.constant 0 : index
    %c2 = arith.constant 2 : index
    %9 = vector.load %arg1[%c0_8, %c0_9, %c2] : memref<1x16x1280xbf16, #tpu.memory_space<vmem>>, vector<1x16x1152xbf16>
    %10 = vector.shape_cast %9 : vector<1x16x1152xbf16> to vector<16x1152xbf16>
    %c32 = arith.constant 32 : index
    %c0_10 = arith.constant 0 : index
    %11 = vector.load %arg7[%c32, %c0_10] : memref<144x1152xbf16, #tpu.memory_space<vmem>>, vector<16x1152xbf16>
    tpu.vector_store %arg7[%c32, %c0_10], %10 {strides = array<i32>} : memref<144x1152xbf16, #tpu.memory_space<vmem>>, vector<16x1152xbf16>,
    %c0_11 = arith.constant 0 : index
    %c0_12 = arith.constant 0 : index
    %c34 = arith.constant 34 : index
    %12 = vector.load %arg1[%c0_11, %c0_12, %c34] : memref<1x16x1280xbf16, #tpu.memory_space<vmem>>, vector<1x16x1152xbf16>
    %13 = vector.shape_cast %12 : vector<1x16x1152xbf16> to vector<16x1152xbf16>
    %c48 = arith.constant 48 : index
    %c0_13 = arith.constant 0 : index
    %14 = vector.load %arg7[%c48, %c0_13] : memref<144x1152xbf16, #tpu.memory_space<vmem>>, vector<16x1152xbf16>
    tpu.vector_store %arg7[%c48, %c0_13], %13 {strides = array<i32>} : memref<144x1152xbf16, #tpu.memory_space<vmem>>, vector<16x1152xbf16>,
    %c0_14 = arith.constant 0 : index
    %c0_15 = arith.constant 0 : index
    %c35 = arith.constant 35 : index
    %15 = vector.load %arg1[%c0_14, %c0_15, %c35] : memref<1x16x1280xbf16, #tpu.memory_space<vmem>>, vector<1x16x1152xbf16>
    %16 = vector.shape_cast %15 : vector<1x16x1152xbf16> to vector<16x1152xbf16>
    %c64 = arith.constant 64 : index
    %c0_16 = arith.constant 0 : index
    %17 = vector.load %arg7[%c64, %c0_16] : memref<144x1152xbf16, #tpu.memory_space<vmem>>, vector<16x1152xbf16>
    tpu.vector_store %arg7[%c64, %c0_16], %16 {strides = array<i32>} : memref<144x1152xbf16, #tpu.memory_space<vmem>>, vector<16x1152xbf16>,
    %c0_17 = arith.constant 0 : index
    %c0_18 = arith.constant 0 : index
    %c36 = arith.constant 36 : index
    %18 = vector.load %arg1[%c0_17, %c0_18, %c36] : memref<1x16x1280xbf16, #tpu.memory_space<vmem>>, vector<1x16x1152xbf16>
    %19 = vector.shape_cast %18 : vector<1x16x1152xbf16> to vector<16x1152xbf16>
    %c80 = arith.constant 80 : index
    %c0_19 = arith.constant 0 : index
    %20 = vector.load %arg7[%c80, %c0_19] : memref<144x1152xbf16, #tpu.memory_space<vmem>>, vector<16x1152xbf16>
    tpu.vector_store %arg7[%c80, %c0_19], %19 {strides = array<i32>} : memref<144x1152xbf16, #tpu.memory_space<vmem>>, vector<16x1152xbf16>,
    %c0_20 = arith.constant 0 : index
    %c0_21 = arith.constant 0 : index
    %c68 = arith.constant 68 : index
    %21 = vector.load %arg1[%c0_20, %c0_21, %c68] : memref<1x16x1280xbf16, #tpu.memory_space<vmem>>, vector<1x16x1152xbf16>
    %22 = vector.shape_cast %21 : vector<1x16x1152xbf16> to vector<16x1152xbf16>
    %c96 = arith.constant 96 : index
    %c0_22 = arith.constant 0 : index
    %23 = vector.load %arg7[%c96, %c0_22] : memref<144x1152xbf16, #tpu.memory_space<vmem>>, vector<16x1152xbf16>
    tpu.vector_store %arg7[%c96, %c0_22], %22 {strides = array<i32>} : memref<144x1152xbf16, #tpu.memory_space<vmem>>, vector<16x1152xbf16>,
    %c0_23 = arith.constant 0 : index
    %c0_24 = arith.constant 0 : index
    %c69 = arith.constant 69 : index
    %24 = vector.load %arg1[%c0_23, %c0_24, %c69] : memref<1x16x1280xbf16, #tpu.memory_space<vmem>>, vector<1x16x1152xbf16>
    %25 = vector.shape_cast %24 : vector<1x16x1152xbf16> to vector<16x1152xbf16>
    %c112 = arith.constant 112 : index
    %c0_25 = arith.constant 0 : index
    %26 = vector.load %arg7[%c112, %c0_25] : memref<144x1152xbf16, #tpu.memory_space<vmem>>, vector<16x1152xbf16>
    tpu.vector_store %arg7[%c112, %c0_25], %25 {strides = array<i32>} : memref<144x1152xbf16, #tpu.memory_space<vmem>>, vector<16x1152xbf16>,
    %c0_26 = arith.constant 0 : index
    %c0_27 = arith.constant 0 : index
    %c70 = arith.constant 70 : index
    %27 = vector.load %arg1[%c0_26, %c0_27, %c70] : memref<1x16x1280xbf16, #tpu.memory_space<vmem>>, vector<1x16x1152xbf16>
    %28 = vector.shape_cast %27 : vector<1x16x1152xbf16> to vector<16x1152xbf16>
    %c128 = arith.constant 128 : index
    %c0_28 = arith.constant 0 : index
    %29 = vector.load %arg7[%c128, %c0_28] : memref<144x1152xbf16, #tpu.memory_space<vmem>>, vector<16x1152xbf16>
    tpu.vector_store %arg7[%c128, %c0_28], %28 {strides = array<i32>} : memref<144x1152xbf16, #tpu.memory_space<vmem>>, vector<16x1152xbf16>,
    %c0_29 = arith.constant 0 : index
    %c0_30 = arith.constant 0 : index
    %30 = vector.load %arg2[%c0_29, %c0_30] : memref<16x144xbf16, #tpu.memory_space<vmem>>, vector<16x144xbf16>
    %c0_31 = arith.constant 0 : index
    %c0_32 = arith.constant 0 : index
    %31 = vector.load %arg7[%c0_31, %c0_32] : memref<144x1152xbf16, #tpu.memory_space<vmem>>, vector<144x1152xbf16>
    %cst = arith.constant dense<0.000000e+00> : vector<16x1152xf32>
    %32 = tpu.matmul %30, %31, %cst {dimension_numbers = #tpu.dot_dimension_numbers<[1], [0], [0], [1], [0, 0, 1, 1], [], []>} : vector<16x144xbf16>, vector<144x1152xbf16>, vector<16x1152xf32> -> vector<16x1152xf32>
    %c0_33 = arith.constant 0 : index
    %c0_34 = arith.constant 0 : index
    %33 = vector.load %arg5[%c0_33, %c0_34] : memref<1x1152xf32, #tpu.memory_space<vmem>>, vector<1x1152xf32>
    %34 = vector.broadcast %33 : vector<1x1152xf32> to vector<16x1152xf32>
    %35 = arith.mulf %32, %34 : vector<16x1152xf32>
    %c0_35 = arith.constant 0 : index
    %c0_36 = arith.constant 0 : index
    %36 = vector.load %arg8[%c0_35, %c0_36] : memref<16x1xf32, #tpu.memory_space<vmem>>, vector<16x1xf32>
    %cst_37 = arith.constant dense<0.000000e+00> : vector<16xf32>
    %37 = vector.multi_reduction <add>, %35, %cst_37 [1] : vector<16x1152xf32> to vector<16xf32>
    %38 = vector.shape_cast %37 : vector<16xf32> to vector<16x1xf32>
    %39 = arith.addf %36, %38 : vector<16x1xf32>
    %c0_38 = arith.constant 0 : index
    %c0_39 = arith.constant 0 : index
    %40 = vector.load %arg8[%c0_38, %c0_39] : memref<16x1xf32, #tpu.memory_space<vmem>>, vector<16x1xf32>
    tpu.vector_store %arg8[%c0_38, %c0_39], %39 {strides = array<i32>} : memref<16x1xf32, #tpu.memory_space<vmem>>, vector<16x1xf32>,
    %c0_40 = arith.constant 0 : index
    %c0_41 = arith.constant 0 : index
    %41 = vector.load %arg9[%c0_40, %c0_41] : memref<16x1xf32, #tpu.memory_space<vmem>>, vector<16x1xf32>
    %42 = arith.mulf %35, %32 : vector<16x1152xf32>
    %cst_42 = arith.constant dense<0.000000e+00> : vector<16xf32>
    %43 = vector.multi_reduction <add>, %42, %cst_42 [1] : vector<16x1152xf32> to vector<16xf32>
    %44 = vector.shape_cast %43 : vector<16xf32> to vector<16x1xf32>
    %45 = arith.addf %41, %44 : vector<16x1xf32>
    %c0_43 = arith.constant 0 : index
    %c0_44 = arith.constant 0 : index
    %46 = vector.load %arg9[%c0_43, %c0_44] : memref<16x1xf32, #tpu.memory_space<vmem>>, vector<16x1xf32>
    tpu.vector_store %arg9[%c0_43, %c0_44], %45 {strides = array<i32>} : memref<16x1xf32, #tpu.memory_space<vmem>>, vector<16x1xf32>,
    %47 = arith.truncf %32 : vector<16x1152xf32> to vector<16x1152xbf16>
    %48 = arith.index_cast %arg0 : i32 to index
    %c0_45 = arith.constant 0 : index
    %c0_46 = arith.constant 0 : index
    %49 = vector.load %arg6[%48, %c0_45, %c0_46] : memref<2x16x1152xbf16, #tpu.memory_space<vmem>>, vector<1x16x1152xbf16>
    %50 = vector.shape_cast %49 : vector<1x16x1152xbf16> to vector<16x1152xbf16>
    %51 = vector.shape_cast %47 : vector<16x1152xbf16> to vector<1x16x1152xbf16>
    tpu.vector_store %arg6[%48, %c0_45, %c0_46], %51 {strides = array<i32>} : memref<2x16x1152xbf16, #tpu.memory_space<vmem>>, vector<1x16x1152xbf16>,
    %c1_i32 = arith.constant 1 : i32
    %52 = arith.cmpi eq, %arg0, %c1_i32 : i32
    %53 = arith.extui %52 : i1 to i32
    %c0_i32_47 = arith.constant 0 : i32
    %54 = arith.cmpi ne, %53, %c0_i32_47 : i32
    scf.if %54 {
      %c0_48 = arith.constant 0 : index
      %c0_49 = arith.constant 0 : index
      %55 = vector.load %arg8[%c0_48, %c0_49] : memref<16x1xf32, #tpu.memory_space<vmem>>, vector<16x1xf32>
      %cst_50 = arith.constant 4.8828125E-4 : f32
      %56 = vector.broadcast %cst_50 : f32 to vector<16x1xf32>
      %57 = arith.mulf %55, %56 : vector<16x1xf32>
      %c0_51 = arith.constant 0 : index
      %c0_52 = arith.constant 0 : index
      %58 = vector.load %arg9[%c0_51, %c0_52] : memref<16x1xf32, #tpu.memory_space<vmem>>, vector<16x1xf32>
      %cst_53 = arith.constant 4.8828125E-4 : f32
      %59 = vector.broadcast %cst_53 : f32 to vector<16x1xf32>
      %60 = arith.mulf %58, %59 : vector<16x1xf32>
      %61 = arith.mulf %57, %57 : vector<16x1xf32>
      %62 = arith.subf %60, %61 : vector<16x1xf32>
      %cst_54 = arith.constant 0.000000e+00 : f32
      %63 = vector.broadcast %cst_54 : f32 to vector<16x1xf32>
      %64 = arith.maximumf %62, %63 : vector<16x1xf32>
      %c0_55 = arith.constant 0 : index
      %c0_56 = arith.constant 0 : index
      %65 = vector.load %arg3[%c0_55, %c0_56] : memref<16x1xf32, #tpu.memory_space<vmem>>, vector<16x1xf32>
      %cst_57 = arith.constant 9.99999974E-6 : f32
      %66 = vector.broadcast %cst_57 : f32 to vector<16x1xf32>
      %67 = arith.addf %64, %66 : vector<16x1xf32>
      %68 = math.rsqrt %67 : vector<16x1xf32>
      %69 = arith.mulf %65, %68 : vector<16x1xf32>
      %c0_58 = arith.constant 0 : index
      %c0_59 = arith.constant 0 : index
      %70 = vector.load %arg4[%c0_58, %c0_59] : memref<16x1xf32, #tpu.memory_space<vmem>>, vector<16x1xf32>
      %71 = arith.mulf %57, %69 : vector<16x1xf32>
      %72 = arith.subf %70, %71 : vector<16x1xf32>
      %c0_60 = arith.constant 0 : index
      %c0_61 = arith.constant 0 : index
      %c0_62 = arith.constant 0 : index
      %73 = vector.load %arg6[%c0_60, %c0_61, %c0_62] : memref<2x16x1152xbf16, #tpu.memory_space<vmem>>, vector<2x16x1152xbf16>
      %74 = arith.extf %73 : vector<2x16x1152xbf16> to vector<2x16x1152xf32>
      %75 = vector.shape_cast %69 : vector<16x1xf32> to vector<1x16x1xf32>
      %76 = vector.broadcast %75 : vector<1x16x1xf32> to vector<2x16x1152xf32>
      %77 = arith.mulf %74, %76 : vector<2x16x1152xf32>
      %78 = vector.shape_cast %72 : vector<16x1xf32> to vector<1x16x1xf32>
      %79 = vector.broadcast %78 : vector<1x16x1xf32> to vector<2x16x1152xf32>
      %80 = arith.addf %77, %79 : vector<2x16x1152xf32>
      %cst_63 = arith.constant 0.000000e+00 : f32
      %81 = vector.broadcast %cst_63 : f32 to vector<2x16x1152xf32>
      %82 = arith.maximumf %80, %81 : vector<2x16x1152xf32>
      %83 = arith.truncf %82 : vector<2x16x1152xf32> to vector<2x16x1152xbf16>
      %c0_64 = arith.constant 0 : index
      %c0_65 = arith.constant 0 : index
      %c0_66 = arith.constant 0 : index
      %84 = vector.load %arg6[%c0_64, %c0_65, %c0_66] : memref<2x16x1152xbf16, #tpu.memory_space<vmem>>, vector<2x16x1152xbf16>
      tpu.vector_store %arg6[%c0_64, %c0_65, %c0_66], %83 {strides = array<i32>} : memref<2x16x1152xbf16, #tpu.memory_space<vmem>>, vector<2x16x1152xbf16>,
    } else {
    }
    return
  }
  func.func @transform_0(%arg0: i32) -> (i32, i32, i32) {
    %c0_i32 = arith.constant 0 : i32
    %c0_i32_0 = arith.constant 0 : i32
    %c0_i32_1 = arith.constant 0 : i32
    return %arg0, %c0_i32, %c0_i32_0 : i32, i32, i32
  }
  func.func @transform_1(%arg0: i32) -> (i32, i32) {
    %c0_i32 = arith.constant 0 : i32
    %c0_i32_0 = arith.constant 0 : i32
    %c0_i32_1 = arith.constant 0 : i32
    return %c0_i32, %c0_i32_0 : i32, i32
  }
  func.func @transform_2(%arg0: i32) -> (i32, i32) {
    %c0_i32 = arith.constant 0 : i32
    %c0_i32_0 = arith.constant 0 : i32
    %c0_i32_1 = arith.constant 0 : i32
    return %c0_i32, %c0_i32_0 : i32, i32
  }
  func.func @transform_3(%arg0: i32) -> (i32, i32) {
    %c0_i32 = arith.constant 0 : i32
    %c0_i32_0 = arith.constant 0 : i32
    %c0_i32_1 = arith.constant 0 : i32
    return %c0_i32, %c0_i32_0 : i32, i32
  }
  func.func @transform_4(%arg0: i32) -> (i32, i32) {
    %c0_i32 = arith.constant 0 : i32
    %c0_i32_0 = arith.constant 0 : i32
    %c0_i32_1 = arith.constant 0 : i32
    return %c0_i32, %c0_i32_0 : i32, i32
  }
  func.func @transform_5(%arg0: i32) -> (i32, i32, i32) {
    %c0_i32 = arith.constant 0 : i32
    %c0_i32_0 = arith.constant 0 : i32
    %c0_i32_1 = arith.constant 0 : i32
    %c0_i32_2 = arith.constant 0 : i32
    return %c0_i32, %c0_i32_0, %c0_i32_1 : i32, i32, i32
  }
}

module attributes {stable_mosaic.version = 11 : i64} {
  func.func @_conv_bn_relu_kernel(%arg0: i32, %arg1: memref<1x16x1280xbf16, #tpu.memory_space<vmem>>, %arg2: memref<16x144xbf16, #tpu.memory_space<vmem>>, %arg3: memref<16x1xf32, #tpu.memory_space<vmem>>, %arg4: memref<16x1xf32, #tpu.memory_space<vmem>>, %arg5: memref<1x1152xf32, #tpu.memory_space<vmem>>, %arg6: memref<2x16x1152xbf16, #tpu.memory_space<vmem>>, %arg7: memref<2x16x1152xbf16, #tpu.memory_space<vmem>>, %arg8: memref<144x1152xbf16, #tpu.memory_space<vmem>>, %arg9: memref<16x1xf32, #tpu.memory_space<vmem>>, %arg10: memref<16x1xf32, #tpu.memory_space<vmem>>) attributes {dimension_semantics = [#tpu.dimension_semantics<arbitrary>], iteration_bounds = array<i64: 2>, scalar_prefetch = 0 : i64, scratch_operands = 3 : i64, tpu.core_type = #tpu.core_type<tc>, window_params = [{transform_indices = @transform_0, window_bounds = array<i64: 1, 16, 1280>}, {pipeline_mode = #tpu.pipeline_mode<synchronous>, transform_indices = @transform_1, window_bounds = array<i64: 16, 144>}, {pipeline_mode = #tpu.pipeline_mode<synchronous>, transform_indices = @transform_2, window_bounds = array<i64: 16, 1>}, {pipeline_mode = #tpu.pipeline_mode<synchronous>, transform_indices = @transform_3, window_bounds = array<i64: 16, 1>}, {pipeline_mode = #tpu.pipeline_mode<synchronous>, transform_indices = @transform_4, window_bounds = array<i64: 1, 1152>}, {pipeline_mode = #tpu.pipeline_mode<synchronous>, transform_indices = @transform_5, window_bounds = array<i64: 2, 16, 1152>}, {pipeline_mode = #tpu.pipeline_mode<synchronous>, transform_indices = @transform_6, window_bounds = array<i64: 2, 16, 1152>}]} {
    %c0_i32 = arith.constant 0 : i32
    %0 = arith.cmpi eq, %arg0, %c0_i32 : i32
    %1 = arith.extui %0 : i1 to i32
    %c0_i32_0 = arith.constant 0 : i32
    %2 = arith.cmpi ne, %1, %c0_i32_0 : i32
    scf.if %2 {
      %cst_48 = arith.constant 0.000000e+00 : f32
      %55 = vector.broadcast %cst_48 : f32 to vector<16x1xf32>
      %c0_49 = arith.constant 0 : index
      %c0_50 = arith.constant 0 : index
      %56 = vector.load %arg9[%c0_49, %c0_50] : memref<16x1xf32, #tpu.memory_space<vmem>>, vector<16x1xf32>
      tpu.vector_store %arg9[%c0_49, %c0_50], %55 {strides = array<i32>} : memref<16x1xf32, #tpu.memory_space<vmem>>, vector<16x1xf32>,
      %cst_51 = arith.constant 0.000000e+00 : f32
      %57 = vector.broadcast %cst_51 : f32 to vector<16x1xf32>
      %c0_52 = arith.constant 0 : index
      %c0_53 = arith.constant 0 : index
      %58 = vector.load %arg10[%c0_52, %c0_53] : memref<16x1xf32, #tpu.memory_space<vmem>>, vector<16x1xf32>
      tpu.vector_store %arg10[%c0_52, %c0_53], %57 {strides = array<i32>} : memref<16x1xf32, #tpu.memory_space<vmem>>, vector<16x1xf32>,
    } else {
    }
    %c0 = arith.constant 0 : index
    %c0_1 = arith.constant 0 : index
    %c0_2 = arith.constant 0 : index
    %3 = vector.load %arg1[%c0, %c0_1, %c0_2] : memref<1x16x1280xbf16, #tpu.memory_space<vmem>>, vector<1x16x1152xbf16>
    %4 = vector.shape_cast %3 : vector<1x16x1152xbf16> to vector<16x1152xbf16>
    %c0_3 = arith.constant 0 : index
    %c0_4 = arith.constant 0 : index
    %5 = vector.load %arg8[%c0_3, %c0_4] : memref<144x1152xbf16, #tpu.memory_space<vmem>>, vector<16x1152xbf16>
    tpu.vector_store %arg8[%c0_3, %c0_4], %4 {strides = array<i32>} : memref<144x1152xbf16, #tpu.memory_space<vmem>>, vector<16x1152xbf16>,
    %c0_5 = arith.constant 0 : index
    %c0_6 = arith.constant 0 : index
    %c1 = arith.constant 1 : index
    %6 = vector.load %arg1[%c0_5, %c0_6, %c1] : memref<1x16x1280xbf16, #tpu.memory_space<vmem>>, vector<1x16x1152xbf16>
    %7 = vector.shape_cast %6 : vector<1x16x1152xbf16> to vector<16x1152xbf16>
    %c16 = arith.constant 16 : index
    %c0_7 = arith.constant 0 : index
    %8 = vector.load %arg8[%c16, %c0_7] : memref<144x1152xbf16, #tpu.memory_space<vmem>>, vector<16x1152xbf16>
    tpu.vector_store %arg8[%c16, %c0_7], %7 {strides = array<i32>} : memref<144x1152xbf16, #tpu.memory_space<vmem>>, vector<16x1152xbf16>,
    %c0_8 = arith.constant 0 : index
    %c0_9 = arith.constant 0 : index
    %c2 = arith.constant 2 : index
    %9 = vector.load %arg1[%c0_8, %c0_9, %c2] : memref<1x16x1280xbf16, #tpu.memory_space<vmem>>, vector<1x16x1152xbf16>
    %10 = vector.shape_cast %9 : vector<1x16x1152xbf16> to vector<16x1152xbf16>
    %c32 = arith.constant 32 : index
    %c0_10 = arith.constant 0 : index
    %11 = vector.load %arg8[%c32, %c0_10] : memref<144x1152xbf16, #tpu.memory_space<vmem>>, vector<16x1152xbf16>
    tpu.vector_store %arg8[%c32, %c0_10], %10 {strides = array<i32>} : memref<144x1152xbf16, #tpu.memory_space<vmem>>, vector<16x1152xbf16>,
    %c0_11 = arith.constant 0 : index
    %c0_12 = arith.constant 0 : index
    %c34 = arith.constant 34 : index
    %12 = vector.load %arg1[%c0_11, %c0_12, %c34] : memref<1x16x1280xbf16, #tpu.memory_space<vmem>>, vector<1x16x1152xbf16>
    %13 = vector.shape_cast %12 : vector<1x16x1152xbf16> to vector<16x1152xbf16>
    %c48 = arith.constant 48 : index
    %c0_13 = arith.constant 0 : index
    %14 = vector.load %arg8[%c48, %c0_13] : memref<144x1152xbf16, #tpu.memory_space<vmem>>, vector<16x1152xbf16>
    tpu.vector_store %arg8[%c48, %c0_13], %13 {strides = array<i32>} : memref<144x1152xbf16, #tpu.memory_space<vmem>>, vector<16x1152xbf16>,
    %c0_14 = arith.constant 0 : index
    %c0_15 = arith.constant 0 : index
    %c35 = arith.constant 35 : index
    %15 = vector.load %arg1[%c0_14, %c0_15, %c35] : memref<1x16x1280xbf16, #tpu.memory_space<vmem>>, vector<1x16x1152xbf16>
    %16 = vector.shape_cast %15 : vector<1x16x1152xbf16> to vector<16x1152xbf16>
    %c64 = arith.constant 64 : index
    %c0_16 = arith.constant 0 : index
    %17 = vector.load %arg8[%c64, %c0_16] : memref<144x1152xbf16, #tpu.memory_space<vmem>>, vector<16x1152xbf16>
    tpu.vector_store %arg8[%c64, %c0_16], %16 {strides = array<i32>} : memref<144x1152xbf16, #tpu.memory_space<vmem>>, vector<16x1152xbf16>,
    %c0_17 = arith.constant 0 : index
    %c0_18 = arith.constant 0 : index
    %c36 = arith.constant 36 : index
    %18 = vector.load %arg1[%c0_17, %c0_18, %c36] : memref<1x16x1280xbf16, #tpu.memory_space<vmem>>, vector<1x16x1152xbf16>
    %19 = vector.shape_cast %18 : vector<1x16x1152xbf16> to vector<16x1152xbf16>
    %c80 = arith.constant 80 : index
    %c0_19 = arith.constant 0 : index
    %20 = vector.load %arg8[%c80, %c0_19] : memref<144x1152xbf16, #tpu.memory_space<vmem>>, vector<16x1152xbf16>
    tpu.vector_store %arg8[%c80, %c0_19], %19 {strides = array<i32>} : memref<144x1152xbf16, #tpu.memory_space<vmem>>, vector<16x1152xbf16>,
    %c0_20 = arith.constant 0 : index
    %c0_21 = arith.constant 0 : index
    %c68 = arith.constant 68 : index
    %21 = vector.load %arg1[%c0_20, %c0_21, %c68] : memref<1x16x1280xbf16, #tpu.memory_space<vmem>>, vector<1x16x1152xbf16>
    %22 = vector.shape_cast %21 : vector<1x16x1152xbf16> to vector<16x1152xbf16>
    %c96 = arith.constant 96 : index
    %c0_22 = arith.constant 0 : index
    %23 = vector.load %arg8[%c96, %c0_22] : memref<144x1152xbf16, #tpu.memory_space<vmem>>, vector<16x1152xbf16>
    tpu.vector_store %arg8[%c96, %c0_22], %22 {strides = array<i32>} : memref<144x1152xbf16, #tpu.memory_space<vmem>>, vector<16x1152xbf16>,
    %c0_23 = arith.constant 0 : index
    %c0_24 = arith.constant 0 : index
    %c69 = arith.constant 69 : index
    %24 = vector.load %arg1[%c0_23, %c0_24, %c69] : memref<1x16x1280xbf16, #tpu.memory_space<vmem>>, vector<1x16x1152xbf16>
    %25 = vector.shape_cast %24 : vector<1x16x1152xbf16> to vector<16x1152xbf16>
    %c112 = arith.constant 112 : index
    %c0_25 = arith.constant 0 : index
    %26 = vector.load %arg8[%c112, %c0_25] : memref<144x1152xbf16, #tpu.memory_space<vmem>>, vector<16x1152xbf16>
    tpu.vector_store %arg8[%c112, %c0_25], %25 {strides = array<i32>} : memref<144x1152xbf16, #tpu.memory_space<vmem>>, vector<16x1152xbf16>,
    %c0_26 = arith.constant 0 : index
    %c0_27 = arith.constant 0 : index
    %c70 = arith.constant 70 : index
    %27 = vector.load %arg1[%c0_26, %c0_27, %c70] : memref<1x16x1280xbf16, #tpu.memory_space<vmem>>, vector<1x16x1152xbf16>
    %28 = vector.shape_cast %27 : vector<1x16x1152xbf16> to vector<16x1152xbf16>
    %c128 = arith.constant 128 : index
    %c0_28 = arith.constant 0 : index
    %29 = vector.load %arg8[%c128, %c0_28] : memref<144x1152xbf16, #tpu.memory_space<vmem>>, vector<16x1152xbf16>
    tpu.vector_store %arg8[%c128, %c0_28], %28 {strides = array<i32>} : memref<144x1152xbf16, #tpu.memory_space<vmem>>, vector<16x1152xbf16>,
    %c0_29 = arith.constant 0 : index
    %c0_30 = arith.constant 0 : index
    %30 = vector.load %arg2[%c0_29, %c0_30] : memref<16x144xbf16, #tpu.memory_space<vmem>>, vector<16x144xbf16>
    %c0_31 = arith.constant 0 : index
    %c0_32 = arith.constant 0 : index
    %31 = vector.load %arg8[%c0_31, %c0_32] : memref<144x1152xbf16, #tpu.memory_space<vmem>>, vector<144x1152xbf16>
    %cst = arith.constant dense<0.000000e+00> : vector<16x1152xf32>
    %32 = tpu.matmul %30, %31, %cst {dimension_numbers = #tpu.dot_dimension_numbers<[1], [0], [0], [1], [0, 0, 1, 1], [], []>} : vector<16x144xbf16>, vector<144x1152xbf16>, vector<16x1152xf32> -> vector<16x1152xf32>
    %c0_33 = arith.constant 0 : index
    %c0_34 = arith.constant 0 : index
    %33 = vector.load %arg5[%c0_33, %c0_34] : memref<1x1152xf32, #tpu.memory_space<vmem>>, vector<1x1152xf32>
    %34 = vector.broadcast %33 : vector<1x1152xf32> to vector<16x1152xf32>
    %35 = arith.mulf %32, %34 : vector<16x1152xf32>
    %c0_35 = arith.constant 0 : index
    %c0_36 = arith.constant 0 : index
    %36 = vector.load %arg9[%c0_35, %c0_36] : memref<16x1xf32, #tpu.memory_space<vmem>>, vector<16x1xf32>
    %cst_37 = arith.constant dense<0.000000e+00> : vector<16xf32>
    %37 = vector.multi_reduction <add>, %35, %cst_37 [1] : vector<16x1152xf32> to vector<16xf32>
    %38 = vector.shape_cast %37 : vector<16xf32> to vector<16x1xf32>
    %39 = arith.addf %36, %38 : vector<16x1xf32>
    %c0_38 = arith.constant 0 : index
    %c0_39 = arith.constant 0 : index
    %40 = vector.load %arg9[%c0_38, %c0_39] : memref<16x1xf32, #tpu.memory_space<vmem>>, vector<16x1xf32>
    tpu.vector_store %arg9[%c0_38, %c0_39], %39 {strides = array<i32>} : memref<16x1xf32, #tpu.memory_space<vmem>>, vector<16x1xf32>,
    %c0_40 = arith.constant 0 : index
    %c0_41 = arith.constant 0 : index
    %41 = vector.load %arg10[%c0_40, %c0_41] : memref<16x1xf32, #tpu.memory_space<vmem>>, vector<16x1xf32>
    %42 = arith.mulf %35, %32 : vector<16x1152xf32>
    %cst_42 = arith.constant dense<0.000000e+00> : vector<16xf32>
    %43 = vector.multi_reduction <add>, %42, %cst_42 [1] : vector<16x1152xf32> to vector<16xf32>
    %44 = vector.shape_cast %43 : vector<16xf32> to vector<16x1xf32>
    %45 = arith.addf %41, %44 : vector<16x1xf32>
    %c0_43 = arith.constant 0 : index
    %c0_44 = arith.constant 0 : index
    %46 = vector.load %arg10[%c0_43, %c0_44] : memref<16x1xf32, #tpu.memory_space<vmem>>, vector<16x1xf32>
    tpu.vector_store %arg10[%c0_43, %c0_44], %45 {strides = array<i32>} : memref<16x1xf32, #tpu.memory_space<vmem>>, vector<16x1xf32>,
    %47 = arith.truncf %32 : vector<16x1152xf32> to vector<16x1152xbf16>
    %48 = arith.index_cast %arg0 : i32 to index
    %c0_45 = arith.constant 0 : index
    %c0_46 = arith.constant 0 : index
    %49 = vector.load %arg7[%48, %c0_45, %c0_46] : memref<2x16x1152xbf16, #tpu.memory_space<vmem>>, vector<1x16x1152xbf16>
    %50 = vector.shape_cast %49 : vector<1x16x1152xbf16> to vector<16x1152xbf16>
    %51 = vector.shape_cast %47 : vector<16x1152xbf16> to vector<1x16x1152xbf16>
    tpu.vector_store %arg7[%48, %c0_45, %c0_46], %51 {strides = array<i32>} : memref<2x16x1152xbf16, #tpu.memory_space<vmem>>, vector<1x16x1152xbf16>,
    %c1_i32 = arith.constant 1 : i32
    %52 = arith.cmpi eq, %arg0, %c1_i32 : i32
    %53 = arith.extui %52 : i1 to i32
    %c0_i32_47 = arith.constant 0 : i32
    %54 = arith.cmpi ne, %53, %c0_i32_47 : i32
    scf.if %54 {
      %c0_48 = arith.constant 0 : index
      %c0_49 = arith.constant 0 : index
      %55 = vector.load %arg9[%c0_48, %c0_49] : memref<16x1xf32, #tpu.memory_space<vmem>>, vector<16x1xf32>
      %cst_50 = arith.constant 4.8828125E-4 : f32
      %56 = vector.broadcast %cst_50 : f32 to vector<16x1xf32>
      %57 = arith.mulf %55, %56 : vector<16x1xf32>
      %c0_51 = arith.constant 0 : index
      %c0_52 = arith.constant 0 : index
      %58 = vector.load %arg10[%c0_51, %c0_52] : memref<16x1xf32, #tpu.memory_space<vmem>>, vector<16x1xf32>
      %cst_53 = arith.constant 4.8828125E-4 : f32
      %59 = vector.broadcast %cst_53 : f32 to vector<16x1xf32>
      %60 = arith.mulf %58, %59 : vector<16x1xf32>
      %61 = arith.mulf %57, %57 : vector<16x1xf32>
      %62 = arith.subf %60, %61 : vector<16x1xf32>
      %cst_54 = arith.constant 0.000000e+00 : f32
      %63 = vector.broadcast %cst_54 : f32 to vector<16x1xf32>
      %64 = arith.maximumf %62, %63 : vector<16x1xf32>
      %c0_55 = arith.constant 0 : index
      %c0_56 = arith.constant 0 : index
      %65 = vector.load %arg3[%c0_55, %c0_56] : memref<16x1xf32, #tpu.memory_space<vmem>>, vector<16x1xf32>
      %cst_57 = arith.constant 9.99999974E-6 : f32
      %66 = vector.broadcast %cst_57 : f32 to vector<16x1xf32>
      %67 = arith.addf %64, %66 : vector<16x1xf32>
      %68 = math.rsqrt %67 : vector<16x1xf32>
      %69 = arith.mulf %65, %68 : vector<16x1xf32>
      %c0_58 = arith.constant 0 : index
      %c0_59 = arith.constant 0 : index
      %70 = vector.load %arg4[%c0_58, %c0_59] : memref<16x1xf32, #tpu.memory_space<vmem>>, vector<16x1xf32>
      %71 = arith.mulf %57, %69 : vector<16x1xf32>
      %72 = arith.subf %70, %71 : vector<16x1xf32>
      %c0_60 = arith.constant 0 : index
      %c0_61 = arith.constant 0 : index
      %c0_62 = arith.constant 0 : index
      %73 = vector.load %arg7[%c0_60, %c0_61, %c0_62] : memref<2x16x1152xbf16, #tpu.memory_space<vmem>>, vector<2x16x1152xbf16>
      %74 = arith.extf %73 : vector<2x16x1152xbf16> to vector<2x16x1152xf32>
      %75 = vector.shape_cast %69 : vector<16x1xf32> to vector<1x16x1xf32>
      %76 = vector.broadcast %75 : vector<1x16x1xf32> to vector<2x16x1152xf32>
      %77 = arith.mulf %74, %76 : vector<2x16x1152xf32>
      %78 = vector.shape_cast %72 : vector<16x1xf32> to vector<1x16x1xf32>
      %79 = vector.broadcast %78 : vector<1x16x1xf32> to vector<2x16x1152xf32>
      %80 = arith.addf %77, %79 : vector<2x16x1152xf32>
      %c0_63 = arith.constant 0 : index
      %c0_64 = arith.constant 0 : index
      %c0_65 = arith.constant 0 : index
      %81 = vector.load %arg6[%c0_63, %c0_64, %c0_65] : memref<2x16x1152xbf16, #tpu.memory_space<vmem>>, vector<2x16x1152xbf16>
      %82 = arith.extf %81 : vector<2x16x1152xbf16> to vector<2x16x1152xf32>
      %83 = arith.addf %80, %82 : vector<2x16x1152xf32>
      %cst_66 = arith.constant 0.000000e+00 : f32
      %84 = vector.broadcast %cst_66 : f32 to vector<2x16x1152xf32>
      %85 = arith.maximumf %83, %84 : vector<2x16x1152xf32>
      %86 = arith.truncf %85 : vector<2x16x1152xf32> to vector<2x16x1152xbf16>
      %c0_67 = arith.constant 0 : index
      %c0_68 = arith.constant 0 : index
      %c0_69 = arith.constant 0 : index
      %87 = vector.load %arg7[%c0_67, %c0_68, %c0_69] : memref<2x16x1152xbf16, #tpu.memory_space<vmem>>, vector<2x16x1152xbf16>
      tpu.vector_store %arg7[%c0_67, %c0_68, %c0_69], %86 {strides = array<i32>} : memref<2x16x1152xbf16, #tpu.memory_space<vmem>>, vector<2x16x1152xbf16>,
    } else {
    }
    return
  }
  func.func @transform_0(%arg0: i32) -> (i32, i32, i32) {
    %c0_i32 = arith.constant 0 : i32
    %c0_i32_0 = arith.constant 0 : i32
    %c0_i32_1 = arith.constant 0 : i32
    return %arg0, %c0_i32, %c0_i32_0 : i32, i32, i32
  }
  func.func @transform_1(%arg0: i32) -> (i32, i32) {
    %c0_i32 = arith.constant 0 : i32
    %c0_i32_0 = arith.constant 0 : i32
    %c0_i32_1 = arith.constant 0 : i32
    return %c0_i32, %c0_i32_0 : i32, i32
  }
  func.func @transform_2(%arg0: i32) -> (i32, i32) {
    %c0_i32 = arith.constant 0 : i32
    %c0_i32_0 = arith.constant 0 : i32
    %c0_i32_1 = arith.constant 0 : i32
    return %c0_i32, %c0_i32_0 : i32, i32
  }
  func.func @transform_3(%arg0: i32) -> (i32, i32) {
    %c0_i32 = arith.constant 0 : i32
    %c0_i32_0 = arith.constant 0 : i32
    %c0_i32_1 = arith.constant 0 : i32
    return %c0_i32, %c0_i32_0 : i32, i32
  }
  func.func @transform_4(%arg0: i32) -> (i32, i32) {
    %c0_i32 = arith.constant 0 : i32
    %c0_i32_0 = arith.constant 0 : i32
    %c0_i32_1 = arith.constant 0 : i32
    return %c0_i32, %c0_i32_0 : i32, i32
  }
  func.func @transform_5(%arg0: i32) -> (i32, i32, i32) {
    %c0_i32 = arith.constant 0 : i32
    %c0_i32_0 = arith.constant 0 : i32
    %c0_i32_1 = arith.constant 0 : i32
    %c0_i32_2 = arith.constant 0 : i32
    return %c0_i32, %c0_i32_0, %c0_i32_1 : i32, i32, i32
  }
  func.func @transform_6(%arg0: i32) -> (i32, i32, i32) {
    %c0_i32 = arith.constant 0 : i32
    %c0_i32_0 = arith.constant 0 : i32
    %c0_i32_1 = arith.constant 0 : i32
    %c0_i32_2 = arith.constant 0 : i32
    return %c0_i32, %c0_i32_0, %c0_i32_1 : i32, i32, i32
  }
}

module attributes {stable_mosaic.version = 11 : i64} {
  func.func @_conv_bn_relu_kernel(%arg0: i32, %arg1: memref<1x16x1280xbf16, #tpu.memory_space<vmem>>, %arg2: memref<32x144xbf16, #tpu.memory_space<vmem>>, %arg3: memref<32x1xf32, #tpu.memory_space<vmem>>, %arg4: memref<32x1xf32, #tpu.memory_space<vmem>>, %arg5: memref<1x1152xf32, #tpu.memory_space<vmem>>, %arg6: memref<2x32x1152xbf16, #tpu.memory_space<vmem>>, %arg7: memref<144x1152xbf16, #tpu.memory_space<vmem>>, %arg8: memref<32x1xf32, #tpu.memory_space<vmem>>, %arg9: memref<32x1xf32, #tpu.memory_space<vmem>>) attributes {dimension_semantics = [#tpu.dimension_semantics<arbitrary>], iteration_bounds = array<i64: 2>, scalar_prefetch = 0 : i64, scratch_operands = 3 : i64, tpu.core_type = #tpu.core_type<tc>, window_params = [{transform_indices = @transform_0, window_bounds = array<i64: 1, 16, 1280>}, {pipeline_mode = #tpu.pipeline_mode<synchronous>, transform_indices = @transform_1, window_bounds = array<i64: 32, 144>}, {pipeline_mode = #tpu.pipeline_mode<synchronous>, transform_indices = @transform_2, window_bounds = array<i64: 32, 1>}, {pipeline_mode = #tpu.pipeline_mode<synchronous>, transform_indices = @transform_3, window_bounds = array<i64: 32, 1>}, {pipeline_mode = #tpu.pipeline_mode<synchronous>, transform_indices = @transform_4, window_bounds = array<i64: 1, 1152>}, {pipeline_mode = #tpu.pipeline_mode<synchronous>, transform_indices = @transform_5, window_bounds = array<i64: 2, 32, 1152>}]} {
    %c0_i32 = arith.constant 0 : i32
    %0 = arith.cmpi eq, %arg0, %c0_i32 : i32
    %1 = arith.extui %0 : i1 to i32
    %c0_i32_0 = arith.constant 0 : i32
    %2 = arith.cmpi ne, %1, %c0_i32_0 : i32
    scf.if %2 {
      %cst_48 = arith.constant 0.000000e+00 : f32
      %55 = vector.broadcast %cst_48 : f32 to vector<32x1xf32>
      %c0_49 = arith.constant 0 : index
      %c0_50 = arith.constant 0 : index
      %56 = vector.load %arg8[%c0_49, %c0_50] : memref<32x1xf32, #tpu.memory_space<vmem>>, vector<32x1xf32>
      tpu.vector_store %arg8[%c0_49, %c0_50], %55 {strides = array<i32>} : memref<32x1xf32, #tpu.memory_space<vmem>>, vector<32x1xf32>,
      %cst_51 = arith.constant 0.000000e+00 : f32
      %57 = vector.broadcast %cst_51 : f32 to vector<32x1xf32>
      %c0_52 = arith.constant 0 : index
      %c0_53 = arith.constant 0 : index
      %58 = vector.load %arg9[%c0_52, %c0_53] : memref<32x1xf32, #tpu.memory_space<vmem>>, vector<32x1xf32>
      tpu.vector_store %arg9[%c0_52, %c0_53], %57 {strides = array<i32>} : memref<32x1xf32, #tpu.memory_space<vmem>>, vector<32x1xf32>,
    } else {
    }
    %c0 = arith.constant 0 : index
    %c0_1 = arith.constant 0 : index
    %c0_2 = arith.constant 0 : index
    %3 = vector.load %arg1[%c0, %c0_1, %c0_2] : memref<1x16x1280xbf16, #tpu.memory_space<vmem>>, vector<1x16x1152xbf16>
    %4 = vector.shape_cast %3 : vector<1x16x1152xbf16> to vector<16x1152xbf16>
    %c0_3 = arith.constant 0 : index
    %c0_4 = arith.constant 0 : index
    %5 = vector.load %arg7[%c0_3, %c0_4] : memref<144x1152xbf16, #tpu.memory_space<vmem>>, vector<16x1152xbf16>
    tpu.vector_store %arg7[%c0_3, %c0_4], %4 {strides = array<i32>} : memref<144x1152xbf16, #tpu.memory_space<vmem>>, vector<16x1152xbf16>,
    %c0_5 = arith.constant 0 : index
    %c0_6 = arith.constant 0 : index
    %c1 = arith.constant 1 : index
    %6 = vector.load %arg1[%c0_5, %c0_6, %c1] : memref<1x16x1280xbf16, #tpu.memory_space<vmem>>, vector<1x16x1152xbf16>
    %7 = vector.shape_cast %6 : vector<1x16x1152xbf16> to vector<16x1152xbf16>
    %c16 = arith.constant 16 : index
    %c0_7 = arith.constant 0 : index
    %8 = vector.load %arg7[%c16, %c0_7] : memref<144x1152xbf16, #tpu.memory_space<vmem>>, vector<16x1152xbf16>
    tpu.vector_store %arg7[%c16, %c0_7], %7 {strides = array<i32>} : memref<144x1152xbf16, #tpu.memory_space<vmem>>, vector<16x1152xbf16>,
    %c0_8 = arith.constant 0 : index
    %c0_9 = arith.constant 0 : index
    %c2 = arith.constant 2 : index
    %9 = vector.load %arg1[%c0_8, %c0_9, %c2] : memref<1x16x1280xbf16, #tpu.memory_space<vmem>>, vector<1x16x1152xbf16>
    %10 = vector.shape_cast %9 : vector<1x16x1152xbf16> to vector<16x1152xbf16>
    %c32 = arith.constant 32 : index
    %c0_10 = arith.constant 0 : index
    %11 = vector.load %arg7[%c32, %c0_10] : memref<144x1152xbf16, #tpu.memory_space<vmem>>, vector<16x1152xbf16>
    tpu.vector_store %arg7[%c32, %c0_10], %10 {strides = array<i32>} : memref<144x1152xbf16, #tpu.memory_space<vmem>>, vector<16x1152xbf16>,
    %c0_11 = arith.constant 0 : index
    %c0_12 = arith.constant 0 : index
    %c34 = arith.constant 34 : index
    %12 = vector.load %arg1[%c0_11, %c0_12, %c34] : memref<1x16x1280xbf16, #tpu.memory_space<vmem>>, vector<1x16x1152xbf16>
    %13 = vector.shape_cast %12 : vector<1x16x1152xbf16> to vector<16x1152xbf16>
    %c48 = arith.constant 48 : index
    %c0_13 = arith.constant 0 : index
    %14 = vector.load %arg7[%c48, %c0_13] : memref<144x1152xbf16, #tpu.memory_space<vmem>>, vector<16x1152xbf16>
    tpu.vector_store %arg7[%c48, %c0_13], %13 {strides = array<i32>} : memref<144x1152xbf16, #tpu.memory_space<vmem>>, vector<16x1152xbf16>,
    %c0_14 = arith.constant 0 : index
    %c0_15 = arith.constant 0 : index
    %c35 = arith.constant 35 : index
    %15 = vector.load %arg1[%c0_14, %c0_15, %c35] : memref<1x16x1280xbf16, #tpu.memory_space<vmem>>, vector<1x16x1152xbf16>
    %16 = vector.shape_cast %15 : vector<1x16x1152xbf16> to vector<16x1152xbf16>
    %c64 = arith.constant 64 : index
    %c0_16 = arith.constant 0 : index
    %17 = vector.load %arg7[%c64, %c0_16] : memref<144x1152xbf16, #tpu.memory_space<vmem>>, vector<16x1152xbf16>
    tpu.vector_store %arg7[%c64, %c0_16], %16 {strides = array<i32>} : memref<144x1152xbf16, #tpu.memory_space<vmem>>, vector<16x1152xbf16>,
    %c0_17 = arith.constant 0 : index
    %c0_18 = arith.constant 0 : index
    %c36 = arith.constant 36 : index
    %18 = vector.load %arg1[%c0_17, %c0_18, %c36] : memref<1x16x1280xbf16, #tpu.memory_space<vmem>>, vector<1x16x1152xbf16>
    %19 = vector.shape_cast %18 : vector<1x16x1152xbf16> to vector<16x1152xbf16>
    %c80 = arith.constant 80 : index
    %c0_19 = arith.constant 0 : index
    %20 = vector.load %arg7[%c80, %c0_19] : memref<144x1152xbf16, #tpu.memory_space<vmem>>, vector<16x1152xbf16>
    tpu.vector_store %arg7[%c80, %c0_19], %19 {strides = array<i32>} : memref<144x1152xbf16, #tpu.memory_space<vmem>>, vector<16x1152xbf16>,
    %c0_20 = arith.constant 0 : index
    %c0_21 = arith.constant 0 : index
    %c68 = arith.constant 68 : index
    %21 = vector.load %arg1[%c0_20, %c0_21, %c68] : memref<1x16x1280xbf16, #tpu.memory_space<vmem>>, vector<1x16x1152xbf16>
    %22 = vector.shape_cast %21 : vector<1x16x1152xbf16> to vector<16x1152xbf16>
    %c96 = arith.constant 96 : index
    %c0_22 = arith.constant 0 : index
    %23 = vector.load %arg7[%c96, %c0_22] : memref<144x1152xbf16, #tpu.memory_space<vmem>>, vector<16x1152xbf16>
    tpu.vector_store %arg7[%c96, %c0_22], %22 {strides = array<i32>} : memref<144x1152xbf16, #tpu.memory_space<vmem>>, vector<16x1152xbf16>,
    %c0_23 = arith.constant 0 : index
    %c0_24 = arith.constant 0 : index
    %c69 = arith.constant 69 : index
    %24 = vector.load %arg1[%c0_23, %c0_24, %c69] : memref<1x16x1280xbf16, #tpu.memory_space<vmem>>, vector<1x16x1152xbf16>
    %25 = vector.shape_cast %24 : vector<1x16x1152xbf16> to vector<16x1152xbf16>
    %c112 = arith.constant 112 : index
    %c0_25 = arith.constant 0 : index
    %26 = vector.load %arg7[%c112, %c0_25] : memref<144x1152xbf16, #tpu.memory_space<vmem>>, vector<16x1152xbf16>
    tpu.vector_store %arg7[%c112, %c0_25], %25 {strides = array<i32>} : memref<144x1152xbf16, #tpu.memory_space<vmem>>, vector<16x1152xbf16>,
    %c0_26 = arith.constant 0 : index
    %c0_27 = arith.constant 0 : index
    %c70 = arith.constant 70 : index
    %27 = vector.load %arg1[%c0_26, %c0_27, %c70] : memref<1x16x1280xbf16, #tpu.memory_space<vmem>>, vector<1x16x1152xbf16>
    %28 = vector.shape_cast %27 : vector<1x16x1152xbf16> to vector<16x1152xbf16>
    %c128 = arith.constant 128 : index
    %c0_28 = arith.constant 0 : index
    %29 = vector.load %arg7[%c128, %c0_28] : memref<144x1152xbf16, #tpu.memory_space<vmem>>, vector<16x1152xbf16>
    tpu.vector_store %arg7[%c128, %c0_28], %28 {strides = array<i32>} : memref<144x1152xbf16, #tpu.memory_space<vmem>>, vector<16x1152xbf16>,
    %c0_29 = arith.constant 0 : index
    %c0_30 = arith.constant 0 : index
    %30 = vector.load %arg2[%c0_29, %c0_30] : memref<32x144xbf16, #tpu.memory_space<vmem>>, vector<32x144xbf16>
    %c0_31 = arith.constant 0 : index
    %c0_32 = arith.constant 0 : index
    %31 = vector.load %arg7[%c0_31, %c0_32] : memref<144x1152xbf16, #tpu.memory_space<vmem>>, vector<144x1152xbf16>
    %cst = arith.constant dense<0.000000e+00> : vector<32x1152xf32>
    %32 = tpu.matmul %30, %31, %cst {dimension_numbers = #tpu.dot_dimension_numbers<[1], [0], [0], [1], [0, 0, 1, 1], [], []>} : vector<32x144xbf16>, vector<144x1152xbf16>, vector<32x1152xf32> -> vector<32x1152xf32>
    %c0_33 = arith.constant 0 : index
    %c0_34 = arith.constant 0 : index
    %33 = vector.load %arg5[%c0_33, %c0_34] : memref<1x1152xf32, #tpu.memory_space<vmem>>, vector<1x1152xf32>
    %34 = vector.broadcast %33 : vector<1x1152xf32> to vector<32x1152xf32>
    %35 = arith.mulf %32, %34 : vector<32x1152xf32>
    %c0_35 = arith.constant 0 : index
    %c0_36 = arith.constant 0 : index
    %36 = vector.load %arg8[%c0_35, %c0_36] : memref<32x1xf32, #tpu.memory_space<vmem>>, vector<32x1xf32>
    %cst_37 = arith.constant dense<0.000000e+00> : vector<32xf32>
    %37 = vector.multi_reduction <add>, %35, %cst_37 [1] : vector<32x1152xf32> to vector<32xf32>
    %38 = vector.shape_cast %37 : vector<32xf32> to vector<32x1xf32>
    %39 = arith.addf %36, %38 : vector<32x1xf32>
    %c0_38 = arith.constant 0 : index
    %c0_39 = arith.constant 0 : index
    %40 = vector.load %arg8[%c0_38, %c0_39] : memref<32x1xf32, #tpu.memory_space<vmem>>, vector<32x1xf32>
    tpu.vector_store %arg8[%c0_38, %c0_39], %39 {strides = array<i32>} : memref<32x1xf32, #tpu.memory_space<vmem>>, vector<32x1xf32>,
    %c0_40 = arith.constant 0 : index
    %c0_41 = arith.constant 0 : index
    %41 = vector.load %arg9[%c0_40, %c0_41] : memref<32x1xf32, #tpu.memory_space<vmem>>, vector<32x1xf32>
    %42 = arith.mulf %35, %32 : vector<32x1152xf32>
    %cst_42 = arith.constant dense<0.000000e+00> : vector<32xf32>
    %43 = vector.multi_reduction <add>, %42, %cst_42 [1] : vector<32x1152xf32> to vector<32xf32>
    %44 = vector.shape_cast %43 : vector<32xf32> to vector<32x1xf32>
    %45 = arith.addf %41, %44 : vector<32x1xf32>
    %c0_43 = arith.constant 0 : index
    %c0_44 = arith.constant 0 : index
    %46 = vector.load %arg9[%c0_43, %c0_44] : memref<32x1xf32, #tpu.memory_space<vmem>>, vector<32x1xf32>
    tpu.vector_store %arg9[%c0_43, %c0_44], %45 {strides = array<i32>} : memref<32x1xf32, #tpu.memory_space<vmem>>, vector<32x1xf32>,
    %47 = arith.truncf %32 : vector<32x1152xf32> to vector<32x1152xbf16>
    %48 = arith.index_cast %arg0 : i32 to index
    %c0_45 = arith.constant 0 : index
    %c0_46 = arith.constant 0 : index
    %49 = vector.load %arg6[%48, %c0_45, %c0_46] : memref<2x32x1152xbf16, #tpu.memory_space<vmem>>, vector<1x32x1152xbf16>
    %50 = vector.shape_cast %49 : vector<1x32x1152xbf16> to vector<32x1152xbf16>
    %51 = vector.shape_cast %47 : vector<32x1152xbf16> to vector<1x32x1152xbf16>
    tpu.vector_store %arg6[%48, %c0_45, %c0_46], %51 {strides = array<i32>} : memref<2x32x1152xbf16, #tpu.memory_space<vmem>>, vector<1x32x1152xbf16>,
    %c1_i32 = arith.constant 1 : i32
    %52 = arith.cmpi eq, %arg0, %c1_i32 : i32
    %53 = arith.extui %52 : i1 to i32
    %c0_i32_47 = arith.constant 0 : i32
    %54 = arith.cmpi ne, %53, %c0_i32_47 : i32
    scf.if %54 {
      %c0_48 = arith.constant 0 : index
      %c0_49 = arith.constant 0 : index
      %55 = vector.load %arg8[%c0_48, %c0_49] : memref<32x1xf32, #tpu.memory_space<vmem>>, vector<32x1xf32>
      %cst_50 = arith.constant 0.001953125 : f32
      %56 = vector.broadcast %cst_50 : f32 to vector<32x1xf32>
      %57 = arith.mulf %55, %56 : vector<32x1xf32>
      %c0_51 = arith.constant 0 : index
      %c0_52 = arith.constant 0 : index
      %58 = vector.load %arg9[%c0_51, %c0_52] : memref<32x1xf32, #tpu.memory_space<vmem>>, vector<32x1xf32>
      %cst_53 = arith.constant 0.001953125 : f32
      %59 = vector.broadcast %cst_53 : f32 to vector<32x1xf32>
      %60 = arith.mulf %58, %59 : vector<32x1xf32>
      %61 = arith.mulf %57, %57 : vector<32x1xf32>
      %62 = arith.subf %60, %61 : vector<32x1xf32>
      %cst_54 = arith.constant 0.000000e+00 : f32
      %63 = vector.broadcast %cst_54 : f32 to vector<32x1xf32>
      %64 = arith.maximumf %62, %63 : vector<32x1xf32>
      %c0_55 = arith.constant 0 : index
      %c0_56 = arith.constant 0 : index
      %65 = vector.load %arg3[%c0_55, %c0_56] : memref<32x1xf32, #tpu.memory_space<vmem>>, vector<32x1xf32>
      %cst_57 = arith.constant 9.99999974E-6 : f32
      %66 = vector.broadcast %cst_57 : f32 to vector<32x1xf32>
      %67 = arith.addf %64, %66 : vector<32x1xf32>
      %68 = math.rsqrt %67 : vector<32x1xf32>
      %69 = arith.mulf %65, %68 : vector<32x1xf32>
      %c0_58 = arith.constant 0 : index
      %c0_59 = arith.constant 0 : index
      %70 = vector.load %arg4[%c0_58, %c0_59] : memref<32x1xf32, #tpu.memory_space<vmem>>, vector<32x1xf32>
      %71 = arith.mulf %57, %69 : vector<32x1xf32>
      %72 = arith.subf %70, %71 : vector<32x1xf32>
      %c0_60 = arith.constant 0 : index
      %c0_61 = arith.constant 0 : index
      %c0_62 = arith.constant 0 : index
      %73 = vector.load %arg6[%c0_60, %c0_61, %c0_62] : memref<2x32x1152xbf16, #tpu.memory_space<vmem>>, vector<2x32x1152xbf16>
      %74 = arith.extf %73 : vector<2x32x1152xbf16> to vector<2x32x1152xf32>
      %75 = vector.shape_cast %69 : vector<32x1xf32> to vector<1x32x1xf32>
      %76 = vector.broadcast %75 : vector<1x32x1xf32> to vector<2x32x1152xf32>
      %77 = arith.mulf %74, %76 : vector<2x32x1152xf32>
      %78 = vector.shape_cast %72 : vector<32x1xf32> to vector<1x32x1xf32>
      %79 = vector.broadcast %78 : vector<1x32x1xf32> to vector<2x32x1152xf32>
      %80 = arith.addf %77, %79 : vector<2x32x1152xf32>
      %cst_63 = arith.constant 0.000000e+00 : f32
      %81 = vector.broadcast %cst_63 : f32 to vector<2x32x1152xf32>
      %82 = arith.maximumf %80, %81 : vector<2x32x1152xf32>
      %83 = arith.truncf %82 : vector<2x32x1152xf32> to vector<2x32x1152xbf16>
      %c0_64 = arith.constant 0 : index
      %c0_65 = arith.constant 0 : index
      %c0_66 = arith.constant 0 : index
      %84 = vector.load %arg6[%c0_64, %c0_65, %c0_66] : memref<2x32x1152xbf16, #tpu.memory_space<vmem>>, vector<2x32x1152xbf16>
      tpu.vector_store %arg6[%c0_64, %c0_65, %c0_66], %83 {strides = array<i32>} : memref<2x32x1152xbf16, #tpu.memory_space<vmem>>, vector<2x32x1152xbf16>,
    } else {
    }
    return
  }
  func.func @transform_0(%arg0: i32) -> (i32, i32, i32) {
    %c0_i32 = arith.constant 0 : i32
    %c0_i32_0 = arith.constant 0 : i32
    %c0_i32_1 = arith.constant 0 : i32
    return %arg0, %c0_i32, %c0_i32_0 : i32, i32, i32
  }
  func.func @transform_1(%arg0: i32) -> (i32, i32) {
    %c0_i32 = arith.constant 0 : i32
    %c0_i32_0 = arith.constant 0 : i32
    %c0_i32_1 = arith.constant 0 : i32
    return %c0_i32, %c0_i32_0 : i32, i32
  }
  func.func @transform_2(%arg0: i32) -> (i32, i32) {
    %c0_i32 = arith.constant 0 : i32
    %c0_i32_0 = arith.constant 0 : i32
    %c0_i32_1 = arith.constant 0 : i32
    return %c0_i32, %c0_i32_0 : i32, i32
  }
  func.func @transform_3(%arg0: i32) -> (i32, i32) {
    %c0_i32 = arith.constant 0 : i32
    %c0_i32_0 = arith.constant 0 : i32
    %c0_i32_1 = arith.constant 0 : i32
    return %c0_i32, %c0_i32_0 : i32, i32
  }
  func.func @transform_4(%arg0: i32) -> (i32, i32) {
    %c0_i32 = arith.constant 0 : i32
    %c0_i32_0 = arith.constant 0 : i32
    %c0_i32_1 = arith.constant 0 : i32
    return %c0_i32, %c0_i32_0 : i32, i32
  }
  func.func @transform_5(%arg0: i32) -> (i32, i32, i32) {
    %c0_i32 = arith.constant 0 : i32
    %c0_i32_0 = arith.constant 0 : i32
    %c0_i32_1 = arith.constant 0 : i32
    %c0_i32_2 = arith.constant 0 : i32
    return %c0_i32, %c0_i32_0, %c0_i32_1 : i32, i32, i32
  }
}

module attributes {stable_mosaic.version = 11 : i64} {
  func.func @_conv_bn_relu_kernel(%arg0: i32, %arg1: memref<1x32x512xbf16, #tpu.memory_space<vmem>>, %arg2: memref<32x288xbf16, #tpu.memory_space<vmem>>, %arg3: memref<32x1xf32, #tpu.memory_space<vmem>>, %arg4: memref<32x1xf32, #tpu.memory_space<vmem>>, %arg5: memref<1x384xf32, #tpu.memory_space<vmem>>, %arg6: memref<2x32x384xbf16, #tpu.memory_space<vmem>>, %arg7: memref<2x32x384xbf16, #tpu.memory_space<vmem>>, %arg8: memref<288x384xbf16, #tpu.memory_space<vmem>>, %arg9: memref<32x1xf32, #tpu.memory_space<vmem>>, %arg10: memref<32x1xf32, #tpu.memory_space<vmem>>) attributes {dimension_semantics = [#tpu.dimension_semantics<arbitrary>], iteration_bounds = array<i64: 2>, scalar_prefetch = 0 : i64, scratch_operands = 3 : i64, tpu.core_type = #tpu.core_type<tc>, window_params = [{transform_indices = @transform_0, window_bounds = array<i64: 1, 32, 512>}, {pipeline_mode = #tpu.pipeline_mode<synchronous>, transform_indices = @transform_1, window_bounds = array<i64: 32, 288>}, {pipeline_mode = #tpu.pipeline_mode<synchronous>, transform_indices = @transform_2, window_bounds = array<i64: 32, 1>}, {pipeline_mode = #tpu.pipeline_mode<synchronous>, transform_indices = @transform_3, window_bounds = array<i64: 32, 1>}, {pipeline_mode = #tpu.pipeline_mode<synchronous>, transform_indices = @transform_4, window_bounds = array<i64: 1, 384>}, {pipeline_mode = #tpu.pipeline_mode<synchronous>, transform_indices = @transform_5, window_bounds = array<i64: 2, 32, 384>}, {pipeline_mode = #tpu.pipeline_mode<synchronous>, transform_indices = @transform_6, window_bounds = array<i64: 2, 32, 384>}]} {
    %c0_i32 = arith.constant 0 : i32
    %0 = arith.cmpi eq, %arg0, %c0_i32 : i32
    %1 = arith.extui %0 : i1 to i32
    %c0_i32_0 = arith.constant 0 : i32
    %2 = arith.cmpi ne, %1, %c0_i32_0 : i32
    scf.if %2 {
      %cst_48 = arith.constant 0.000000e+00 : f32
      %55 = vector.broadcast %cst_48 : f32 to vector<32x1xf32>
      %c0_49 = arith.constant 0 : index
      %c0_50 = arith.constant 0 : index
      %56 = vector.load %arg9[%c0_49, %c0_50] : memref<32x1xf32, #tpu.memory_space<vmem>>, vector<32x1xf32>
      tpu.vector_store %arg9[%c0_49, %c0_50], %55 {strides = array<i32>} : memref<32x1xf32, #tpu.memory_space<vmem>>, vector<32x1xf32>,
      %cst_51 = arith.constant 0.000000e+00 : f32
      %57 = vector.broadcast %cst_51 : f32 to vector<32x1xf32>
      %c0_52 = arith.constant 0 : index
      %c0_53 = arith.constant 0 : index
      %58 = vector.load %arg10[%c0_52, %c0_53] : memref<32x1xf32, #tpu.memory_space<vmem>>, vector<32x1xf32>
      tpu.vector_store %arg10[%c0_52, %c0_53], %57 {strides = array<i32>} : memref<32x1xf32, #tpu.memory_space<vmem>>, vector<32x1xf32>,
    } else {
    }
    %c0 = arith.constant 0 : index
    %c0_1 = arith.constant 0 : index
    %c0_2 = arith.constant 0 : index
    %3 = vector.load %arg1[%c0, %c0_1, %c0_2] : memref<1x32x512xbf16, #tpu.memory_space<vmem>>, vector<1x32x384xbf16>
    %4 = vector.shape_cast %3 : vector<1x32x384xbf16> to vector<32x384xbf16>
    %c0_3 = arith.constant 0 : index
    %c0_4 = arith.constant 0 : index
    %5 = vector.load %arg8[%c0_3, %c0_4] : memref<288x384xbf16, #tpu.memory_space<vmem>>, vector<32x384xbf16>
    tpu.vector_store %arg8[%c0_3, %c0_4], %4 {strides = array<i32>} : memref<288x384xbf16, #tpu.memory_space<vmem>>, vector<32x384xbf16>,
    %c0_5 = arith.constant 0 : index
    %c0_6 = arith.constant 0 : index
    %c1 = arith.constant 1 : index
    %6 = vector.load %arg1[%c0_5, %c0_6, %c1] : memref<1x32x512xbf16, #tpu.memory_space<vmem>>, vector<1x32x384xbf16>
    %7 = vector.shape_cast %6 : vector<1x32x384xbf16> to vector<32x384xbf16>
    %c32 = arith.constant 32 : index
    %c0_7 = arith.constant 0 : index
    %8 = vector.load %arg8[%c32, %c0_7] : memref<288x384xbf16, #tpu.memory_space<vmem>>, vector<32x384xbf16>
    tpu.vector_store %arg8[%c32, %c0_7], %7 {strides = array<i32>} : memref<288x384xbf16, #tpu.memory_space<vmem>>, vector<32x384xbf16>,
    %c0_8 = arith.constant 0 : index
    %c0_9 = arith.constant 0 : index
    %c2 = arith.constant 2 : index
    %9 = vector.load %arg1[%c0_8, %c0_9, %c2] : memref<1x32x512xbf16, #tpu.memory_space<vmem>>, vector<1x32x384xbf16>
    %10 = vector.shape_cast %9 : vector<1x32x384xbf16> to vector<32x384xbf16>
    %c64 = arith.constant 64 : index
    %c0_10 = arith.constant 0 : index
    %11 = vector.load %arg8[%c64, %c0_10] : memref<288x384xbf16, #tpu.memory_space<vmem>>, vector<32x384xbf16>
    tpu.vector_store %arg8[%c64, %c0_10], %10 {strides = array<i32>} : memref<288x384xbf16, #tpu.memory_space<vmem>>, vector<32x384xbf16>,
    %c0_11 = arith.constant 0 : index
    %c0_12 = arith.constant 0 : index
    %c18 = arith.constant 18 : index
    %12 = vector.load %arg1[%c0_11, %c0_12, %c18] : memref<1x32x512xbf16, #tpu.memory_space<vmem>>, vector<1x32x384xbf16>
    %13 = vector.shape_cast %12 : vector<1x32x384xbf16> to vector<32x384xbf16>
    %c96 = arith.constant 96 : index
    %c0_13 = arith.constant 0 : index
    %14 = vector.load %arg8[%c96, %c0_13] : memref<288x384xbf16, #tpu.memory_space<vmem>>, vector<32x384xbf16>
    tpu.vector_store %arg8[%c96, %c0_13], %13 {strides = array<i32>} : memref<288x384xbf16, #tpu.memory_space<vmem>>, vector<32x384xbf16>,
    %c0_14 = arith.constant 0 : index
    %c0_15 = arith.constant 0 : index
    %c19 = arith.constant 19 : index
    %15 = vector.load %arg1[%c0_14, %c0_15, %c19] : memref<1x32x512xbf16, #tpu.memory_space<vmem>>, vector<1x32x384xbf16>
    %16 = vector.shape_cast %15 : vector<1x32x384xbf16> to vector<32x384xbf16>
    %c128 = arith.constant 128 : index
    %c0_16 = arith.constant 0 : index
    %17 = vector.load %arg8[%c128, %c0_16] : memref<288x384xbf16, #tpu.memory_space<vmem>>, vector<32x384xbf16>
    tpu.vector_store %arg8[%c128, %c0_16], %16 {strides = array<i32>} : memref<288x384xbf16, #tpu.memory_space<vmem>>, vector<32x384xbf16>,
    %c0_17 = arith.constant 0 : index
    %c0_18 = arith.constant 0 : index
    %c20 = arith.constant 20 : index
    %18 = vector.load %arg1[%c0_17, %c0_18, %c20] : memref<1x32x512xbf16, #tpu.memory_space<vmem>>, vector<1x32x384xbf16>
    %19 = vector.shape_cast %18 : vector<1x32x384xbf16> to vector<32x384xbf16>
    %c160 = arith.constant 160 : index
    %c0_19 = arith.constant 0 : index
    %20 = vector.load %arg8[%c160, %c0_19] : memref<288x384xbf16, #tpu.memory_space<vmem>>, vector<32x384xbf16>
    tpu.vector_store %arg8[%c160, %c0_19], %19 {strides = array<i32>} : memref<288x384xbf16, #tpu.memory_space<vmem>>, vector<32x384xbf16>,
    %c0_20 = arith.constant 0 : index
    %c0_21 = arith.constant 0 : index
    %c36 = arith.constant 36 : index
    %21 = vector.load %arg1[%c0_20, %c0_21, %c36] : memref<1x32x512xbf16, #tpu.memory_space<vmem>>, vector<1x32x384xbf16>
    %22 = vector.shape_cast %21 : vector<1x32x384xbf16> to vector<32x384xbf16>
    %c192 = arith.constant 192 : index
    %c0_22 = arith.constant 0 : index
    %23 = vector.load %arg8[%c192, %c0_22] : memref<288x384xbf16, #tpu.memory_space<vmem>>, vector<32x384xbf16>
    tpu.vector_store %arg8[%c192, %c0_22], %22 {strides = array<i32>} : memref<288x384xbf16, #tpu.memory_space<vmem>>, vector<32x384xbf16>,
    %c0_23 = arith.constant 0 : index
    %c0_24 = arith.constant 0 : index
    %c37 = arith.constant 37 : index
    %24 = vector.load %arg1[%c0_23, %c0_24, %c37] : memref<1x32x512xbf16, #tpu.memory_space<vmem>>, vector<1x32x384xbf16>
    %25 = vector.shape_cast %24 : vector<1x32x384xbf16> to vector<32x384xbf16>
    %c224 = arith.constant 224 : index
    %c0_25 = arith.constant 0 : index
    %26 = vector.load %arg8[%c224, %c0_25] : memref<288x384xbf16, #tpu.memory_space<vmem>>, vector<32x384xbf16>
    tpu.vector_store %arg8[%c224, %c0_25], %25 {strides = array<i32>} : memref<288x384xbf16, #tpu.memory_space<vmem>>, vector<32x384xbf16>,
    %c0_26 = arith.constant 0 : index
    %c0_27 = arith.constant 0 : index
    %c38 = arith.constant 38 : index
    %27 = vector.load %arg1[%c0_26, %c0_27, %c38] : memref<1x32x512xbf16, #tpu.memory_space<vmem>>, vector<1x32x384xbf16>
    %28 = vector.shape_cast %27 : vector<1x32x384xbf16> to vector<32x384xbf16>
    %c256 = arith.constant 256 : index
    %c0_28 = arith.constant 0 : index
    %29 = vector.load %arg8[%c256, %c0_28] : memref<288x384xbf16, #tpu.memory_space<vmem>>, vector<32x384xbf16>
    tpu.vector_store %arg8[%c256, %c0_28], %28 {strides = array<i32>} : memref<288x384xbf16, #tpu.memory_space<vmem>>, vector<32x384xbf16>,
    %c0_29 = arith.constant 0 : index
    %c0_30 = arith.constant 0 : index
    %30 = vector.load %arg2[%c0_29, %c0_30] : memref<32x288xbf16, #tpu.memory_space<vmem>>, vector<32x288xbf16>
    %c0_31 = arith.constant 0 : index
    %c0_32 = arith.constant 0 : index
    %31 = vector.load %arg8[%c0_31, %c0_32] : memref<288x384xbf16, #tpu.memory_space<vmem>>, vector<288x384xbf16>
    %cst = arith.constant dense<0.000000e+00> : vector<32x384xf32>
    %32 = tpu.matmul %30, %31, %cst {dimension_numbers = #tpu.dot_dimension_numbers<[1], [0], [0], [1], [0, 0, 1, 1], [], []>} : vector<32x288xbf16>, vector<288x384xbf16>, vector<32x384xf32> -> vector<32x384xf32>
    %c0_33 = arith.constant 0 : index
    %c0_34 = arith.constant 0 : index
    %33 = vector.load %arg5[%c0_33, %c0_34] : memref<1x384xf32, #tpu.memory_space<vmem>>, vector<1x384xf32>
    %34 = vector.broadcast %33 : vector<1x384xf32> to vector<32x384xf32>
    %35 = arith.mulf %32, %34 : vector<32x384xf32>
    %c0_35 = arith.constant 0 : index
    %c0_36 = arith.constant 0 : index
    %36 = vector.load %arg9[%c0_35, %c0_36] : memref<32x1xf32, #tpu.memory_space<vmem>>, vector<32x1xf32>
    %cst_37 = arith.constant dense<0.000000e+00> : vector<32xf32>
    %37 = vector.multi_reduction <add>, %35, %cst_37 [1] : vector<32x384xf32> to vector<32xf32>
    %38 = vector.shape_cast %37 : vector<32xf32> to vector<32x1xf32>
    %39 = arith.addf %36, %38 : vector<32x1xf32>
    %c0_38 = arith.constant 0 : index
    %c0_39 = arith.constant 0 : index
    %40 = vector.load %arg9[%c0_38, %c0_39] : memref<32x1xf32, #tpu.memory_space<vmem>>, vector<32x1xf32>
    tpu.vector_store %arg9[%c0_38, %c0_39], %39 {strides = array<i32>} : memref<32x1xf32, #tpu.memory_space<vmem>>, vector<32x1xf32>,
    %c0_40 = arith.constant 0 : index
    %c0_41 = arith.constant 0 : index
    %41 = vector.load %arg10[%c0_40, %c0_41] : memref<32x1xf32, #tpu.memory_space<vmem>>, vector<32x1xf32>
    %42 = arith.mulf %35, %32 : vector<32x384xf32>
    %cst_42 = arith.constant dense<0.000000e+00> : vector<32xf32>
    %43 = vector.multi_reduction <add>, %42, %cst_42 [1] : vector<32x384xf32> to vector<32xf32>
    %44 = vector.shape_cast %43 : vector<32xf32> to vector<32x1xf32>
    %45 = arith.addf %41, %44 : vector<32x1xf32>
    %c0_43 = arith.constant 0 : index
    %c0_44 = arith.constant 0 : index
    %46 = vector.load %arg10[%c0_43, %c0_44] : memref<32x1xf32, #tpu.memory_space<vmem>>, vector<32x1xf32>
    tpu.vector_store %arg10[%c0_43, %c0_44], %45 {strides = array<i32>} : memref<32x1xf32, #tpu.memory_space<vmem>>, vector<32x1xf32>,
    %47 = arith.truncf %32 : vector<32x384xf32> to vector<32x384xbf16>
    %48 = arith.index_cast %arg0 : i32 to index
    %c0_45 = arith.constant 0 : index
    %c0_46 = arith.constant 0 : index
    %49 = vector.load %arg7[%48, %c0_45, %c0_46] : memref<2x32x384xbf16, #tpu.memory_space<vmem>>, vector<1x32x384xbf16>
    %50 = vector.shape_cast %49 : vector<1x32x384xbf16> to vector<32x384xbf16>
    %51 = vector.shape_cast %47 : vector<32x384xbf16> to vector<1x32x384xbf16>
    tpu.vector_store %arg7[%48, %c0_45, %c0_46], %51 {strides = array<i32>} : memref<2x32x384xbf16, #tpu.memory_space<vmem>>, vector<1x32x384xbf16>,
    %c1_i32 = arith.constant 1 : i32
    %52 = arith.cmpi eq, %arg0, %c1_i32 : i32
    %53 = arith.extui %52 : i1 to i32
    %c0_i32_47 = arith.constant 0 : i32
    %54 = arith.cmpi ne, %53, %c0_i32_47 : i32
    scf.if %54 {
      %c0_48 = arith.constant 0 : index
      %c0_49 = arith.constant 0 : index
      %55 = vector.load %arg9[%c0_48, %c0_49] : memref<32x1xf32, #tpu.memory_space<vmem>>, vector<32x1xf32>
      %cst_50 = arith.constant 0.001953125 : f32
      %56 = vector.broadcast %cst_50 : f32 to vector<32x1xf32>
      %57 = arith.mulf %55, %56 : vector<32x1xf32>
      %c0_51 = arith.constant 0 : index
      %c0_52 = arith.constant 0 : index
      %58 = vector.load %arg10[%c0_51, %c0_52] : memref<32x1xf32, #tpu.memory_space<vmem>>, vector<32x1xf32>
      %cst_53 = arith.constant 0.001953125 : f32
      %59 = vector.broadcast %cst_53 : f32 to vector<32x1xf32>
      %60 = arith.mulf %58, %59 : vector<32x1xf32>
      %61 = arith.mulf %57, %57 : vector<32x1xf32>
      %62 = arith.subf %60, %61 : vector<32x1xf32>
      %cst_54 = arith.constant 0.000000e+00 : f32
      %63 = vector.broadcast %cst_54 : f32 to vector<32x1xf32>
      %64 = arith.maximumf %62, %63 : vector<32x1xf32>
      %c0_55 = arith.constant 0 : index
      %c0_56 = arith.constant 0 : index
      %65 = vector.load %arg3[%c0_55, %c0_56] : memref<32x1xf32, #tpu.memory_space<vmem>>, vector<32x1xf32>
      %cst_57 = arith.constant 9.99999974E-6 : f32
      %66 = vector.broadcast %cst_57 : f32 to vector<32x1xf32>
      %67 = arith.addf %64, %66 : vector<32x1xf32>
      %68 = math.rsqrt %67 : vector<32x1xf32>
      %69 = arith.mulf %65, %68 : vector<32x1xf32>
      %c0_58 = arith.constant 0 : index
      %c0_59 = arith.constant 0 : index
      %70 = vector.load %arg4[%c0_58, %c0_59] : memref<32x1xf32, #tpu.memory_space<vmem>>, vector<32x1xf32>
      %71 = arith.mulf %57, %69 : vector<32x1xf32>
      %72 = arith.subf %70, %71 : vector<32x1xf32>
      %c0_60 = arith.constant 0 : index
      %c0_61 = arith.constant 0 : index
      %c0_62 = arith.constant 0 : index
      %73 = vector.load %arg7[%c0_60, %c0_61, %c0_62] : memref<2x32x384xbf16, #tpu.memory_space<vmem>>, vector<2x32x384xbf16>
      %74 = arith.extf %73 : vector<2x32x384xbf16> to vector<2x32x384xf32>
      %75 = vector.shape_cast %69 : vector<32x1xf32> to vector<1x32x1xf32>
      %76 = vector.broadcast %75 : vector<1x32x1xf32> to vector<2x32x384xf32>
      %77 = arith.mulf %74, %76 : vector<2x32x384xf32>
      %78 = vector.shape_cast %72 : vector<32x1xf32> to vector<1x32x1xf32>
      %79 = vector.broadcast %78 : vector<1x32x1xf32> to vector<2x32x384xf32>
      %80 = arith.addf %77, %79 : vector<2x32x384xf32>
      %c0_63 = arith.constant 0 : index
      %c0_64 = arith.constant 0 : index
      %c0_65 = arith.constant 0 : index
      %81 = vector.load %arg6[%c0_63, %c0_64, %c0_65] : memref<2x32x384xbf16, #tpu.memory_space<vmem>>, vector<2x32x384xbf16>
      %82 = arith.extf %81 : vector<2x32x384xbf16> to vector<2x32x384xf32>
      %83 = arith.addf %80, %82 : vector<2x32x384xf32>
      %cst_66 = arith.constant 0.000000e+00 : f32
      %84 = vector.broadcast %cst_66 : f32 to vector<2x32x384xf32>
      %85 = arith.maximumf %83, %84 : vector<2x32x384xf32>
      %86 = arith.truncf %85 : vector<2x32x384xf32> to vector<2x32x384xbf16>
      %c0_67 = arith.constant 0 : index
      %c0_68 = arith.constant 0 : index
      %c0_69 = arith.constant 0 : index
      %87 = vector.load %arg7[%c0_67, %c0_68, %c0_69] : memref<2x32x384xbf16, #tpu.memory_space<vmem>>, vector<2x32x384xbf16>
      tpu.vector_store %arg7[%c0_67, %c0_68, %c0_69], %86 {strides = array<i32>} : memref<2x32x384xbf16, #tpu.memory_space<vmem>>, vector<2x32x384xbf16>,
    } else {
    }
    return
  }
  func.func @transform_0(%arg0: i32) -> (i32, i32, i32) {
    %c0_i32 = arith.constant 0 : i32
    %c0_i32_0 = arith.constant 0 : i32
    %c0_i32_1 = arith.constant 0 : i32
    return %arg0, %c0_i32, %c0_i32_0 : i32, i32, i32
  }
  func.func @transform_1(%arg0: i32) -> (i32, i32) {
    %c0_i32 = arith.constant 0 : i32
    %c0_i32_0 = arith.constant 0 : i32
    %c0_i32_1 = arith.constant 0 : i32
    return %c0_i32, %c0_i32_0 : i32, i32
  }
  func.func @transform_2(%arg0: i32) -> (i32, i32) {
    %c0_i32 = arith.constant 0 : i32
    %c0_i32_0 = arith.constant 0 : i32
    %c0_i32_1 = arith.constant 0 : i32
    return %c0_i32, %c0_i32_0 : i32, i32
  }
  func.func @transform_3(%arg0: i32) -> (i32, i32) {
    %c0_i32 = arith.constant 0 : i32
    %c0_i32_0 = arith.constant 0 : i32
    %c0_i32_1 = arith.constant 0 : i32
    return %c0_i32, %c0_i32_0 : i32, i32
  }
  func.func @transform_4(%arg0: i32) -> (i32, i32) {
    %c0_i32 = arith.constant 0 : i32
    %c0_i32_0 = arith.constant 0 : i32
    %c0_i32_1 = arith.constant 0 : i32
    return %c0_i32, %c0_i32_0 : i32, i32
  }
  func.func @transform_5(%arg0: i32) -> (i32, i32, i32) {
    %c0_i32 = arith.constant 0 : i32
    %c0_i32_0 = arith.constant 0 : i32
    %c0_i32_1 = arith.constant 0 : i32
    %c0_i32_2 = arith.constant 0 : i32
    return %c0_i32, %c0_i32_0, %c0_i32_1 : i32, i32, i32
  }
  func.func @transform_6(%arg0: i32) -> (i32, i32, i32) {
    %c0_i32 = arith.constant 0 : i32
    %c0_i32_0 = arith.constant 0 : i32
    %c0_i32_1 = arith.constant 0 : i32
    %c0_i32_2 = arith.constant 0 : i32
    return %c0_i32, %c0_i32_0, %c0_i32_1 : i32, i32, i32
  }
}

module attributes {stable_mosaic.version = 11 : i64} {
  func.func @_conv_bn_relu_kernel(%arg0: i32, %arg1: memref<1x32x512xbf16, #tpu.memory_space<vmem>>, %arg2: memref<64x288xbf16, #tpu.memory_space<vmem>>, %arg3: memref<64x1xf32, #tpu.memory_space<vmem>>, %arg4: memref<64x1xf32, #tpu.memory_space<vmem>>, %arg5: memref<1x384xf32, #tpu.memory_space<vmem>>, %arg6: memref<2x64x384xbf16, #tpu.memory_space<vmem>>, %arg7: memref<288x384xbf16, #tpu.memory_space<vmem>>, %arg8: memref<64x1xf32, #tpu.memory_space<vmem>>, %arg9: memref<64x1xf32, #tpu.memory_space<vmem>>) attributes {dimension_semantics = [#tpu.dimension_semantics<arbitrary>], iteration_bounds = array<i64: 2>, scalar_prefetch = 0 : i64, scratch_operands = 3 : i64, tpu.core_type = #tpu.core_type<tc>, window_params = [{transform_indices = @transform_0, window_bounds = array<i64: 1, 32, 512>}, {pipeline_mode = #tpu.pipeline_mode<synchronous>, transform_indices = @transform_1, window_bounds = array<i64: 64, 288>}, {pipeline_mode = #tpu.pipeline_mode<synchronous>, transform_indices = @transform_2, window_bounds = array<i64: 64, 1>}, {pipeline_mode = #tpu.pipeline_mode<synchronous>, transform_indices = @transform_3, window_bounds = array<i64: 64, 1>}, {pipeline_mode = #tpu.pipeline_mode<synchronous>, transform_indices = @transform_4, window_bounds = array<i64: 1, 384>}, {pipeline_mode = #tpu.pipeline_mode<synchronous>, transform_indices = @transform_5, window_bounds = array<i64: 2, 64, 384>}]} {
    %c0_i32 = arith.constant 0 : i32
    %0 = arith.cmpi eq, %arg0, %c0_i32 : i32
    %1 = arith.extui %0 : i1 to i32
    %c0_i32_0 = arith.constant 0 : i32
    %2 = arith.cmpi ne, %1, %c0_i32_0 : i32
    scf.if %2 {
      %cst_48 = arith.constant 0.000000e+00 : f32
      %55 = vector.broadcast %cst_48 : f32 to vector<64x1xf32>
      %c0_49 = arith.constant 0 : index
      %c0_50 = arith.constant 0 : index
      %56 = vector.load %arg8[%c0_49, %c0_50] : memref<64x1xf32, #tpu.memory_space<vmem>>, vector<64x1xf32>
      tpu.vector_store %arg8[%c0_49, %c0_50], %55 {strides = array<i32>} : memref<64x1xf32, #tpu.memory_space<vmem>>, vector<64x1xf32>,
      %cst_51 = arith.constant 0.000000e+00 : f32
      %57 = vector.broadcast %cst_51 : f32 to vector<64x1xf32>
      %c0_52 = arith.constant 0 : index
      %c0_53 = arith.constant 0 : index
      %58 = vector.load %arg9[%c0_52, %c0_53] : memref<64x1xf32, #tpu.memory_space<vmem>>, vector<64x1xf32>
      tpu.vector_store %arg9[%c0_52, %c0_53], %57 {strides = array<i32>} : memref<64x1xf32, #tpu.memory_space<vmem>>, vector<64x1xf32>,
    } else {
    }
    %c0 = arith.constant 0 : index
    %c0_1 = arith.constant 0 : index
    %c0_2 = arith.constant 0 : index
    %3 = vector.load %arg1[%c0, %c0_1, %c0_2] : memref<1x32x512xbf16, #tpu.memory_space<vmem>>, vector<1x32x384xbf16>
    %4 = vector.shape_cast %3 : vector<1x32x384xbf16> to vector<32x384xbf16>
    %c0_3 = arith.constant 0 : index
    %c0_4 = arith.constant 0 : index
    %5 = vector.load %arg7[%c0_3, %c0_4] : memref<288x384xbf16, #tpu.memory_space<vmem>>, vector<32x384xbf16>
    tpu.vector_store %arg7[%c0_3, %c0_4], %4 {strides = array<i32>} : memref<288x384xbf16, #tpu.memory_space<vmem>>, vector<32x384xbf16>,
    %c0_5 = arith.constant 0 : index
    %c0_6 = arith.constant 0 : index
    %c1 = arith.constant 1 : index
    %6 = vector.load %arg1[%c0_5, %c0_6, %c1] : memref<1x32x512xbf16, #tpu.memory_space<vmem>>, vector<1x32x384xbf16>
    %7 = vector.shape_cast %6 : vector<1x32x384xbf16> to vector<32x384xbf16>
    %c32 = arith.constant 32 : index
    %c0_7 = arith.constant 0 : index
    %8 = vector.load %arg7[%c32, %c0_7] : memref<288x384xbf16, #tpu.memory_space<vmem>>, vector<32x384xbf16>
    tpu.vector_store %arg7[%c32, %c0_7], %7 {strides = array<i32>} : memref<288x384xbf16, #tpu.memory_space<vmem>>, vector<32x384xbf16>,
    %c0_8 = arith.constant 0 : index
    %c0_9 = arith.constant 0 : index
    %c2 = arith.constant 2 : index
    %9 = vector.load %arg1[%c0_8, %c0_9, %c2] : memref<1x32x512xbf16, #tpu.memory_space<vmem>>, vector<1x32x384xbf16>
    %10 = vector.shape_cast %9 : vector<1x32x384xbf16> to vector<32x384xbf16>
    %c64 = arith.constant 64 : index
    %c0_10 = arith.constant 0 : index
    %11 = vector.load %arg7[%c64, %c0_10] : memref<288x384xbf16, #tpu.memory_space<vmem>>, vector<32x384xbf16>
    tpu.vector_store %arg7[%c64, %c0_10], %10 {strides = array<i32>} : memref<288x384xbf16, #tpu.memory_space<vmem>>, vector<32x384xbf16>,
    %c0_11 = arith.constant 0 : index
    %c0_12 = arith.constant 0 : index
    %c18 = arith.constant 18 : index
    %12 = vector.load %arg1[%c0_11, %c0_12, %c18] : memref<1x32x512xbf16, #tpu.memory_space<vmem>>, vector<1x32x384xbf16>
    %13 = vector.shape_cast %12 : vector<1x32x384xbf16> to vector<32x384xbf16>
    %c96 = arith.constant 96 : index
    %c0_13 = arith.constant 0 : index
    %14 = vector.load %arg7[%c96, %c0_13] : memref<288x384xbf16, #tpu.memory_space<vmem>>, vector<32x384xbf16>
    tpu.vector_store %arg7[%c96, %c0_13], %13 {strides = array<i32>} : memref<288x384xbf16, #tpu.memory_space<vmem>>, vector<32x384xbf16>,
    %c0_14 = arith.constant 0 : index
    %c0_15 = arith.constant 0 : index
    %c19 = arith.constant 19 : index
    %15 = vector.load %arg1[%c0_14, %c0_15, %c19] : memref<1x32x512xbf16, #tpu.memory_space<vmem>>, vector<1x32x384xbf16>
    %16 = vector.shape_cast %15 : vector<1x32x384xbf16> to vector<32x384xbf16>
    %c128 = arith.constant 128 : index
    %c0_16 = arith.constant 0 : index
    %17 = vector.load %arg7[%c128, %c0_16] : memref<288x384xbf16, #tpu.memory_space<vmem>>, vector<32x384xbf16>
    tpu.vector_store %arg7[%c128, %c0_16], %16 {strides = array<i32>} : memref<288x384xbf16, #tpu.memory_space<vmem>>, vector<32x384xbf16>,
    %c0_17 = arith.constant 0 : index
    %c0_18 = arith.constant 0 : index
    %c20 = arith.constant 20 : index
    %18 = vector.load %arg1[%c0_17, %c0_18, %c20] : memref<1x32x512xbf16, #tpu.memory_space<vmem>>, vector<1x32x384xbf16>
    %19 = vector.shape_cast %18 : vector<1x32x384xbf16> to vector<32x384xbf16>
    %c160 = arith.constant 160 : index
    %c0_19 = arith.constant 0 : index
    %20 = vector.load %arg7[%c160, %c0_19] : memref<288x384xbf16, #tpu.memory_space<vmem>>, vector<32x384xbf16>
    tpu.vector_store %arg7[%c160, %c0_19], %19 {strides = array<i32>} : memref<288x384xbf16, #tpu.memory_space<vmem>>, vector<32x384xbf16>,
    %c0_20 = arith.constant 0 : index
    %c0_21 = arith.constant 0 : index
    %c36 = arith.constant 36 : index
    %21 = vector.load %arg1[%c0_20, %c0_21, %c36] : memref<1x32x512xbf16, #tpu.memory_space<vmem>>, vector<1x32x384xbf16>
    %22 = vector.shape_cast %21 : vector<1x32x384xbf16> to vector<32x384xbf16>
    %c192 = arith.constant 192 : index
    %c0_22 = arith.constant 0 : index
    %23 = vector.load %arg7[%c192, %c0_22] : memref<288x384xbf16, #tpu.memory_space<vmem>>, vector<32x384xbf16>
    tpu.vector_store %arg7[%c192, %c0_22], %22 {strides = array<i32>} : memref<288x384xbf16, #tpu.memory_space<vmem>>, vector<32x384xbf16>,
    %c0_23 = arith.constant 0 : index
    %c0_24 = arith.constant 0 : index
    %c37 = arith.constant 37 : index
    %24 = vector.load %arg1[%c0_23, %c0_24, %c37] : memref<1x32x512xbf16, #tpu.memory_space<vmem>>, vector<1x32x384xbf16>
    %25 = vector.shape_cast %24 : vector<1x32x384xbf16> to vector<32x384xbf16>
    %c224 = arith.constant 224 : index
    %c0_25 = arith.constant 0 : index
    %26 = vector.load %arg7[%c224, %c0_25] : memref<288x384xbf16, #tpu.memory_space<vmem>>, vector<32x384xbf16>
    tpu.vector_store %arg7[%c224, %c0_25], %25 {strides = array<i32>} : memref<288x384xbf16, #tpu.memory_space<vmem>>, vector<32x384xbf16>,
    %c0_26 = arith.constant 0 : index
    %c0_27 = arith.constant 0 : index
    %c38 = arith.constant 38 : index
    %27 = vector.load %arg1[%c0_26, %c0_27, %c38] : memref<1x32x512xbf16, #tpu.memory_space<vmem>>, vector<1x32x384xbf16>
    %28 = vector.shape_cast %27 : vector<1x32x384xbf16> to vector<32x384xbf16>
    %c256 = arith.constant 256 : index
    %c0_28 = arith.constant 0 : index
    %29 = vector.load %arg7[%c256, %c0_28] : memref<288x384xbf16, #tpu.memory_space<vmem>>, vector<32x384xbf16>
    tpu.vector_store %arg7[%c256, %c0_28], %28 {strides = array<i32>} : memref<288x384xbf16, #tpu.memory_space<vmem>>, vector<32x384xbf16>,
    %c0_29 = arith.constant 0 : index
    %c0_30 = arith.constant 0 : index
    %30 = vector.load %arg2[%c0_29, %c0_30] : memref<64x288xbf16, #tpu.memory_space<vmem>>, vector<64x288xbf16>
    %c0_31 = arith.constant 0 : index
    %c0_32 = arith.constant 0 : index
    %31 = vector.load %arg7[%c0_31, %c0_32] : memref<288x384xbf16, #tpu.memory_space<vmem>>, vector<288x384xbf16>
    %cst = arith.constant dense<0.000000e+00> : vector<64x384xf32>
    %32 = tpu.matmul %30, %31, %cst {dimension_numbers = #tpu.dot_dimension_numbers<[1], [0], [0], [1], [0, 0, 1, 1], [], []>} : vector<64x288xbf16>, vector<288x384xbf16>, vector<64x384xf32> -> vector<64x384xf32>
    %c0_33 = arith.constant 0 : index
    %c0_34 = arith.constant 0 : index
    %33 = vector.load %arg5[%c0_33, %c0_34] : memref<1x384xf32, #tpu.memory_space<vmem>>, vector<1x384xf32>
    %34 = vector.broadcast %33 : vector<1x384xf32> to vector<64x384xf32>
    %35 = arith.mulf %32, %34 : vector<64x384xf32>
    %c0_35 = arith.constant 0 : index
    %c0_36 = arith.constant 0 : index
    %36 = vector.load %arg8[%c0_35, %c0_36] : memref<64x1xf32, #tpu.memory_space<vmem>>, vector<64x1xf32>
    %cst_37 = arith.constant dense<0.000000e+00> : vector<64xf32>
    %37 = vector.multi_reduction <add>, %35, %cst_37 [1] : vector<64x384xf32> to vector<64xf32>
    %38 = vector.shape_cast %37 : vector<64xf32> to vector<64x1xf32>
    %39 = arith.addf %36, %38 : vector<64x1xf32>
    %c0_38 = arith.constant 0 : index
    %c0_39 = arith.constant 0 : index
    %40 = vector.load %arg8[%c0_38, %c0_39] : memref<64x1xf32, #tpu.memory_space<vmem>>, vector<64x1xf32>
    tpu.vector_store %arg8[%c0_38, %c0_39], %39 {strides = array<i32>} : memref<64x1xf32, #tpu.memory_space<vmem>>, vector<64x1xf32>,
    %c0_40 = arith.constant 0 : index
    %c0_41 = arith.constant 0 : index
    %41 = vector.load %arg9[%c0_40, %c0_41] : memref<64x1xf32, #tpu.memory_space<vmem>>, vector<64x1xf32>
    %42 = arith.mulf %35, %32 : vector<64x384xf32>
    %cst_42 = arith.constant dense<0.000000e+00> : vector<64xf32>
    %43 = vector.multi_reduction <add>, %42, %cst_42 [1] : vector<64x384xf32> to vector<64xf32>
    %44 = vector.shape_cast %43 : vector<64xf32> to vector<64x1xf32>
    %45 = arith.addf %41, %44 : vector<64x1xf32>
    %c0_43 = arith.constant 0 : index
    %c0_44 = arith.constant 0 : index
    %46 = vector.load %arg9[%c0_43, %c0_44] : memref<64x1xf32, #tpu.memory_space<vmem>>, vector<64x1xf32>
    tpu.vector_store %arg9[%c0_43, %c0_44], %45 {strides = array<i32>} : memref<64x1xf32, #tpu.memory_space<vmem>>, vector<64x1xf32>,
    %47 = arith.truncf %32 : vector<64x384xf32> to vector<64x384xbf16>
    %48 = arith.index_cast %arg0 : i32 to index
    %c0_45 = arith.constant 0 : index
    %c0_46 = arith.constant 0 : index
    %49 = vector.load %arg6[%48, %c0_45, %c0_46] : memref<2x64x384xbf16, #tpu.memory_space<vmem>>, vector<1x64x384xbf16>
    %50 = vector.shape_cast %49 : vector<1x64x384xbf16> to vector<64x384xbf16>
    %51 = vector.shape_cast %47 : vector<64x384xbf16> to vector<1x64x384xbf16>
    tpu.vector_store %arg6[%48, %c0_45, %c0_46], %51 {strides = array<i32>} : memref<2x64x384xbf16, #tpu.memory_space<vmem>>, vector<1x64x384xbf16>,
    %c1_i32 = arith.constant 1 : i32
    %52 = arith.cmpi eq, %arg0, %c1_i32 : i32
    %53 = arith.extui %52 : i1 to i32
    %c0_i32_47 = arith.constant 0 : i32
    %54 = arith.cmpi ne, %53, %c0_i32_47 : i32
    scf.if %54 {
      %c0_48 = arith.constant 0 : index
      %c0_49 = arith.constant 0 : index
      %55 = vector.load %arg8[%c0_48, %c0_49] : memref<64x1xf32, #tpu.memory_space<vmem>>, vector<64x1xf32>
      %cst_50 = arith.constant 7.812500e-03 : f32
      %56 = vector.broadcast %cst_50 : f32 to vector<64x1xf32>
      %57 = arith.mulf %55, %56 : vector<64x1xf32>
      %c0_51 = arith.constant 0 : index
      %c0_52 = arith.constant 0 : index
      %58 = vector.load %arg9[%c0_51, %c0_52] : memref<64x1xf32, #tpu.memory_space<vmem>>, vector<64x1xf32>
      %cst_53 = arith.constant 7.812500e-03 : f32
      %59 = vector.broadcast %cst_53 : f32 to vector<64x1xf32>
      %60 = arith.mulf %58, %59 : vector<64x1xf32>
      %61 = arith.mulf %57, %57 : vector<64x1xf32>
      %62 = arith.subf %60, %61 : vector<64x1xf32>
      %cst_54 = arith.constant 0.000000e+00 : f32
      %63 = vector.broadcast %cst_54 : f32 to vector<64x1xf32>
      %64 = arith.maximumf %62, %63 : vector<64x1xf32>
      %c0_55 = arith.constant 0 : index
      %c0_56 = arith.constant 0 : index
      %65 = vector.load %arg3[%c0_55, %c0_56] : memref<64x1xf32, #tpu.memory_space<vmem>>, vector<64x1xf32>
      %cst_57 = arith.constant 9.99999974E-6 : f32
      %66 = vector.broadcast %cst_57 : f32 to vector<64x1xf32>
      %67 = arith.addf %64, %66 : vector<64x1xf32>
      %68 = math.rsqrt %67 : vector<64x1xf32>
      %69 = arith.mulf %65, %68 : vector<64x1xf32>
      %c0_58 = arith.constant 0 : index
      %c0_59 = arith.constant 0 : index
      %70 = vector.load %arg4[%c0_58, %c0_59] : memref<64x1xf32, #tpu.memory_space<vmem>>, vector<64x1xf32>
      %71 = arith.mulf %57, %69 : vector<64x1xf32>
      %72 = arith.subf %70, %71 : vector<64x1xf32>
      %c0_60 = arith.constant 0 : index
      %c0_61 = arith.constant 0 : index
      %c0_62 = arith.constant 0 : index
      %73 = vector.load %arg6[%c0_60, %c0_61, %c0_62] : memref<2x64x384xbf16, #tpu.memory_space<vmem>>, vector<2x64x384xbf16>
      %74 = arith.extf %73 : vector<2x64x384xbf16> to vector<2x64x384xf32>
      %75 = vector.shape_cast %69 : vector<64x1xf32> to vector<1x64x1xf32>
      %76 = vector.broadcast %75 : vector<1x64x1xf32> to vector<2x64x384xf32>
      %77 = arith.mulf %74, %76 : vector<2x64x384xf32>
      %78 = vector.shape_cast %72 : vector<64x1xf32> to vector<1x64x1xf32>
      %79 = vector.broadcast %78 : vector<1x64x1xf32> to vector<2x64x384xf32>
      %80 = arith.addf %77, %79 : vector<2x64x384xf32>
      %cst_63 = arith.constant 0.000000e+00 : f32
      %81 = vector.broadcast %cst_63 : f32 to vector<2x64x384xf32>
      %82 = arith.maximumf %80, %81 : vector<2x64x384xf32>
      %83 = arith.truncf %82 : vector<2x64x384xf32> to vector<2x64x384xbf16>
      %c0_64 = arith.constant 0 : index
      %c0_65 = arith.constant 0 : index
      %c0_66 = arith.constant 0 : index
      %84 = vector.load %arg6[%c0_64, %c0_65, %c0_66] : memref<2x64x384xbf16, #tpu.memory_space<vmem>>, vector<2x64x384xbf16>
      tpu.vector_store %arg6[%c0_64, %c0_65, %c0_66], %83 {strides = array<i32>} : memref<2x64x384xbf16, #tpu.memory_space<vmem>>, vector<2x64x384xbf16>,
    } else {
    }
    return
  }
  func.func @transform_0(%arg0: i32) -> (i32, i32, i32) {
    %c0_i32 = arith.constant 0 : i32
    %c0_i32_0 = arith.constant 0 : i32
    %c0_i32_1 = arith.constant 0 : i32
    return %arg0, %c0_i32, %c0_i32_0 : i32, i32, i32
  }
  func.func @transform_1(%arg0: i32) -> (i32, i32) {
    %c0_i32 = arith.constant 0 : i32
    %c0_i32_0 = arith.constant 0 : i32
    %c0_i32_1 = arith.constant 0 : i32
    return %c0_i32, %c0_i32_0 : i32, i32
  }
  func.func @transform_2(%arg0: i32) -> (i32, i32) {
    %c0_i32 = arith.constant 0 : i32
    %c0_i32_0 = arith.constant 0 : i32
    %c0_i32_1 = arith.constant 0 : i32
    return %c0_i32, %c0_i32_0 : i32, i32
  }
  func.func @transform_3(%arg0: i32) -> (i32, i32) {
    %c0_i32 = arith.constant 0 : i32
    %c0_i32_0 = arith.constant 0 : i32
    %c0_i32_1 = arith.constant 0 : i32
    return %c0_i32, %c0_i32_0 : i32, i32
  }
  func.func @transform_4(%arg0: i32) -> (i32, i32) {
    %c0_i32 = arith.constant 0 : i32
    %c0_i32_0 = arith.constant 0 : i32
    %c0_i32_1 = arith.constant 0 : i32
    return %c0_i32, %c0_i32_0 : i32, i32
  }
  func.func @transform_5(%arg0: i32) -> (i32, i32, i32) {
    %c0_i32 = arith.constant 0 : i32
    %c0_i32_0 = arith.constant 0 : i32
    %c0_i32_1 = arith.constant 0 : i32
    %c0_i32_2 = arith.constant 0 : i32
    return %c0_i32, %c0_i32_0, %c0_i32_1 : i32, i32, i32
  }
}

module attributes {stable_mosaic.version = 11 : i64} {
  func.func @_conv_bn_relu_kernel(%arg0: i32, %arg1: memref<1x64x256xbf16, #tpu.memory_space<vmem>>, %arg2: memref<64x576xbf16, #tpu.memory_space<vmem>>, %arg3: memref<64x1xf32, #tpu.memory_space<vmem>>, %arg4: memref<64x1xf32, #tpu.memory_space<vmem>>, %arg5: memref<1x128xf32, #tpu.memory_space<vmem>>, %arg6: memref<2x64x128xbf16, #tpu.memory_space<vmem>>, %arg7: memref<2x64x128xbf16, #tpu.memory_space<vmem>>, %arg8: memref<576x128xbf16, #tpu.memory_space<vmem>>, %arg9: memref<64x1xf32, #tpu.memory_space<vmem>>, %arg10: memref<64x1xf32, #tpu.memory_space<vmem>>) attributes {dimension_semantics = [#tpu.dimension_semantics<arbitrary>], iteration_bounds = array<i64: 2>, scalar_prefetch = 0 : i64, scratch_operands = 3 : i64, tpu.core_type = #tpu.core_type<tc>, window_params = [{transform_indices = @transform_0, window_bounds = array<i64: 1, 64, 256>}, {pipeline_mode = #tpu.pipeline_mode<synchronous>, transform_indices = @transform_1, window_bounds = array<i64: 64, 576>}, {pipeline_mode = #tpu.pipeline_mode<synchronous>, transform_indices = @transform_2, window_bounds = array<i64: 64, 1>}, {pipeline_mode = #tpu.pipeline_mode<synchronous>, transform_indices = @transform_3, window_bounds = array<i64: 64, 1>}, {pipeline_mode = #tpu.pipeline_mode<synchronous>, transform_indices = @transform_4, window_bounds = array<i64: 1, 128>}, {pipeline_mode = #tpu.pipeline_mode<synchronous>, transform_indices = @transform_5, window_bounds = array<i64: 2, 64, 128>}, {pipeline_mode = #tpu.pipeline_mode<synchronous>, transform_indices = @transform_6, window_bounds = array<i64: 2, 64, 128>}]} {
    %c0_i32 = arith.constant 0 : i32
    %0 = arith.cmpi eq, %arg0, %c0_i32 : i32
    %1 = arith.extui %0 : i1 to i32
    %c0_i32_0 = arith.constant 0 : i32
    %2 = arith.cmpi ne, %1, %c0_i32_0 : i32
    scf.if %2 {
      %cst_48 = arith.constant 0.000000e+00 : f32
      %55 = vector.broadcast %cst_48 : f32 to vector<64x1xf32>
      %c0_49 = arith.constant 0 : index
      %c0_50 = arith.constant 0 : index
      %56 = vector.load %arg9[%c0_49, %c0_50] : memref<64x1xf32, #tpu.memory_space<vmem>>, vector<64x1xf32>
      tpu.vector_store %arg9[%c0_49, %c0_50], %55 {strides = array<i32>} : memref<64x1xf32, #tpu.memory_space<vmem>>, vector<64x1xf32>,
      %cst_51 = arith.constant 0.000000e+00 : f32
      %57 = vector.broadcast %cst_51 : f32 to vector<64x1xf32>
      %c0_52 = arith.constant 0 : index
      %c0_53 = arith.constant 0 : index
      %58 = vector.load %arg10[%c0_52, %c0_53] : memref<64x1xf32, #tpu.memory_space<vmem>>, vector<64x1xf32>
      tpu.vector_store %arg10[%c0_52, %c0_53], %57 {strides = array<i32>} : memref<64x1xf32, #tpu.memory_space<vmem>>, vector<64x1xf32>,
    } else {
    }
    %c0 = arith.constant 0 : index
    %c0_1 = arith.constant 0 : index
    %c0_2 = arith.constant 0 : index
    %3 = vector.load %arg1[%c0, %c0_1, %c0_2] : memref<1x64x256xbf16, #tpu.memory_space<vmem>>, vector<1x64x128xbf16>
    %4 = vector.shape_cast %3 : vector<1x64x128xbf16> to vector<64x128xbf16>
    %c0_3 = arith.constant 0 : index
    %c0_4 = arith.constant 0 : index
    %5 = vector.load %arg8[%c0_3, %c0_4] : memref<576x128xbf16, #tpu.memory_space<vmem>>, vector<64x128xbf16>
    tpu.vector_store %arg8[%c0_3, %c0_4], %4 {strides = array<i32>} : memref<576x128xbf16, #tpu.memory_space<vmem>>, vector<64x128xbf16>,
    %c0_5 = arith.constant 0 : index
    %c0_6 = arith.constant 0 : index
    %c1 = arith.constant 1 : index
    %6 = vector.load %arg1[%c0_5, %c0_6, %c1] : memref<1x64x256xbf16, #tpu.memory_space<vmem>>, vector<1x64x128xbf16>
    %7 = vector.shape_cast %6 : vector<1x64x128xbf16> to vector<64x128xbf16>
    %c64 = arith.constant 64 : index
    %c0_7 = arith.constant 0 : index
    %8 = vector.load %arg8[%c64, %c0_7] : memref<576x128xbf16, #tpu.memory_space<vmem>>, vector<64x128xbf16>
    tpu.vector_store %arg8[%c64, %c0_7], %7 {strides = array<i32>} : memref<576x128xbf16, #tpu.memory_space<vmem>>, vector<64x128xbf16>,
    %c0_8 = arith.constant 0 : index
    %c0_9 = arith.constant 0 : index
    %c2 = arith.constant 2 : index
    %9 = vector.load %arg1[%c0_8, %c0_9, %c2] : memref<1x64x256xbf16, #tpu.memory_space<vmem>>, vector<1x64x128xbf16>
    %10 = vector.shape_cast %9 : vector<1x64x128xbf16> to vector<64x128xbf16>
    %c128 = arith.constant 128 : index
    %c0_10 = arith.constant 0 : index
    %11 = vector.load %arg8[%c128, %c0_10] : memref<576x128xbf16, #tpu.memory_space<vmem>>, vector<64x128xbf16>
    tpu.vector_store %arg8[%c128, %c0_10], %10 {strides = array<i32>} : memref<576x128xbf16, #tpu.memory_space<vmem>>, vector<64x128xbf16>,
    %c0_11 = arith.constant 0 : index
    %c0_12 = arith.constant 0 : index
    %c10 = arith.constant 10 : index
    %12 = vector.load %arg1[%c0_11, %c0_12, %c10] : memref<1x64x256xbf16, #tpu.memory_space<vmem>>, vector<1x64x128xbf16>
    %13 = vector.shape_cast %12 : vector<1x64x128xbf16> to vector<64x128xbf16>
    %c192 = arith.constant 192 : index
    %c0_13 = arith.constant 0 : index
    %14 = vector.load %arg8[%c192, %c0_13] : memref<576x128xbf16, #tpu.memory_space<vmem>>, vector<64x128xbf16>
    tpu.vector_store %arg8[%c192, %c0_13], %13 {strides = array<i32>} : memref<576x128xbf16, #tpu.memory_space<vmem>>, vector<64x128xbf16>,
    %c0_14 = arith.constant 0 : index
    %c0_15 = arith.constant 0 : index
    %c11 = arith.constant 11 : index
    %15 = vector.load %arg1[%c0_14, %c0_15, %c11] : memref<1x64x256xbf16, #tpu.memory_space<vmem>>, vector<1x64x128xbf16>
    %16 = vector.shape_cast %15 : vector<1x64x128xbf16> to vector<64x128xbf16>
    %c256 = arith.constant 256 : index
    %c0_16 = arith.constant 0 : index
    %17 = vector.load %arg8[%c256, %c0_16] : memref<576x128xbf16, #tpu.memory_space<vmem>>, vector<64x128xbf16>
    tpu.vector_store %arg8[%c256, %c0_16], %16 {strides = array<i32>} : memref<576x128xbf16, #tpu.memory_space<vmem>>, vector<64x128xbf16>,
    %c0_17 = arith.constant 0 : index
    %c0_18 = arith.constant 0 : index
    %c12 = arith.constant 12 : index
    %18 = vector.load %arg1[%c0_17, %c0_18, %c12] : memref<1x64x256xbf16, #tpu.memory_space<vmem>>, vector<1x64x128xbf16>
    %19 = vector.shape_cast %18 : vector<1x64x128xbf16> to vector<64x128xbf16>
    %c320 = arith.constant 320 : index
    %c0_19 = arith.constant 0 : index
    %20 = vector.load %arg8[%c320, %c0_19] : memref<576x128xbf16, #tpu.memory_space<vmem>>, vector<64x128xbf16>
    tpu.vector_store %arg8[%c320, %c0_19], %19 {strides = array<i32>} : memref<576x128xbf16, #tpu.memory_space<vmem>>, vector<64x128xbf16>,
    %c0_20 = arith.constant 0 : index
    %c0_21 = arith.constant 0 : index
    %c20 = arith.constant 20 : index
    %21 = vector.load %arg1[%c0_20, %c0_21, %c20] : memref<1x64x256xbf16, #tpu.memory_space<vmem>>, vector<1x64x128xbf16>
    %22 = vector.shape_cast %21 : vector<1x64x128xbf16> to vector<64x128xbf16>
    %c384 = arith.constant 384 : index
    %c0_22 = arith.constant 0 : index
    %23 = vector.load %arg8[%c384, %c0_22] : memref<576x128xbf16, #tpu.memory_space<vmem>>, vector<64x128xbf16>
    tpu.vector_store %arg8[%c384, %c0_22], %22 {strides = array<i32>} : memref<576x128xbf16, #tpu.memory_space<vmem>>, vector<64x128xbf16>,
    %c0_23 = arith.constant 0 : index
    %c0_24 = arith.constant 0 : index
    %c21 = arith.constant 21 : index
    %24 = vector.load %arg1[%c0_23, %c0_24, %c21] : memref<1x64x256xbf16, #tpu.memory_space<vmem>>, vector<1x64x128xbf16>
    %25 = vector.shape_cast %24 : vector<1x64x128xbf16> to vector<64x128xbf16>
    %c448 = arith.constant 448 : index
    %c0_25 = arith.constant 0 : index
    %26 = vector.load %arg8[%c448, %c0_25] : memref<576x128xbf16, #tpu.memory_space<vmem>>, vector<64x128xbf16>
    tpu.vector_store %arg8[%c448, %c0_25], %25 {strides = array<i32>} : memref<576x128xbf16, #tpu.memory_space<vmem>>, vector<64x128xbf16>,
    %c0_26 = arith.constant 0 : index
    %c0_27 = arith.constant 0 : index
    %c22 = arith.constant 22 : index
    %27 = vector.load %arg1[%c0_26, %c0_27, %c22] : memref<1x64x256xbf16, #tpu.memory_space<vmem>>, vector<1x64x128xbf16>
    %28 = vector.shape_cast %27 : vector<1x64x128xbf16> to vector<64x128xbf16>
    %c512 = arith.constant 512 : index
    %c0_28 = arith.constant 0 : index
    %29 = vector.load %arg8[%c512, %c0_28] : memref<576x128xbf16, #tpu.memory_space<vmem>>, vector<64x128xbf16>
    tpu.vector_store %arg8[%c512, %c0_28], %28 {strides = array<i32>} : memref<576x128xbf16, #tpu.memory_space<vmem>>, vector<64x128xbf16>,
    %c0_29 = arith.constant 0 : index
    %c0_30 = arith.constant 0 : index
    %30 = vector.load %arg2[%c0_29, %c0_30] : memref<64x576xbf16, #tpu.memory_space<vmem>>, vector<64x576xbf16>
    %c0_31 = arith.constant 0 : index
    %c0_32 = arith.constant 0 : index
    %31 = vector.load %arg8[%c0_31, %c0_32] : memref<576x128xbf16, #tpu.memory_space<vmem>>, vector<576x128xbf16>
    %cst = arith.constant dense<0.000000e+00> : vector<64x128xf32>
    %32 = tpu.matmul %30, %31, %cst {dimension_numbers = #tpu.dot_dimension_numbers<[1], [0], [0], [1], [0, 0, 1, 1], [], []>} : vector<64x576xbf16>, vector<576x128xbf16>, vector<64x128xf32> -> vector<64x128xf32>
    %c0_33 = arith.constant 0 : index
    %c0_34 = arith.constant 0 : index
    %33 = vector.load %arg5[%c0_33, %c0_34] : memref<1x128xf32, #tpu.memory_space<vmem>>, vector<1x128xf32>
    %34 = vector.broadcast %33 : vector<1x128xf32> to vector<64x128xf32>
    %35 = arith.mulf %32, %34 : vector<64x128xf32>
    %c0_35 = arith.constant 0 : index
    %c0_36 = arith.constant 0 : index
    %36 = vector.load %arg9[%c0_35, %c0_36] : memref<64x1xf32, #tpu.memory_space<vmem>>, vector<64x1xf32>
    %cst_37 = arith.constant dense<0.000000e+00> : vector<64xf32>
    %37 = vector.multi_reduction <add>, %35, %cst_37 [1] : vector<64x128xf32> to vector<64xf32>
    %38 = vector.shape_cast %37 : vector<64xf32> to vector<64x1xf32>
    %39 = arith.addf %36, %38 : vector<64x1xf32>
    %c0_38 = arith.constant 0 : index
    %c0_39 = arith.constant 0 : index
    %40 = vector.load %arg9[%c0_38, %c0_39] : memref<64x1xf32, #tpu.memory_space<vmem>>, vector<64x1xf32>
    tpu.vector_store %arg9[%c0_38, %c0_39], %39 {strides = array<i32>} : memref<64x1xf32, #tpu.memory_space<vmem>>, vector<64x1xf32>,
    %c0_40 = arith.constant 0 : index
    %c0_41 = arith.constant 0 : index
    %41 = vector.load %arg10[%c0_40, %c0_41] : memref<64x1xf32, #tpu.memory_space<vmem>>, vector<64x1xf32>
    %42 = arith.mulf %35, %32 : vector<64x128xf32>
    %cst_42 = arith.constant dense<0.000000e+00> : vector<64xf32>
    %43 = vector.multi_reduction <add>, %42, %cst_42 [1] : vector<64x128xf32> to vector<64xf32>
    %44 = vector.shape_cast %43 : vector<64xf32> to vector<64x1xf32>
    %45 = arith.addf %41, %44 : vector<64x1xf32>
    %c0_43 = arith.constant 0 : index
    %c0_44 = arith.constant 0 : index
    %46 = vector.load %arg10[%c0_43, %c0_44] : memref<64x1xf32, #tpu.memory_space<vmem>>, vector<64x1xf32>
    tpu.vector_store %arg10[%c0_43, %c0_44], %45 {strides = array<i32>} : memref<64x1xf32, #tpu.memory_space<vmem>>, vector<64x1xf32>,
    %47 = arith.truncf %32 : vector<64x128xf32> to vector<64x128xbf16>
    %48 = arith.index_cast %arg0 : i32 to index
    %c0_45 = arith.constant 0 : index
    %c0_46 = arith.constant 0 : index
    %49 = vector.load %arg7[%48, %c0_45, %c0_46] : memref<2x64x128xbf16, #tpu.memory_space<vmem>>, vector<1x64x128xbf16>
    %50 = vector.shape_cast %49 : vector<1x64x128xbf16> to vector<64x128xbf16>
    %51 = vector.shape_cast %47 : vector<64x128xbf16> to vector<1x64x128xbf16>
    tpu.vector_store %arg7[%48, %c0_45, %c0_46], %51 {strides = array<i32>} : memref<2x64x128xbf16, #tpu.memory_space<vmem>>, vector<1x64x128xbf16>,
    %c1_i32 = arith.constant 1 : i32
    %52 = arith.cmpi eq, %arg0, %c1_i32 : i32
    %53 = arith.extui %52 : i1 to i32
    %c0_i32_47 = arith.constant 0 : i32
    %54 = arith.cmpi ne, %53, %c0_i32_47 : i32
    scf.if %54 {
      %c0_48 = arith.constant 0 : index
      %c0_49 = arith.constant 0 : index
      %55 = vector.load %arg9[%c0_48, %c0_49] : memref<64x1xf32, #tpu.memory_space<vmem>>, vector<64x1xf32>
      %cst_50 = arith.constant 7.812500e-03 : f32
      %56 = vector.broadcast %cst_50 : f32 to vector<64x1xf32>
      %57 = arith.mulf %55, %56 : vector<64x1xf32>
      %c0_51 = arith.constant 0 : index
      %c0_52 = arith.constant 0 : index
      %58 = vector.load %arg10[%c0_51, %c0_52] : memref<64x1xf32, #tpu.memory_space<vmem>>, vector<64x1xf32>
      %cst_53 = arith.constant 7.812500e-03 : f32
      %59 = vector.broadcast %cst_53 : f32 to vector<64x1xf32>
      %60 = arith.mulf %58, %59 : vector<64x1xf32>
      %61 = arith.mulf %57, %57 : vector<64x1xf32>
      %62 = arith.subf %60, %61 : vector<64x1xf32>
      %cst_54 = arith.constant 0.000000e+00 : f32
      %63 = vector.broadcast %cst_54 : f32 to vector<64x1xf32>
      %64 = arith.maximumf %62, %63 : vector<64x1xf32>
      %c0_55 = arith.constant 0 : index
      %c0_56 = arith.constant 0 : index
      %65 = vector.load %arg3[%c0_55, %c0_56] : memref<64x1xf32, #tpu.memory_space<vmem>>, vector<64x1xf32>
      %cst_57 = arith.constant 9.99999974E-6 : f32
      %66 = vector.broadcast %cst_57 : f32 to vector<64x1xf32>
      %67 = arith.addf %64, %66 : vector<64x1xf32>
      %68 = math.rsqrt %67 : vector<64x1xf32>
      %69 = arith.mulf %65, %68 : vector<64x1xf32>
      %c0_58 = arith.constant 0 : index
      %c0_59 = arith.constant 0 : index
      %70 = vector.load %arg4[%c0_58, %c0_59] : memref<64x1xf32, #tpu.memory_space<vmem>>, vector<64x1xf32>
      %71 = arith.mulf %57, %69 : vector<64x1xf32>
      %72 = arith.subf %70, %71 : vector<64x1xf32>
      %c0_60 = arith.constant 0 : index
      %c0_61 = arith.constant 0 : index
      %c0_62 = arith.constant 0 : index
      %73 = vector.load %arg7[%c0_60, %c0_61, %c0_62] : memref<2x64x128xbf16, #tpu.memory_space<vmem>>, vector<2x64x128xbf16>
      %74 = arith.extf %73 : vector<2x64x128xbf16> to vector<2x64x128xf32>
      %75 = vector.shape_cast %69 : vector<64x1xf32> to vector<1x64x1xf32>
      %76 = vector.broadcast %75 : vector<1x64x1xf32> to vector<2x64x128xf32>
      %77 = arith.mulf %74, %76 : vector<2x64x128xf32>
      %78 = vector.shape_cast %72 : vector<64x1xf32> to vector<1x64x1xf32>
      %79 = vector.broadcast %78 : vector<1x64x1xf32> to vector<2x64x128xf32>
      %80 = arith.addf %77, %79 : vector<2x64x128xf32>
      %c0_63 = arith.constant 0 : index
      %c0_64 = arith.constant 0 : index
      %c0_65 = arith.constant 0 : index
      %81 = vector.load %arg6[%c0_63, %c0_64, %c0_65] : memref<2x64x128xbf16, #tpu.memory_space<vmem>>, vector<2x64x128xbf16>
      %82 = arith.extf %81 : vector<2x64x128xbf16> to vector<2x64x128xf32>
      %83 = arith.addf %80, %82 : vector<2x64x128xf32>
      %cst_66 = arith.constant 0.000000e+00 : f32
      %84 = vector.broadcast %cst_66 : f32 to vector<2x64x128xf32>
      %85 = arith.maximumf %83, %84 : vector<2x64x128xf32>
      %86 = arith.truncf %85 : vector<2x64x128xf32> to vector<2x64x128xbf16>
      %c0_67 = arith.constant 0 : index
      %c0_68 = arith.constant 0 : index
      %c0_69 = arith.constant 0 : index
      %87 = vector.load %arg7[%c0_67, %c0_68, %c0_69] : memref<2x64x128xbf16, #tpu.memory_space<vmem>>, vector<2x64x128xbf16>
      tpu.vector_store %arg7[%c0_67, %c0_68, %c0_69], %86 {strides = array<i32>} : memref<2x64x128xbf16, #tpu.memory_space<vmem>>, vector<2x64x128xbf16>,
    } else {
    }
    return
  }
  func.func @transform_0(%arg0: i32) -> (i32, i32, i32) {
    %c0_i32 = arith.constant 0 : i32
    %c0_i32_0 = arith.constant 0 : i32
    %c0_i32_1 = arith.constant 0 : i32
    return %arg0, %c0_i32, %c0_i32_0 : i32, i32, i32
  }
  func.func @transform_1(%arg0: i32) -> (i32, i32) {
    %c0_i32 = arith.constant 0 : i32
    %c0_i32_0 = arith.constant 0 : i32
    %c0_i32_1 = arith.constant 0 : i32
    return %c0_i32, %c0_i32_0 : i32, i32
  }
  func.func @transform_2(%arg0: i32) -> (i32, i32) {
    %c0_i32 = arith.constant 0 : i32
    %c0_i32_0 = arith.constant 0 : i32
    %c0_i32_1 = arith.constant 0 : i32
    return %c0_i32, %c0_i32_0 : i32, i32
  }
  func.func @transform_3(%arg0: i32) -> (i32, i32) {
    %c0_i32 = arith.constant 0 : i32
    %c0_i32_0 = arith.constant 0 : i32
    %c0_i32_1 = arith.constant 0 : i32
    return %c0_i32, %c0_i32_0 : i32, i32
  }
  func.func @transform_4(%arg0: i32) -> (i32, i32) {
    %c0_i32 = arith.constant 0 : i32
    %c0_i32_0 = arith.constant 0 : i32
    %c0_i32_1 = arith.constant 0 : i32
    return %c0_i32, %c0_i32_0 : i32, i32
  }
  func.func @transform_5(%arg0: i32) -> (i32, i32, i32) {
    %c0_i32 = arith.constant 0 : i32
    %c0_i32_0 = arith.constant 0 : i32
    %c0_i32_1 = arith.constant 0 : i32
    %c0_i32_2 = arith.constant 0 : i32
    return %c0_i32, %c0_i32_0, %c0_i32_1 : i32, i32, i32
  }
  func.func @transform_6(%arg0: i32) -> (i32, i32, i32) {
    %c0_i32 = arith.constant 0 : i32
    %c0_i32_0 = arith.constant 0 : i32
    %c0_i32_1 = arith.constant 0 : i32
    %c0_i32_2 = arith.constant 0 : i32
    return %c0_i32, %c0_i32_0, %c0_i32_1 : i32, i32, i32
  }
}

module attributes {stable_mosaic.version = 11 : i64} {
  func.func @_pool_fc_kernel(%arg0: memref<2x64x64xbf16, #tpu.memory_space<vmem>>, %arg1: memref<64x10xf32, #tpu.memory_space<vmem>>, %arg2: memref<1x10xf32, #tpu.memory_space<vmem>>, %arg3: memref<2x10xf32, #tpu.memory_space<vmem>>) attributes {dimension_semantics = [], scalar_prefetch = 0 : i64, scratch_operands = 0 : i64, tpu.core_type = #tpu.core_type<tc>} {
    %c0 = arith.constant 0 : index
    %c0_0 = arith.constant 0 : index
    %c0_1 = arith.constant 0 : index
    %0 = vector.load %arg0[%c0, %c0_0, %c0_1] : memref<2x64x64xbf16, #tpu.memory_space<vmem>>, vector<2x64x64xbf16>
    %1 = arith.extf %0 : vector<2x64x64xbf16> to vector<2x64x64xf32>
    %cst = arith.constant dense<0.000000e+00> : vector<2x64xf32>
    %2 = vector.multi_reduction <add>, %1, %cst [2] : vector<2x64x64xf32> to vector<2x64xf32>
    %cst_2 = arith.constant 1.562500e-02 : f32
    %3 = vector.broadcast %cst_2 : f32 to vector<2x64xf32>
    %4 = arith.mulf %2, %3 : vector<2x64xf32>
    %c0_3 = arith.constant 0 : index
    %c0_4 = arith.constant 0 : index
    %5 = vector.load %arg1[%c0_3, %c0_4] : memref<64x10xf32, #tpu.memory_space<vmem>>, vector<64x10xf32>
    %cst_5 = arith.constant dense<0.000000e+00> : vector<2x10xf32>
    %6 = tpu.matmul %4, %5, %cst_5 {dimension_numbers = #tpu.dot_dimension_numbers<[1], [0], [0], [1], [0, 0, 1, 1], [], []>} : vector<2x64xf32>, vector<64x10xf32>, vector<2x10xf32> -> vector<2x10xf32>
    %c0_6 = arith.constant 0 : index
    %c0_7 = arith.constant 0 : index
    %7 = vector.load %arg2[%c0_6, %c0_7] : memref<1x10xf32, #tpu.memory_space<vmem>>, vector<1x10xf32>
    %8 = vector.broadcast %7 : vector<1x10xf32> to vector<2x10xf32>
    %9 = arith.addf %6, %8 : vector<2x10xf32>
    %c0_8 = arith.constant 0 : index
    %c0_9 = arith.constant 0 : index
    %10 = vector.load %arg3[%c0_8, %c0_9] : memref<2x10xf32, #tpu.memory_space<vmem>>, vector<2x10xf32>
    tpu.vector_store %arg3[%c0_8, %c0_9], %9 {strides = array<i32>} : memref<2x10xf32, #tpu.memory_space<vmem>>, vector<2x10xf32>,
    return
  }
}

</mosaic_0001>

<bundles_post_ra>
// kernel: _lambda_.8
= control target key start
LH: loop header
LB: loop body
LE: loop exit
PB: predicated region body
PF: predicated region fallthrough
CT: control target
= control target key end

     0   :  { %s2225_s18 = smov 0   ;;  %s2821_s0 = inlined_call_operand.vmem [shape: bf16[2,16,1280], index: 0, kind: input, shape index: {}]   ;;  %s2822_s1 = inlined_call_operand.vmem [shape: bf16[16,144], index: 1, kind: input, shape index: {}]   ;;  %s2823_s2 = inlined_call_operand.vmem [shape: f32[16,1], index: 2, kind: input, shape index: {}]   ;;  %s2824_s3 = inlined_call_operand.vmem [shape: f32[16,1], index: 3, kind: input, shape index: {}]   ;;  %s2825_s4 = inlined_call_operand.vmem [shape: f32[1,1152], index: 4, kind: input, shape index: {}]   ;;  %s2826_s5 = inlined_call_operand.vmem [shape: bf16[2,16,1152], index: 5, kind: output, shape index: {}]  }
   0x1 LB: > { %s2231_s19 = sadd.s32 4294967295, %s2182_s18   ;;  %p1966_p0 = scmp.ge.s32.totalorder %s2182_s18, 1  ;;  %s2182_s18 = sphi %s2225_s18, %s15_s18  }
   0x2   : > { %p182_p1 = scmp.lt.s32.totalorder %s2182_s18, 3 }
   0x4   : > { %p183_p2 = pnand %p1966_p0, %p182_p1 }
   0x5   : > { %p205_p3 = scmp.lt.s32.totalorder (!%p183_p2), %s2231_s19, 1  ;;  %p1968_p4 = scmp.ne.s32.totalorder (!%p183_p2), %s2231_s19, 0 }
   0x6   : > { %186 = sbr.rel (%p183_p2) target bundleno = 859 (0x35b), region = 40 }
   0xd   : > { %s206_s20 = scalar_select %p205_p3, %s2231_s19, 1 }
   0xe   : > { %214 = sbr.rel (%p1968_p4) target bundleno = 21 (0x15), region = 44  ;;  %vm215_vm0 = vcmask (!%p1968_p4), 7168   ;;  %v2184_v0 = vmov (!%p1968_p4), 0.0  }
   0xf   : > { %s2131_s21 = smul.u32 80, %s206_s20  ;;  %216 = vst.msk [vmem:[#allocation3] sm:$0xff] (!%p1968_p4), %vm215_vm0, %v2184_v0  ;;  %217 = vst.msk [vmem:[#allocation3 + $0x8] sm:$0xff] (!%p1968_p4), %vm215_vm0, %v2184_v0 }
  0x10   : > { %218 = vst.msk [vmem:[#allocation4] sm:$0xff] (!%p1968_p4), %vm215_vm0, %v2184_v0  ;;  %219 = vst.msk [vmem:[#allocation4 + $0x8] sm:$0xff] (!%p1968_p4), %vm215_vm0, %v2184_v0 }
  0x11   : > { %s2240_s24 = scalar_lea.vmem %s2821_s0, %s2131_s21 }
  0x15 PF: > { %v2151_v1 = vld [vmem:[%s2240_s24 + $0x4] ss:$40 sps:$4 sm:$0xff]   ;;  %v2153_v2 = vld [vmem:[%s2240_s24] ss:$40 sps:$4 sm:$0xff]   ;;  %s2185_s25 = smov 127   ;;  %s2186_s26 = smov 126  }
  0x16   : > { %337 = vrot.lane.b32.xlu0 %v2151_v1, %s2185_s25  ;;  %v2154_v3 = vld [vmem:[%s2240_s24 + $0x8] ss:$40 sps:$4 sm:$0xff]   ;;  %v2248_v4 = vld [vmem:[%s2240_s24 + $0xc] ss:$40 sps:$4 sm:$0xff]   ;;  %1165 = vmatprep.subr.bf16.mxu0 %v2151_v1  ;;  %s2187_s27 = smov 94   ;;  %s2188_s28 = smov 93  }
  0x17   : > { %335 = vrot.lane.b32.xlu1 %v2153_v2, %s2185_s25  ;;  %1166 = vmatpush1.bf16.msra.mxu0 %v2153_v2  ;;  %s2189_s29 = smov 92   ;;  %s2190_s30 = smov 60   ;;  %v2271_v5 = vld [vmem:[%s2822_s1 + $0x4] ss:$8 sps:$4 sm:$0xff]   ;;  %vm1161_vm1 = vcmask 130048   ;;  %vm355_vm2 = vcmask 1039360  }
  0x18   : > { %1208 = vmatprep.subr.bf16.mxu1 %v2248_v4  ;;  %s2191_s8 = smov 59   ;;  %2060 = vmatprep.mubr.msk.bf16.mxu0 %vm1161_vm1, %v2271_v5  ;;  %s2192_s9 = smov 58   ;;  %v2284_v6 = vld [vmem:[%s2240_s24 + $0x10] ss:$40 sps:$4 sm:$0xff]   ;;  %v2289_v7 = vld [vmem:[%s2240_s24 + $0x14] ss:$40 sps:$4 sm:$0xff]  }
  0x19   : > { %1209 = vmatpush1.bf16.msra.mxu1 %v2154_v3  ;;  %2061 = vmatprep.mubr.msk.bf16.mxu1 %vm1161_vm1, %v2271_v5  ;;  %v2294_v8 = vld [vmem:[%s2240_s24 + $0x18] ss:$40 sps:$4 sm:$0xff]   ;;  %v2355_v9 = vld [vmem:[%s2240_s24 + $0x1c] ss:$40 sps:$4 sm:$0xff]   ;;  %vm453_vm3 = vcmask 1031168   ;;  %vm551_vm4 = vcmask 769024  }
  0x1a   : > { %339 = vrot.lane.b32.xlu0 %v2154_v3, %s2185_s25  ;;  %v2360_v10 = vld [vmem:[%s2240_s24 + $0x20] ss:$40 sps:$4 sm:$0xff]   ;;  %v2369_v13 = vld [vmem:[%s2240_s24 + $0x24] ss:$40 sps:$4 sm:$0xff]   ;;  %vm649_vm5 = vcmask 760832   ;;  %vm747_vm6 = vcmask 752640  }
  0x1b   : > { %435 = vrot.lane.b32.xlu1 %v2151_v1, %s2186_s26  ;;  %vm845_vm7 = vcmask 490496   ;;  %vm943_vm8 = vcmask 482304   ;;  %vm1041_vm9 = vcmask 474112   ;;  %v2456_v52 = vld [vmem:[%s2822_s1] ss:$8 sps:$4 sm:$0xff]   ;;  %s2110_s14 = smul.u32 72, %s2231_s19 }
  0x1c   : > { %vm1469_vm10 = vcmask 7168   ;;  %p2077_p5 = scmp.ne.s32.totalorder %s2231_s19, 1 }
  0x1d   : > { %s2594_s17 = scalar_lea.vmem %s2826_s5, %s2110_s14 }
  0x1e   : > { %437 = vrot.lane.b32.xlu0 %v2154_v3, %s2186_s26 }
  0x1f   : > { %433 = vrot.lane.b32.xlu1 %v2153_v2, %s2186_s26 }
  0x22   : > { %533 = vrot.lane.b32.xlu0 %v2151_v1, %s2187_s27 }
  0x23   : > { %535 = vrot.lane.b32.xlu1 %v2154_v3, %s2187_s27 }
  0x26   : > { %531 = vrot.lane.b32.xlu0 %v2153_v2, %s2187_s27 }
  0x27   : > { %631 = vrot.lane.b32.xlu1 %v2151_v1, %s2188_s28 }
  0x2a   : > { %633 = vrot.lane.b32.xlu0 %v2154_v3, %s2188_s28 }
  0x2b   : > { %629 = vrot.lane.b32.xlu1 %v2153_v2, %s2188_s28 }
  0x2e   : > { %729 = vrot.lane.b32.xlu0 %v2151_v1, %s2189_s29 }
  0x2f   : > { %731 = vrot.lane.b32.xlu1 %v2154_v3, %s2189_s29 }
  0x32   : > { %727 = vrot.lane.b32.xlu0 %v2153_v2, %s2189_s29 }
  0x33   : > { %827 = vrot.lane.b32.xlu1 %v2151_v1, %s2190_s30 }
  0x36   : > { %829 = vrot.lane.b32.xlu0 %v2154_v3, %s2190_s30 }
  0x37   : > { %825 = vrot.lane.b32.xlu1 %v2153_v2, %s2190_s30 }
  0x3a   : > { %925 = vrot.lane.b32.xlu0 %v2151_v1, %s2191_s8 }
  0x3b   : > { %927 = vrot.lane.b32.xlu1 %v2154_v3, %s2191_s8 }
  0x3e   : > { %923 = vrot.lane.b32.xlu0 %v2153_v2, %s2191_s8 }
  0x3f   : > { %1023 = vrot.lane.b32.xlu1 %v2151_v1, %s2192_s9 }
  0x42   : > { %1025 = vrot.lane.b32.xlu0 %v2154_v3, %s2192_s9 }
  0x43   : > { %1021 = vrot.lane.b32.xlu1 %v2153_v2, %s2192_s9 }
  0x46   : > { %341 = vrot.lane.b32.xlu0 %v2248_v4, %s2185_s25 }
  0x47   : > { %343 = vrot.lane.b32.xlu1 %v2284_v6, %s2185_s25 }
  0x4a   : > { %345 = vrot.lane.b32.xlu0 %v2289_v7, %s2185_s25 }
  0x4b   : > { %347 = vrot.lane.b32.xlu1 %v2294_v8, %s2185_s25 }
  0x4e   : > { %439 = vrot.lane.b32.xlu0 %v2248_v4, %s2186_s26 }
  0x4f   : > { %441 = vrot.lane.b32.xlu1 %v2284_v6, %s2186_s26 }
  0x52   : > { %443 = vrot.lane.b32.xlu0 %v2289_v7, %s2186_s26 }
  0x53   : > { %445 = vrot.lane.b32.xlu1 %v2294_v8, %s2186_s26 }
  0x56   : > { %537 = vrot.lane.b32.xlu0 %v2248_v4, %s2187_s27 }
  0x57   : > { %539 = vrot.lane.b32.xlu1 %v2284_v6, %s2187_s27 }
  0x5a   : > { %541 = vrot.lane.b32.xlu0 %v2289_v7, %s2187_s27 }
  0x5b   : > { %543 = vrot.lane.b32.xlu1 %v2294_v8, %s2187_s27 }
  0x5e   : > { %635 = vrot.lane.b32.xlu0 %v2248_v4, %s2188_s28 }
  0x5f   : > { %637 = vrot.lane.b32.xlu1 %v2284_v6, %s2188_s28 }
  0x62   : > { %639 = vrot.lane.b32.xlu0 %v2289_v7, %s2188_s28 }
  0x63   : > { %641 = vrot.lane.b32.xlu1 %v2294_v8, %s2188_s28 }
  0x66   : > { %733 = vrot.lane.b32.xlu0 %v2248_v4, %s2189_s29 }
  0x67   : > { %735 = vrot.lane.b32.xlu1 %v2284_v6, %s2189_s29 }
  0x6a   : > { %737 = vrot.lane.b32.xlu0 %v2289_v7, %s2189_s29 }
  0x6b   : > { %739 = vrot.lane.b32.xlu1 %v2294_v8, %s2189_s29 }
  0x6e   : > { %831 = vrot.lane.b32.xlu0 %v2248_v4, %s2190_s30 }
  0x6f   : > { %833 = vrot.lane.b32.xlu1 %v2284_v6, %s2190_s30 }
  0x72   : > { %835 = vrot.lane.b32.xlu0 %v2289_v7, %s2190_s30 }
  0x73   : > { %837 = vrot.lane.b32.xlu1 %v2294_v8, %s2190_s30 }
  0x76   : > { %929 = vrot.lane.b32.xlu0 %v2248_v4, %s2191_s8 }
  0x77   : > { %931 = vrot.lane.b32.xlu1 %v2284_v6, %s2191_s8 }
  0x7a   : > { %933 = vrot.lane.b32.xlu0 %v2289_v7, %s2191_s8 }
  0x7b   : > { %935 = vrot.lane.b32.xlu1 %v2294_v8, %s2191_s8 }
  0x7e   : > { %1027 = vrot.lane.b32.xlu0 %v2248_v4, %s2192_s9 }
  0x7f   : > { %1029 = vrot.lane.b32.xlu1 %v2284_v6, %s2192_s9 }
  0x82   : > { %1031 = vrot.lane.b32.xlu0 %v2289_v7, %s2192_s9 }
  0x83   : > { %1033 = vrot.lane.b32.xlu1 %v2294_v8, %s2192_s9 }
  0x86   : > { %349 = vrot.lane.b32.xlu0 %v2355_v9, %s2185_s25 }
  0x87   : > { %351 = vrot.lane.b32.xlu1 %v2360_v10, %s2185_s25 }
  0x88   : > { %v338_v11 = vpop.permute.xlu0 %337 }
  0x89   : > { %v336_v12 = vpop.permute.xlu1 %335 }
  0x8a   : > { %447 = vrot.lane.b32.xlu0 %v2355_v9, %s2186_s26  ;;  %v356_v17 = vsel %vm355_vm2, %v336_v12, %v338_v11 }
  0x8b   : > { %449 = vrot.lane.b32.xlu1 %v2360_v10, %s2186_s26 }
  0x8c   : > { %v2373_v14 = vpop.permute.xlu0 %339 }
  0x8d   : > { %v436_v15 = vpop.permute.xlu1 %435  ;;  %v357_v16 = vsel %vm355_vm2, %v338_v11, %v2373_v14 }
  0x8e   : > { %353 = vrot.lane.b32.xlu0 %v2369_v13, %s2185_s25  ;;  %1167 = vmatprep.subr.bf16.mxu0 %v357_v16 }
  0x8f   : > { %545 = vrot.lane.b32.xlu1 %v2355_v9, %s2187_s27  ;;  %1168 = vmatpush1.bf16.msra.mxu0 %v356_v17 }
  0x90   : > { %v2382_v18 = vpop.permute.xlu0 %437 }
  0x91   : > { %v434_v19 = vpop.permute.xlu1 %433  ;;  %v455_v20 = vsel %vm453_vm3, %v436_v15, %v2382_v18 }
  0x92   : > { %547 = vrot.lane.b32.xlu0 %v2360_v10, %s2187_s27  ;;  %1169 = vmatprep.subr.bf16.mxu0 %v455_v20  ;;  %v454_v21 = vsel %vm453_vm3, %v434_v19, %v436_v15 }
  0x93   : > { %451 = vrot.lane.b32.xlu1 %v2369_v13, %s2186_s26  ;;  %1170 = vmatpush1.bf16.msra.mxu0 %v454_v21 }
  0x94   : > { %v534_v22 = vpop.permute.xlu0 %533 }
  0x95   : > { %v2391_v23 = vpop.permute.xlu1 %535 }
  0x96   : > { %643 = vrot.lane.b32.xlu0 %v2355_v9, %s2188_s28  ;;  %v553_v24 = vsel %vm551_vm4, %v534_v22, %v2391_v23 }
  0x97   : > { %645 = vrot.lane.b32.xlu1 %v2360_v10, %s2188_s28  ;;  %1171 = vmatprep.subr.bf16.mxu0 %v553_v24 }
  0x98   : > { %v532_v25 = vpop.permute.xlu0 %531 }
  0x99   : > { %v632_v26 = vpop.permute.xlu1 %631  ;;  %v552_v27 = vsel %vm551_vm4, %v532_v25, %v534_v22 }
  0x9a   : > { %549 = vrot.lane.b32.xlu0 %v2369_v13, %s2187_s27  ;;  %1172 = vmatpush1.bf16.msra.mxu0 %v552_v27 }
  0x9b   : > { %741 = vrot.lane.b32.xlu1 %v2355_v9, %s2189_s29 }
  0x9c   : > { %v2404_v28 = vpop.permute.xlu0 %633 }
  0x9d   : > { %v630_v29 = vpop.permute.xlu1 %629  ;;  %v651_v30 = vsel %vm649_vm5, %v632_v26, %v2404_v28 }
  0x9e   : > { %743 = vrot.lane.b32.xlu0 %v2360_v10, %s2189_s29  ;;  %1173 = vmatprep.subr.bf16.mxu0 %v651_v30  ;;  %v650_v31 = vsel %vm649_vm5, %v630_v29, %v632_v26 }
  0x9f   : > { %647 = vrot.lane.b32.xlu1 %v2369_v13, %s2188_s28  ;;  %1174 = vmatpush1.bf16.msra.mxu0 %v650_v31 }
  0xa0   : > { %v730_v32 = vpop.permute.xlu0 %729 }
  0xa1   : > { %v2413_v33 = vpop.permute.xlu1 %731 }
  0xa2   : > { %839 = vrot.lane.b32.xlu0 %v2355_v9, %s2190_s30  ;;  %v749_v34 = vsel %vm747_vm6, %v730_v32, %v2413_v33 }
  0xa3   : > { %841 = vrot.lane.b32.xlu1 %v2360_v10, %s2190_s30  ;;  %1175 = vmatprep.subr.bf16.mxu0 %v749_v34 }
  0xa4   : > { %v728_v35 = vpop.permute.xlu0 %727 }
  0xa5   : > { %v828_v36 = vpop.permute.xlu1 %827  ;;  %v748_v37 = vsel %vm747_vm6, %v728_v35, %v730_v32 }
  0xa6   : > { %745 = vrot.lane.b32.xlu0 %v2369_v13, %s2189_s29  ;;  %1176 = vmatpush1.bf16.msra.mxu0 %v748_v37 }
  0xa7   : > { %937 = vrot.lane.b32.xlu1 %v2355_v9, %s2191_s8 }
  0xa8   : > { %v2426_v38 = vpop.permute.xlu0 %829 }
  0xa9   : > { %v826_v39 = vpop.permute.xlu1 %825  ;;  %v847_v40 = vsel %vm845_vm7, %v828_v36, %v2426_v38 }
  0xaa   : > { %939 = vrot.lane.b32.xlu0 %v2360_v10, %s2191_s8  ;;  %1177 = vmatprep.subr.bf16.mxu0 %v847_v40  ;;  %v846_v41 = vsel %vm845_vm7, %v826_v39, %v828_v36 }
  0xab   : > { %843 = vrot.lane.b32.xlu1 %v2369_v13, %s2190_s30  ;;  %1178 = vmatpush1.bf16.msra.mxu0 %v846_v41 }
  0xac   : > { %v926_v42 = vpop.permute.xlu0 %925 }
  0xad   : > { %v2435_v43 = vpop.permute.xlu1 %927 }
  0xae   : > { %1035 = vrot.lane.b32.xlu0 %v2355_v9, %s2192_s9  ;;  %v945_v44 = vsel %vm943_vm8, %v926_v42, %v2435_v43 }
  0xaf   : > { %1037 = vrot.lane.b32.xlu1 %v2360_v10, %s2192_s9  ;;  %1179 = vmatprep.subr.bf16.mxu0 %v945_v44 }
  0xb0   : > { %v924_v45 = vpop.permute.xlu0 %923 }
  0xb1   : > { %v1024_v46 = vpop.permute.xlu1 %1023  ;;  %v944_v47 = vsel %vm943_vm8, %v924_v45, %v926_v42 }
  0xb2   : > { %941 = vrot.lane.b32.xlu0 %v2369_v13, %s2191_s8  ;;  %1180 = vmatpush1.bf16.msra.mxu0 %v944_v47 }
  0xb3   : > { %1039 = vrot.lane.b32.xlu1 %v2369_v13, %s2192_s9 }
  0xb4   : > { %v2448_v48 = vpop.permute.xlu0 %1025 }
  0xb5   : > { %v1022_v49 = vpop.permute.xlu1 %1021  ;;  %v1043_v50 = vsel %vm1041_vm9, %v1024_v46, %v2448_v48 }
  0xb6   : > { %1181 = vmatprep.subr.bf16.mxu0 %v1043_v50  ;;  %v1042_v51 = vsel %vm1041_vm9, %v1022_v49, %v1024_v46 }
  0xb7   : > { %1182 = vmatpush1.bf16.msra.mxu0 %v1042_v51 }
  0xb8   : > { %v342_v53 = vpop.permute.xlu0 %341  ;;  %1251 = vmatprep.subr.bf16.mxu0 %v2289_v7 }
  0xb9   : > { %v344_v54 = vpop.permute.xlu1 %343  ;;  %v358_v55 = vsel %vm355_vm2, %v2373_v14, %v342_v53 }
  0xba   : > { %v359_v56 = vsel %vm355_vm2, %v342_v53, %v344_v54  ;;  %1198 = vmatmul.mubr.bf16.vlgmr.msra.gmra.mrb[0].mxu0 %v2456_v52 }
  0xbb   : > { %1210 = vmatprep.subr.bf16.mxu1 %v359_v56  ;;  %1252 = vmatpush1.bf16.msra.mxu0 %v2284_v6 }
  0xbc   : > { %1211 = vmatpush1.bf16.msra.mxu1 %v358_v55  ;;  %v346_v57 = vpop.permute.xlu0 %345  ;;  %2062 = vmatprep.mubr.msk.bf16.mxu0 %vm1161_vm1, %v2271_v5 }
  0xbd   : > { %v360_v58 = vsel %vm355_vm2, %v344_v54, %v346_v57  ;;  %v2467_v59 = vpop.permute.xlu1 %347 }
  0xbe   : > { %v361_v60 = vsel %vm355_vm2, %v346_v57, %v2467_v59 }
  0xbf   : > { %1253 = vmatprep.subr.bf16.mxu0 %v361_v60 }
  0xc0   : > { %1254 = vmatpush1.bf16.msra.mxu0 %v360_v58  ;;  %v440_v61 = vpop.permute.xlu0 %439  ;;  %v2169_v58 = vld [vmem:[%s2240_s24 + $0x20] ss:$40 sps:$4 sm:$0xff]  }
  0xc1   : > { %v442_v62 = vpop.permute.xlu1 %441  ;;  %v456_v63 = vsel %vm453_vm3, %v2382_v18, %v440_v61 }
  0xc2   : > { %v457_v0 = vsel %vm453_vm3, %v440_v61, %v442_v62 }
  0xc3   : > { %1212 = vmatprep.subr.bf16.mxu1 %v457_v0 }
  0xc4   : > { %1213 = vmatpush1.bf16.msra.mxu1 %v456_v63  ;;  %v444_v1 = vpop.permute.xlu0 %443 }
  0xc5   : > { %v458_v2 = vsel %vm453_vm3, %v442_v62, %v444_v1  ;;  %v2475_v3 = vpop.permute.xlu1 %445  ;;  %v2193_v62 = vmov 0  }
  0xc6   : > { %v459_v4 = vsel %vm453_vm3, %v444_v1, %v2475_v3 }
  0xc7   : > { %1255 = vmatprep.subr.bf16.mxu0 %v459_v4 }
  0xc8   : > { %1256 = vmatpush1.bf16.msra.mxu0 %v458_v2  ;;  %v538_v6 = vpop.permute.xlu0 %537 }
  0xc9   : > { %v540_v7 = vpop.permute.xlu1 %539  ;;  %v554_v10 = vsel %vm551_vm4, %v2391_v23, %v538_v6 }
  0xca   : > { %v555_v11 = vsel %vm551_vm4, %v538_v6, %v540_v7 }
  0xcb   : > { %1214 = vmatprep.subr.bf16.mxu1 %v555_v11 }
  0xcc   : > { %1215 = vmatpush1.bf16.msra.mxu1 %v554_v10  ;;  %v542_v12 = vpop.permute.xlu0 %541 }
  0xcd   : > { %v556_v13 = vsel %vm551_vm4, %v540_v7, %v542_v12  ;;  %v2483_v14 = vpop.permute.xlu1 %543 }
  0xce   : > { %v557_v15 = vsel %vm551_vm4, %v542_v12, %v2483_v14 }
  0xcf   : > { %1257 = vmatprep.subr.bf16.mxu0 %v557_v15 }
  0xd0   : > { %1258 = vmatpush1.bf16.msra.mxu0 %v556_v13  ;;  %v636_v16 = vpop.permute.xlu0 %635 }
  0xd1   : > { %v638_v17 = vpop.permute.xlu1 %637  ;;  %v652_v18 = vsel %vm649_vm5, %v2404_v28, %v636_v16 }
  0xd2   : > { %v653_v19 = vsel %vm649_vm5, %v636_v16, %v638_v17 }
  0xd3   : > { %1216 = vmatprep.subr.bf16.mxu1 %v653_v19 }
  0xd4   : > { %1217 = vmatpush1.bf16.msra.mxu1 %v652_v18  ;;  %v640_v20 = vpop.permute.xlu0 %639 }
  0xd5   : > { %v654_v21 = vsel %vm649_vm5, %v638_v17, %v640_v20  ;;  %v2491_v22 = vpop.permute.xlu1 %641 }
  0xd6   : > { %v655_v23 = vsel %vm649_vm5, %v640_v20, %v2491_v22 }
  0xd7   : > { %1259 = vmatprep.subr.bf16.mxu0 %v655_v23 }
  0xd8   : > { %1260 = vmatpush1.bf16.msra.mxu0 %v654_v21  ;;  %v734_v24 = vpop.permute.xlu0 %733 }
  0xd9   : > { %v736_v25 = vpop.permute.xlu1 %735  ;;  %v750_v26 = vsel %vm747_vm6, %v2413_v33, %v734_v24 }
  0xda   : > { %v751_v27 = vsel %vm747_vm6, %v734_v24, %v736_v25 }
  0xdb   : > { %1218 = vmatprep.subr.bf16.mxu1 %v751_v27 }
  0xdc   : > { %1219 = vmatpush1.bf16.msra.mxu1 %v750_v26  ;;  %v738_v28 = vpop.permute.xlu0 %737 }
  0xdd   : > { %v752_v29 = vsel %vm747_vm6, %v736_v25, %v738_v28  ;;  %v2499_v30 = vpop.permute.xlu1 %739 }
  0xde   : > { %v753_v31 = vsel %vm747_vm6, %v738_v28, %v2499_v30 }
  0xdf   : > { %1261 = vmatprep.subr.bf16.mxu0 %v753_v31 }
  0xe0   : > { %1262 = vmatpush1.bf16.msra.mxu0 %v752_v29  ;;  %v832_v32 = vpop.permute.xlu0 %831 }
  0xe1   : > { %v834_v34 = vpop.permute.xlu1 %833  ;;  %v848_v35 = vsel %vm845_vm7, %v2426_v38, %v832_v32 }
  0xe2   : > { %v849_v33 = vsel %vm845_vm7, %v832_v32, %v834_v34 }
  0xe3   : > { %1220 = vmatprep.subr.bf16.mxu1 %v849_v33 }
  0xe4   : > { %1221 = vmatpush1.bf16.msra.mxu1 %v848_v35  ;;  %v836_v36 = vpop.permute.xlu0 %835 }
  0xe5   : > { %v850_v37 = vsel %vm845_vm7, %v834_v34, %v836_v36  ;;  %v2507_v39 = vpop.permute.xlu1 %837 }
  0xe6   : > { %v851_v40 = vsel %vm845_vm7, %v836_v36, %v2507_v39 }
  0xe7   : > { %1263 = vmatprep.subr.bf16.mxu0 %v851_v40 }
  0xe8   : > { %1264 = vmatpush1.bf16.msra.mxu0 %v850_v37  ;;  %v930_v41 = vpop.permute.xlu0 %929 }
  0xe9   : > { %v932_v42 = vpop.permute.xlu1 %931  ;;  %v946_v44 = vsel %vm943_vm8, %v2435_v43, %v930_v41 }
  0xea   : > { %v947_v38 = vsel %vm943_vm8, %v930_v41, %v932_v42 }
  0xeb   : > { %1222 = vmatprep.subr.bf16.mxu1 %v947_v38  ;;  %v1382_v38 = vlaneseq }
  0xec   : > { %1223 = vmatpush1.bf16.msra.mxu1 %v946_v44  ;;  %v934_v45 = vpop.permute.xlu0 %933 }
  0xed   : > { %v948_v46 = vsel %vm943_vm8, %v932_v42, %v934_v45  ;;  %v2515_v47 = vpop.permute.xlu1 %935 }
  0xee   : > { %v949_v49 = vsel %vm943_vm8, %v934_v45, %v2515_v47  ;;  %v2579_v45 = vshrl.u32 %v1382_v38, 7 }
  0xef   : > { %1265 = vmatprep.subr.bf16.mxu0 %v949_v49 }
  0xf0   : > { %1266 = vmatpush1.bf16.msra.mxu0 %v948_v46  ;;  %v1028_v50 = vpop.permute.xlu0 %1027  ;;  %v1384_v46 = vsub.s32 0, %v2579_v45  ;;  %v1388_v49 = vsub.s32 1, %v2579_v45 }
  0xf1   : > { %v1030_v51 = vpop.permute.xlu1 %1029  ;;  %v1044_v43 = vsel %vm1041_vm9, %v2448_v48, %v1028_v50 }
  0xf2   : > { %v1045_v53 = vsel %vm1041_vm9, %v1028_v50, %v1030_v51 }
  0xf3   : > { %1224 = vmatprep.subr.bf16.mxu1 %v1045_v53 }
  0xf4   : > { %1225 = vmatpush1.bf16.msra.mxu1 %v1044_v43  ;;  %v1032_v54 = vpop.permute.xlu0 %1031 }
  0xf5   : > { %v1046_v55 = vsel %vm1041_vm9, %v1030_v51, %v1032_v54  ;;  %v2523_v56 = vpop.permute.xlu1 %1033  ;;  %1294 = vmatprep.subr.bf16.mxu1 %v2355_v9 }
  0xf6   : > { %v1047_v57 = vsel %vm1041_vm9, %v1032_v54, %v2523_v56 }
  0xf7   : > { %1241 = vmatmul.mubr.bf16.vlgmr.msra.gmra.mrb[0].mxu1 %v2456_v52  ;;  %1267 = vmatprep.subr.bf16.mxu0 %v1047_v57 }
  0xf8   : > { %1268 = vmatpush1.bf16.msra.mxu0 %v1046_v55  ;;  %1295 = vmatpush1.bf16.msra.mxu1 %v2294_v8  ;;  %v350_v48 = vpop.permute.xlu0 %349 }
  0xf9   : > { %v362_v60 = vsel %vm355_vm2, %v2467_v59, %v350_v48  ;;  %v352_v61 = vpop.permute.xlu1 %351  ;;  %1337 = vmatprep.subr.bf16.mxu0 %v2193_v62  ;;  %2063 = vmatprep.mubr.msk.bf16.mxu1 %vm1161_vm1, %v2271_v5 }
  0xfa   : > { %v363_v9 = vsel %vm355_vm2, %v350_v48, %v352_v61 }
  0xfb   : > { %1284 = vmatmul.mubr.bf16.vlgmr.msra.gmra.mrb[4].mxu0 %v2456_v52  ;;  %1296 = vmatprep.subr.bf16.mxu1 %v363_v9 }
  0xfc   : > { %1297 = vmatpush1.bf16.msra.mxu1 %v362_v60  ;;  %v448_v63 = vpop.permute.xlu0 %447  ;;  %1338 = vmatpush1.bf16.msra.mxu0 %v2169_v58 }
  0xfd   : > { %v460_v8 = vsel %vm453_vm3, %v2475_v3, %v448_v63  ;;  %v450_v0 = vpop.permute.xlu1 %449  ;;  %1339 = vmatprep.subr.bf16.mxu0 %v2193_v62  ;;  %2064 = vmatprep.mubr.msk.bf16.mxu0 %vm1161_vm1, %v2271_v5 }
  0xfe   : > { %v461_v59 = vsel %vm453_vm3, %v448_v63, %v450_v0 }
  0xff   : > { %1298 = vmatprep.subr.bf16.mxu1 %v461_v59 }
 0x100   : > { %1299 = vmatpush1.bf16.msra.mxu1 %v460_v8  ;;  %v354_v1 = vpop.permute.xlu0 %353 }
 0x101   : > { %v364_v2 = vsel %vm355_vm2, %v352_v61, %v354_v1  ;;  %v546_v4 = vpop.permute.xlu1 %545 }
 0x102   : > { %1340 = vmatpush1.bf16.msra.mxu0 %v364_v2  ;;  %v558_v10 = vsel %vm551_vm4, %v2483_v14, %v546_v4  ;;  %v1392_v2 = vsub.s32 2, %v2579_v45 }
 0x103   : > { %1341 = vmatprep.subr.bf16.mxu0 %v2193_v62 }
 0x104   : > { %v548_v6 = vpop.permute.xlu0 %547 }
 0x105   : > { %v452_v7 = vpop.permute.xlu1 %451  ;;  %v559_v3 = vsel %vm551_vm4, %v546_v4, %v548_v6  ;;  %v1396_v4 = vsub.s32 3, %v2579_v45 }
 0x106   : > { %v462_v5 = vsel %vm453_vm3, %v450_v0, %v452_v7  ;;  %1300 = vmatprep.subr.bf16.mxu1 %v559_v3  ;;  %v1400_v3 = vsub.s32 4, %v2579_v45 }
 0x107   : > { %1342 = vmatpush1.bf16.msra.mxu0 %v462_v5  ;;  %1301 = vmatpush1.bf16.msra.mxu1 %v558_v10  ;;  %v1404_v10 = vsub.s32 5, %v2579_v45 }
 0x108   : > { %v644_v11 = vpop.permute.xlu0 %643  ;;  %1343 = vmatprep.subr.bf16.mxu0 %v2193_v62 }
 0x109   : > { %v656_v12 = vsel %vm649_vm5, %v2491_v22, %v644_v11  ;;  %v646_v13 = vpop.permute.xlu1 %645 }
 0x10a   : > { %v657_v15 = vsel %vm649_vm5, %v644_v11, %v646_v13 }
 0x10b   : > { %1302 = vmatprep.subr.bf16.mxu1 %v657_v15 }
 0x10c   : > { %1303 = vmatpush1.bf16.msra.mxu1 %v656_v12  ;;  %v550_v16 = vpop.permute.xlu0 %549 }
 0x10d   : > { %v560_v17 = vsel %vm551_vm4, %v548_v6, %v550_v16  ;;  %v742_v14 = vpop.permute.xlu1 %741 }
 0x10e   : > { %1344 = vmatpush1.bf16.msra.mxu0 %v560_v17  ;;  %v754_v21 = vsel %vm747_vm6, %v2499_v30, %v742_v14 }
 0x10f   : > { %1345 = vmatprep.subr.bf16.mxu0 %v2193_v62 }
 0x110   : > { %v744_v18 = vpop.permute.xlu0 %743 }
 0x111   : > { %v648_v19 = vpop.permute.xlu1 %647  ;;  %v755_v20 = vsel %vm747_vm6, %v742_v14, %v744_v18 }
 0x112   : > { %v658_v22 = vsel %vm649_vm5, %v646_v13, %v648_v19  ;;  %1304 = vmatprep.subr.bf16.mxu1 %v755_v20 }
 0x113   : > { %1346 = vmatpush1.bf16.msra.mxu0 %v658_v22  ;;  %1305 = vmatpush1.bf16.msra.mxu1 %v754_v21 }
 0x114   : > { %v840_v23 = vpop.permute.xlu0 %839  ;;  %1347 = vmatprep.subr.bf16.mxu0 %v2193_v62 }
 0x115   : > { %v852_v24 = vsel %vm845_vm7, %v2507_v39, %v840_v23  ;;  %v842_v25 = vpop.permute.xlu1 %841 }
 0x116   : > { %v853_v26 = vsel %vm845_vm7, %v840_v23, %v842_v25 }
 0x117   : > { %1306 = vmatprep.subr.bf16.mxu1 %v853_v26 }
 0x118   : > { %1307 = vmatpush1.bf16.msra.mxu1 %v852_v24  ;;  %v746_v27 = vpop.permute.xlu0 %745 }
 0x119   : > { %v756_v28 = vsel %vm747_vm6, %v744_v18, %v746_v27  ;;  %v938_v29 = vpop.permute.xlu1 %937 }
 0x11a   : > { %1348 = vmatpush1.bf16.msra.mxu0 %v756_v28  ;;  %v950_v34 = vsel %vm943_vm8, %v2515_v47, %v938_v29  ;;  %v2585_v47 = vld [vmem:[%s2825_s4] sm:$0xff] }
 0x11b   : > { %1349 = vmatprep.subr.bf16.mxu0 %v2193_v62  ;;  %v1385_v50 = vrot.slane %v2585_v47, %v1384_v46  ;;  %v1389_v51 = vrot.slane %v2585_v47, %v1388_v49  ;;  %v1393_v6 = vrot.slane %v2585_v47, %v1392_v2  ;;  %v1397_v7 = vrot.slane %v2585_v47, %v1396_v4 }
 0x11c   : > { %v940_v30 = vpop.permute.xlu0 %939  ;;  %v1401_v17 = vrot.slane %v2585_v47, %v1400_v3  ;;  %v1405_v14 = vrot.slane %v2585_v47, %v1404_v10 }
 0x11d   : > { %v844_v31 = vpop.permute.xlu1 %843  ;;  %v951_v32 = vsel %vm943_vm8, %v938_v29, %v940_v30 }
 0x11e   : > { %v854_v35 = vsel %vm845_vm7, %v842_v25, %v844_v31  ;;  %1308 = vmatprep.subr.bf16.mxu1 %v951_v32 }
 0x11f   : > { %1350 = vmatpush1.bf16.msra.mxu0 %v854_v35  ;;  %1309 = vmatpush1.bf16.msra.mxu1 %v950_v34 }
 0x120   : > { %v1036_v33 = vpop.permute.xlu0 %1035  ;;  %1351 = vmatprep.subr.bf16.mxu0 %v2193_v62 }
 0x121   : > { %v1048_v36 = vsel %vm1041_vm9, %v2523_v56, %v1036_v33  ;;  %v1038_v37 = vpop.permute.xlu1 %1037 }
 0x122   : > { %v1049_v39 = vsel %vm1041_vm9, %v1036_v33, %v1038_v37 }
 0x123   : > { %1310 = vmatprep.subr.bf16.mxu1 %v1049_v39 }
 0x124   : > { %1311 = vmatpush1.bf16.msra.mxu1 %v1048_v36  ;;  %v942_v40 = vpop.permute.xlu0 %941 }
 0x125   : > { %v952_v41 = vsel %vm943_vm8, %v940_v30, %v942_v40  ;;  %v1040_v42 = vpop.permute.xlu1 %1039 }
 0x126   : > { %1352 = vmatpush1.bf16.msra.mxu0 %v952_v41  ;;  %v1050_v44 = vsel %vm1041_vm9, %v1038_v37, %v1040_v42 }
 0x127   : > { %1327 = vmatmul.mubr.bf16.vlgmr.msra.gmra.mrb[4].mxu1 %v2456_v52  ;;  %1353 = vmatprep.subr.bf16.mxu0 %v2193_v62 }
 0x12a   : > { %1354 = vmatpush1.bf16.msra.mxu0 %v1050_v44 }
 0x12d   : > { %1370 = vmatmul.mubr.bf16.vlgmr.msra.gmra.mrb[8].mxu0 %v2456_v52 }
 0x18d   : > { %v1199_v43 = vpop.f32.mrb[0].mxu0 }
 0x18e   : > { %v1427_v53 = vmul.f32 %v1385_v50, %v1199_v43  ;;  %v1201_v52 = vpop.f32.mrb[1].mxu0 }
 0x18f   : > { %v1428_v54 = vmul.f32 %v1389_v51, %v1201_v52  ;;  %v2100_v55 = vpack.c.bf16 %v1201_v52, %v1199_v43  ;;  %v1203_v56 = vpop.f32.mrb[2].mxu0 }
 0x190   : > { %v1474_v57 = vmul.f32 %v1427_v53, %v1199_v43  ;;  %v1436_v48 = vmul.f32 %v1385_v50, %v1203_v56  ;;  %v1205_v58 = vpop.f32.mrb[3].mxu0 }
 0x191   : > { %v1447_v60 = vadd.f32 %v1428_v54, %v1427_v53  ;;  %v1475_v61 = vmul.f32 %v1428_v54, %v1201_v52  ;;  %1575 = vst [vmem:[%s2594_s17] sm:$0xff] %v2100_v55  ;;  %v1437_v62 = vmul.f32 %v1389_v51, %v1205_v58  ;;  %v2105_v9 = vpack.c.bf16 %v1205_v58, %v1203_v56 }
 0x192   : > { %v1483_v63 = vmul.f32 %v1436_v48, %v1203_v56 }
 0x193   : > { %v1492_v8 = vadd.f32 %v1475_v61, %v1474_v57  ;;  %v1457_v0 = vadd.f32 %v1437_v62, %v1436_v48  ;;  %v1484_v59 = vmul.f32 %v1437_v62, %v1205_v58  ;;  %1580 = vst [vmem:[%s2594_s17 + $0x24] sm:$0xff] %v2105_v9  ;;  %v1408_v58 = vsub.s32 6, %v2579_v45 }
 0x195   : > { %v1502_v1 = vadd.f32 %v1484_v59, %v1483_v63  ;;  %v1409_v61 = vrot.slane %v2585_v47, %v1408_v58 }
 0x1ca   : > { %v1242_v5 = vpop.f32.mrb[0].mxu1 }
 0x1cb   : > { %v1429_v11 = vmul.f32 %v1393_v6, %v1242_v5  ;;  %v1244_v12 = vpop.f32.mrb[1].mxu1 }
 0x1cc   : > { %v1430_v13 = vmul.f32 %v1397_v7, %v1244_v12  ;;  %v2101_v15 = vpack.c.bf16 %v1244_v12, %v1242_v5  ;;  %v1246_v16 = vpop.f32.mrb[2].mxu1 }
 0x1cd   : > { %v1448_v18 = vadd.f32 %v1447_v60, %v1429_v11  ;;  %v1476_v19 = vmul.f32 %v1429_v11, %v1242_v5  ;;  %v1438_v20 = vmul.f32 %v1393_v6, %v1246_v16  ;;  %v1248_v21 = vpop.f32.mrb[3].mxu1  ;;  %v1412_v60 = vsub.s32 7, %v2579_v45  ;;  %v2065_v45 = vld [vmem:[%s2825_s4 + $0x8] ss:$0 sm:$0xff] }
 0x1ce   : > { %v1477_v22 = vmul.f32 %v1430_v13, %v1244_v12  ;;  %1576 = vst [vmem:[%s2594_s17 + $0x8] sm:$0xff] %v2101_v15  ;;  %v1439_v23 = vmul.f32 %v1397_v7, %v1248_v21  ;;  %v2106_v24 = vpack.c.bf16 %v1248_v21, %v1246_v16  ;;  %v1285_v25 = vpop.f32.mrb[4].mxu0 }
 0x1cf   : > { %v1493_v26 = vadd.f32 %v1492_v8, %v1476_v19  ;;  %v1449_v27 = vadd.f32 %v1448_v18, %v1430_v13  ;;  %v1458_v28 = vadd.f32 %v1457_v0, %v1438_v20  ;;  %v1485_v29 = vmul.f32 %v1438_v20, %v1246_v16  ;;  %v1287_v30 = vpop.f32.mrb[5].mxu0 }
 0x1d0   : > { %v1486_v31 = vmul.f32 %v1439_v23, %v1248_v21  ;;  %1581 = vst [vmem:[%s2594_s17 + $0x2c] sm:$0xff] %v2106_v24  ;;  %v1431_v32 = vmul.f32 %v1401_v17, %v1285_v25  ;;  %v1432_v34 = vmul.f32 %v1405_v14, %v1287_v30  ;;  %v2102_v35 = vpack.c.bf16 %v1287_v30, %v1285_v25  ;;  %v1289_v33 = vpop.f32.mrb[6].mxu0 }
 0x1d1   : > { %v1494_v36 = vadd.f32 %v1493_v26, %v1477_v22  ;;  %v1503_v37 = vadd.f32 %v1502_v1, %v1485_v29  ;;  %v1459_v39 = vadd.f32 %v1458_v28, %v1439_v23  ;;  %v1440_v40 = vmul.f32 %v1401_v17, %v1289_v33  ;;  %v1291_v41 = vpop.f32.mrb[7].mxu0 }
 0x1d2   : > { %v1450_v42 = vadd.f32 %v1449_v27, %v1431_v32  ;;  %v1478_v44 = vmul.f32 %v1431_v32, %v1285_v25  ;;  %v1479_v38 = vmul.f32 %v1432_v34, %v1287_v30  ;;  %1577 = vst [vmem:[%s2594_s17 + $0x10] sm:$0xff] %v2102_v35  ;;  %v1441_v46 = vmul.f32 %v1405_v14, %v1291_v41 }
 0x1d3   : > { %v1504_v49 = vadd.f32 %v1503_v37, %v1486_v31  ;;  %v1460_v50 = vadd.f32 %v1459_v39, %v1440_v40  ;;  %v1487_v51 = vmul.f32 %v1440_v40, %v1289_v33  ;;  %v2107_v43 = vpack.c.bf16 %v1291_v41, %v1289_v33  ;;  %v1446_v33 = vld [vmem:[#allocation3 + $0x8] sm:$0xff]  ;;  %v1472_v39 = vld [vmem:[#allocation4] sm:$0xff] }
 0x1d4   : > { %v1495_v53 = vadd.f32 %v1494_v36, %v1478_v44  ;;  %v1451_v52 = vadd.f32 %v1450_v42, %v1432_v34  ;;  %v1488_v54 = vmul.f32 %v1441_v46, %v1291_v41  ;;  %v1413_v62 = vrot.slane %v2585_v47, %v1412_v60  ;;  %v1445_v34 = vld [vmem:[#allocation3] sm:$0xff]  ;;  %v1473_v44 = vld [vmem:[#allocation4 + $0x8] sm:$0xff] }
 0x1d5   : > { %v1505_v55 = vadd.f32 %v1504_v49, %v1487_v51  ;;  %v1461_v56 = vadd.f32 %v1460_v50, %v1441_v46  ;;  %1582 = vst [vmem:[%s2594_s17 + $0x34] sm:$0xff] %v2107_v43  ;;  %v2194_v51 = vmov (!%p2077_p5), 0  }
 0x1d6   : > { %v1496_v57 = vadd.f32 %v1495_v53, %v1479_v38  ;;  %2170 = vset.pattern.permute.xlu0 (!%p2077_p5), %v2194_v51  ;;  %2171 = vset.pattern.permute.xlu1 (!%p2077_p5), %v2194_v51 }
 0x1d7   : > { %v1506_v48 = vadd.f32 %v1505_v55, %v1488_v54 }
 0x1fa   : > { %v1328_v9 = vpop.f32.mrb[4].mxu1 }
 0x1fb   : > { %v1433_v63 = vmul.f32 %v1409_v61, %v1328_v9  ;;  %v1330_v8 = vpop.f32.mrb[5].mxu1 }
 0x1fc   : > { %v1434_v0 = vmul.f32 %v1413_v62, %v1330_v8  ;;  %v2103_v59 = vpack.c.bf16 %v1330_v8, %v1328_v9  ;;  %v1332_v1 = vpop.f32.mrb[6].mxu1 }
 0x1fd   : > { %v1480_v2 = vmul.f32 %v1433_v63, %v1328_v9  ;;  %v1442_v4 = vmul.f32 %v1409_v61, %v1332_v1  ;;  %v1334_v6 = vpop.f32.mrb[7].mxu1  ;;  %v1452_v7 = vadd.f32 %v1451_v52, %v1433_v63 }
 0x1fe   : > { %v1481_v3 = vmul.f32 %v1434_v0, %v1330_v8  ;;  %1578 = vst [vmem:[%s2594_s17 + $0x18] sm:$0xff] %v2103_v59  ;;  %v1443_v10 = vmul.f32 %v1413_v62, %v1334_v6  ;;  %v2108_v5 = vpack.c.bf16 %v1334_v6, %v1332_v1  ;;  %v1603_v8 = vld [vmem:[%s2823_s2] sm:$0xff] (!%p2077_p5) }
 0x1ff   : > { %v1489_v47 = vmul.f32 %v1442_v4, %v1332_v1  ;;  %v1453_v11 = vadd.f32 %v1452_v7, %v1434_v0  ;;  %v1462_v12 = vadd.f32 %v1461_v56, %v1442_v4  ;;  %v1497_v13 = vadd.f32 %v1496_v57, %v1480_v2  ;;  %v1604_v0 = vld [vmem:[%s2823_s2 + $0x8] sm:$0xff] (!%p2077_p5) }
 0x200   : > { %v1490_v15 = vmul.f32 %v1443_v10, %v1334_v6  ;;  %1583 = vst [vmem:[%s2594_s17 + $0x3c] sm:$0xff] %v2108_v5  ;;  %v1371_v16 = vpop.f32.mrb[8].mxu0  ;;  %v1611_v6 = vld [vmem:[%s2824_s3] sm:$0xff] (!%p2077_p5) }
 0x201   : > { %v2104_v17 = vpack.c.bf16 %v1371_v16, %v1371_v16  ;;  %v1373_v14 = vpop.f32.mrb[9].mxu0  ;;  %v1435_v18 = vmul.f32 %v2065_v45, %v1371_v16  ;;  %v1463_v19 = vadd.f32 %v1462_v12, %v1443_v10  ;;  %v1498_v20 = vadd.f32 %v1497_v13, %v1481_v3  ;;  %v1612_v3 = vld [vmem:[%s2824_s3 + $0x8] sm:$0xff] (!%p2077_p5) }
 0x202   : > { %v1374_v21 = vpop.f32.mrb[10].mxu0  ;;  %v1507_v22 = vadd.f32 %v1506_v48, %v1489_v47 }
 0x203   : > { %1579 = vst [vmem:[%s2594_s17 + $0x20] sm:$0xf] %v2104_v17  ;;  %v2109_v23 = vpack.c.bf16 %v1374_v21, %v1374_v21  ;;  %v1376_v24 = vpop.f32.mrb[11].mxu0  ;;  %v1454_v25 = vadd.f32 %v1453_v11, %v1435_v18  ;;  %v1444_v26 = vmul.f32 %v2065_v45, %v1374_v21  ;;  %v1482_v27 = vmul.f32 %v1435_v18, %v1371_v16 }
 0x204   : > { %v1508_v28 = vadd.f32 %v1507_v22, %v1490_v15 }
 0x205   : > { %1584 = vst [vmem:[%s2594_s17 + $0x44] sm:$0xf] %v2109_v23  ;;  %1455 = vadd.xlane.f32.xlu0 %v1454_v25  ;;  %v1464_v29 = vadd.f32 %v1463_v19, %v1444_v26  ;;  %v1499_v30 = vadd.f32 %v1498_v20, %v1482_v27  ;;  %v1491_v31 = vmul.f32 %v1444_v26, %v1374_v21 }
 0x207   : > { %1465 = vadd.xlane.f32.xlu1 %v1464_v29  ;;  %v1509_v32 = vadd.f32 %v1508_v28, %v1491_v31 }
 0x209   : > { %1500 = vadd.xlane.f32.xlu0 %v1499_v30 }
 0x20c   : > { %v1617_v47 = vld [vmem:[%s2826_s5] sm:$0xff] (!%p2077_p5)  ;;  %v1618_v11 = vld [vmem:[%s2826_s5 + $0x8] sm:$0xff] (!%p2077_p5)  ;;  %v1619_v12 = vld [vmem:[%s2826_s5 + $0x10] sm:$0xff] (!%p2077_p5) }
 0x20d   : > { %1510 = vadd.xlane.f32.xlu0 %v1509_v32  ;;  %v1620_v13 = vld [vmem:[%s2826_s5 + $0x18] sm:$0xff] (!%p2077_p5)  ;;  %v2649_v15 = vld [vmem:[%s2826_s5 + $0x20] ss:$72 sps:$4 sm:$0xff] (!%p2077_p5)   ;;  %v1628_v17 = vld [vmem:[%s2826_s5 + $0x50] sm:$0xff] (!%p2077_p5)  ;;  %v1637_v19 = vunpack.c.l.bf16 (!%p2077_p5), %v1617_v47  ;;  %v1638_v20 = vunpack.c.h.bf16 (!%p2077_p5), %v1617_v47  ;;  %v1639_v21 = vunpack.c.l.bf16 (!%p2077_p5), %v1618_v11  ;;  %v1640_v22 = vunpack.c.h.bf16 (!%p2077_p5), %v1618_v11 }
 0x20e   : > { %v1627_v16 = vld [vmem:[%s2826_s5 + $0x48] sm:$0xff] (!%p2077_p5)  ;;  %v2660_v14 = vld [vmem:[%s2826_s5 + $0x58] sm:$0xff] (!%p2077_p5)  ;;  %v2665_v18 = vld [vmem:[%s2826_s5 + $0x60] sm:$0xff] (!%p2077_p5)  ;;  %v1641_v23 = vunpack.c.l.bf16 (!%p2077_p5), %v1619_v12  ;;  %v1642_v24 = vunpack.c.h.bf16 (!%p2077_p5), %v1619_v12  ;;  %v1643_v25 = vunpack.c.l.bf16 (!%p2077_p5), %v1620_v13  ;;  %v1644_v26 = vunpack.c.h.bf16 (!%p2077_p5), %v1620_v13 }
 0x20f   : > { %v1622_v27 = vld [vmem:[%s2826_s5 + $0x24] sm:$0xff] (!%p2077_p5)  ;;  %v1645_v28 = vunpack.c.l.bf16 (!%p2077_p5), %v2649_v15  ;;  %v1655_v29 = vunpack.c.l.bf16 (!%p2077_p5), %v1627_v16  ;;  %v1656_v30 = vunpack.c.h.bf16 (!%p2077_p5), %v1627_v16  ;;  %v1657_v31 = vunpack.c.l.bf16 (!%p2077_p5), %v1628_v17  ;;  %v1623_v32 = vld [vmem:[%s2826_s5 + $0x2c] sm:$0xff] (!%p2077_p5) }
 0x210   : > { %v1635_v51 = vld [vmem:[%s2826_s5 + $0x84] sm:$0xff] (!%p2077_p5) }
 0x292   : > { %v1456_v35 = vpop.xlane.xlu0 %1455 }
 0x293   : > { %v1467_v36 = vadd.f32 %v1456_v35, %v1445_v34  ;;  %v1624_v34 = vld [vmem:[%s2826_s5 + $0x34] sm:$0xff] (!%p2077_p5)  ;;  %v1658_v35 = vunpack.c.h.bf16 (!%p2077_p5), %v1628_v17 }
 0x294   : > { %v1466_v37 = vpop.xlane.xlu1 %1465 }
 0x295   : > { %1470 = vst.msk [vmem:[#allocation3] sm:$0xff] %vm1469_vm10, %v1467_v36  ;;  %v1468_v40 = vadd.f32 %v1466_v37, %v1446_v33  ;;  %v1659_v33 = vunpack.c.l.bf16 (!%p2077_p5), %v2660_v14  ;;  %v1660_v36 = vunpack.c.h.bf16 (!%p2077_p5), %v2660_v14  ;;  %v1661_v37 = vunpack.c.l.bf16 (!%p2077_p5), %v2665_v18 }
 0x296   : > { %v1501_v41 = vpop.xlane.xlu0 %1500 }
 0x297   : > { %1471 = vst.msk [vmem:[#allocation3 + $0x8] sm:$0xff] %vm1469_vm10, %v1468_v40  ;;  %v1512_v42 = vadd.f32 %v1501_v41, %v1472_v39  ;;  %1588 = sbr.rel (%p2077_p5) target bundleno = 859 (0x35b), region = 48  ;;  %v1625_v39 = vld [vmem:[%s2826_s5 + $0x3c] sm:$0xff] (!%p2077_p5)  ;;  %v2686_v40 = vld [vmem:[%s2826_s5 + $0x44] ss:$72 sps:$4 sm:$0xff] (!%p2077_p5)  }
 0x298   : > { %v1632_v41 = vld [vmem:[%s2826_s5 + $0x6c] sm:$0xff] (!%p2077_p5) }
 0x299   : > { %1514 = vst.msk [vmem:[#allocation4] sm:$0xff] %vm1469_vm10, %v1512_v42  ;;  %v1662_v42 = vunpack.c.h.bf16 (!%p2077_p5), %v2665_v18 }
 0x29a   : > { %v1511_v38 = vpop.xlane.xlu0 %1510 }
 0x29b   : > { %v1513_v46 = vadd.f32 %v1511_v38, %v1473_v44  ;;  %v1663_v44 = vunpack.c.h.bf16 (!%p2077_p5), %v2649_v15  ;;  %v1633_v38 = vld [vmem:[%s2826_s5 + $0x74] sm:$0xff] (!%p2077_p5) }
 0x29c   : > { %v1589_v49 = vld [vmem:[#allocation3] sm:$0xff] (!%p2077_p5) }
 0x29d   : > { %1515 = vst.msk [vmem:[#allocation4 + $0x8] sm:$0xff] %vm1469_vm10, %v1513_v46  ;;  %v1591_v43 = vmul.f32 (!%p2077_p5), 0.00048828125, %v1589_v49  ;;  %v1634_v46 = vld [vmem:[%s2826_s5 + $0x7c] sm:$0xff] (!%p2077_p5)  ;;  %v1646_v49 = vunpack.c.l.bf16 (!%p2077_p5), %v1622_v27 }
 0x29e   : > { %v1590_v52 = vld [vmem:[#allocation3 + $0x8] sm:$0xff] }
 0x29f   : > { %v1592_v55 = vmul.f32 0.00048828125, %v1590_v52  ;;  %v1597_v57 = vmul.f32 %v1591_v43, %v1591_v43  ;;  %v1650_v52 = vunpack.c.l.bf16 %v1624_v34 }
 0x2a0   : > { %v1593_v50 = vld [vmem:[#allocation4] sm:$0xff] }
 0x2a1   : > { %v1595_v53 = vmul.f32 0.00048828125, %v1593_v50  ;;  %v1598_v48 = vmul.f32 %v1592_v55, %v1592_v55  ;;  %v1647_v50 = vunpack.c.h.bf16 %v1622_v27 }
 0x2a3   : > { %v1599_v58 = vsub.f32 %v1595_v53, %v1597_v57  ;;  %v1649_v53 = vunpack.c.h.bf16 %v1623_v32  ;;  %v1654_v57 = vunpack.c.l.bf16 %v2686_v40 }
 0x2a4   : > { %v1594_v54 = vld [vmem:[#allocation4 + $0x8] sm:$0xff] }
 0x2a5   : > { %v1596_v56 = vmul.f32 0.00048828125, %v1594_v54  ;;  %v1601_v61 = vmax.f32 %v1599_v58, 0.0  ;;  %v1651_v54 = vunpack.c.h.bf16 %v1624_v34  ;;  %v1665_v58 = vunpack.c.h.bf16 %v1632_v41 }
 0x2a7   : > { %v1600_v60 = vsub.f32 %v1596_v56, %v1598_v48  ;;  %v1605_v9 = vadd.f32 1e-05, %v1601_v61  ;;  %v1653_v56 = vunpack.c.h.bf16 %v1625_v39  ;;  %v1664_v48 = vunpack.c.l.bf16 %v1632_v41 }
 0x2a8   : > { %v1667_v61 = vunpack.c.h.bf16 %v1633_v38 }
 0x2a9   : > { %v1602_v62 = vmax.f32 %v1600_v60, 0.0  ;;  %2172 = vrsqrt.f32 %v1605_v9  ;;  %v1666_v60 = vunpack.c.l.bf16 %v1633_v38 }
 0x2ab   : > { %v1606_v63 = vadd.f32 1e-05, %v1602_v62  ;;  %v1668_v62 = vunpack.c.l.bf16 %v1634_v46 }
 0x2ad   : > { %2174 = vrsqrt.f32 %v1606_v63  ;;  %v1669_v63 = vunpack.c.h.bf16 %v1634_v46 }
 0x2b3   : > { %v2173_v59 = vpop.eup %2172 }
 0x2b4   : > { %v1609_v2 = vmul.f32 %v2173_v59, %v1603_v8  ;;  %v1670_v8 = vunpack.c.l.bf16 %v1635_v51  ;;  %v1672_v59 = vunpack.c.h.bf16 %v2686_v40 }
 0x2b6   : > { %1675 = vperm.xlu0 %2170, %v1609_v2   ;;  %v1613_v7 = vmul.f32 %v1609_v2, %v1591_v43  ;;  %v1648_v43 = vunpack.c.l.bf16 %v1623_v32 }
 0x2b7   : > { %v2175_v1 = vpop.eup %2174 }
 0x2b8   : > { %v1610_v4 = vmul.f32 %v2175_v1, %v1604_v0  ;;  %v1615_v5 = vsub.f32 %v1611_v6, %v1613_v7  ;;  %v1671_v0 = vunpack.c.h.bf16 %v1635_v51 }
 0x2ba   : > { %v1614_v10 = vmul.f32 %v1610_v4, %v1592_v55  ;;  %1680 = vperm.xlu0 %2170, %v1610_v4   ;;  %1721 = vperm.xlu1 %2171, %v1615_v5   ;;  %v1652_v55 = vunpack.c.l.bf16 %v1625_v39 }
 0x2bc   : > { %v1616_v45 = vsub.f32 %v1612_v3, %v1614_v10 }
 0x2be   : > { %1726 = vperm.xlu1 %2171, %v1616_v45  }
 0x335   : > { %v1676_v9 = vpop.permute.xlu0 %1675 }
 0x336   : > { %v1683_v1 = vmul.f32 %v1676_v9, %v1637_v19  ;;  %v1684_v2 = vmul.f32 %v1676_v9, %v1638_v20  ;;  %v1685_v4 = vmul.f32 %v1676_v9, %v1639_v21  ;;  %v1686_v6 = vmul.f32 %v1676_v9, %v1640_v22 }
 0x337   : > { %v1687_v7 = vmul.f32 %v1676_v9, %v1641_v23  ;;  %v1688_v3 = vmul.f32 %v1676_v9, %v1642_v24  ;;  %v1689_v10 = vmul.f32 %v1676_v9, %v1643_v25  ;;  %v1690_v5 = vmul.f32 %v1676_v9, %v1644_v26 }
 0x338   : > { %v1691_v45 = vmul.f32 %v1676_v9, %v1645_v28  ;;  %v1701_v47 = vmul.f32 %v1676_v9, %v1655_v29  ;;  %v1702_v11 = vmul.f32 %v1676_v9, %v1656_v30  ;;  %v1703_v12 = vmul.f32 %v1676_v9, %v1657_v31 }
 0x339   : > { %v1704_v13 = vmul.f32 %v1676_v9, %v1658_v35  ;;  %v1705_v15 = vmul.f32 %v1676_v9, %v1659_v33  ;;  %v1706_v16 = vmul.f32 %v1676_v9, %v1660_v36  ;;  %v1707_v17 = vmul.f32 %v1676_v9, %v1661_v37  ;;  %v1681_v14 = vpop.permute.xlu0 %1680  ;;  %v1722_v29 = vpop.permute.xlu1 %1721 }
 0x33a   : > { %v1708_v18 = vmul.f32 %v1676_v9, %v1662_v42  ;;  %v1709_v27 = vmul.f32 %v1676_v9, %v1663_v44  ;;  %v2704_v32 = vmul.f32 %v1681_v14, %v1646_v49  ;;  %v2706_v19 = vmul.f32 %v1681_v14, %v1647_v50 }
 0x33b   : > { %v2708_v20 = vmul.f32 %v1681_v14, %v1648_v43  ;;  %v2710_v21 = vmul.f32 %v1681_v14, %v1649_v53  ;;  %v2712_v22 = vmul.f32 %v1681_v14, %v1650_v52  ;;  %v2714_v23 = vmul.f32 %v1681_v14, %v1651_v54 }
 0x33c   : > { %v2716_v24 = vmul.f32 %v1681_v14, %v1652_v55  ;;  %v2718_v25 = vmul.f32 %v1681_v14, %v1653_v56  ;;  %v2720_v26 = vmul.f32 %v1681_v14, %v1654_v57  ;;  %v2722_v28 = vmul.f32 %v1681_v14, %v1664_v48 }
 0x33d   : > { %v2724_v30 = vmul.f32 %v1681_v14, %v1665_v58  ;;  %v2726_v31 = vmul.f32 %v1681_v14, %v1666_v60  ;;  %v2728_v34 = vmul.f32 %v1681_v14, %v1667_v61  ;;  %v2730_v35 = vmul.f32 %v1681_v14, %v1668_v62 }
 0x33e   : > { %v2732_v33 = vmul.f32 %v1681_v14, %v1669_v63  ;;  %v2734_v36 = vmul.f32 %v1681_v14, %v1670_v8  ;;  %v2736_v37 = vmul.f32 %v1681_v14, %v1671_v0  ;;  %v2738_v39 = vmul.f32 %v1681_v14, %v1672_v59 }
 0x33f   : > { %v1729_v40 = vadd.f32 %v1722_v29, %v1683_v1  ;;  %v1730_v41 = vadd.f32 %v1722_v29, %v1684_v2  ;;  %v1731_v42 = vadd.f32 %v1722_v29, %v1685_v4  ;;  %v1732_v44 = vadd.f32 %v1722_v29, %v1686_v6 }
 0x340   : > { %v1733_v38 = vadd.f32 %v1722_v29, %v1687_v7  ;;  %v1734_v46 = vadd.f32 %v1722_v29, %v1688_v3  ;;  %v1735_v49 = vadd.f32 %v1722_v29, %v1689_v10  ;;  %v1736_v50 = vadd.f32 %v1722_v29, %v1690_v5 }
 0x341   : > { %v1737_v51 = vadd.f32 %v1722_v29, %v1691_v45  ;;  %v1747_v43 = vadd.f32 %v1722_v29, %v1701_v47  ;;  %v1748_v53 = vadd.f32 %v1722_v29, %v1702_v11  ;;  %v1749_v52 = vadd.f32 %v1722_v29, %v1703_v12  ;;  %v1727_v11 = vpop.permute.xlu1 %1726 }
 0x342   : > { %v1750_v54 = vadd.f32 %v1722_v29, %v1704_v13  ;;  %v1751_v55 = vadd.f32 %v1722_v29, %v1705_v15  ;;  %v1752_v56 = vadd.f32 %v1722_v29, %v1706_v16  ;;  %v1753_v57 = vadd.f32 %v1722_v29, %v1707_v17 }
 0x343   : > { %v1754_v48 = vadd.f32 %v1722_v29, %v1708_v18  ;;  %v1755_v58 = vadd.f32 %v1722_v29, %v1709_v27  ;;  %v1765_v60 = vmax.f32 %v1729_v40, 0.0  ;;  %v1766_v61 = vmax.f32 %v1730_v41, 0.0 }
 0x344   : > { %v1767_v62 = vmax.f32 %v1731_v42, 0.0  ;;  %v1768_v9 = vmax.f32 %v1732_v44, 0.0  ;;  %v1769_v63 = vmax.f32 %v1733_v38, 0.0  ;;  %v1770_v8 = vmax.f32 %v1734_v46, 0.0 }
 0x345   : > { %v1771_v0 = vmax.f32 %v1735_v49, 0.0  ;;  %v1772_v59 = vmax.f32 %v1736_v50, 0.0  ;;  %v1773_v1 = vmax.f32 %v1737_v51, 0.0  ;;  %v1783_v2 = vmax.f32 %v1747_v43, 0.0 }
 0x346   : > { %v1784_v4 = vmax.f32 %v1748_v53, 0.0  ;;  %v1785_v6 = vmax.f32 %v1749_v52, 0.0  ;;  %v1786_v7 = vmax.f32 %v1750_v54, 0.0  ;;  %v1787_v3 = vmax.f32 %v1751_v55, 0.0 }
 0x347   : > { %v1788_v10 = vmax.f32 %v1752_v56, 0.0  ;;  %v1789_v5 = vmax.f32 %v1753_v57, 0.0  ;;  %v1790_v45 = vmax.f32 %v1754_v48, 0.0  ;;  %v1791_v47 = vmax.f32 %v1755_v58, 0.0 }
 0x348   : > { %v2111_v12 = vpack.c.bf16 %v1766_v61, %v1765_v60  ;;  %v2112_v13 = vpack.c.bf16 %v1768_v9, %v1767_v62  ;;  %v2113_v15 = vpack.c.bf16 %v1770_v8, %v1769_v63  ;;  %v2114_v16 = vpack.c.bf16 %v1772_v59, %v1771_v0 }
 0x349   : > { %v2115_v17 = vpack.c.bf16 %v1773_v1, %v1773_v1  ;;  %v2121_v14 = vpack.c.bf16 %v1784_v4, %v1783_v2  ;;  %v2122_v18 = vpack.c.bf16 %v1786_v7, %v1785_v6  ;;  %v2123_v27 = vpack.c.bf16 %v1788_v10, %v1787_v3 }
 0x34a   : > { %v2124_v29 = vpack.c.bf16 %v1790_v45, %v1789_v5  ;;  %v2125_v40 = vpack.c.bf16 %v1791_v47, %v1791_v47  ;;  %1913 = vst [vmem:[%s2826_s5] sm:$0xff] %v2111_v12  ;;  %1914 = vst [vmem:[%s2826_s5 + $0x8] sm:$0xff] %v2112_v13  ;;  %v1738_v41 = vadd.f32 %v1727_v11, %v2704_v32 }
 0x34b   : > { %1915 = vst [vmem:[%s2826_s5 + $0x10] sm:$0xff] %v2113_v15  ;;  %1916 = vst [vmem:[%s2826_s5 + $0x18] sm:$0xff] %v2114_v16  ;;  %v1739_v42 = vadd.f32 %v1727_v11, %v2706_v19  ;;  %v1740_v32 = vadd.f32 %v1727_v11, %v2708_v20  ;;  %v1741_v19 = vadd.f32 %v1727_v11, %v2710_v21 }
 0x34c   : > { %1917 = vst [vmem:[%s2826_s5 + $0x20] sm:$0xf] %v2115_v17  ;;  %1923 = vst [vmem:[%s2826_s5 + $0x48] sm:$0xff] %v2121_v14  ;;  %v1742_v44 = vadd.f32 %v1727_v11, %v2712_v22  ;;  %v1743_v38 = vadd.f32 %v1727_v11, %v2714_v23  ;;  %v1744_v46 = vadd.f32 %v1727_v11, %v2716_v24  ;;  %v1774_v52 = vmax.f32 %v1738_v41, 0.0 }
 0x34d   : > { %1924 = vst [vmem:[%s2826_s5 + $0x50] sm:$0xff] %v2122_v18  ;;  %1925 = vst [vmem:[%s2826_s5 + $0x58] sm:$0xff] %v2123_v27  ;;  %v1745_v49 = vadd.f32 %v1727_v11, %v2718_v25  ;;  %v1746_v20 = vadd.f32 %v1727_v11, %v2720_v26  ;;  %v1756_v21 = vadd.f32 %v1727_v11, %v2722_v28  ;;  %v1775_v26 = vmax.f32 %v1739_v42, 0.0 }
 0x34e   : > { %1926 = vst [vmem:[%s2826_s5 + $0x60] sm:$0xff] %v2124_v29  ;;  %1927 = vst [vmem:[%s2826_s5 + $0x68] sm:$0xf] %v2125_v40  ;;  %v1757_v22 = vadd.f32 %v1727_v11, %v2724_v30  ;;  %v1758_v23 = vadd.f32 %v1727_v11, %v2726_v31  ;;  %v1759_v50 = vadd.f32 %v1727_v11, %v2728_v34  ;;  %v1776_v54 = vmax.f32 %v1740_v32, 0.0 }
 0x34f   : > { %v1760_v51 = vadd.f32 %v1727_v11, %v2730_v35  ;;  %v1761_v43 = vadd.f32 %v1727_v11, %v2732_v33  ;;  %v1762_v53 = vadd.f32 %v1727_v11, %v2734_v36  ;;  %v1763_v24 = vadd.f32 %v1727_v11, %v2736_v37 }
 0x350   : > { %v1764_v25 = vadd.f32 %v1727_v11, %v2738_v39  ;;  %v1777_v28 = vmax.f32 %v1741_v19, 0.0  ;;  %v1778_v55 = vmax.f32 %v1742_v44, 0.0  ;;  %v1779_v30 = vmax.f32 %v1743_v38, 0.0 }
 0x351   : > { %v1780_v56 = vmax.f32 %v1744_v46, 0.0  ;;  %v1781_v31 = vmax.f32 %v1745_v49, 0.0  ;;  %v1782_v57 = vmax.f32 %v1746_v20, 0.0  ;;  %v1792_v34 = vmax.f32 %v1756_v21, 0.0 }
 0x352   : > { %v1793_v48 = vmax.f32 %v1757_v22, 0.0  ;;  %v1794_v35 = vmax.f32 %v1758_v23, 0.0  ;;  %v1795_v58 = vmax.f32 %v1759_v50, 0.0  ;;  %v1796_v33 = vmax.f32 %v1760_v51, 0.0 }
 0x353   : > { %v1797_v60 = vmax.f32 %v1761_v43, 0.0  ;;  %v1798_v36 = vmax.f32 %v1762_v53, 0.0  ;;  %v1799_v61 = vmax.f32 %v1763_v24, 0.0  ;;  %v1800_v37 = vmax.f32 %v1764_v25, 0.0 }
 0x354   : > { %v2116_v62 = vpack.c.bf16 %v1775_v26, %v1774_v52  ;;  %v2117_v39 = vpack.c.bf16 %v1777_v28, %v1776_v54  ;;  %v2118_v9 = vpack.c.bf16 %v1779_v30, %v1778_v55  ;;  %v2119_v63 = vpack.c.bf16 %v1781_v31, %v1780_v56 }
 0x355   : > { %v2120_v8 = vpack.c.bf16 %v1782_v57, %v1782_v57  ;;  %v2126_v0 = vpack.c.bf16 %v1793_v48, %v1792_v34  ;;  %v2127_v59 = vpack.c.bf16 %v1795_v58, %v1794_v35  ;;  %v2128_v1 = vpack.c.bf16 %v1797_v60, %v1796_v33 }
 0x356   : > { %v2129_v2 = vpack.c.bf16 %v1799_v61, %v1798_v36  ;;  %v2130_v4 = vpack.c.bf16 %v1800_v37, %v1800_v37  ;;  %1918 = vst [vmem:[%s2826_s5 + $0x24] sm:$0xff] %v2116_v62  ;;  %1919 = vst [vmem:[%s2826_s5 + $0x2c] sm:$0xff] %v2117_v39 }
 0x357   : > { %1920 = vst [vmem:[%s2826_s5 + $0x34] sm:$0xff] %v2118_v9  ;;  %1921 = vst [vmem:[%s2826_s5 + $0x3c] sm:$0xff] %v2119_v63 }
 0x358   : > { %1922 = vst [vmem:[%s2826_s5 + $0x44] sm:$0xf] %v2120_v8  ;;  %1928 = vst [vmem:[%s2826_s5 + $0x6c] sm:$0xff] %v2126_v0 }
 0x359   : > { %1929 = vst [vmem:[%s2826_s5 + $0x74] sm:$0xff] %v2127_v59  ;;  %1930 = vst [vmem:[%s2826_s5 + $0x7c] sm:$0xff] %v2128_v1 }
 0x35a   : > { %1931 = vst [vmem:[%s2826_s5 + $0x84] sm:$0xff] %v2129_v2  ;;  %1932 = vst [vmem:[%s2826_s5 + $0x8c] sm:$0xf] %v2130_v4 }
 0x35b PF: > { %s15_s18 = sadd.s32 1, %s2182_s18  }
 0x35c   : > { %p12_p6 = scmp.ge.s32.totalorder %s15_s18, 4  }
 0x35e   :  { %14 = sbr.rel (!%p12_p6) target bundleno = 1 (0x1), region = 75 }

// kernel: _lambda_.10
= control target key start
LH: loop header
LB: loop body
LE: loop exit
PB: predicated region body
PF: predicated region fallthrough
CT: control target
= control target key end

     0   :  { %s2349_s21 = smov 0   ;;  %s3271_s0 = inlined_call_operand.vmem [shape: bf16[2,16,1280], index: 0, kind: input, shape index: {}]   ;;  %s3272_s1 = inlined_call_operand.vmem [shape: bf16[16,144], index: 1, kind: input, shape index: {}]   ;;  %s3273_s2 = inlined_call_operand.vmem [shape: f32[16,1], index: 2, kind: input, shape index: {}]   ;;  %s3274_s3 = inlined_call_operand.vmem [shape: f32[16,1], index: 3, kind: input, shape index: {}]   ;;  %s3275_s4 = inlined_call_operand.vmem [shape: f32[1,1152], index: 4, kind: input, shape index: {}]   ;;  %s3276_s5 = inlined_call_operand.vmem [shape: bf16[2,16,1152], index: 5, kind: input, shape index: {}]   ;;  %s3277_s6 = inlined_call_operand.vmem [shape: bf16[2,16,1152], index: 6, kind: output, shape index: {}]  }
   0x1 LB: > { %s2355_s22 = sadd.s32 4294967295, %s2301_s21   ;;  %p2085_p0 = scmp.ge.s32.totalorder %s2301_s21, 1  ;;  %s2301_s21 = sphi %s2349_s21, %s16_s21  }
   0x2   : > { %p207_p1 = scmp.lt.s32.totalorder %s2301_s21, 3 }
   0x4   : > { %p208_p2 = pnand %p2085_p0, %p207_p1 }
   0x5   : > { %p232_p3 = scmp.lt.s32.totalorder (!%p208_p2), %s2355_s22, 1  ;;  %p2087_p4 = scmp.ne.s32.totalorder (!%p208_p2), %s2355_s22, 0 }
   0x6   : > { %211 = sbr.rel (%p208_p2) target bundleno = 881 (0x371), region = 44 }
   0xd   : > { %s233_s23 = scalar_select %p232_p3, %s2355_s22, 1 }
   0xe   : > { %241 = sbr.rel (%p2087_p4) target bundleno = 21 (0x15), region = 48  ;;  %vm242_vm0 = vcmask (!%p2087_p4), 7168   ;;  %v2303_v0 = vmov (!%p2087_p4), 0.0  }
   0xf   : > { %s2250_s24 = smul.u32 80, %s233_s23  ;;  %243 = vst.msk [vmem:[#allocation3] sm:$0xff] (!%p2087_p4), %vm242_vm0, %v2303_v0  ;;  %244 = vst.msk [vmem:[#allocation3 + $0x8] sm:$0xff] (!%p2087_p4), %vm242_vm0, %v2303_v0 }
  0x10   : > { %245 = vst.msk [vmem:[#allocation4] sm:$0xff] (!%p2087_p4), %vm242_vm0, %v2303_v0  ;;  %246 = vst.msk [vmem:[#allocation4 + $0x8] sm:$0xff] (!%p2087_p4), %vm242_vm0, %v2303_v0 }
  0x11   : > { %s2364_s27 = scalar_lea.vmem %s3271_s0, %s2250_s24 }
  0x15 PF: > { %v2270_v1 = vld [vmem:[%s2364_s27 + $0x4] ss:$40 sps:$4 sm:$0xff]   ;;  %v2272_v2 = vld [vmem:[%s2364_s27] ss:$40 sps:$4 sm:$0xff]   ;;  %s2304_s28 = smov 127   ;;  %s2305_s29 = smov 126  }
  0x16   : > { %364 = vrot.lane.b32.xlu0 %v2270_v1, %s2304_s28  ;;  %v2273_v3 = vld [vmem:[%s2364_s27 + $0x8] ss:$40 sps:$4 sm:$0xff]   ;;  %v2372_v4 = vld [vmem:[%s2364_s27 + $0xc] ss:$40 sps:$4 sm:$0xff]   ;;  %1192 = vmatprep.subr.bf16.mxu0 %v2270_v1  ;;  %s2306_s30 = smov 94   ;;  %s2307_s7 = smov 93  }
  0x17   : > { %362 = vrot.lane.b32.xlu1 %v2272_v2, %s2304_s28  ;;  %1193 = vmatpush1.bf16.msra.mxu0 %v2272_v2  ;;  %s2308_s8 = smov 92   ;;  %s2309_s9 = smov 60   ;;  %v2395_v5 = vld [vmem:[%s3272_s1 + $0x4] ss:$8 sps:$4 sm:$0xff]   ;;  %vm1188_vm1 = vcmask 130048   ;;  %vm382_vm2 = vcmask 1039360  }
  0x18   : > { %1235 = vmatprep.subr.bf16.mxu1 %v2372_v4  ;;  %s2310_s12 = smov 59   ;;  %2179 = vmatprep.mubr.msk.bf16.mxu0 %vm1188_vm1, %v2395_v5  ;;  %s2311_s13 = smov 58   ;;  %v2408_v6 = vld [vmem:[%s2364_s27 + $0x10] ss:$40 sps:$4 sm:$0xff]   ;;  %v2413_v7 = vld [vmem:[%s2364_s27 + $0x14] ss:$40 sps:$4 sm:$0xff]  }
  0x19   : > { %1236 = vmatpush1.bf16.msra.mxu1 %v2273_v3  ;;  %2180 = vmatprep.mubr.msk.bf16.mxu1 %vm1188_vm1, %v2395_v5  ;;  %v2418_v8 = vld [vmem:[%s2364_s27 + $0x18] ss:$40 sps:$4 sm:$0xff]   ;;  %v2479_v9 = vld [vmem:[%s2364_s27 + $0x1c] ss:$40 sps:$4 sm:$0xff]   ;;  %vm480_vm3 = vcmask 1031168   ;;  %vm578_vm4 = vcmask 769024  }
  0x1a   : > { %366 = vrot.lane.b32.xlu0 %v2273_v3, %s2304_s28  ;;  %v2484_v10 = vld [vmem:[%s2364_s27 + $0x20] ss:$40 sps:$4 sm:$0xff]   ;;  %v2493_v13 = vld [vmem:[%s2364_s27 + $0x24] ss:$40 sps:$4 sm:$0xff]   ;;  %vm676_vm5 = vcmask 760832   ;;  %vm774_vm6 = vcmask 752640  }
  0x1b   : > { %462 = vrot.lane.b32.xlu1 %v2270_v1, %s2305_s29  ;;  %vm872_vm7 = vcmask 490496   ;;  %vm970_vm8 = vcmask 482304   ;;  %vm1068_vm9 = vcmask 474112   ;;  %v2580_v52 = vld [vmem:[%s3272_s1] ss:$8 sps:$4 sm:$0xff]   ;;  %s2229_s18 = smul.u32 72, %s2355_s22 }
  0x1c   : > { %vm1496_vm10 = vcmask 7168   ;;  %p2196_p5 = scmp.ne.s32.totalorder %s2355_s22, 1 }
  0x1d   : > { %s2718_s23 = scalar_lea.vmem %s3277_s6, %s2229_s18 }
  0x1e   : > { %464 = vrot.lane.b32.xlu0 %v2273_v3, %s2305_s29 }
  0x1f   : > { %460 = vrot.lane.b32.xlu1 %v2272_v2, %s2305_s29 }
  0x22   : > { %560 = vrot.lane.b32.xlu0 %v2270_v1, %s2306_s30 }
  0x23   : > { %562 = vrot.lane.b32.xlu1 %v2273_v3, %s2306_s30 }
  0x26   : > { %558 = vrot.lane.b32.xlu0 %v2272_v2, %s2306_s30 }
  0x27   : > { %658 = vrot.lane.b32.xlu1 %v2270_v1, %s2307_s7 }
  0x2a   : > { %660 = vrot.lane.b32.xlu0 %v2273_v3, %s2307_s7 }
  0x2b   : > { %656 = vrot.lane.b32.xlu1 %v2272_v2, %s2307_s7 }
  0x2e   : > { %756 = vrot.lane.b32.xlu0 %v2270_v1, %s2308_s8 }
  0x2f   : > { %758 = vrot.lane.b32.xlu1 %v2273_v3, %s2308_s8 }
  0x32   : > { %754 = vrot.lane.b32.xlu0 %v2272_v2, %s2308_s8 }
  0x33   : > { %854 = vrot.lane.b32.xlu1 %v2270_v1, %s2309_s9 }
  0x36   : > { %856 = vrot.lane.b32.xlu0 %v2273_v3, %s2309_s9 }
  0x37   : > { %852 = vrot.lane.b32.xlu1 %v2272_v2, %s2309_s9 }
  0x3a   : > { %952 = vrot.lane.b32.xlu0 %v2270_v1, %s2310_s12 }
  0x3b   : > { %954 = vrot.lane.b32.xlu1 %v2273_v3, %s2310_s12 }
  0x3e   : > { %950 = vrot.lane.b32.xlu0 %v2272_v2, %s2310_s12 }
  0x3f   : > { %1050 = vrot.lane.b32.xlu1 %v2270_v1, %s2311_s13 }
  0x42   : > { %1052 = vrot.lane.b32.xlu0 %v2273_v3, %s2311_s13 }
  0x43   : > { %1048 = vrot.lane.b32.xlu1 %v2272_v2, %s2311_s13 }
  0x46   : > { %368 = vrot.lane.b32.xlu0 %v2372_v4, %s2304_s28 }
  0x47   : > { %370 = vrot.lane.b32.xlu1 %v2408_v6, %s2304_s28 }
  0x4a   : > { %372 = vrot.lane.b32.xlu0 %v2413_v7, %s2304_s28 }
  0x4b   : > { %374 = vrot.lane.b32.xlu1 %v2418_v8, %s2304_s28 }
  0x4e   : > { %466 = vrot.lane.b32.xlu0 %v2372_v4, %s2305_s29 }
  0x4f   : > { %468 = vrot.lane.b32.xlu1 %v2408_v6, %s2305_s29 }
  0x52   : > { %470 = vrot.lane.b32.xlu0 %v2413_v7, %s2305_s29 }
  0x53   : > { %472 = vrot.lane.b32.xlu1 %v2418_v8, %s2305_s29 }
  0x56   : > { %564 = vrot.lane.b32.xlu0 %v2372_v4, %s2306_s30 }
  0x57   : > { %566 = vrot.lane.b32.xlu1 %v2408_v6, %s2306_s30 }
  0x5a   : > { %568 = vrot.lane.b32.xlu0 %v2413_v7, %s2306_s30 }
  0x5b   : > { %570 = vrot.lane.b32.xlu1 %v2418_v8, %s2306_s30 }
  0x5e   : > { %662 = vrot.lane.b32.xlu0 %v2372_v4, %s2307_s7 }
  0x5f   : > { %664 = vrot.lane.b32.xlu1 %v2408_v6, %s2307_s7 }
  0x62   : > { %666 = vrot.lane.b32.xlu0 %v2413_v7, %s2307_s7 }
  0x63   : > { %668 = vrot.lane.b32.xlu1 %v2418_v8, %s2307_s7 }
  0x66   : > { %760 = vrot.lane.b32.xlu0 %v2372_v4, %s2308_s8 }
  0x67   : > { %762 = vrot.lane.b32.xlu1 %v2408_v6, %s2308_s8 }
  0x6a   : > { %764 = vrot.lane.b32.xlu0 %v2413_v7, %s2308_s8 }
  0x6b   : > { %766 = vrot.lane.b32.xlu1 %v2418_v8, %s2308_s8 }
  0x6e   : > { %858 = vrot.lane.b32.xlu0 %v2372_v4, %s2309_s9 }
  0x6f   : > { %860 = vrot.lane.b32.xlu1 %v2408_v6, %s2309_s9 }
  0x72   : > { %862 = vrot.lane.b32.xlu0 %v2413_v7, %s2309_s9 }
  0x73   : > { %864 = vrot.lane.b32.xlu1 %v2418_v8, %s2309_s9 }
  0x76   : > { %956 = vrot.lane.b32.xlu0 %v2372_v4, %s2310_s12 }
  0x77   : > { %958 = vrot.lane.b32.xlu1 %v2408_v6, %s2310_s12 }
  0x7a   : > { %960 = vrot.lane.b32.xlu0 %v2413_v7, %s2310_s12 }
  0x7b   : > { %962 = vrot.lane.b32.xlu1 %v2418_v8, %s2310_s12 }
  0x7e   : > { %1054 = vrot.lane.b32.xlu0 %v2372_v4, %s2311_s13 }
  0x7f   : > { %1056 = vrot.lane.b32.xlu1 %v2408_v6, %s2311_s13 }
  0x82   : > { %1058 = vrot.lane.b32.xlu0 %v2413_v7, %s2311_s13 }
  0x83   : > { %1060 = vrot.lane.b32.xlu1 %v2418_v8, %s2311_s13 }
  0x86   : > { %376 = vrot.lane.b32.xlu0 %v2479_v9, %s2304_s28 }
  0x87   : > { %378 = vrot.lane.b32.xlu1 %v2484_v10, %s2304_s28 }
  0x88   : > { %v365_v11 = vpop.permute.xlu0 %364 }
  0x89   : > { %v363_v12 = vpop.permute.xlu1 %362 }
  0x8a   : > { %474 = vrot.lane.b32.xlu0 %v2479_v9, %s2305_s29  ;;  %v383_v17 = vsel %vm382_vm2, %v363_v12, %v365_v11 }
  0x8b   : > { %476 = vrot.lane.b32.xlu1 %v2484_v10, %s2305_s29 }
  0x8c   : > { %v2497_v14 = vpop.permute.xlu0 %366 }
  0x8d   : > { %v463_v15 = vpop.permute.xlu1 %462  ;;  %v384_v16 = vsel %vm382_vm2, %v365_v11, %v2497_v14 }
  0x8e   : > { %380 = vrot.lane.b32.xlu0 %v2493_v13, %s2304_s28  ;;  %1194 = vmatprep.subr.bf16.mxu0 %v384_v16 }
  0x8f   : > { %572 = vrot.lane.b32.xlu1 %v2479_v9, %s2306_s30  ;;  %1195 = vmatpush1.bf16.msra.mxu0 %v383_v17 }
  0x90   : > { %v2506_v18 = vpop.permute.xlu0 %464 }
  0x91   : > { %v461_v19 = vpop.permute.xlu1 %460  ;;  %v482_v20 = vsel %vm480_vm3, %v463_v15, %v2506_v18 }
  0x92   : > { %574 = vrot.lane.b32.xlu0 %v2484_v10, %s2306_s30  ;;  %1196 = vmatprep.subr.bf16.mxu0 %v482_v20  ;;  %v481_v21 = vsel %vm480_vm3, %v461_v19, %v463_v15 }
  0x93   : > { %478 = vrot.lane.b32.xlu1 %v2493_v13, %s2305_s29  ;;  %1197 = vmatpush1.bf16.msra.mxu0 %v481_v21 }
  0x94   : > { %v561_v22 = vpop.permute.xlu0 %560 }
  0x95   : > { %v2515_v23 = vpop.permute.xlu1 %562 }
  0x96   : > { %670 = vrot.lane.b32.xlu0 %v2479_v9, %s2307_s7  ;;  %v580_v24 = vsel %vm578_vm4, %v561_v22, %v2515_v23 }
  0x97   : > { %672 = vrot.lane.b32.xlu1 %v2484_v10, %s2307_s7  ;;  %1198 = vmatprep.subr.bf16.mxu0 %v580_v24 }
  0x98   : > { %v559_v25 = vpop.permute.xlu0 %558 }
  0x99   : > { %v659_v26 = vpop.permute.xlu1 %658  ;;  %v579_v27 = vsel %vm578_vm4, %v559_v25, %v561_v22 }
  0x9a   : > { %576 = vrot.lane.b32.xlu0 %v2493_v13, %s2306_s30  ;;  %1199 = vmatpush1.bf16.msra.mxu0 %v579_v27 }
  0x9b   : > { %768 = vrot.lane.b32.xlu1 %v2479_v9, %s2308_s8 }
  0x9c   : > { %v2528_v28 = vpop.permute.xlu0 %660 }
  0x9d   : > { %v657_v29 = vpop.permute.xlu1 %656  ;;  %v678_v30 = vsel %vm676_vm5, %v659_v26, %v2528_v28 }
  0x9e   : > { %770 = vrot.lane.b32.xlu0 %v2484_v10, %s2308_s8  ;;  %1200 = vmatprep.subr.bf16.mxu0 %v678_v30  ;;  %v677_v31 = vsel %vm676_vm5, %v657_v29, %v659_v26 }
  0x9f   : > { %674 = vrot.lane.b32.xlu1 %v2493_v13, %s2307_s7  ;;  %1201 = vmatpush1.bf16.msra.mxu0 %v677_v31 }
  0xa0   : > { %v757_v32 = vpop.permute.xlu0 %756 }
  0xa1   : > { %v2537_v33 = vpop.permute.xlu1 %758 }
  0xa2   : > { %866 = vrot.lane.b32.xlu0 %v2479_v9, %s2309_s9  ;;  %v776_v34 = vsel %vm774_vm6, %v757_v32, %v2537_v33 }
  0xa3   : > { %868 = vrot.lane.b32.xlu1 %v2484_v10, %s2309_s9  ;;  %1202 = vmatprep.subr.bf16.mxu0 %v776_v34 }
  0xa4   : > { %v755_v35 = vpop.permute.xlu0 %754 }
  0xa5   : > { %v855_v36 = vpop.permute.xlu1 %854  ;;  %v775_v37 = vsel %vm774_vm6, %v755_v35, %v757_v32 }
  0xa6   : > { %772 = vrot.lane.b32.xlu0 %v2493_v13, %s2308_s8  ;;  %1203 = vmatpush1.bf16.msra.mxu0 %v775_v37 }
  0xa7   : > { %964 = vrot.lane.b32.xlu1 %v2479_v9, %s2310_s12 }
  0xa8   : > { %v2550_v38 = vpop.permute.xlu0 %856 }
  0xa9   : > { %v853_v39 = vpop.permute.xlu1 %852  ;;  %v874_v40 = vsel %vm872_vm7, %v855_v36, %v2550_v38 }
  0xaa   : > { %966 = vrot.lane.b32.xlu0 %v2484_v10, %s2310_s12  ;;  %1204 = vmatprep.subr.bf16.mxu0 %v874_v40  ;;  %v873_v41 = vsel %vm872_vm7, %v853_v39, %v855_v36 }
  0xab   : > { %870 = vrot.lane.b32.xlu1 %v2493_v13, %s2309_s9  ;;  %1205 = vmatpush1.bf16.msra.mxu0 %v873_v41 }
  0xac   : > { %v953_v42 = vpop.permute.xlu0 %952 }
  0xad   : > { %v2559_v43 = vpop.permute.xlu1 %954 }
  0xae   : > { %1062 = vrot.lane.b32.xlu0 %v2479_v9, %s2311_s13  ;;  %v972_v44 = vsel %vm970_vm8, %v953_v42, %v2559_v43 }
  0xaf   : > { %1064 = vrot.lane.b32.xlu1 %v2484_v10, %s2311_s13  ;;  %1206 = vmatprep.subr.bf16.mxu0 %v972_v44 }
  0xb0   : > { %v951_v45 = vpop.permute.xlu0 %950 }
  0xb1   : > { %v1051_v46 = vpop.permute.xlu1 %1050  ;;  %v971_v47 = vsel %vm970_vm8, %v951_v45, %v953_v42 }
  0xb2   : > { %968 = vrot.lane.b32.xlu0 %v2493_v13, %s2310_s12  ;;  %1207 = vmatpush1.bf16.msra.mxu0 %v971_v47 }
  0xb3   : > { %1066 = vrot.lane.b32.xlu1 %v2493_v13, %s2311_s13 }
  0xb4   : > { %v2572_v48 = vpop.permute.xlu0 %1052 }
  0xb5   : > { %v1049_v49 = vpop.permute.xlu1 %1048  ;;  %v1070_v50 = vsel %vm1068_vm9, %v1051_v46, %v2572_v48 }
  0xb6   : > { %1208 = vmatprep.subr.bf16.mxu0 %v1070_v50  ;;  %v1069_v51 = vsel %vm1068_vm9, %v1049_v49, %v1051_v46 }
  0xb7   : > { %1209 = vmatpush1.bf16.msra.mxu0 %v1069_v51 }
  0xb8   : > { %v369_v53 = vpop.permute.xlu0 %368  ;;  %1278 = vmatprep.subr.bf16.mxu0 %v2413_v7 }
  0xb9   : > { %v371_v54 = vpop.permute.xlu1 %370  ;;  %v385_v55 = vsel %vm382_vm2, %v2497_v14, %v369_v53 }
  0xba   : > { %v386_v56 = vsel %vm382_vm2, %v369_v53, %v371_v54  ;;  %1225 = vmatmul.mubr.bf16.vlgmr.msra.gmra.mrb[0].mxu0 %v2580_v52 }
  0xbb   : > { %1237 = vmatprep.subr.bf16.mxu1 %v386_v56  ;;  %1279 = vmatpush1.bf16.msra.mxu0 %v2408_v6 }
  0xbc   : > { %1238 = vmatpush1.bf16.msra.mxu1 %v385_v55  ;;  %v373_v57 = vpop.permute.xlu0 %372  ;;  %2181 = vmatprep.mubr.msk.bf16.mxu0 %vm1188_vm1, %v2395_v5 }
  0xbd   : > { %v387_v58 = vsel %vm382_vm2, %v371_v54, %v373_v57  ;;  %v2591_v59 = vpop.permute.xlu1 %374 }
  0xbe   : > { %v388_v60 = vsel %vm382_vm2, %v373_v57, %v2591_v59 }
  0xbf   : > { %1280 = vmatprep.subr.bf16.mxu0 %v388_v60 }
  0xc0   : > { %1281 = vmatpush1.bf16.msra.mxu0 %v387_v58  ;;  %v467_v61 = vpop.permute.xlu0 %466  ;;  %v2288_v58 = vld [vmem:[%s2364_s27 + $0x20] ss:$40 sps:$4 sm:$0xff]  }
  0xc1   : > { %v469_v62 = vpop.permute.xlu1 %468  ;;  %v483_v63 = vsel %vm480_vm3, %v2506_v18, %v467_v61 }
  0xc2   : > { %v484_v0 = vsel %vm480_vm3, %v467_v61, %v469_v62 }
  0xc3   : > { %1239 = vmatprep.subr.bf16.mxu1 %v484_v0 }
  0xc4   : > { %1240 = vmatpush1.bf16.msra.mxu1 %v483_v63  ;;  %v471_v1 = vpop.permute.xlu0 %470 }
  0xc5   : > { %v485_v2 = vsel %vm480_vm3, %v469_v62, %v471_v1  ;;  %v2599_v3 = vpop.permute.xlu1 %472  ;;  %v2312_v62 = vmov 0  }
  0xc6   : > { %v486_v4 = vsel %vm480_vm3, %v471_v1, %v2599_v3 }
  0xc7   : > { %1282 = vmatprep.subr.bf16.mxu0 %v486_v4 }
  0xc8   : > { %1283 = vmatpush1.bf16.msra.mxu0 %v485_v2  ;;  %v565_v6 = vpop.permute.xlu0 %564 }
  0xc9   : > { %v567_v7 = vpop.permute.xlu1 %566  ;;  %v581_v10 = vsel %vm578_vm4, %v2515_v23, %v565_v6 }
  0xca   : > { %v582_v11 = vsel %vm578_vm4, %v565_v6, %v567_v7 }
  0xcb   : > { %1241 = vmatprep.subr.bf16.mxu1 %v582_v11 }
  0xcc   : > { %1242 = vmatpush1.bf16.msra.mxu1 %v581_v10  ;;  %v569_v12 = vpop.permute.xlu0 %568 }
  0xcd   : > { %v583_v13 = vsel %vm578_vm4, %v567_v7, %v569_v12  ;;  %v2607_v14 = vpop.permute.xlu1 %570 }
  0xce   : > { %v584_v15 = vsel %vm578_vm4, %v569_v12, %v2607_v14 }
  0xcf   : > { %1284 = vmatprep.subr.bf16.mxu0 %v584_v15 }
  0xd0   : > { %1285 = vmatpush1.bf16.msra.mxu0 %v583_v13  ;;  %v663_v16 = vpop.permute.xlu0 %662 }
  0xd1   : > { %v665_v17 = vpop.permute.xlu1 %664  ;;  %v679_v18 = vsel %vm676_vm5, %v2528_v28, %v663_v16 }
  0xd2   : > { %v680_v19 = vsel %vm676_vm5, %v663_v16, %v665_v17 }
  0xd3   : > { %1243 = vmatprep.subr.bf16.mxu1 %v680_v19 }
  0xd4   : > { %1244 = vmatpush1.bf16.msra.mxu1 %v679_v18  ;;  %v667_v20 = vpop.permute.xlu0 %666 }
  0xd5   : > { %v681_v21 = vsel %vm676_vm5, %v665_v17, %v667_v20  ;;  %v2615_v22 = vpop.permute.xlu1 %668 }
  0xd6   : > { %v682_v23 = vsel %vm676_vm5, %v667_v20, %v2615_v22 }
  0xd7   : > { %1286 = vmatprep.subr.bf16.mxu0 %v682_v23 }
  0xd8   : > { %1287 = vmatpush1.bf16.msra.mxu0 %v681_v21  ;;  %v761_v24 = vpop.permute.xlu0 %760 }
  0xd9   : > { %v763_v25 = vpop.permute.xlu1 %762  ;;  %v777_v26 = vsel %vm774_vm6, %v2537_v33, %v761_v24 }
  0xda   : > { %v778_v27 = vsel %vm774_vm6, %v761_v24, %v763_v25 }
  0xdb   : > { %1245 = vmatprep.subr.bf16.mxu1 %v778_v27 }
  0xdc   : > { %1246 = vmatpush1.bf16.msra.mxu1 %v777_v26  ;;  %v765_v28 = vpop.permute.xlu0 %764 }
  0xdd   : > { %v779_v29 = vsel %vm774_vm6, %v763_v25, %v765_v28  ;;  %v2623_v30 = vpop.permute.xlu1 %766 }
  0xde   : > { %v780_v31 = vsel %vm774_vm6, %v765_v28, %v2623_v30 }
  0xdf   : > { %1288 = vmatprep.subr.bf16.mxu0 %v780_v31 }
  0xe0   : > { %1289 = vmatpush1.bf16.msra.mxu0 %v779_v29  ;;  %v859_v32 = vpop.permute.xlu0 %858 }
  0xe1   : > { %v861_v34 = vpop.permute.xlu1 %860  ;;  %v875_v35 = vsel %vm872_vm7, %v2550_v38, %v859_v32 }
  0xe2   : > { %v876_v33 = vsel %vm872_vm7, %v859_v32, %v861_v34 }
  0xe3   : > { %1247 = vmatprep.subr.bf16.mxu1 %v876_v33 }
  0xe4   : > { %1248 = vmatpush1.bf16.msra.mxu1 %v875_v35  ;;  %v863_v36 = vpop.permute.xlu0 %862 }
  0xe5   : > { %v877_v37 = vsel %vm872_vm7, %v861_v34, %v863_v36  ;;  %v2631_v39 = vpop.permute.xlu1 %864 }
  0xe6   : > { %v878_v40 = vsel %vm872_vm7, %v863_v36, %v2631_v39 }
  0xe7   : > { %1290 = vmatprep.subr.bf16.mxu0 %v878_v40 }
  0xe8   : > { %1291 = vmatpush1.bf16.msra.mxu0 %v877_v37  ;;  %v957_v41 = vpop.permute.xlu0 %956 }
  0xe9   : > { %v959_v42 = vpop.permute.xlu1 %958  ;;  %v973_v44 = vsel %vm970_vm8, %v2559_v43, %v957_v41 }
  0xea   : > { %v974_v38 = vsel %vm970_vm8, %v957_v41, %v959_v42 }
  0xeb   : > { %1249 = vmatprep.subr.bf16.mxu1 %v974_v38  ;;  %v1409_v38 = vlaneseq }
  0xec   : > { %1250 = vmatpush1.bf16.msra.mxu1 %v973_v44  ;;  %v961_v45 = vpop.permute.xlu0 %960 }
  0xed   : > { %v975_v46 = vsel %vm970_vm8, %v959_v42, %v961_v45  ;;  %v2639_v47 = vpop.permute.xlu1 %962 }
  0xee   : > { %v976_v49 = vsel %vm970_vm8, %v961_v45, %v2639_v47  ;;  %v2703_v45 = vshrl.u32 %v1409_v38, 7 }
  0xef   : > { %1292 = vmatprep.subr.bf16.mxu0 %v976_v49 }
  0xf0   : > { %1293 = vmatpush1.bf16.msra.mxu0 %v975_v46  ;;  %v1055_v50 = vpop.permute.xlu0 %1054  ;;  %v1411_v46 = vsub.s32 0, %v2703_v45  ;;  %v1415_v49 = vsub.s32 1, %v2703_v45 }
  0xf1   : > { %v1057_v51 = vpop.permute.xlu1 %1056  ;;  %v1071_v43 = vsel %vm1068_vm9, %v2572_v48, %v1055_v50 }
  0xf2   : > { %v1072_v53 = vsel %vm1068_vm9, %v1055_v50, %v1057_v51 }
  0xf3   : > { %1251 = vmatprep.subr.bf16.mxu1 %v1072_v53 }
  0xf4   : > { %1252 = vmatpush1.bf16.msra.mxu1 %v1071_v43  ;;  %v1059_v54 = vpop.permute.xlu0 %1058 }
  0xf5   : > { %v1073_v55 = vsel %vm1068_vm9, %v1057_v51, %v1059_v54  ;;  %v2647_v56 = vpop.permute.xlu1 %1060  ;;  %1321 = vmatprep.subr.bf16.mxu1 %v2479_v9 }
  0xf6   : > { %v1074_v57 = vsel %vm1068_vm9, %v1059_v54, %v2647_v56 }
  0xf7   : > { %1268 = vmatmul.mubr.bf16.vlgmr.msra.gmra.mrb[0].mxu1 %v2580_v52  ;;  %1294 = vmatprep.subr.bf16.mxu0 %v1074_v57 }
  0xf8   : > { %1295 = vmatpush1.bf16.msra.mxu0 %v1073_v55  ;;  %1322 = vmatpush1.bf16.msra.mxu1 %v2418_v8  ;;  %v377_v48 = vpop.permute.xlu0 %376 }
  0xf9   : > { %v389_v60 = vsel %vm382_vm2, %v2591_v59, %v377_v48  ;;  %v379_v61 = vpop.permute.xlu1 %378  ;;  %1364 = vmatprep.subr.bf16.mxu0 %v2312_v62  ;;  %2182 = vmatprep.mubr.msk.bf16.mxu1 %vm1188_vm1, %v2395_v5 }
  0xfa   : > { %v390_v9 = vsel %vm382_vm2, %v377_v48, %v379_v61 }
  0xfb   : > { %1311 = vmatmul.mubr.bf16.vlgmr.msra.gmra.mrb[4].mxu0 %v2580_v52  ;;  %1323 = vmatprep.subr.bf16.mxu1 %v390_v9 }
  0xfc   : > { %1324 = vmatpush1.bf16.msra.mxu1 %v389_v60  ;;  %v475_v63 = vpop.permute.xlu0 %474  ;;  %1365 = vmatpush1.bf16.msra.mxu0 %v2288_v58 }
  0xfd   : > { %v487_v8 = vsel %vm480_vm3, %v2599_v3, %v475_v63  ;;  %v477_v0 = vpop.permute.xlu1 %476  ;;  %1366 = vmatprep.subr.bf16.mxu0 %v2312_v62  ;;  %2183 = vmatprep.mubr.msk.bf16.mxu0 %vm1188_vm1, %v2395_v5 }
  0xfe   : > { %v488_v59 = vsel %vm480_vm3, %v475_v63, %v477_v0 }
  0xff   : > { %1325 = vmatprep.subr.bf16.mxu1 %v488_v59 }
 0x100   : > { %1326 = vmatpush1.bf16.msra.mxu1 %v487_v8  ;;  %v381_v1 = vpop.permute.xlu0 %380 }
 0x101   : > { %v391_v2 = vsel %vm382_vm2, %v379_v61, %v381_v1  ;;  %v573_v4 = vpop.permute.xlu1 %572 }
 0x102   : > { %1367 = vmatpush1.bf16.msra.mxu0 %v391_v2  ;;  %v585_v10 = vsel %vm578_vm4, %v2607_v14, %v573_v4  ;;  %v1419_v2 = vsub.s32 2, %v2703_v45 }
 0x103   : > { %1368 = vmatprep.subr.bf16.mxu0 %v2312_v62 }
 0x104   : > { %v575_v6 = vpop.permute.xlu0 %574 }
 0x105   : > { %v479_v7 = vpop.permute.xlu1 %478  ;;  %v586_v3 = vsel %vm578_vm4, %v573_v4, %v575_v6  ;;  %v1423_v4 = vsub.s32 3, %v2703_v45 }
 0x106   : > { %v489_v5 = vsel %vm480_vm3, %v477_v0, %v479_v7  ;;  %1327 = vmatprep.subr.bf16.mxu1 %v586_v3  ;;  %v1427_v3 = vsub.s32 4, %v2703_v45 }
 0x107   : > { %1369 = vmatpush1.bf16.msra.mxu0 %v489_v5  ;;  %1328 = vmatpush1.bf16.msra.mxu1 %v585_v10  ;;  %v1431_v10 = vsub.s32 5, %v2703_v45 }
 0x108   : > { %v671_v11 = vpop.permute.xlu0 %670  ;;  %1370 = vmatprep.subr.bf16.mxu0 %v2312_v62 }
 0x109   : > { %v683_v12 = vsel %vm676_vm5, %v2615_v22, %v671_v11  ;;  %v673_v13 = vpop.permute.xlu1 %672 }
 0x10a   : > { %v684_v15 = vsel %vm676_vm5, %v671_v11, %v673_v13 }
 0x10b   : > { %1329 = vmatprep.subr.bf16.mxu1 %v684_v15 }
 0x10c   : > { %1330 = vmatpush1.bf16.msra.mxu1 %v683_v12  ;;  %v577_v16 = vpop.permute.xlu0 %576 }
 0x10d   : > { %v587_v17 = vsel %vm578_vm4, %v575_v6, %v577_v16  ;;  %v769_v14 = vpop.permute.xlu1 %768 }
 0x10e   : > { %1371 = vmatpush1.bf16.msra.mxu0 %v587_v17  ;;  %v781_v21 = vsel %vm774_vm6, %v2623_v30, %v769_v14 }
 0x10f   : > { %1372 = vmatprep.subr.bf16.mxu0 %v2312_v62 }
 0x110   : > { %v771_v18 = vpop.permute.xlu0 %770 }
 0x111   : > { %v675_v19 = vpop.permute.xlu1 %674  ;;  %v782_v20 = vsel %vm774_vm6, %v769_v14, %v771_v18 }
 0x112   : > { %v685_v22 = vsel %vm676_vm5, %v673_v13, %v675_v19  ;;  %1331 = vmatprep.subr.bf16.mxu1 %v782_v20 }
 0x113   : > { %1373 = vmatpush1.bf16.msra.mxu0 %v685_v22  ;;  %1332 = vmatpush1.bf16.msra.mxu1 %v781_v21 }
 0x114   : > { %v867_v23 = vpop.permute.xlu0 %866  ;;  %1374 = vmatprep.subr.bf16.mxu0 %v2312_v62 }
 0x115   : > { %v879_v24 = vsel %vm872_vm7, %v2631_v39, %v867_v23  ;;  %v869_v25 = vpop.permute.xlu1 %868 }
 0x116   : > { %v880_v26 = vsel %vm872_vm7, %v867_v23, %v869_v25 }
 0x117   : > { %1333 = vmatprep.subr.bf16.mxu1 %v880_v26 }
 0x118   : > { %1334 = vmatpush1.bf16.msra.mxu1 %v879_v24  ;;  %v773_v27 = vpop.permute.xlu0 %772 }
 0x119   : > { %v783_v28 = vsel %vm774_vm6, %v771_v18, %v773_v27  ;;  %v965_v29 = vpop.permute.xlu1 %964 }
 0x11a   : > { %1375 = vmatpush1.bf16.msra.mxu0 %v783_v28  ;;  %v977_v34 = vsel %vm970_vm8, %v2639_v47, %v965_v29  ;;  %v2709_v47 = vld [vmem:[%s3275_s4] sm:$0xff] }
 0x11b   : > { %1376 = vmatprep.subr.bf16.mxu0 %v2312_v62  ;;  %v1412_v50 = vrot.slane %v2709_v47, %v1411_v46  ;;  %v1416_v51 = vrot.slane %v2709_v47, %v1415_v49  ;;  %v1420_v6 = vrot.slane %v2709_v47, %v1419_v2  ;;  %v1424_v7 = vrot.slane %v2709_v47, %v1423_v4 }
 0x11c   : > { %v967_v30 = vpop.permute.xlu0 %966  ;;  %v1428_v17 = vrot.slane %v2709_v47, %v1427_v3  ;;  %v1432_v14 = vrot.slane %v2709_v47, %v1431_v10 }
 0x11d   : > { %v871_v31 = vpop.permute.xlu1 %870  ;;  %v978_v32 = vsel %vm970_vm8, %v965_v29, %v967_v30 }
 0x11e   : > { %v881_v35 = vsel %vm872_vm7, %v869_v25, %v871_v31  ;;  %1335 = vmatprep.subr.bf16.mxu1 %v978_v32 }
 0x11f   : > { %1377 = vmatpush1.bf16.msra.mxu0 %v881_v35  ;;  %1336 = vmatpush1.bf16.msra.mxu1 %v977_v34 }
 0x120   : > { %v1063_v33 = vpop.permute.xlu0 %1062  ;;  %1378 = vmatprep.subr.bf16.mxu0 %v2312_v62 }
 0x121   : > { %v1075_v36 = vsel %vm1068_vm9, %v2647_v56, %v1063_v33  ;;  %v1065_v37 = vpop.permute.xlu1 %1064 }
 0x122   : > { %v1076_v39 = vsel %vm1068_vm9, %v1063_v33, %v1065_v37 }
 0x123   : > { %1337 = vmatprep.subr.bf16.mxu1 %v1076_v39 }
 0x124   : > { %1338 = vmatpush1.bf16.msra.mxu1 %v1075_v36  ;;  %v969_v40 = vpop.permute.xlu0 %968 }
 0x125   : > { %v979_v41 = vsel %vm970_vm8, %v967_v30, %v969_v40  ;;  %v1067_v42 = vpop.permute.xlu1 %1066 }
 0x126   : > { %1379 = vmatpush1.bf16.msra.mxu0 %v979_v41  ;;  %v1077_v44 = vsel %vm1068_vm9, %v1065_v37, %v1067_v42 }
 0x127   : > { %1354 = vmatmul.mubr.bf16.vlgmr.msra.gmra.mrb[4].mxu1 %v2580_v52  ;;  %1380 = vmatprep.subr.bf16.mxu0 %v2312_v62 }
 0x12a   : > { %1381 = vmatpush1.bf16.msra.mxu0 %v1077_v44 }
 0x12d   : > { %1397 = vmatmul.mubr.bf16.vlgmr.msra.gmra.mrb[8].mxu0 %v2580_v52 }
 0x18d   : > { %v1226_v43 = vpop.f32.mrb[0].mxu0 }
 0x18e   : > { %v1454_v53 = vmul.f32 %v1412_v50, %v1226_v43  ;;  %v1228_v52 = vpop.f32.mrb[1].mxu0 }
 0x18f   : > { %v1455_v54 = vmul.f32 %v1416_v51, %v1228_v52  ;;  %v2219_v55 = vpack.c.bf16 %v1228_v52, %v1226_v43  ;;  %v1230_v56 = vpop.f32.mrb[2].mxu0 }
 0x190   : > { %v1501_v57 = vmul.f32 %v1454_v53, %v1226_v43  ;;  %v1463_v48 = vmul.f32 %v1412_v50, %v1230_v56  ;;  %v1232_v58 = vpop.f32.mrb[3].mxu0 }
 0x191   : > { %v1474_v60 = vadd.f32 %v1455_v54, %v1454_v53  ;;  %v1502_v61 = vmul.f32 %v1455_v54, %v1228_v52  ;;  %1602 = vst [vmem:[%s2718_s23] sm:$0xff] %v2219_v55  ;;  %v1464_v62 = vmul.f32 %v1416_v51, %v1232_v58  ;;  %v2224_v9 = vpack.c.bf16 %v1232_v58, %v1230_v56 }
 0x192   : > { %v1510_v63 = vmul.f32 %v1463_v48, %v1230_v56 }
 0x193   : > { %v1519_v8 = vadd.f32 %v1502_v61, %v1501_v57  ;;  %v1484_v0 = vadd.f32 %v1464_v62, %v1463_v48  ;;  %v1511_v59 = vmul.f32 %v1464_v62, %v1232_v58  ;;  %1607 = vst [vmem:[%s2718_s23 + $0x24] sm:$0xff] %v2224_v9  ;;  %v1435_v58 = vsub.s32 6, %v2703_v45 }
 0x195   : > { %v1529_v1 = vadd.f32 %v1511_v59, %v1510_v63  ;;  %v1436_v61 = vrot.slane %v2709_v47, %v1435_v58 }
 0x1ca   : > { %v1269_v5 = vpop.f32.mrb[0].mxu1 }
 0x1cb   : > { %v1456_v11 = vmul.f32 %v1420_v6, %v1269_v5  ;;  %v1271_v12 = vpop.f32.mrb[1].mxu1 }
 0x1cc   : > { %v1457_v13 = vmul.f32 %v1424_v7, %v1271_v12  ;;  %v2220_v15 = vpack.c.bf16 %v1271_v12, %v1269_v5  ;;  %v1273_v16 = vpop.f32.mrb[2].mxu1 }
 0x1cd   : > { %v1475_v18 = vadd.f32 %v1474_v60, %v1456_v11  ;;  %v1503_v19 = vmul.f32 %v1456_v11, %v1269_v5  ;;  %v1465_v20 = vmul.f32 %v1420_v6, %v1273_v16  ;;  %v1275_v21 = vpop.f32.mrb[3].mxu1  ;;  %v1439_v60 = vsub.s32 7, %v2703_v45  ;;  %v2184_v45 = vld [vmem:[%s3275_s4 + $0x8] ss:$0 sm:$0xff] }
 0x1ce   : > { %v1504_v22 = vmul.f32 %v1457_v13, %v1271_v12  ;;  %1603 = vst [vmem:[%s2718_s23 + $0x8] sm:$0xff] %v2220_v15  ;;  %v1466_v23 = vmul.f32 %v1424_v7, %v1275_v21  ;;  %v2225_v24 = vpack.c.bf16 %v1275_v21, %v1273_v16  ;;  %v1312_v25 = vpop.f32.mrb[4].mxu0 }
 0x1cf   : > { %v1520_v26 = vadd.f32 %v1519_v8, %v1503_v19  ;;  %v1476_v27 = vadd.f32 %v1475_v18, %v1457_v13  ;;  %v1485_v28 = vadd.f32 %v1484_v0, %v1465_v20  ;;  %v1512_v29 = vmul.f32 %v1465_v20, %v1273_v16  ;;  %v1314_v30 = vpop.f32.mrb[5].mxu0 }
 0x1d0   : > { %v1513_v31 = vmul.f32 %v1466_v23, %v1275_v21  ;;  %1608 = vst [vmem:[%s2718_s23 + $0x2c] sm:$0xff] %v2225_v24  ;;  %v1458_v32 = vmul.f32 %v1428_v17, %v1312_v25  ;;  %v1459_v34 = vmul.f32 %v1432_v14, %v1314_v30  ;;  %v2221_v35 = vpack.c.bf16 %v1314_v30, %v1312_v25  ;;  %v1316_v33 = vpop.f32.mrb[6].mxu0 }
 0x1d1   : > { %v1521_v36 = vadd.f32 %v1520_v26, %v1504_v22  ;;  %v1530_v37 = vadd.f32 %v1529_v1, %v1512_v29  ;;  %v1486_v39 = vadd.f32 %v1485_v28, %v1466_v23  ;;  %v1467_v40 = vmul.f32 %v1428_v17, %v1316_v33  ;;  %v1318_v41 = vpop.f32.mrb[7].mxu0 }
 0x1d2   : > { %v1477_v42 = vadd.f32 %v1476_v27, %v1458_v32  ;;  %v1505_v44 = vmul.f32 %v1458_v32, %v1312_v25  ;;  %v1506_v38 = vmul.f32 %v1459_v34, %v1314_v30  ;;  %1604 = vst [vmem:[%s2718_s23 + $0x10] sm:$0xff] %v2221_v35  ;;  %v1468_v46 = vmul.f32 %v1432_v14, %v1318_v41 }
 0x1d3   : > { %v1531_v49 = vadd.f32 %v1530_v37, %v1513_v31  ;;  %v1487_v50 = vadd.f32 %v1486_v39, %v1467_v40  ;;  %v1514_v51 = vmul.f32 %v1467_v40, %v1316_v33  ;;  %v2226_v43 = vpack.c.bf16 %v1318_v41, %v1316_v33  ;;  %v1473_v33 = vld [vmem:[#allocation3 + $0x8] sm:$0xff]  ;;  %v1499_v39 = vld [vmem:[#allocation4] sm:$0xff] }
 0x1d4   : > { %v1522_v53 = vadd.f32 %v1521_v36, %v1505_v44  ;;  %v1478_v52 = vadd.f32 %v1477_v42, %v1459_v34  ;;  %v1515_v54 = vmul.f32 %v1468_v46, %v1318_v41  ;;  %v1440_v62 = vrot.slane %v2709_v47, %v1439_v60  ;;  %v1472_v34 = vld [vmem:[#allocation3] sm:$0xff]  ;;  %v1500_v44 = vld [vmem:[#allocation4 + $0x8] sm:$0xff] }
 0x1d5   : > { %v1532_v55 = vadd.f32 %v1531_v49, %v1514_v51  ;;  %v1488_v56 = vadd.f32 %v1487_v50, %v1468_v46  ;;  %1609 = vst [vmem:[%s2718_s23 + $0x34] sm:$0xff] %v2226_v43 }
 0x1d6   : > { %v1523_v57 = vadd.f32 %v1522_v53, %v1506_v38 }
 0x1d7   : > { %v1533_v48 = vadd.f32 %v1532_v55, %v1515_v54 }
 0x1fa   : > { %v1355_v9 = vpop.f32.mrb[4].mxu1 }
 0x1fb   : > { %v1460_v63 = vmul.f32 %v1436_v61, %v1355_v9  ;;  %v1357_v8 = vpop.f32.mrb[5].mxu1 }
 0x1fc   : > { %v1461_v0 = vmul.f32 %v1440_v62, %v1357_v8  ;;  %v2222_v59 = vpack.c.bf16 %v1357_v8, %v1355_v9  ;;  %v1359_v1 = vpop.f32.mrb[6].mxu1 }
 0x1fd   : > { %v1507_v2 = vmul.f32 %v1460_v63, %v1355_v9  ;;  %v1469_v4 = vmul.f32 %v1436_v61, %v1359_v1  ;;  %v1361_v6 = vpop.f32.mrb[7].mxu1  ;;  %v1479_v7 = vadd.f32 %v1478_v52, %v1460_v63 }
 0x1fe   : > { %v1508_v3 = vmul.f32 %v1461_v0, %v1357_v8  ;;  %1605 = vst [vmem:[%s2718_s23 + $0x18] sm:$0xff] %v2222_v59  ;;  %v1470_v10 = vmul.f32 %v1440_v62, %v1361_v6  ;;  %v2227_v5 = vpack.c.bf16 %v1361_v6, %v1359_v1 }
 0x1ff   : > { %v1516_v47 = vmul.f32 %v1469_v4, %v1359_v1  ;;  %v1480_v11 = vadd.f32 %v1479_v7, %v1461_v0  ;;  %v1489_v12 = vadd.f32 %v1488_v56, %v1469_v4  ;;  %v1524_v13 = vadd.f32 %v1523_v57, %v1507_v2 }
 0x200   : > { %v1517_v15 = vmul.f32 %v1470_v10, %v1361_v6  ;;  %1610 = vst [vmem:[%s2718_s23 + $0x3c] sm:$0xff] %v2227_v5  ;;  %v1398_v16 = vpop.f32.mrb[8].mxu0 }
 0x201   : > { %v2223_v17 = vpack.c.bf16 %v1398_v16, %v1398_v16  ;;  %v1400_v14 = vpop.f32.mrb[9].mxu0  ;;  %v1462_v18 = vmul.f32 %v2184_v45, %v1398_v16  ;;  %v1490_v19 = vadd.f32 %v1489_v12, %v1470_v10  ;;  %v1525_v20 = vadd.f32 %v1524_v13, %v1508_v3 }
 0x202   : > { %v1401_v21 = vpop.f32.mrb[10].mxu0  ;;  %v1534_v22 = vadd.f32 %v1533_v48, %v1516_v47 }
 0x203   : > { %1606 = vst [vmem:[%s2718_s23 + $0x20] sm:$0xf] %v2223_v17  ;;  %v2228_v23 = vpack.c.bf16 %v1401_v21, %v1401_v21  ;;  %v1403_v24 = vpop.f32.mrb[11].mxu0  ;;  %v1481_v25 = vadd.f32 %v1480_v11, %v1462_v18  ;;  %v1471_v26 = vmul.f32 %v2184_v45, %v1401_v21  ;;  %v1509_v27 = vmul.f32 %v1462_v18, %v1398_v16 }
 0x204   : > { %v1535_v28 = vadd.f32 %v1534_v22, %v1517_v15 }
 0x205   : > { %1611 = vst [vmem:[%s2718_s23 + $0x44] sm:$0xf] %v2228_v23  ;;  %1482 = vadd.xlane.f32.xlu0 %v1481_v25  ;;  %v1491_v29 = vadd.f32 %v1490_v19, %v1471_v26  ;;  %v1526_v30 = vadd.f32 %v1525_v20, %v1509_v27  ;;  %v1518_v31 = vmul.f32 %v1471_v26, %v1401_v21 }
 0x207   : > { %1492 = vadd.xlane.f32.xlu1 %v1491_v29  ;;  %v1536_v32 = vadd.f32 %v1535_v28, %v1518_v31 }
 0x209   : > { %1527 = vadd.xlane.f32.xlu0 %v1526_v30 }
 0x20d   : > { %1537 = vadd.xlane.f32.xlu0 %v1536_v32 }
 0x292   : > { %v1483_v35 = vpop.xlane.xlu0 %1482 }
 0x293   : > { %v1494_v36 = vadd.f32 %v1483_v35, %v1472_v34 }
 0x294   : > { %v1493_v37 = vpop.xlane.xlu1 %1492 }
 0x295   : > { %1497 = vst.msk [vmem:[#allocation3] sm:$0xff] %vm1496_vm10, %v1494_v36  ;;  %v1495_v40 = vadd.f32 %v1493_v37, %v1473_v33 }
 0x296   : > { %v1528_v41 = vpop.xlane.xlu0 %1527 }
 0x297   : > { %1498 = vst.msk [vmem:[#allocation3 + $0x8] sm:$0xff] %vm1496_vm10, %v1495_v40  ;;  %v1539_v42 = vadd.f32 %v1528_v41, %v1499_v39  ;;  %1615 = sbr.rel (%p2196_p5) target bundleno = 881 (0x371), region = 52 }
 0x299   : > { %1541 = vst.msk [vmem:[#allocation4] sm:$0xff] %vm1496_vm10, %v1539_v42 }
 0x29a   : > { %v1538_v38 = vpop.xlane.xlu0 %1537 }
 0x29b   : > { %v1540_v46 = vadd.f32 %v1538_v38, %v1500_v44 }
 0x29d   : > { %1542 = vst.msk [vmem:[#allocation4 + $0x8] sm:$0xff] %vm1496_vm10, %v1540_v46 }
 0x29e   : > { %v1616_v49 = vld [vmem:[#allocation3] sm:$0xff]  ;;  %v2313_v51 = vmov 0   ;;  %v1617_v52 = vld [vmem:[#allocation3 + $0x8] sm:$0xff]  ;;  %v2771_v12 = vld [vmem:[%s3277_s6 + $0x10] sm:$0xff] }
 0x29f   : > { %2289 = vset.pattern.permute.xlu0 %v2313_v51  ;;  %v1618_v43 = vmul.f32 0.00048828125, %v1616_v49  ;;  %2290 = vset.pattern.permute.xlu1 %v2313_v51  ;;  %v1619_v55 = vmul.f32 0.00048828125, %v1617_v52  ;;  %v1630_v8 = vld [vmem:[%s3273_s2] sm:$0xff]  ;;  %v1631_v0 = vld [vmem:[%s3273_s2 + $0x8] sm:$0xff]  ;;  %v2776_v13 = vld [vmem:[%s3277_s6 + $0x18] sm:$0xff]  ;;  %v1668_v23 = vunpack.c.l.bf16 %v2771_v12  ;;  %v1669_v24 = vunpack.c.h.bf16 %v2771_v12 }
 0x2a0   : > { %v1620_v50 = vld [vmem:[#allocation4] sm:$0xff]  ;;  %v1638_v6 = vld [vmem:[%s3274_s3] sm:$0xff]  ;;  %v1639_v3 = vld [vmem:[%s3274_s3 + $0x8] sm:$0xff]  ;;  %v1670_v25 = vunpack.c.l.bf16 %v2776_v13  ;;  %v1671_v26 = vunpack.c.h.bf16 %v2776_v13 }
 0x2a1   : > { %v1622_v53 = vmul.f32 0.00048828125, %v1620_v50  ;;  %v1624_v57 = vmul.f32 %v1618_v43, %v1618_v43  ;;  %v1625_v48 = vmul.f32 %v1619_v55, %v1619_v55  ;;  %v2761_v47 = vld [vmem:[%s3277_s6] sm:$0xff]  ;;  %v2766_v11 = vld [vmem:[%s3277_s6 + $0x8] sm:$0xff]  ;;  %v2791_v17 = vld [vmem:[%s3277_s6 + $0x50] sm:$0xff] }
 0x2a2   : > { %v2781_v15 = vld [vmem:[%s3277_s6 + $0x20] ss:$72 sps:$4 sm:$0xff]   ;;  %v2796_v14 = vld [vmem:[%s3277_s6 + $0x58] sm:$0xff]  ;;  %v1664_v19 = vunpack.c.l.bf16 %v2761_v47  ;;  %v1665_v20 = vunpack.c.h.bf16 %v2761_v47  ;;  %v1666_v21 = vunpack.c.l.bf16 %v2766_v11  ;;  %v1667_v22 = vunpack.c.h.bf16 %v2766_v11  ;;  %v2823_v32 = vld [vmem:[%s3277_s6 + $0x2c] sm:$0xff] }
 0x2a3   : > { %v1626_v58 = vsub.f32 %v1622_v53, %v1624_v57  ;;  %v2786_v16 = vld [vmem:[%s3277_s6 + $0x48] sm:$0xff]  ;;  %v2801_v18 = vld [vmem:[%s3277_s6 + $0x60] sm:$0xff]  ;;  %v1672_v28 = vunpack.c.l.bf16 %v2781_v15  ;;  %v1684_v31 = vunpack.c.l.bf16 %v2791_v17  ;;  %v2828_v34 = vld [vmem:[%s3277_s6 + $0x34] sm:$0xff]  ;;  %v1685_v35 = vunpack.c.h.bf16 %v2791_v17 }
 0x2a4   : > { %v1621_v54 = vld [vmem:[#allocation4 + $0x8] sm:$0xff]  ;;  %v2814_v27 = vld [vmem:[%s3277_s6 + $0x24] sm:$0xff]  ;;  %v1682_v29 = vunpack.c.l.bf16 %v2786_v16  ;;  %v1683_v30 = vunpack.c.h.bf16 %v2786_v16  ;;  %v1686_v33 = vunpack.c.l.bf16 %v2796_v14  ;;  %v1687_v36 = vunpack.c.h.bf16 %v2796_v14  ;;  %v2847_v41 = vld [vmem:[%s3277_s6 + $0x6c] sm:$0xff] }
 0x2a5   : > { %v1623_v56 = vmul.f32 0.00048828125, %v1621_v54  ;;  %v1628_v61 = vmax.f32 %v1626_v58, 0.0  ;;  %v1688_v37 = vunpack.c.l.bf16 %v2801_v18  ;;  %v2837_v39 = vld [vmem:[%s3277_s6 + $0x3c] sm:$0xff]  ;;  %v2842_v40 = vld [vmem:[%s3277_s6 + $0x44] ss:$72 sps:$4 sm:$0xff]   ;;  %v1689_v42 = vunpack.c.h.bf16 %v2801_v18  ;;  %v2854_v38 = vld [vmem:[%s3277_s6 + $0x74] sm:$0xff] }
 0x2a6   : > { %v2859_v46 = vld [vmem:[%s3277_s6 + $0x7c] sm:$0xff]  ;;  %v2866_v51 = vld [vmem:[%s3277_s6 + $0x84] sm:$0xff]  ;;  %v3308_v14 = vunpack.c.l.bf16 %v2823_v32  ;;  %v3310_v18 = vunpack.c.l.bf16 %v2828_v34 }
 0x2a7   : > { %v1627_v60 = vsub.f32 %v1623_v56, %v1625_v48  ;;  %v1632_v9 = vadd.f32 1e-05, %v1628_v61  ;;  %v2879_v58 = vld [vmem:[%s3276_s5] sm:$0xff]  ;;  %v3323_v57 = vunpack.c.h.bf16 %v2866_v51 }
 0x2a8   : > { %v2940_v61 = vld [vmem:[%s3276_s5 + $0x24] sm:$0xff]  ;;  %v2985_v48 = vld [vmem:[%s3276_s5 + $0x7c] sm:$0xff] }
 0x2a9   : > { %v1629_v62 = vmax.f32 %v1627_v60, 0.0  ;;  %2291 = vrsqrt.f32 %v1632_v9  ;;  %v2884_v60 = vld [vmem:[%s3276_s5 + $0x8] sm:$0xff]  ;;  %3296 = vst [vmem:[#allocation5_spill] sm:$0xff] %v2940_v61  ;;  %3303 = vst [vmem:[#allocation12_spill] sm:$0xff] %v2985_v48 }
 0x2aa   : > { %v2973_v9 = vld [vmem:[%s3276_s5 + $0x6c] sm:$0xff] }
 0x2ab   : > { %v1633_v63 = vadd.f32 1e-05, %v1629_v62  ;;  %v2954_v62 = vld [vmem:[%s3276_s5 + $0x34] sm:$0xff]  ;;  %3301 = vst [vmem:[#allocation10_spill] sm:$0xff] %v2973_v9 }
 0x2ac   : > { %3298 = vst [vmem:[#allocation7_spill] sm:$0xff] %v2954_v62 }
 0x2ad   : > { %2293 = vrsqrt.f32 %v1633_v63  ;;  %v2949_v63 = vld [vmem:[%s3276_s5 + $0x2c] sm:$0xff] }
 0x2ae   : > { %3297 = vst [vmem:[#allocation6_spill] sm:$0xff] %v2949_v63 }
 0x2b3   : > { %v2292_v59 = vpop.eup %2291 }
 0x2b4   : > { %v1636_v2 = vmul.f32 %v2292_v59, %v1630_v8  ;;  %v2893_v8 = vld [vmem:[%s3276_s5 + $0x10] sm:$0xff]  ;;  %v2968_v59 = vld [vmem:[%s3276_s5 + $0x44] ss:$72 sps:$4 sm:$0xff]  }
 0x2b5   : > { %3300 = vst [vmem:[#allocation9_spill] sm:$0xff] %v2968_v59 }
 0x2b6   : > { %1702 = vperm.xlu0 %2289, %v1636_v2   ;;  %v1640_v7 = vmul.f32 %v1636_v2, %v1618_v43  ;;  %v2980_v2 = vld [vmem:[%s3276_s5 + $0x74] sm:$0xff] }
 0x2b7   : > { %v2294_v1 = vpop.eup %2293  ;;  %3302 = vst [vmem:[#allocation11_spill] sm:$0xff] %v2980_v2 }
 0x2b8   : > { %v1637_v4 = vmul.f32 %v2294_v1, %v1631_v0  ;;  %v1642_v5 = vsub.f32 %v1638_v6, %v1640_v7  ;;  %v2898_v0 = vld [vmem:[%s3276_s5 + $0x18] sm:$0xff]  ;;  %v2907_v6 = vld [vmem:[%s3276_s5 + $0x20] ss:$72 sps:$4 sm:$0xff]  }
 0x2b9   : > { %v2912_v7 = vld [vmem:[%s3276_s5 + $0x48] sm:$0xff]  ;;  %v2963_v1 = vld [vmem:[%s3276_s5 + $0x3c] sm:$0xff] }
 0x2ba   : > { %v1641_v10 = vmul.f32 %v1637_v4, %v1619_v55  ;;  %1707 = vperm.xlu0 %2289, %v1637_v4   ;;  %1748 = vperm.xlu1 %2290, %v1642_v5   ;;  %v2927_v5 = vld [vmem:[%s3276_s5 + $0x60] sm:$0xff]  ;;  %3299 = vst [vmem:[#allocation8_spill] sm:$0xff] %v2963_v1 }
 0x2bc   : > { %v1643_v45 = vsub.f32 %v1639_v3, %v1641_v10  ;;  %v2917_v3 = vld [vmem:[%s3276_s5 + $0x50] sm:$0xff]  ;;  %v2922_v10 = vld [vmem:[%s3276_s5 + $0x58] sm:$0xff] }
 0x2be   : > { %1753 = vperm.xlu1 %2290, %v1643_v45   ;;  %v2992_v45 = vld [vmem:[%s3276_s5 + $0x84] sm:$0xff] }
 0x2bf   : > { %3304 = vst [vmem:[#allocation13_spill] sm:$0xff] %v2992_v45 }
 0x335   : > { %v1703_v44 = vpop.permute.xlu0 %1702 }
 0x336   : > { %v1710_v56 = vmul.f32 %v1703_v44, %v1664_v19  ;;  %v1711_v50 = vmul.f32 %v1703_v44, %v1665_v20  ;;  %v1712_v4 = vmul.f32 %v1703_v44, %v1666_v21  ;;  %v1713_v55 = vmul.f32 %v1703_v44, %v1667_v22 }
 0x337   : > { %v1714_v54 = vmul.f32 %v1703_v44, %v1668_v23  ;;  %v1715_v53 = vmul.f32 %v1703_v44, %v1669_v24  ;;  %v1716_v43 = vmul.f32 %v1703_v44, %v1670_v25  ;;  %v1717_v19 = vmul.f32 %v1703_v44, %v1671_v26 }
 0x338   : > { %v1718_v47 = vmul.f32 %v1703_v44, %v1672_v28  ;;  %v1728_v20 = vmul.f32 %v1703_v44, %v1682_v29  ;;  %v1729_v11 = vmul.f32 %v1703_v44, %v1683_v30  ;;  %v1730_v21 = vmul.f32 %v1703_v44, %v1684_v31 }
 0x339   : > { %v1731_v12 = vmul.f32 %v1703_v44, %v1685_v35  ;;  %v1732_v22 = vmul.f32 %v1703_v44, %v1686_v33  ;;  %v1733_v13 = vmul.f32 %v1703_v44, %v1687_v36  ;;  %v1734_v23 = vmul.f32 %v1703_v44, %v1688_v37  ;;  %v1708_v24 = vpop.permute.xlu0 %1707 }
 0x33a   : > { %v1735_v16 = vmul.f32 %v1703_v44, %v1689_v42  ;;  %v3305_v25 = vunpack.c.h.bf16 %v2781_v15  ;;  %v3306_v28 = vunpack.c.l.bf16 %v2814_v27  ;;  %v3307_v29 = vunpack.c.h.bf16 %v2814_v27 }
 0x33b   : > { %v3056_v31 = vmul.f32 %v1708_v24, %v3308_v14  ;;  %v3309_v35 = vunpack.c.h.bf16 %v2823_v32  ;;  %v3064_v15 = vmul.f32 %v1708_v24, %v3310_v18  ;;  %v3311_v36 = vunpack.c.h.bf16 %v2828_v34 }
 0x33c   : > { %v1736_v26 = vmul.f32 %v1703_v44, %v3305_v25  ;;  %v3048_v17 = vmul.f32 %v1708_v24, %v3306_v28  ;;  %v3052_v30 = vmul.f32 %v1708_v24, %v3307_v29  ;;  %v3312_v27 = vunpack.c.l.bf16 %v2837_v39 }
 0x33d   : > { %v3060_v33 = vmul.f32 %v1708_v24, %v3309_v35  ;;  %v3068_v37 = vmul.f32 %v1708_v24, %v3311_v36  ;;  %v3313_v44 = vunpack.c.h.bf16 %v2837_v39  ;;  %v3314_v32 = vunpack.c.l.bf16 %v2842_v40  ;;  %v1749_v35 = vpop.permute.xlu1 %1748 }
 0x33e   : > { %v3072_v42 = vmul.f32 %v1708_v24, %v3312_v27  ;;  %v3315_v29 = vunpack.c.l.bf16 %v2847_v41  ;;  %v3316_v34 = vunpack.c.h.bf16 %v2847_v41  ;;  %v3317_v36 = vunpack.c.l.bf16 %v2854_v38 }
 0x33f   : > { %v3076_v25 = vmul.f32 %v1708_v24, %v3313_v44  ;;  %v3080_v28 = vmul.f32 %v1708_v24, %v3314_v32  ;;  %v3318_v39 = vunpack.c.h.bf16 %v2854_v38  ;;  %v3319_v32 = vunpack.c.l.bf16 %v2859_v46 }
 0x340   : > { %v3084_v14 = vmul.f32 %v1708_v24, %v3315_v29  ;;  %v3088_v18 = vmul.f32 %v1708_v24, %v3316_v34  ;;  %v3092_v27 = vmul.f32 %v1708_v24, %v3317_v36  ;;  %v3320_v29 = vunpack.c.h.bf16 %v2859_v46 }
 0x341   : > { %v3096_v44 = vmul.f32 %v1708_v24, %v3318_v39  ;;  %v3100_v52 = vmul.f32 %v1708_v24, %v3319_v32  ;;  %v3321_v41 = vunpack.c.l.bf16 %v2866_v51  ;;  %v3112_v36 = vmul.f32 %v1708_v24, %v3323_v57 }
 0x342   : > { %v3104_v49 = vmul.f32 %v1708_v24, %v3320_v29  ;;  %v3325_v38 = vunpack.c.h.bf16 %v2842_v40  ;;  %v1756_v45 = vadd.f32 %v1749_v35, %v1710_v56  ;;  %v1757_v48 = vadd.f32 %v1749_v35, %v1711_v50 }
 0x343   : > { %v3108_v34 = vmul.f32 %v1708_v24, %v3321_v41  ;;  %3324 = vst [vmem:[#allocation15_spill] sm:$0xff] %v3112_v36  ;;  %v1758_v32 = vadd.f32 %v1749_v35, %v1712_v4  ;;  %v1759_v2 = vadd.f32 %v1749_v35, %v1713_v55  ;;  %v1760_v9 = vadd.f32 %v1749_v35, %v1714_v54 }
 0x344   : > { %v3116_v39 = vmul.f32 %v1708_v24, %v3325_v38  ;;  %v1761_v46 = vadd.f32 %v1749_v35, %v1715_v53  ;;  %v1762_v29 = vadd.f32 %v1749_v35, %v1716_v43  ;;  %v1763_v59 = vadd.f32 %v1749_v35, %v1717_v19 }
 0x345   : > { %3322 = vst [vmem:[#allocation14_spill] sm:$0xff] %v3108_v34  ;;  %v1764_v1 = vadd.f32 %v1749_v35, %v1718_v47  ;;  %v1774_v62 = vadd.f32 %v1749_v35, %v1728_v20  ;;  %v1775_v41 = vadd.f32 %v1749_v35, %v1729_v11  ;;  %v1776_v63 = vadd.f32 %v1749_v35, %v1730_v21 }
 0x346   : > { %v1777_v61 = vadd.f32 %v1749_v35, %v1731_v12  ;;  %v1778_v51 = vadd.f32 %v1749_v35, %v1732_v22  ;;  %v1779_v57 = vadd.f32 %v1749_v35, %v1733_v13  ;;  %v1780_v36 = vadd.f32 %v1749_v35, %v1734_v23 }
 0x347   : > { %v1781_v34 = vadd.f32 %v1749_v35, %v1735_v16  ;;  %v1782_v40 = vadd.f32 %v1749_v35, %v1736_v26  ;;  %v3326_v24 = vunpack.c.l.bf16 %v2879_v58  ;;  %v3327_v50 = vunpack.c.h.bf16 %v2879_v58 }
 0x348   : > { %v3328_v53 = vunpack.c.l.bf16 %v2884_v60  ;;  %v3329_v54 = vunpack.c.h.bf16 %v2884_v60  ;;  %v3330_v19 = vunpack.c.l.bf16 %v2893_v8  ;;  %v3331_v20 = vunpack.c.h.bf16 %v2893_v8 }
 0x349   : > { %v1848_v56 = vadd.f32 %v3326_v24, %v1756_v45  ;;  %v1849_v55 = vadd.f32 %v3327_v50, %v1757_v48  ;;  %v3332_v21 = vunpack.c.l.bf16 %v2898_v0  ;;  %v3333_v45 = vunpack.c.h.bf16 %v2898_v0 }
 0x34a   : > { %v1850_v43 = vadd.f32 %v3328_v53, %v1758_v32  ;;  %v1851_v4 = vadd.f32 %v3329_v54, %v1759_v2  ;;  %v1852_v47 = vadd.f32 %v3330_v19, %v1760_v9  ;;  %v1853_v11 = vadd.f32 %v3331_v20, %v1761_v46 }
 0x34b   : > { %v1854_v12 = vadd.f32 %v3332_v21, %v1762_v29  ;;  %v1855_v22 = vadd.f32 %v3333_v45, %v1763_v59  ;;  %v3334_v48 = vunpack.c.l.bf16 %v2907_v6  ;;  %v3335_v13 = vunpack.c.l.bf16 %v2912_v7 }
 0x34c   : > { %v3336_v60 = vunpack.c.h.bf16 %v2912_v7  ;;  %v3337_v9 = vunpack.c.l.bf16 %v2917_v3  ;;  %v3338_v8 = vunpack.c.h.bf16 %v2917_v3  ;;  %v3339_v35 = vunpack.c.l.bf16 %v2922_v10 }
 0x34d   : > { %v1856_v58 = vadd.f32 %v3334_v48, %v1764_v1  ;;  %v1866_v23 = vadd.f32 %v3335_v13, %v1774_v62  ;;  %v3340_v0 = vunpack.c.h.bf16 %v2922_v10  ;;  %v3341_v1 = vunpack.c.l.bf16 %v2927_v5 }
 0x34e   : > { %v1867_v2 = vadd.f32 %v3336_v60, %v1775_v41  ;;  %v1868_v16 = vadd.f32 %v3337_v9, %v1776_v63  ;;  %v1869_v26 = vadd.f32 %v3338_v8, %v1777_v61  ;;  %v1870_v38 = vadd.f32 %v3339_v35, %v1778_v51 }
 0x34f   : > { %v1871_v59 = vadd.f32 %v3340_v0, %v1779_v57  ;;  %v1872_v32 = vadd.f32 %v3341_v1, %v1780_v36  ;;  %v3342_v62 = vunpack.c.h.bf16 %v2927_v5  ;;  %v3343_v7 = vunpack.c.h.bf16 %v2907_v6  ;;  %v3345_v0 = vld [vmem:[#allocation15_spill] sm:$0xff] }
 0x350   : > { %v1884_v41 = vmax.f32 %v1848_v56, 0.0  ;;  %v1885_v63 = vmax.f32 %v1849_v55, 0.0  ;;  %v1886_v24 = vmax.f32 %v1850_v43, 0.0  ;;  %v1887_v3 = vmax.f32 %v1851_v4, 0.0  ;;  %v1754_v56 = vpop.permute.xlu1 %1753 }
 0x351   : > { %v1873_v46 = vadd.f32 %v3342_v62, %v1781_v34  ;;  %v1874_v29 = vadd.f32 %v3343_v7, %v1782_v40  ;;  %v1888_v61 = vmax.f32 %v1852_v47, 0.0  ;;  %v1889_v50 = vmax.f32 %v1853_v11, 0.0 }
 0x352   : > { %v1890_v53 = vmax.f32 %v1854_v12, 0.0  ;;  %v1891_v51 = vmax.f32 %v1855_v22, 0.0  ;;  %v1892_v54 = vmax.f32 %v1856_v58, 0.0  ;;  %v1902_v10 = vmax.f32 %v1866_v23, 0.0 }
 0x353   : > { %v1903_v57 = vmax.f32 %v1867_v2, 0.0  ;;  %v1904_v19 = vmax.f32 %v1868_v16, 0.0  ;;  %v1905_v20 = vmax.f32 %v1869_v26, 0.0  ;;  %v1906_v36 = vmax.f32 %v1870_v38, 0.0  ;;  %v3344_v38 = vld [vmem:[#allocation14_spill] sm:$0xff] }
 0x354   : > { %v1907_v21 = vmax.f32 %v1871_v59, 0.0  ;;  %v1908_v5 = vmax.f32 %v1872_v32, 0.0  ;;  %v1909_v34 = vmax.f32 %v1873_v46, 0.0  ;;  %v1910_v45 = vmax.f32 %v1874_v29, 0.0  ;;  %v3346_v59 = vld [vmem:[#allocation5_spill] sm:$0xff]  ;;  %v3349_v32 = vld [vmem:[#allocation6_spill] sm:$0xff] }
 0x355   : > { %v2230_v6 = vpack.c.bf16 %v1885_v63, %v1884_v41  ;;  %v2231_v40 = vpack.c.bf16 %v1887_v3, %v1886_v24  ;;  %v2232_v55 = vpack.c.bf16 %v1889_v50, %v1888_v61  ;;  %v2233_v43 = vpack.c.bf16 %v1891_v51, %v1890_v53  ;;  %v3352_v46 = vld [vmem:[#allocation7_spill] sm:$0xff]  ;;  %v3355_v63 = vld [vmem:[#allocation8_spill] sm:$0xff]  ;;  %v3358_v50 = vld [vmem:[#allocation9_spill] sm:$0xff] }
 0x356   : > { %v2234_v4 = vpack.c.bf16 %v1892_v54, %v1892_v54  ;;  %v2240_v47 = vpack.c.bf16 %v1903_v57, %v1902_v10  ;;  %v2241_v11 = vpack.c.bf16 %v1905_v20, %v1904_v19  ;;  %v2242_v12 = vpack.c.bf16 %v1907_v21, %v1906_v36  ;;  %v3360_v54 = vld [vmem:[#allocation10_spill] sm:$0xff]  ;;  %v3363_v36 = vld [vmem:[#allocation11_spill] sm:$0xff] }
 0x357   : > { %v2243_v22 = vpack.c.bf16 %v1909_v34, %v1908_v5  ;;  %v2244_v48 = vpack.c.bf16 %v1910_v45, %v1910_v45  ;;  %2032 = vst [vmem:[%s3277_s6] sm:$0xff] %v2230_v6  ;;  %2033 = vst [vmem:[%s3277_s6 + $0x8] sm:$0xff] %v2231_v40  ;;  %v1765_v58 = vadd.f32 %v1754_v56, %v3048_v17  ;;  %v3354_v29 = vunpack.c.h.bf16 %v3352_v46  ;;  %v3366_v6 = vld [vmem:[#allocation12_spill] sm:$0xff] }
 0x358   : > { %2034 = vst [vmem:[%s3277_s6 + $0x10] sm:$0xff] %v2232_v55  ;;  %2035 = vst [vmem:[%s3277_s6 + $0x18] sm:$0xff] %v2233_v43  ;;  %v1766_v13 = vadd.f32 %v1754_v56, %v3052_v30  ;;  %v1767_v23 = vadd.f32 %v1754_v56, %v3056_v31  ;;  %v1768_v60 = vadd.f32 %v1754_v56, %v3060_v33  ;;  %v3357_v3 = vunpack.c.h.bf16 %v3355_v63 }
 0x359   : > { %2036 = vst [vmem:[%s3277_s6 + $0x20] sm:$0xf] %v2234_v4  ;;  %2042 = vst [vmem:[%s3277_s6 + $0x48] sm:$0xff] %v2240_v47  ;;  %v1769_v17 = vadd.f32 %v1754_v56, %v3064_v15  ;;  %v1770_v30 = vadd.f32 %v1754_v56, %v3068_v37  ;;  %v1771_v31 = vadd.f32 %v1754_v56, %v3072_v42  ;;  %v3359_v53 = vunpack.c.l.bf16 %v3358_v50  ;;  %v3369_v4 = vld [vmem:[#allocation13_spill] sm:$0xff] }
 0x35a   : > { %2043 = vst [vmem:[%s3277_s6 + $0x50] sm:$0xff] %v2241_v11  ;;  %2044 = vst [vmem:[%s3277_s6 + $0x58] sm:$0xff] %v2242_v12  ;;  %v1772_v33 = vadd.f32 %v1754_v56, %v3076_v25  ;;  %v1773_v2 = vadd.f32 %v1754_v56, %v3080_v28  ;;  %v1783_v9 = vadd.f32 %v1754_v56, %v3084_v14  ;;  %v3347_v28 = vunpack.c.l.bf16 %v3346_v59 }
 0x35b   : > { %2045 = vst [vmem:[%s3277_s6 + $0x60] sm:$0xff] %v2243_v22  ;;  %2046 = vst [vmem:[%s3277_s6 + $0x68] sm:$0xf] %v2244_v48  ;;  %v1784_v16 = vadd.f32 %v1754_v56, %v3088_v18  ;;  %v1785_v8 = vadd.f32 %v1754_v56, %v3092_v27  ;;  %v1786_v26 = vadd.f32 %v1754_v56, %v3096_v44  ;;  %v3348_v14 = vunpack.c.h.bf16 %v3346_v59 }
 0x35c   : > { %v1787_v35 = vadd.f32 %v1754_v56, %v3100_v52  ;;  %v1788_v15 = vadd.f32 %v1754_v56, %v3104_v49  ;;  %v1789_v37 = vadd.f32 %v1754_v56, %v3344_v38  ;;  %v1790_v42 = vadd.f32 %v1754_v56, %v3345_v0 }
 0x35d   : > { %v1791_v25 = vadd.f32 %v1754_v56, %v3116_v39  ;;  %v1857_v1 = vadd.f32 %v3347_v28, %v1765_v58  ;;  %v1858_v18 = vadd.f32 %v3348_v14, %v1766_v13  ;;  %v3350_v27 = vunpack.c.l.bf16 %v3349_v32 }
 0x35e   : > { %v3351_v44 = vunpack.c.h.bf16 %v3349_v32  ;;  %v3353_v49 = vunpack.c.l.bf16 %v3352_v46  ;;  %v1862_v41 = vadd.f32 %v3354_v29, %v1770_v30  ;;  %v3356_v39 = vunpack.c.l.bf16 %v3355_v63 }
 0x35f   : > { %v1859_v62 = vadd.f32 %v3350_v27, %v1767_v23  ;;  %v1864_v61 = vadd.f32 %v3357_v3, %v1772_v33  ;;  %v1865_v51 = vadd.f32 %v3359_v53, %v1773_v2  ;;  %v3361_v10 = vunpack.c.l.bf16 %v3360_v54 }
 0x360   : > { %v1860_v52 = vadd.f32 %v3351_v44, %v1768_v60  ;;  %v1861_v7 = vadd.f32 %v3353_v49, %v1769_v17  ;;  %v1863_v24 = vadd.f32 %v3356_v39, %v1771_v31  ;;  %v3362_v19 = vunpack.c.h.bf16 %v3360_v54 }
 0x361   : > { %v1875_v57 = vadd.f32 %v3361_v10, %v1783_v9  ;;  %v3364_v21 = vunpack.c.l.bf16 %v3363_v36  ;;  %v3365_v34 = vunpack.c.h.bf16 %v3363_v36  ;;  %v3367_v40 = vunpack.c.l.bf16 %v3366_v6 }
 0x362   : > { %v1876_v20 = vadd.f32 %v3362_v19, %v1784_v16  ;;  %v3368_v55 = vunpack.c.h.bf16 %v3366_v6  ;;  %v3370_v47 = vunpack.c.l.bf16 %v3369_v4  ;;  %v3371_v12 = vunpack.c.h.bf16 %v3369_v4 }
 0x363   : > { %v1877_v5 = vadd.f32 %v3364_v21, %v1785_v8  ;;  %v1878_v45 = vadd.f32 %v3365_v34, %v1786_v26  ;;  %v1879_v56 = vadd.f32 %v3367_v40, %v1787_v35  ;;  %v3372_v48 = vunpack.c.h.bf16 %v3358_v50 }
 0x364   : > { %v1880_v43 = vadd.f32 %v3368_v55, %v1788_v15  ;;  %v1881_v11 = vadd.f32 %v3370_v47, %v1789_v37  ;;  %v1882_v22 = vadd.f32 %v3371_v12, %v1790_v42  ;;  %v1893_v13 = vmax.f32 %v1857_v1, 0.0 }
 0x365   : > { %v1883_v58 = vadd.f32 %v3372_v48, %v1791_v25  ;;  %v1894_v23 = vmax.f32 %v1858_v18, 0.0  ;;  %v1895_v60 = vmax.f32 %v1859_v62, 0.0  ;;  %v1896_v17 = vmax.f32 %v1860_v52, 0.0 }
 0x366   : > { %v1897_v30 = vmax.f32 %v1861_v7, 0.0  ;;  %v1898_v31 = vmax.f32 %v1862_v41, 0.0  ;;  %v1899_v33 = vmax.f32 %v1863_v24, 0.0  ;;  %v1900_v2 = vmax.f32 %v1864_v61, 0.0 }
 0x367   : > { %v1901_v9 = vmax.f32 %v1865_v51, 0.0  ;;  %v1911_v16 = vmax.f32 %v1875_v57, 0.0  ;;  %v1912_v8 = vmax.f32 %v1876_v20, 0.0  ;;  %v1913_v26 = vmax.f32 %v1877_v5, 0.0 }
 0x368   : > { %v1914_v35 = vmax.f32 %v1878_v45, 0.0  ;;  %v1915_v15 = vmax.f32 %v1879_v56, 0.0  ;;  %v1916_v38 = vmax.f32 %v1880_v43, 0.0  ;;  %v1917_v37 = vmax.f32 %v1881_v11, 0.0 }
 0x369   : > { %v1918_v0 = vmax.f32 %v1882_v22, 0.0  ;;  %v1919_v42 = vmax.f32 %v1883_v58, 0.0  ;;  %v2235_v59 = vpack.c.bf16 %v1894_v23, %v1893_v13  ;;  %v2236_v25 = vpack.c.bf16 %v1896_v17, %v1895_v60 }
 0x36a   : > { %v2237_v28 = vpack.c.bf16 %v1898_v31, %v1897_v30  ;;  %v2238_v1 = vpack.c.bf16 %v1900_v2, %v1899_v33  ;;  %v2239_v14 = vpack.c.bf16 %v1901_v9, %v1901_v9  ;;  %v2245_v18 = vpack.c.bf16 %v1912_v8, %v1911_v16 }
 0x36b   : > { %v2246_v32 = vpack.c.bf16 %v1914_v35, %v1913_v26  ;;  %v2247_v27 = vpack.c.bf16 %v1916_v38, %v1915_v15  ;;  %v2248_v62 = vpack.c.bf16 %v1918_v0, %v1917_v37  ;;  %v2249_v44 = vpack.c.bf16 %v1919_v42, %v1919_v42  ;;  %2037 = vst [vmem:[%s3277_s6 + $0x24] sm:$0xff] %v2235_v59 }
 0x36c   : > { %2038 = vst [vmem:[%s3277_s6 + $0x2c] sm:$0xff] %v2236_v25  ;;  %2039 = vst [vmem:[%s3277_s6 + $0x34] sm:$0xff] %v2237_v28 }
 0x36d   : > { %2040 = vst [vmem:[%s3277_s6 + $0x3c] sm:$0xff] %v2238_v1  ;;  %2041 = vst [vmem:[%s3277_s6 + $0x44] sm:$0xf] %v2239_v14 }
 0x36e   : > { %2047 = vst [vmem:[%s3277_s6 + $0x6c] sm:$0xff] %v2245_v18  ;;  %2048 = vst [vmem:[%s3277_s6 + $0x74] sm:$0xff] %v2246_v32 }
 0x36f   : > { %2049 = vst [vmem:[%s3277_s6 + $0x7c] sm:$0xff] %v2247_v27  ;;  %2050 = vst [vmem:[%s3277_s6 + $0x84] sm:$0xff] %v2248_v62 }
 0x370   : > { %2051 = vst [vmem:[%s3277_s6 + $0x8c] sm:$0xf] %v2249_v44 }
 0x371 PF: > { %s16_s21 = sadd.s32 1, %s2301_s21  }
 0x372   : > { %p13_p6 = scmp.ge.s32.totalorder %s16_s21, 4  }
 0x374   :  { %15 = sbr.rel (!%p13_p6) target bundleno = 1 (0x1), region = 79 }

// kernel: _lambda_.11
= control target key start
LH: loop header
LB: loop body
LE: loop exit
PB: predicated region body
PF: predicated region fallthrough
CT: control target
= control target key end

     0   :  { %s2881_s18 = smov 0   ;;  %s3972_s0 = inlined_call_operand.vmem [shape: bf16[2,16,1280], index: 0, kind: input, shape index: {}]   ;;  %s3973_s1 = inlined_call_operand.vmem [shape: bf16[32,144], index: 1, kind: input, shape index: {}]   ;;  %s3974_s2 = inlined_call_operand.vmem [shape: f32[32,1], index: 2, kind: input, shape index: {}]   ;;  %s3975_s3 = inlined_call_operand.vmem [shape: f32[32,1], index: 3, kind: input, shape index: {}]   ;;  %s3976_s4 = inlined_call_operand.vmem [shape: f32[1,1152], index: 4, kind: input, shape index: {}]   ;;  %s3977_s5 = inlined_call_operand.vmem [shape: bf16[2,32,1152], index: 5, kind: output, shape index: {}]  }
   0x1 LB: > { %s2887_s19 = sadd.s32 4294967295, %s2838_s18   ;;  %p2530_p0 = scmp.ge.s32.totalorder %s2838_s18, 1  ;;  %s2838_s18 = sphi %s2881_s18, %s15_s18  }
   0x2   : > { %p182_p1 = scmp.lt.s32.totalorder %s2838_s18, 3 }
   0x4   : > { %p183_p2 = pnand %p2530_p0, %p182_p1 }
   0x5   : > { %p205_p3 = scmp.lt.s32.totalorder (!%p183_p2), %s2887_s19, 1  ;;  %p2532_p4 = scmp.ne.s32.totalorder (!%p183_p2), %s2887_s19, 0 }
   0x6   : > { %186 = sbr.rel (%p183_p2) target bundleno = 925 (0x39d), region = 40 }
   0xd   : > { %s206_s20 = scalar_select %p205_p3, %s2887_s19, 1 }
   0xe   : > { %214 = sbr.rel (%p2532_p4) target bundleno = 21 (0x15), region = 44  ;;  %vm215_vm0 = vcmask (!%p2532_p4), 7168   ;;  %v2840_v0 = vmov (!%p2532_p4), 0.0  }
   0xf   : > { %s2780_s21 = smul.u32 80, %s206_s20  ;;  %216 = vst.msk [vmem:[#allocation3] sm:$0xff] (!%p2532_p4), %vm215_vm0, %v2840_v0  ;;  %217 = vst.msk [vmem:[#allocation3 + $0x8] sm:$0xff] (!%p2532_p4), %vm215_vm0, %v2840_v0 }
  0x10   : > { %218 = vst.msk [vmem:[#allocation3 + $0x10] sm:$0xff] (!%p2532_p4), %vm215_vm0, %v2840_v0  ;;  %219 = vst.msk [vmem:[#allocation3 + $0x18] sm:$0xff] (!%p2532_p4), %vm215_vm0, %v2840_v0 }
  0x11   : > { %s2896_s24 = scalar_lea.vmem %s3972_s0, %s2780_s21  ;;  %220 = vst.msk [vmem:[#allocation4] sm:$0xff] (!%p2532_p4), %vm215_vm0, %v2840_v0  ;;  %221 = vst.msk [vmem:[#allocation4 + $0x8] sm:$0xff] (!%p2532_p4), %vm215_vm0, %v2840_v0 }
  0x12   : > { %222 = vst.msk [vmem:[#allocation4 + $0x10] sm:$0xff] (!%p2532_p4), %vm215_vm0, %v2840_v0  ;;  %223 = vst.msk [vmem:[#allocation4 + $0x18] sm:$0xff] (!%p2532_p4), %vm215_vm0, %v2840_v0 }
  0x15 PF: > { %v2800_v1 = vld [vmem:[%s2896_s24 + $0xc] ss:$40 sps:$4 sm:$0xff]   ;;  %v2802_v2 = vld [vmem:[%s2896_s24 + $0x8] ss:$40 sps:$4 sm:$0xff]   ;;  %s2841_s25 = smov 127   ;;  %s2842_s26 = smov 126  }
  0x16   : > { %345 = vrot.lane.b32.xlu1 %v2800_v1, %s2841_s25  ;;  %v2803_v3 = vld [vmem:[%s2896_s24 + $0x4] ss:$40 sps:$4 sm:$0xff]   ;;  %v2805_v4 = vld [vmem:[%s2896_s24] ss:$40 sps:$4 sm:$0xff]   ;;  %1236 = vmatprep.subr.bf16.mxu1 %v2800_v1  ;;  %v2905_v5 = vld [vmem:[%s2896_s24 + $0x10] ss:$40 sps:$4 sm:$0xff]  }
  0x17   : > { %1237 = vmatpush1.bf16.msra.mxu1 %v2802_v2  ;;  %341 = vrot.lane.b32.xlu0 %v2803_v3, %s2841_s25  ;;  %s2843_s27 = smov 94   ;;  %s2844_s28 = smov 93   ;;  %v2950_v6 = vld [vmem:[%s3973_s1 + $0x4] ss:$8 sps:$4 sm:$0xff]   ;;  %vm1176_vm1 = vcmask 130048   ;;  %vm359_vm2 = vcmask 1039360  }
  0x18   : > { %1183 = vmatprep.subr.bf16.mxu0 %v2803_v3  ;;  %s2845_s29 = smov 92   ;;  %s2846_s30 = smov 60   ;;  %2626 = vmatprep.mubr.msk.bf16.mxu0 %vm1176_vm1, %v2950_v6  ;;  %v2962_v7 = vld [vmem:[%s2896_s24 + $0x18] ss:$40 sps:$4 sm:$0xff]   ;;  %v2967_v8 = vld [vmem:[%s2896_s24 + $0x14] ss:$40 sps:$4 sm:$0xff]  }
  0x19   : > { %1184 = vmatpush1.bf16.msra.mxu0 %v2805_v4  ;;  %s2847_s6 = smov 59   ;;  %s2848_s9 = smov 58   ;;  %2628 = vmatprep.mubr.msk.bf16.mxu1 %vm1176_vm1, %v2950_v6  ;;  %v2972_v9 = vld [vmem:[%s2896_s24 + $0x20] ss:$40 sps:$4 sm:$0xff]   ;;  %v2977_v10 = vld [vmem:[%s2896_s24 + $0x1c] ss:$40 sps:$4 sm:$0xff]  }
  0x1a   : > { %347 = vrot.lane.b32.xlu1 %v2905_v5, %s2841_s25  ;;  %vm457_vm3 = vcmask 1031168   ;;  %vm555_vm4 = vcmask 769024   ;;  %v2814_v34 = vld [vmem:[%s2896_s24 + $0x24] ss:$40 sps:$4 sm:$0xff]   ;;  %vm653_vm5 = vcmask 760832   ;;  %vm751_vm6 = vcmask 752640  }
  0x1b   : > { %343 = vrot.lane.b32.xlu0 %v2802_v2, %s2841_s25  ;;  %vm849_vm7 = vcmask 490496   ;;  %vm947_vm8 = vcmask 482304   ;;  %vm1045_vm9 = vcmask 474112   ;;  %s2721_s20 = smul.u32 144, %s2887_s19  ;;  %vm1577_vm10 = vcmask 7168   ;;  %p2658_p5 = scmp.ne.s32.totalorder %s2887_s19, 1 }
  0x1d   : > { %s3247_s23 = scalar_lea.vmem %s3977_s5, %s2721_s20 }
  0x1e   : > { %439 = vrot.lane.b32.xlu1 %v2803_v3, %s2842_s26 }
  0x1f   : > { %339 = vrot.lane.b32.xlu0 %v2805_v4, %s2841_s25 }
  0x22   : > { %443 = vrot.lane.b32.xlu1 %v2800_v1, %s2842_s26 }
  0x23   : > { %441 = vrot.lane.b32.xlu0 %v2802_v2, %s2842_s26 }
  0x26   : > { %437 = vrot.lane.b32.xlu1 %v2805_v4, %s2842_s26 }
  0x27   : > { %445 = vrot.lane.b32.xlu0 %v2905_v5, %s2842_s26 }
  0x2a   : > { %539 = vrot.lane.b32.xlu1 %v2802_v2, %s2843_s27 }
  0x2b   : > { %537 = vrot.lane.b32.xlu0 %v2803_v3, %s2843_s27 }
  0x2e   : > { %543 = vrot.lane.b32.xlu1 %v2905_v5, %s2843_s27 }
  0x2f   : > { %541 = vrot.lane.b32.xlu0 %v2800_v1, %s2843_s27 }
  0x32   : > { %635 = vrot.lane.b32.xlu1 %v2803_v3, %s2844_s28 }
  0x33   : > { %535 = vrot.lane.b32.xlu0 %v2805_v4, %s2843_s27 }
  0x36   : > { %639 = vrot.lane.b32.xlu1 %v2800_v1, %s2844_s28 }
  0x37   : > { %637 = vrot.lane.b32.xlu0 %v2802_v2, %s2844_s28 }
  0x3a   : > { %633 = vrot.lane.b32.xlu1 %v2805_v4, %s2844_s28 }
  0x3b   : > { %641 = vrot.lane.b32.xlu0 %v2905_v5, %s2844_s28 }
  0x3e   : > { %735 = vrot.lane.b32.xlu1 %v2802_v2, %s2845_s29 }
  0x3f   : > { %733 = vrot.lane.b32.xlu0 %v2803_v3, %s2845_s29 }
  0x42   : > { %739 = vrot.lane.b32.xlu1 %v2905_v5, %s2845_s29 }
  0x43   : > { %737 = vrot.lane.b32.xlu0 %v2800_v1, %s2845_s29 }
  0x46   : > { %831 = vrot.lane.b32.xlu1 %v2803_v3, %s2846_s30 }
  0x47   : > { %731 = vrot.lane.b32.xlu0 %v2805_v4, %s2845_s29 }
  0x4a   : > { %835 = vrot.lane.b32.xlu1 %v2800_v1, %s2846_s30 }
  0x4b   : > { %833 = vrot.lane.b32.xlu0 %v2802_v2, %s2846_s30 }
  0x4e   : > { %829 = vrot.lane.b32.xlu1 %v2805_v4, %s2846_s30 }
  0x4f   : > { %837 = vrot.lane.b32.xlu0 %v2905_v5, %s2846_s30 }
  0x52   : > { %931 = vrot.lane.b32.xlu1 %v2802_v2, %s2847_s6 }
  0x53   : > { %929 = vrot.lane.b32.xlu0 %v2803_v3, %s2847_s6 }
  0x56   : > { %935 = vrot.lane.b32.xlu1 %v2905_v5, %s2847_s6 }
  0x57   : > { %933 = vrot.lane.b32.xlu0 %v2800_v1, %s2847_s6 }
  0x5a   : > { %1027 = vrot.lane.b32.xlu1 %v2803_v3, %s2848_s9 }
  0x5b   : > { %927 = vrot.lane.b32.xlu0 %v2805_v4, %s2847_s6 }
  0x5e   : > { %1031 = vrot.lane.b32.xlu1 %v2800_v1, %s2848_s9 }
  0x5f   : > { %1029 = vrot.lane.b32.xlu0 %v2802_v2, %s2848_s9 }
  0x62   : > { %1025 = vrot.lane.b32.xlu1 %v2805_v4, %s2848_s9 }
  0x63   : > { %1033 = vrot.lane.b32.xlu0 %v2905_v5, %s2848_s9 }
  0x66   : > { %351 = vrot.lane.b32.xlu1 %v2962_v7, %s2841_s25 }
  0x67   : > { %349 = vrot.lane.b32.xlu0 %v2967_v8, %s2841_s25 }
  0x6a   : > { %355 = vrot.lane.b32.xlu1 %v2972_v9, %s2841_s25 }
  0x6b   : > { %353 = vrot.lane.b32.xlu0 %v2977_v10, %s2841_s25 }
  0x6e   : > { %449 = vrot.lane.b32.xlu1 %v2962_v7, %s2842_s26 }
  0x6f   : > { %447 = vrot.lane.b32.xlu0 %v2967_v8, %s2842_s26 }
  0x72   : > { %453 = vrot.lane.b32.xlu1 %v2972_v9, %s2842_s26 }
  0x73   : > { %451 = vrot.lane.b32.xlu0 %v2977_v10, %s2842_s26 }
  0x76   : > { %547 = vrot.lane.b32.xlu1 %v2962_v7, %s2843_s27 }
  0x77   : > { %545 = vrot.lane.b32.xlu0 %v2967_v8, %s2843_s27 }
  0x7a   : > { %551 = vrot.lane.b32.xlu1 %v2972_v9, %s2843_s27 }
  0x7b   : > { %549 = vrot.lane.b32.xlu0 %v2977_v10, %s2843_s27 }
  0x7e   : > { %645 = vrot.lane.b32.xlu1 %v2962_v7, %s2844_s28 }
  0x7f   : > { %643 = vrot.lane.b32.xlu0 %v2967_v8, %s2844_s28 }
  0x82   : > { %649 = vrot.lane.b32.xlu1 %v2972_v9, %s2844_s28 }
  0x83   : > { %647 = vrot.lane.b32.xlu0 %v2977_v10, %s2844_s28 }
  0x86   : > { %743 = vrot.lane.b32.xlu1 %v2962_v7, %s2845_s29 }
  0x87   : > { %741 = vrot.lane.b32.xlu0 %v2967_v8, %s2845_s29 }
  0x88   : > { %v346_v11 = vpop.permute.xlu1 %345 }
  0x89   : > { %v342_v12 = vpop.permute.xlu0 %341 }
  0x8a   : > { %747 = vrot.lane.b32.xlu1 %v2972_v9, %s2845_s29 }
  0x8b   : > { %745 = vrot.lane.b32.xlu0 %v2977_v10, %s2845_s29 }
  0x8c   : > { %v3015_v13 = vpop.permute.xlu1 %347 }
  0x8d   : > { %v363_v14 = vsel %vm359_vm2, %v346_v11, %v3015_v13  ;;  %v344_v15 = vpop.permute.xlu0 %343 }
  0x8e   : > { %841 = vrot.lane.b32.xlu1 %v2962_v7, %s2846_s30  ;;  %1238 = vmatprep.subr.bf16.mxu1 %v363_v14  ;;  %v361_v16 = vsel %vm359_vm2, %v342_v12, %v344_v15  ;;  %v362_v17 = vsel %vm359_vm2, %v344_v15, %v346_v11 }
  0x8f   : > { %839 = vrot.lane.b32.xlu0 %v2967_v8, %s2846_s30  ;;  %1185 = vmatprep.subr.bf16.mxu0 %v361_v16 }
  0x90   : > { %v440_v18 = vpop.permute.xlu1 %439  ;;  %1239 = vmatpush1.bf16.msra.mxu1 %v362_v17 }
  0x91   : > { %v340_v19 = vpop.permute.xlu0 %339 }
  0x92   : > { %845 = vrot.lane.b32.xlu1 %v2972_v9, %s2846_s30  ;;  %v360_v20 = vsel %vm359_vm2, %v340_v19, %v342_v12 }
  0x93   : > { %843 = vrot.lane.b32.xlu0 %v2977_v10, %s2846_s30  ;;  %1186 = vmatpush1.bf16.msra.mxu0 %v360_v20 }
  0x94   : > { %v444_v21 = vpop.permute.xlu1 %443 }
  0x95   : > { %v442_v22 = vpop.permute.xlu0 %441 }
  0x96   : > { %939 = vrot.lane.b32.xlu1 %v2962_v7, %s2847_s6  ;;  %v459_v23 = vsel %vm457_vm3, %v440_v18, %v442_v22  ;;  %v460_v28 = vsel %vm457_vm3, %v442_v22, %v444_v21 }
  0x97   : > { %937 = vrot.lane.b32.xlu0 %v2967_v8, %s2847_s6  ;;  %1187 = vmatprep.subr.bf16.mxu0 %v459_v23  ;;  %v3102_v23 = vld [vmem:[%s3973_s1] ss:$8 sps:$4 sm:$0xff]  }
  0x98   : > { %v438_v24 = vpop.permute.xlu1 %437 }
  0x99   : > { %v458_v25 = vsel %vm457_vm3, %v438_v24, %v440_v18  ;;  %v3036_v26 = vpop.permute.xlu0 %445 }
  0x9a   : > { %943 = vrot.lane.b32.xlu1 %v2972_v9, %s2847_s6  ;;  %1188 = vmatpush1.bf16.msra.mxu0 %v458_v25  ;;  %v461_v27 = vsel %vm457_vm3, %v444_v21, %v3036_v26 }
  0x9b   : > { %941 = vrot.lane.b32.xlu0 %v2977_v10, %s2847_s6  ;;  %1240 = vmatprep.subr.bf16.mxu1 %v461_v27  ;;  %v3112_v27 = vld [vmem:[%s3973_s1 + $0x14] ss:$8 sps:$4 sm:$0xff]  }
  0x9c   : > { %v540_v29 = vpop.permute.xlu1 %539  ;;  %1241 = vmatpush1.bf16.msra.mxu1 %v460_v28 }
  0x9d   : > { %v538_v30 = vpop.permute.xlu0 %537 }
  0x9e   : > { %1037 = vrot.lane.b32.xlu1 %v2962_v7, %s2848_s9  ;;  %v557_v31 = vsel %vm555_vm4, %v538_v30, %v540_v29 }
  0x9f   : > { %1035 = vrot.lane.b32.xlu0 %v2967_v8, %s2848_s9  ;;  %1189 = vmatprep.subr.bf16.mxu0 %v557_v31 }
  0xa0   : > { %v3050_v32 = vpop.permute.xlu1 %543 }
  0xa1   : > { %v542_v33 = vpop.permute.xlu0 %541 }
  0xa2   : > { %1041 = vrot.lane.b32.xlu1 %v2972_v9, %s2848_s9  ;;  %v559_v35 = vsel %vm555_vm4, %v542_v33, %v3050_v32  ;;  %v558_v36 = vsel %vm555_vm4, %v540_v29, %v542_v33 }
  0xa3   : > { %1039 = vrot.lane.b32.xlu0 %v2977_v10, %s2848_s9  ;;  %1242 = vmatprep.subr.bf16.mxu1 %v559_v35 }
  0xa4   : > { %v636_v37 = vpop.permute.xlu1 %635  ;;  %1243 = vmatpush1.bf16.msra.mxu1 %v558_v36 }
  0xa5   : > { %v536_v38 = vpop.permute.xlu0 %535 }
  0xa6   : > { %455 = vrot.lane.b32.xlu1 %v2814_v34, %s2842_s26  ;;  %v556_v39 = vsel %vm555_vm4, %v536_v38, %v538_v30 }
  0xa7   : > { %357 = vrot.lane.b32.xlu0 %v2814_v34, %s2841_s25  ;;  %1190 = vmatpush1.bf16.msra.mxu0 %v556_v39 }
  0xa8   : > { %v640_v40 = vpop.permute.xlu1 %639 }
  0xa9   : > { %v638_v41 = vpop.permute.xlu0 %637 }
  0xaa   : > { %651 = vrot.lane.b32.xlu1 %v2814_v34, %s2844_s28  ;;  %v655_v42 = vsel %vm653_vm5, %v636_v37, %v638_v41  ;;  %v656_v47 = vsel %vm653_vm5, %v638_v41, %v640_v40 }
  0xab   : > { %553 = vrot.lane.b32.xlu0 %v2814_v34, %s2843_s27  ;;  %1191 = vmatprep.subr.bf16.mxu0 %v655_v42 }
  0xac   : > { %v634_v43 = vpop.permute.xlu1 %633 }
  0xad   : > { %v654_v44 = vsel %vm653_vm5, %v634_v43, %v636_v37  ;;  %v3067_v45 = vpop.permute.xlu0 %641 }
  0xae   : > { %847 = vrot.lane.b32.xlu1 %v2814_v34, %s2846_s30  ;;  %1192 = vmatpush1.bf16.msra.mxu0 %v654_v44  ;;  %v657_v46 = vsel %vm653_vm5, %v640_v40, %v3067_v45 }
  0xaf   : > { %749 = vrot.lane.b32.xlu0 %v2814_v34, %s2845_s29  ;;  %1244 = vmatprep.subr.bf16.mxu1 %v657_v46 }
  0xb0   : > { %v736_v48 = vpop.permute.xlu1 %735  ;;  %1245 = vmatpush1.bf16.msra.mxu1 %v656_v47 }
  0xb1   : > { %v734_v49 = vpop.permute.xlu0 %733 }
  0xb2   : > { %1043 = vrot.lane.b32.xlu1 %v2814_v34, %s2848_s9  ;;  %v753_v50 = vsel %vm751_vm6, %v734_v49, %v736_v48 }
  0xb3   : > { %945 = vrot.lane.b32.xlu0 %v2814_v34, %s2847_s6  ;;  %1193 = vmatprep.subr.bf16.mxu0 %v753_v50 }
  0xb4   : > { %v3077_v51 = vpop.permute.xlu1 %739 }
  0xb5   : > { %v738_v52 = vpop.permute.xlu0 %737 }
  0xb6   : > { %v755_v53 = vsel %vm751_vm6, %v738_v52, %v3077_v51  ;;  %v754_v54 = vsel %vm751_vm6, %v736_v48, %v738_v52 }
  0xb7   : > { %1246 = vmatprep.subr.bf16.mxu1 %v755_v53 }
  0xb8   : > { %v832_v55 = vpop.permute.xlu1 %831  ;;  %1247 = vmatpush1.bf16.msra.mxu1 %v754_v54 }
  0xb9   : > { %v732_v56 = vpop.permute.xlu0 %731 }
  0xba   : > { %v752_v57 = vsel %vm751_vm6, %v732_v56, %v734_v49 }
  0xbb   : > { %1194 = vmatpush1.bf16.msra.mxu0 %v752_v57 }
  0xbc   : > { %v836_v58 = vpop.permute.xlu1 %835 }
  0xbd   : > { %v834_v59 = vpop.permute.xlu0 %833 }
  0xbe   : > { %v851_v60 = vsel %vm849_vm7, %v832_v55, %v834_v59  ;;  %v852_v1 = vsel %vm849_vm7, %v834_v59, %v836_v58 }
  0xbf   : > { %1195 = vmatprep.subr.bf16.mxu0 %v851_v60 }
  0xc0   : > { %v830_v61 = vpop.permute.xlu1 %829 }
  0xc1   : > { %v850_v62 = vsel %vm849_vm7, %v830_v61, %v832_v55  ;;  %v3085_v63 = vpop.permute.xlu0 %837 }
  0xc2   : > { %1196 = vmatpush1.bf16.msra.mxu0 %v850_v62  ;;  %v853_v0 = vsel %vm849_vm7, %v836_v58, %v3085_v63 }
  0xc3   : > { %1248 = vmatprep.subr.bf16.mxu1 %v853_v0 }
  0xc4   : > { %v932_v2 = vpop.permute.xlu1 %931  ;;  %1249 = vmatpush1.bf16.msra.mxu1 %v852_v1 }
  0xc5   : > { %v930_v3 = vpop.permute.xlu0 %929 }
  0xc6   : > { %v949_v4 = vsel %vm947_vm8, %v930_v3, %v932_v2 }
  0xc7   : > { %1197 = vmatprep.subr.bf16.mxu0 %v949_v4 }
  0xc8   : > { %v3091_v9 = vpop.permute.xlu1 %935 }
  0xc9   : > { %v934_v11 = vpop.permute.xlu0 %933 }
  0xca   : > { %v951_v12 = vsel %vm947_vm8, %v934_v11, %v3091_v9  ;;  %v950_v14 = vsel %vm947_vm8, %v932_v2, %v934_v11 }
  0xcb   : > { %1250 = vmatprep.subr.bf16.mxu1 %v951_v12 }
  0xcc   : > { %v1028_v15 = vpop.permute.xlu1 %1027  ;;  %1251 = vmatpush1.bf16.msra.mxu1 %v950_v14 }
  0xcd   : > { %v928_v16 = vpop.permute.xlu0 %927 }
  0xce   : > { %v948_v17 = vsel %vm947_vm8, %v928_v16, %v930_v3 }
  0xcf   : > { %1198 = vmatpush1.bf16.msra.mxu0 %v948_v17 }
  0xd0   : > { %v1032_v18 = vpop.permute.xlu1 %1031 }
  0xd1   : > { %v1030_v19 = vpop.permute.xlu0 %1029 }
  0xd2   : > { %v1047_v20 = vsel %vm1045_vm9, %v1028_v15, %v1030_v19  ;;  %v1048_v28 = vsel %vm1045_vm9, %v1030_v19, %v1032_v18 }
  0xd3   : > { %1199 = vmatprep.subr.bf16.mxu0 %v1047_v20 }
  0xd4   : > { %v1026_v21 = vpop.permute.xlu1 %1025 }
  0xd5   : > { %v1046_v22 = vsel %vm1045_vm9, %v1026_v21, %v1028_v15  ;;  %v3104_v24 = vpop.permute.xlu0 %1033 }
  0xd6   : > { %1200 = vmatpush1.bf16.msra.mxu0 %v1046_v22  ;;  %v1049_v25 = vsel %vm1045_vm9, %v1032_v18, %v3104_v24 }
  0xd7   : > { %1289 = vmatprep.subr.bf16.mxu0 %v2967_v8  ;;  %1252 = vmatprep.subr.bf16.mxu1 %v1049_v25 }
  0xd8   : > { %v352_v29 = vpop.permute.xlu1 %351  ;;  %1253 = vmatpush1.bf16.msra.mxu1 %v1048_v28 }
  0xd9   : > { %1216 = vmatmul.mubr.bf16.vlgmr.msra.gmra.mrb[0].mxu0 %v3102_v23  ;;  %v350_v30 = vpop.permute.xlu0 %349  ;;  %1342 = vmatprep.subr.bf16.mxu1 %v2977_v10 }
  0xda   : > { %1290 = vmatpush1.bf16.msra.mxu0 %v2905_v5  ;;  %v365_v31 = vsel %vm359_vm2, %v350_v30, %v352_v29  ;;  %2627 = vmatprep.mubr.msk.bf16.mxu0 %vm1176_vm1, %v3112_v27  ;;  %v364_v33 = vsel %vm359_vm2, %v3015_v13, %v350_v30  ;;  %v3130_v5 = vld [vmem:[%s3973_s1 + $0x10] ss:$8 sps:$4 sm:$0xff]  }
  0xdb   : > { %1269 = vmatmul.mubr.bf16.vlgmr.msra.gmra.mrb[0].mxu1 %v3102_v23  ;;  %1291 = vmatprep.subr.bf16.mxu0 %v365_v31  ;;  %v2821_v31 = vld [vmem:[%s2896_s24 + $0x20] ss:$40 sps:$4 sm:$0xff]  }
  0xdc   : > { %v3122_v8 = vpop.permute.xlu1 %355  ;;  %1343 = vmatpush1.bf16.msra.mxu1 %v2962_v7  ;;  %2629 = vmatprep.mubr.msk.bf16.mxu1 %vm1176_vm1, %v3112_v27 }
  0xdd   : > { %v354_v10 = vpop.permute.xlu0 %353 }
  0xde   : > { %1292 = vmatpush1.bf16.msra.mxu0 %v364_v33  ;;  %v366_v34 = vsel %vm359_vm2, %v352_v29, %v354_v10  ;;  %v367_v35 = vsel %vm359_vm2, %v354_v10, %v3122_v8  ;;  %v2849_v10 = vmov 0  }
  0xdf   : > { %1344 = vmatprep.subr.bf16.mxu1 %v367_v35 }
  0xe0   : > { %v450_v36 = vpop.permute.xlu1 %449  ;;  %1345 = vmatpush1.bf16.msra.mxu1 %v366_v34 }
  0xe1   : > { %1226 = vmatmul.mubr.bf16.gmra.mrb[4].mxu0 %v3130_v5  ;;  %v448_v7 = vpop.permute.xlu0 %447 }
  0xe2   : > { %2630 = vmatprep.mubr.msk.bf16.mxu0 %vm1176_vm1, %v2950_v6  ;;  %v462_v13 = vsel %vm457_vm3, %v3036_v26, %v448_v7  ;;  %v463_v37 = vsel %vm457_vm3, %v448_v7, %v450_v36 }
  0xe3   : > { %1293 = vmatprep.subr.bf16.mxu0 %v463_v37  ;;  %1279 = vmatmul.mubr.bf16.gmra.mrb[4].mxu1 %v3130_v5 }
  0xe4   : > { %v3143_v38 = vpop.permute.xlu1 %453  ;;  %1294 = vmatpush1.bf16.msra.mxu0 %v462_v13  ;;  %2632 = vmatprep.mubr.msk.bf16.mxu1 %vm1176_vm1, %v2950_v6 }
  0xe5   : > { %v452_v39 = vpop.permute.xlu0 %451 }
  0xe6   : > { %v464_v40 = vsel %vm457_vm3, %v450_v36, %v452_v39  ;;  %v465_v41 = vsel %vm457_vm3, %v452_v39, %v3143_v38 }
  0xe7   : > { %1346 = vmatprep.subr.bf16.mxu1 %v465_v41 }
  0xe8   : > { %v548_v42 = vpop.permute.xlu1 %547  ;;  %1347 = vmatpush1.bf16.msra.mxu1 %v464_v40 }
  0xe9   : > { %v546_v26 = vpop.permute.xlu0 %545 }
  0xea   : > { %v560_v43 = vsel %vm555_vm4, %v3050_v32, %v546_v26  ;;  %v561_v44 = vsel %vm555_vm4, %v546_v26, %v548_v42 }
  0xeb   : > { %1295 = vmatprep.subr.bf16.mxu0 %v561_v44 }
  0xec   : > { %v3154_v46 = vpop.permute.xlu1 %551  ;;  %1296 = vmatpush1.bf16.msra.mxu0 %v560_v43 }
  0xed   : > { %v550_v47 = vpop.permute.xlu0 %549 }
  0xee   : > { %v562_v48 = vsel %vm555_vm4, %v548_v42, %v550_v47  ;;  %v563_v49 = vsel %vm555_vm4, %v550_v47, %v3154_v46 }
  0xef   : > { %1348 = vmatprep.subr.bf16.mxu1 %v563_v49  ;;  %v3236_v49 = vld [vmem:[%s3976_s4] sm:$0xff] }
  0xf0   : > { %v646_v50 = vpop.permute.xlu1 %645  ;;  %1349 = vmatpush1.bf16.msra.mxu1 %v562_v48 }
  0xf1   : > { %v644_v52 = vpop.permute.xlu0 %643 }
  0xf2   : > { %v658_v53 = vsel %vm653_vm5, %v3067_v45, %v644_v52  ;;  %v659_v32 = vsel %vm653_vm5, %v644_v52, %v646_v50 }
  0xf3   : > { %1297 = vmatprep.subr.bf16.mxu0 %v659_v32 }
  0xf4   : > { %v3162_v54 = vpop.permute.xlu1 %649  ;;  %1298 = vmatpush1.bf16.msra.mxu0 %v658_v53 }
  0xf5   : > { %v648_v55 = vpop.permute.xlu0 %647 }
  0xf6   : > { %v660_v56 = vsel %vm653_vm5, %v646_v50, %v648_v55  ;;  %v661_v57 = vsel %vm653_vm5, %v648_v55, %v3162_v54 }
  0xf7   : > { %1350 = vmatprep.subr.bf16.mxu1 %v661_v57 }
  0xf8   : > { %v744_v58 = vpop.permute.xlu1 %743  ;;  %1351 = vmatpush1.bf16.msra.mxu1 %v660_v56 }
  0xf9   : > { %v742_v59 = vpop.permute.xlu0 %741 }
  0xfa   : > { %v756_v60 = vsel %vm751_vm6, %v3077_v51, %v742_v59  ;;  %v757_v45 = vsel %vm751_vm6, %v742_v59, %v744_v58 }
  0xfb   : > { %1299 = vmatprep.subr.bf16.mxu0 %v757_v45 }
  0xfc   : > { %v3170_v61 = vpop.permute.xlu1 %747  ;;  %1300 = vmatpush1.bf16.msra.mxu0 %v756_v60 }
  0xfd   : > { %v746_v62 = vpop.permute.xlu0 %745 }
  0xfe   : > { %v758_v0 = vsel %vm751_vm6, %v744_v58, %v746_v62  ;;  %v759_v1 = vsel %vm751_vm6, %v746_v62, %v3170_v61 }
  0xff   : > { %1352 = vmatprep.subr.bf16.mxu1 %v759_v1 }
 0x100   : > { %v842_v2 = vpop.permute.xlu1 %841  ;;  %1353 = vmatpush1.bf16.msra.mxu1 %v758_v0 }
 0x101   : > { %v840_v3 = vpop.permute.xlu0 %839 }
 0x102   : > { %v854_v4 = vsel %vm849_vm7, %v3085_v63, %v840_v3  ;;  %v855_v51 = vsel %vm849_vm7, %v840_v3, %v842_v2 }
 0x103   : > { %1301 = vmatprep.subr.bf16.mxu0 %v855_v51 }
 0x104   : > { %v3178_v11 = vpop.permute.xlu1 %845  ;;  %1302 = vmatpush1.bf16.msra.mxu0 %v854_v4 }
 0x105   : > { %v844_v12 = vpop.permute.xlu0 %843 }
 0x106   : > { %v856_v14 = vsel %vm849_vm7, %v842_v2, %v844_v12  ;;  %v857_v15 = vsel %vm849_vm7, %v844_v12, %v3178_v11 }
 0x107   : > { %1354 = vmatprep.subr.bf16.mxu1 %v857_v15 }
 0x108   : > { %v940_v16 = vpop.permute.xlu1 %939  ;;  %1355 = vmatpush1.bf16.msra.mxu1 %v856_v14 }
 0x109   : > { %v938_v17 = vpop.permute.xlu0 %937 }
 0x10a   : > { %v952_v18 = vsel %vm947_vm8, %v3091_v9, %v938_v17  ;;  %v953_v63 = vsel %vm947_vm8, %v938_v17, %v940_v16 }
 0x10b   : > { %1303 = vmatprep.subr.bf16.mxu0 %v953_v63 }
 0x10c   : > { %v3186_v19 = vpop.permute.xlu1 %943  ;;  %1304 = vmatpush1.bf16.msra.mxu0 %v952_v18 }
 0x10d   : > { %v942_v20 = vpop.permute.xlu0 %941 }
 0x10e   : > { %v954_v21 = vsel %vm947_vm8, %v940_v16, %v942_v20  ;;  %v955_v22 = vsel %vm947_vm8, %v942_v20, %v3186_v19 }
 0x10f   : > { %1356 = vmatprep.subr.bf16.mxu1 %v955_v22 }
 0x110   : > { %v1038_v25 = vpop.permute.xlu1 %1037  ;;  %1357 = vmatpush1.bf16.msra.mxu1 %v954_v21 }
 0x111   : > { %v1036_v28 = vpop.permute.xlu0 %1035 }
 0x112   : > { %v1050_v9 = vsel %vm1045_vm9, %v3104_v24, %v1036_v28  ;;  %v1051_v29 = vsel %vm1045_vm9, %v1036_v28, %v1038_v25 }
 0x113   : > { %1305 = vmatprep.subr.bf16.mxu0 %v1051_v29 }
 0x114   : > { %v3194_v30 = vpop.permute.xlu1 %1041  ;;  %1306 = vmatpush1.bf16.msra.mxu0 %v1050_v9 }
 0x115   : > { %v1040_v33 = vpop.permute.xlu0 %1039  ;;  %1395 = vmatprep.subr.bf16.mxu0 %v2849_v10 }
 0x116   : > { %v1052_v34 = vsel %vm1045_vm9, %v1038_v25, %v1040_v33  ;;  %v1053_v35 = vsel %vm1045_vm9, %v1040_v33, %v3194_v30 }
 0x117   : > { %1322 = vmatmul.mubr.bf16.vlgmr.msra.gmra.mrb[8].mxu0 %v3102_v23  ;;  %1358 = vmatprep.subr.bf16.mxu1 %v1053_v35 }
 0x118   : > { %1359 = vmatpush1.bf16.msra.mxu1 %v1052_v34  ;;  %1396 = vmatpush1.bf16.msra.mxu0 %v2821_v31  ;;  %v456_v7 = vpop.permute.xlu1 %455 }
 0x119   : > { %v358_v24 = vpop.permute.xlu0 %357  ;;  %2762 = vmatprep.subr.bf16.mxu1 %v2849_v10  ;;  %1397 = vmatprep.subr.bf16.mxu0 %v2849_v10  ;;  %v466_v13 = vsel %vm457_vm3, %v3143_v38, %v456_v7 }
 0x11a   : > { %v368_v36 = vsel %vm359_vm2, %v3122_v8, %v358_v24  ;;  %2631 = vmatprep.mubr.msk.bf16.mxu0 %vm1176_vm1, %v3112_v27 }
 0x11b   : > { %1375 = vmatmul.mubr.bf16.vlgmr.msra.gmra.mrb[8].mxu1 %v3102_v23 }
 0x11c   : > { %2771 = vmatpush1.bf16.msra.mxu1 %v2821_v31  ;;  %1398 = vmatpush1.bf16.msra.mxu0 %v368_v36  ;;  %v652_v39 = vpop.permute.xlu1 %651 }
 0x11d   : > { %2763 = vmatprep.subr.bf16.mxu1 %v2849_v10  ;;  %1399 = vmatprep.subr.bf16.mxu0 %v2849_v10  ;;  %v554_v37 = vpop.permute.xlu0 %553  ;;  %v662_v38 = vsel %vm653_vm5, %v3162_v54, %v652_v39 }
 0x11e   : > { %2633 = vmatprep.mubr.msk.bf16.mxu1 %vm1176_vm1, %v3112_v27  ;;  %v564_v8 = vsel %vm555_vm4, %v3154_v46, %v554_v37  ;;  %v1448_v46 = vlaneseq }
 0x11f   : > { %1332 = vmatmul.mubr.bf16.gmra.mrb[12].mxu0 %v3130_v5 }
 0x120   : > { %2772 = vmatpush1.bf16.msra.mxu1 %v368_v36  ;;  %1400 = vmatpush1.bf16.msra.mxu0 %v466_v13  ;;  %v848_v41 = vpop.permute.xlu1 %847  ;;  %v3230_v47 = vshrl.u32 %v1448_v46, 7 }
 0x121   : > { %2764 = vmatprep.subr.bf16.mxu1 %v2849_v10  ;;  %1401 = vmatprep.subr.bf16.mxu0 %v2849_v10  ;;  %v750_v40 = vpop.permute.xlu0 %749  ;;  %v858_v42 = vsel %vm849_vm7, %v3178_v11, %v848_v41 }
 0x122   : > { %2634 = vmatprep.mubr.msk.bf16.mxu0 %vm1176_vm1, %v2950_v6  ;;  %v760_v6 = vsel %vm751_vm6, %v3170_v61, %v750_v40  ;;  %v1450_v48 = vsub.s32 0, %v3230_v47  ;;  %v1454_v50 = vsub.s32 1, %v3230_v47  ;;  %v1462_v53 = vsub.s32 3, %v3230_v47 }
 0x123   : > { %1385 = vmatmul.mubr.bf16.gmra.mrb[12].mxu1 %v3130_v5 }
 0x124   : > { %2773 = vmatpush1.bf16.msra.mxu1 %v466_v13  ;;  %1402 = vmatpush1.bf16.msra.mxu0 %v564_v8  ;;  %v1044_v43 = vpop.permute.xlu1 %1043  ;;  %v1451_v52 = vrot.slane %v3236_v49, %v1450_v48  ;;  %v3253_v57 = vrot.slane %v3236_v49, %v1462_v53 }
 0x125   : > { %2765 = vmatprep.subr.bf16.mxu1 %v2849_v10  ;;  %1403 = vmatprep.subr.bf16.mxu0 %v2849_v10  ;;  %v1054_v44 = vsel %vm1045_vm9, %v3194_v30, %v1044_v43 }
 0x126   : > { %2635 = vmatprep.mubr.msk.bf16.mxu1 %vm1176_vm1, %v3112_v27  ;;  %v946_v27 = vpop.permute.xlu0 %945 }
 0x127   : > { %v956_v26 = vsel %vm947_vm8, %v3186_v19, %v946_v27 }
 0x128   : > { %2774 = vmatpush1.bf16.msra.mxu1 %v564_v8  ;;  %1404 = vmatpush1.bf16.msra.mxu0 %v662_v38 }
 0x129   : > { %2766 = vmatprep.subr.bf16.mxu1 %v2849_v10  ;;  %1405 = vmatprep.subr.bf16.mxu0 %v2849_v10 }
 0x12c   : > { %2775 = vmatpush1.bf16.msra.mxu1 %v662_v38  ;;  %1406 = vmatpush1.bf16.msra.mxu0 %v760_v6 }
 0x12d   : > { %2767 = vmatprep.subr.bf16.mxu1 %v2849_v10  ;;  %1407 = vmatprep.subr.bf16.mxu0 %v2849_v10 }
 0x130   : > { %2776 = vmatpush1.bf16.msra.mxu1 %v760_v6  ;;  %1408 = vmatpush1.bf16.msra.mxu0 %v858_v42 }
 0x131   : > { %2768 = vmatprep.subr.bf16.mxu1 %v2849_v10  ;;  %1409 = vmatprep.subr.bf16.mxu0 %v2849_v10 }
 0x134   : > { %2777 = vmatpush1.bf16.msra.mxu1 %v858_v42  ;;  %1410 = vmatpush1.bf16.msra.mxu0 %v956_v26 }
 0x135   : > { %2769 = vmatprep.subr.bf16.mxu1 %v2849_v10  ;;  %1411 = vmatprep.subr.bf16.mxu0 %v2849_v10 }
 0x138   : > { %2778 = vmatpush1.bf16.msra.mxu1 %v956_v26  ;;  %1412 = vmatpush1.bf16.msra.mxu0 %v1054_v44 }
 0x139   : > { %2770 = vmatprep.subr.bf16.mxu1 %v2849_v10 }
 0x13b   : > { %1428 = vmatmul.mubr.bf16.vlgmr.msra.gmra.mrb[16].mxu0 %v3102_v23  ;;  %v1458_v23 = vsub.s32 2, %v3230_v47 }
 0x13c   : > { %2779 = vmatpush1.bf16.msra.mxu1 %v1054_v44 }
 0x13d   : > { %v3250_v56 = vrot.slane %v3236_v49, %v1458_v23 }
 0x13f   : > { %1436 = vmatmul.mubr.bf16.vlgmr.msra.gmra.mrb[16].mxu1 %v3130_v5  ;;  %v1455_v5 = vrot.slane %v3236_v49, %v1454_v50 }
 0x1ac   : > { %v1217_v32 = vpop.f32.mrb[0].mxu0 }
 0x1ad   : > { %v1493_v54 = vmul.f32 %v1451_v52, %v1217_v32  ;;  %v1219_v55 = vpop.f32.mrb[1].mxu0 }
 0x1ae   : > { %v1494_v58 = vmul.f32 %v1455_v5, %v1219_v55  ;;  %v2701_v59 = vpack.c.bf16 %v1219_v55, %v1217_v32  ;;  %v1221_v60 = vpop.f32.mrb[2].mxu0  ;;  %v1270_v0 = vpop.f32.mrb[0].mxu1 }
 0x1af   : > { %v1586_v45 = vmul.f32 %v1493_v54, %v1217_v32  ;;  %v1502_v61 = vmul.f32 %v1451_v52, %v1221_v60  ;;  %v1223_v62 = vpop.f32.mrb[3].mxu0  ;;  %v1272_v51 = vpop.f32.mrb[1].mxu1  ;;  %v1495_v12 = vmul.f32 %v3250_v56, %v1270_v0 }
 0x1b0   : > { %v1533_v1 = vadd.f32 %v1494_v58, %v1493_v54  ;;  %v1587_v2 = vmul.f32 %v1494_v58, %v1219_v55  ;;  %1785 = vst [vmem:[%s3247_s23] sm:$0xff] %v2701_v59  ;;  %v1503_v3 = vmul.f32 %v1455_v5, %v1223_v62  ;;  %v2706_v4 = vpack.c.bf16 %v1223_v62, %v1221_v60  ;;  %v1274_v16 = vpop.f32.mrb[2].mxu1 }
 0x1b1   : > { %v1595_v11 = vmul.f32 %v1502_v61, %v1221_v60  ;;  %v1496_v14 = vmul.f32 %v3253_v57, %v1272_v51  ;;  %v2702_v15 = vpack.c.bf16 %v1272_v51, %v1270_v0  ;;  %v1504_v19 = vmul.f32 %v3250_v56, %v1274_v16  ;;  %v1276_v20 = vpop.f32.mrb[3].mxu1 }
 0x1b2   : > { %v1622_v17 = vadd.f32 %v1587_v2, %v1586_v45  ;;  %v1543_v18 = vadd.f32 %v1503_v3, %v1502_v61  ;;  %v1596_v63 = vmul.f32 %v1503_v3, %v1223_v62  ;;  %1790 = vst [vmem:[%s3247_s23 + $0x24] sm:$0xff] %v2706_v4  ;;  %v1534_v21 = vadd.f32 %v1533_v1, %v1495_v12 }
 0x1b3   : > { %v1588_v22 = vmul.f32 %v1495_v12, %v1270_v0  ;;  %v1589_v25 = vmul.f32 %v1496_v14, %v1272_v51  ;;  %1786 = vst [vmem:[%s3247_s23 + $0x8] sm:$0xff] %v2702_v15  ;;  %v1505_v28 = vmul.f32 %v3253_v57, %v1276_v20  ;;  %v1597_v30 = vmul.f32 %v1504_v19, %v1274_v16 }
 0x1b4   : > { %v1632_v9 = vadd.f32 %v1596_v63, %v1595_v11  ;;  %v1544_v29 = vadd.f32 %v1543_v18, %v1504_v19  ;;  %v2707_v31 = vpack.c.bf16 %v1276_v20, %v1274_v16  ;;  %v1227_v33 = vpop.f32.mrb[4].mxu0  ;;  %v3262_v34 = vadd.f32 %v1534_v21, %v1496_v14 }
 0x1b5   : > { %v1623_v10 = vadd.f32 %v1622_v17, %v1588_v22  ;;  %v1598_v35 = vmul.f32 %v1505_v28, %v1276_v20  ;;  %v1511_v24 = vmul.f32 %v1451_v52, %v1227_v33  ;;  %v1229_v36 = vpop.f32.mrb[5].mxu0  ;;  %v1470_v17 = vsub.s32 5, %v3230_v47 }
 0x1b6   : > { %v1633_v7 = vadd.f32 %v1632_v9, %v1597_v30  ;;  %v3264_v13 = vadd.f32 %v1544_v29, %v1505_v28  ;;  %1791 = vst [vmem:[%s3247_s23 + $0x2c] sm:$0xff] %v2707_v31  ;;  %v1512_v37 = vmul.f32 %v1455_v5, %v1229_v36  ;;  %v2711_v8 = vpack.c.bf16 %v1229_v36, %v1227_v33  ;;  %v1231_v39 = vpop.f32.mrb[6].mxu0  ;;  %v1280_v42 = vpop.f32.mrb[4].mxu1 }
 0x1b7   : > { %v3267_v38 = vadd.f32 %v1623_v10, %v1589_v25  ;;  %v1604_v40 = vmul.f32 %v1511_v24, %v1227_v33  ;;  %v1520_v6 = vmul.f32 %v1451_v52, %v1231_v39  ;;  %v1233_v41 = vpop.f32.mrb[7].mxu0  ;;  %v1282_v46 = vpop.f32.mrb[5].mxu1  ;;  %v1513_v23 = vmul.f32 %v3250_v56, %v1280_v42 }
 0x1b8   : > { %v3269_v27 = vadd.f32 %v1633_v7, %v1598_v35  ;;  %v1553_v26 = vadd.f32 %v1512_v37, %v1511_v24  ;;  %v1605_v43 = vmul.f32 %v1512_v37, %v1229_v36  ;;  %1795 = vst [vmem:[%s3247_s23 + $0x48] sm:$0xff] %v2711_v8  ;;  %v1521_v44 = vmul.f32 %v1455_v5, %v1233_v41  ;;  %v1284_v32 = vpop.f32.mrb[6].mxu1 }
 0x1b9   : > { %v1613_v48 = vmul.f32 %v1520_v6, %v1231_v39  ;;  %v2716_v50 = vpack.c.bf16 %v1233_v41, %v1231_v39  ;;  %v1514_v53 = vmul.f32 %v3253_v57, %v1282_v46  ;;  %v2712_v58 = vpack.c.bf16 %v1282_v46, %v1280_v42  ;;  %v1286_v59 = vpop.f32.mrb[7].mxu1 }
 0x1ba   : > { %v1642_v54 = vadd.f32 %v1605_v43, %v1604_v40  ;;  %v1563_v52 = vadd.f32 %v1521_v44, %v1520_v6  ;;  %v1614_v55 = vmul.f32 %v1521_v44, %v1233_v41  ;;  %v1554_v60 = vadd.f32 %v1553_v26, %v1513_v23 }
 0x1bb   : > { %1800 = vst [vmem:[%s3247_s23 + $0x6c] sm:$0xff] %v2716_v50  ;;  %v1606_v45 = vmul.f32 %v1513_v23, %v1280_v42  ;;  %v1607_v61 = vmul.f32 %v1514_v53, %v1282_v46  ;;  %v1522_v5 = vmul.f32 %v3250_v56, %v1284_v32  ;;  %1796 = vst [vmem:[%s3247_s23 + $0x50] sm:$0xff] %v2712_v58  ;;  %v1466_v56 = vsub.s32 4, %v3230_v47 }
 0x1bc   : > { %v1652_v62 = vadd.f32 %v1614_v55, %v1613_v48  ;;  %v1523_v0 = vmul.f32 %v3253_v57, %v1286_v59  ;;  %v2717_v1 = vpack.c.bf16 %v1286_v59, %v1284_v32  ;;  %v3278_v3 = vadd.f32 %v1554_v60, %v1514_v53 }
 0x1bd   : > { %v1643_v2 = vadd.f32 %v1642_v54, %v1606_v45  ;;  %v1564_v4 = vadd.f32 %v1563_v52, %v1522_v5  ;;  %v1615_v51 = vmul.f32 %v1522_v5, %v1284_v32  ;;  %v1467_v57 = vrot.slane %v3236_v49, %v1466_v56 }
 0x1be   : > { %v1616_v11 = vmul.f32 %v1523_v0, %v1286_v59  ;;  %1801 = vst [vmem:[%s3247_s23 + $0x74] sm:$0xff] %v2717_v1  ;;  %v1471_v18 = vrot.slane %v3236_v49, %v1470_v17  ;;  %v1474_v63 = vsub.s32 6, %v3230_v47  ;;  %v1478_v19 = vsub.s32 7, %v3230_v47 }
 0x1bf   : > { %v3281_v12 = vadd.f32 %v1643_v2, %v1607_v61  ;;  %v1653_v14 = vadd.f32 %v1652_v62, %v1615_v51  ;;  %v3283_v15 = vadd.f32 %v1564_v4, %v1523_v0 }
 0x1c0   : > { %v3294_v29 = vrot.slane %v3236_v49, %v1474_v63  ;;  %v3297_v30 = vrot.slane %v3236_v49, %v1478_v19 }
 0x1c1   : > { %v3285_v16 = vadd.f32 %v1653_v14, %v1616_v11 }
 0x1ea   : > { %v1323_v20 = vpop.f32.mrb[8].mxu0 }
 0x1eb   : > { %v1497_v21 = vmul.f32 %v1467_v57, %v1323_v20  ;;  %v1325_v22 = vpop.f32.mrb[9].mxu0 }
 0x1ec   : > { %v1498_v25 = vmul.f32 %v1471_v18, %v1325_v22  ;;  %v2703_v28 = vpack.c.bf16 %v1325_v22, %v1323_v20  ;;  %v1327_v9 = vpop.f32.mrb[10].mxu0 }
 0x1ed   : > { %v1536_v31 = vadd.f32 %v3262_v34, %v1497_v21  ;;  %v1590_v33 = vmul.f32 %v1497_v21, %v1323_v20  ;;  %v1506_v10 = vmul.f32 %v1467_v57, %v1327_v9  ;;  %v1329_v35 = vpop.f32.mrb[11].mxu0 }
 0x1ee   : > { %v1591_v24 = vmul.f32 %v1498_v25, %v1325_v22  ;;  %1787 = vst [vmem:[%s3247_s23 + $0x10] sm:$0xff] %v2703_v28  ;;  %v1507_v47 = vmul.f32 %v1471_v18, %v1329_v35  ;;  %v2708_v36 = vpack.c.bf16 %v1329_v35, %v1327_v9  ;;  %v1376_v7 = vpop.f32.mrb[8].mxu1 }
 0x1ef   : > { %v1625_v37 = vadd.f32 %v3267_v38, %v1590_v33  ;;  %v1537_v8 = vadd.f32 %v1536_v31, %v1498_v25  ;;  %v1546_v39 = vadd.f32 %v3264_v13, %v1506_v10  ;;  %v1599_v40 = vmul.f32 %v1506_v10, %v1327_v9  ;;  %v1378_v49 = vpop.f32.mrb[9].mxu1 }
 0x1f0   : > { %v1600_v6 = vmul.f32 %v1507_v47, %v1329_v35  ;;  %1792 = vst [vmem:[%s3247_s23 + $0x34] sm:$0xff] %v2708_v36  ;;  %v1499_v34 = vmul.f32 %v3294_v29, %v1376_v7  ;;  %v1500_v41 = vmul.f32 %v3297_v30, %v1378_v49  ;;  %v2704_v42 = vpack.c.bf16 %v1378_v49, %v1376_v7  ;;  %v1380_v26 = vpop.f32.mrb[10].mxu1 }
 0x1f1   : > { %v1626_v43 = vadd.f32 %v1625_v37, %v1591_v24  ;;  %v1635_v44 = vadd.f32 %v3269_v27, %v1599_v40  ;;  %v1547_v46 = vadd.f32 %v1546_v39, %v1507_v47  ;;  %v1508_v38 = vmul.f32 %v3294_v29, %v1380_v26  ;;  %v1382_v48 = vpop.f32.mrb[11].mxu1 }
 0x1f2   : > { %v1592_v13 = vmul.f32 %v1499_v34, %v1376_v7  ;;  %v1593_v50 = vmul.f32 %v1500_v41, %v1378_v49  ;;  %1788 = vst [vmem:[%s3247_s23 + $0x18] sm:$0xff] %v2704_v42  ;;  %v1509_v23 = vmul.f32 %v3297_v30, %v1382_v48  ;;  %v2709_v53 = vpack.c.bf16 %v1382_v48, %v1380_v26  ;;  %v1333_v32 = vpop.f32.mrb[12].mxu0 }
 0x1f3   : > { %v1636_v54 = vadd.f32 %v1635_v44, %v1600_v6  ;;  %v1601_v52 = vmul.f32 %v1508_v38, %v1380_v26  ;;  %v1515_v55 = vmul.f32 %v1467_v57, %v1333_v32  ;;  %v1335_v58 = vpop.f32.mrb[13].mxu0  ;;  %v1538_v59 = vadd.f32 %v1537_v8, %v1499_v34 }
 0x1f4   : > { %v1602_v60 = vmul.f32 %v1509_v23, %v1382_v48  ;;  %1793 = vst [vmem:[%s3247_s23 + $0x3c] sm:$0xff] %v2709_v53  ;;  %v1516_v27 = vmul.f32 %v1471_v18, %v1335_v58  ;;  %v2713_v45 = vpack.c.bf16 %v1335_v58, %v1333_v32  ;;  %v1337_v61 = vpop.f32.mrb[14].mxu0  ;;  %v1548_v5 = vadd.f32 %v1547_v46, %v1508_v38 }
 0x1f5   : > { %v1556_v62 = vadd.f32 %v3278_v3, %v1515_v55  ;;  %v1608_v0 = vmul.f32 %v1515_v55, %v1333_v32  ;;  %v1524_v1 = vmul.f32 %v1467_v57, %v1337_v61  ;;  %v1339_v2 = vpop.f32.mrb[15].mxu0  ;;  %v1539_v4 = vadd.f32 %v1538_v59, %v1500_v41 }
 0x1f6   : > { %v1609_v51 = vmul.f32 %v1516_v27, %v1335_v58  ;;  %1797 = vst [vmem:[%s3247_s23 + $0x58] sm:$0xff] %v2713_v45  ;;  %v1525_v11 = vmul.f32 %v1471_v18, %v1339_v2  ;;  %v2718_v14 = vpack.c.bf16 %v1339_v2, %v1337_v61  ;;  %v1386_v56 = vpop.f32.mrb[12].mxu1  ;;  %v1549_v17 = vadd.f32 %v1548_v5, %v1509_v23 }
 0x1f7   : > { %v1645_v63 = vadd.f32 %v3281_v12, %v1608_v0  ;;  %v1557_v19 = vadd.f32 %v1556_v62, %v1516_v27  ;;  %v1566_v20 = vadd.f32 %v3283_v15, %v1524_v1  ;;  %v1617_v21 = vmul.f32 %v1524_v1, %v1337_v61  ;;  %v1388_v22 = vpop.f32.mrb[13].mxu1 }
 0x1f8   : > { %v1618_v3 = vmul.f32 %v1525_v11, %v1339_v2  ;;  %1802 = vst [vmem:[%s3247_s23 + $0x7c] sm:$0xff] %v2718_v14  ;;  %v1517_v57 = vmul.f32 %v3294_v29, %v1386_v56  ;;  %v1518_v25 = vmul.f32 %v3297_v30, %v1388_v22  ;;  %v2714_v28 = vpack.c.bf16 %v1388_v22, %v1386_v56  ;;  %v1390_v9 = vpop.f32.mrb[14].mxu1 }
 0x1f9   : > { %v1646_v18 = vadd.f32 %v1645_v63, %v1609_v51  ;;  %v1655_v31 = vadd.f32 %v3285_v16, %v1617_v21  ;;  %v1567_v33 = vadd.f32 %v1566_v20, %v1525_v11  ;;  %v1526_v12 = vmul.f32 %v3294_v29, %v1390_v9  ;;  %v1392_v10 = vpop.f32.mrb[15].mxu1 }
 0x1fa   : > { %v1610_v15 = vmul.f32 %v1517_v57, %v1386_v56  ;;  %v1611_v35 = vmul.f32 %v1518_v25, %v1388_v22  ;;  %1798 = vst [vmem:[%s3247_s23 + $0x60] sm:$0xff] %v2714_v28  ;;  %v1527_v24 = vmul.f32 %v3297_v30, %v1392_v10  ;;  %v2719_v47 = vpack.c.bf16 %v1392_v10, %v1390_v9  ;;  %v2636_v30 = vld [vmem:[%s3976_s4 + $0x8] ss:$0 sm:$0xff]  ;;  %v1531_v22 = vld [vmem:[#allocation3 + $0x10] sm:$0xff] }
 0x1fb   : > { %v1656_v36 = vadd.f32 %v1655_v31, %v1618_v3  ;;  %v1619_v7 = vmul.f32 %v1526_v12, %v1390_v9  ;;  %v1558_v37 = vadd.f32 %v1557_v19, %v1517_v57  ;;  %v1627_v8 = vadd.f32 %v1626_v43, %v1592_v13  ;;  %v1530_v19 = vld [vmem:[#allocation3 + $0x8] sm:$0xff] }
 0x1fc   : > { %v1620_v39 = vmul.f32 %v1527_v24, %v1392_v10  ;;  %1803 = vst [vmem:[%s3247_s23 + $0x84] sm:$0xff] %v2719_v47  ;;  %v1568_v40 = vadd.f32 %v1567_v33, %v1526_v12  ;;  %v1647_v49 = vadd.f32 %v1646_v18, %v1610_v15  ;;  %v1637_v16 = vadd.f32 %v1636_v54, %v1601_v52  ;;  %v1532_v18 = vld [vmem:[#allocation3 + $0x18] sm:$0xff]  ;;  %v1584_v12 = vld [vmem:[#allocation4 + $0x10] sm:$0xff] }
 0x1fd   : > { %v1559_v6 = vadd.f32 %v1558_v37, %v1518_v25  ;;  %v1628_v34 = vadd.f32 %v1627_v8, %v1593_v50  ;;  %v1657_v29 = vadd.f32 %v1656_v36, %v1619_v7  ;;  %v1582_v25 = vld [vmem:[#allocation4] sm:$0xff]  ;;  %v1585_v7 = vld [vmem:[#allocation4 + $0x18] sm:$0xff] }
 0x1fe   : > { %v1569_v41 = vadd.f32 %v1568_v40, %v1527_v24  ;;  %v1648_v42 = vadd.f32 %v1647_v49, %v1611_v35  ;;  %v1638_v26 = vadd.f32 %v1637_v16, %v1602_v60  ;;  %v1583_v35 = vld [vmem:[#allocation4 + $0x8] sm:$0xff] }
 0x1ff   : > { %v1658_v44 = vadd.f32 %v1657_v29, %v1620_v39 }
 0x20e   : > { %v1429_v46 = vpop.f32.mrb[16].mxu0 }
 0x20f   : > { %v2705_v43 = vpack.c.bf16 %v1429_v46, %v1429_v46  ;;  %v1431_v38 = vpop.f32.mrb[17].mxu0  ;;  %v1501_v48 = vmul.f32 %v2636_v30, %v1429_v46 }
 0x210   : > { %v1432_v13 = vpop.f32.mrb[18].mxu0 }
 0x211   : > { %1789 = vst [vmem:[%s3247_s23 + $0x20] sm:$0xf] %v2705_v43  ;;  %v2710_v23 = vpack.c.bf16 %v1432_v13, %v1432_v13  ;;  %v1434_v53 = vpop.f32.mrb[19].mxu0  ;;  %v1540_v50 = vadd.f32 %v1539_v4, %v1501_v48  ;;  %v1510_v32 = vmul.f32 %v2636_v30, %v1432_v13  ;;  %v1594_v54 = vmul.f32 %v1501_v48, %v1429_v46 }
 0x212   : > { %v1437_v52 = vpop.f32.mrb[16].mxu1 }
 0x213   : > { %1794 = vst [vmem:[%s3247_s23 + $0x44] sm:$0xf] %v2710_v23  ;;  %v2715_v55 = vpack.c.bf16 %v1437_v52, %v1437_v52  ;;  %v1439_v58 = vpop.f32.mrb[17].mxu1  ;;  %1541 = vadd.xlane.f32.xlu0 %v1540_v50  ;;  %v1550_v59 = vadd.f32 %v1549_v17, %v1510_v32  ;;  %v1519_v60 = vmul.f32 %v2636_v30, %v1437_v52  ;;  %v1529_v17 = vld [vmem:[#allocation3] sm:$0xff] }
 0x214   : > { %v1629_v27 = vadd.f32 %v1628_v34, %v1594_v54  ;;  %v1440_v45 = vpop.f32.mrb[18].mxu1  ;;  %v1603_v61 = vmul.f32 %v1510_v32, %v1432_v13 }
 0x215   : > { %1799 = vst [vmem:[%s3247_s23 + $0x68] sm:$0xf] %v2715_v55  ;;  %v2720_v5 = vpack.c.bf16 %v1440_v45, %v1440_v45  ;;  %v1442_v62 = vpop.f32.mrb[19].mxu1  ;;  %1551 = vadd.xlane.f32.xlu1 %v1550_v59  ;;  %v1560_v0 = vadd.f32 %v1559_v6, %v1519_v60  ;;  %v1528_v1 = vmul.f32 %v2636_v30, %v1440_v45 }
 0x216   : > { %v1612_v2 = vmul.f32 %v1519_v60, %v1437_v52  ;;  %v1639_v4 = vadd.f32 %v1638_v26, %v1603_v61 }
 0x217   : > { %1804 = vst [vmem:[%s3247_s23 + $0x8c] sm:$0xf] %v2720_v5  ;;  %1561 = vadd.xlane.f32.xlu0 %v1560_v0  ;;  %v1570_v51 = vadd.f32 %v1569_v41, %v1528_v1  ;;  %v1621_v14 = vmul.f32 %v1528_v1, %v1440_v45 }
 0x218   : > { %v1649_v11 = vadd.f32 %v1648_v42, %v1612_v2 }
 0x219   : > { %1630 = vadd.xlane.f32.xlu1 %v1629_v27  ;;  %v1659_v56 = vadd.f32 %v1658_v44, %v1621_v14 }
 0x21b   : > { %1571 = vadd.xlane.f32.xlu0 %v1570_v51 }
 0x21d   : > { %1650 = vadd.xlane.f32.xlu1 %v1649_v11 }
 0x21f   : > { %1640 = vadd.xlane.f32.xlu0 %v1639_v4 }
 0x223   : > { %1660 = vadd.xlane.f32.xlu0 %v1659_v56 }
 0x2a0   : > { %v1542_v63 = vpop.xlane.xlu0 %1541 }
 0x2a1   : > { %v1573_v20 = vadd.f32 %v1542_v63, %v1529_v17 }
 0x2a2   : > { %v1552_v21 = vpop.xlane.xlu1 %1551 }
 0x2a3   : > { %1578 = vst.msk [vmem:[#allocation3] sm:$0xff] %vm1577_vm10, %v1573_v20  ;;  %v1574_v3 = vadd.f32 %v1552_v21, %v1530_v19 }
 0x2a4   : > { %v1562_v57 = vpop.xlane.xlu0 %1561 }
 0x2a5   : > { %1579 = vst.msk [vmem:[#allocation3 + $0x8] sm:$0xff] %vm1577_vm10, %v1574_v3  ;;  %v1575_v28 = vadd.f32 %v1562_v57, %v1531_v22 }
 0x2a6   : > { %v1631_v9 = vpop.xlane.xlu1 %1630 }
 0x2a7   : > { %1580 = vst.msk [vmem:[#allocation3 + $0x10] sm:$0xff] %vm1577_vm10, %v1575_v28  ;;  %v1662_v31 = vadd.f32 %v1631_v9, %v1582_v25 }
 0x2a8   : > { %v1572_v33 = vpop.xlane.xlu0 %1571 }
 0x2a9   : > { %1666 = vst.msk [vmem:[#allocation4] sm:$0xff] %vm1577_vm10, %v1662_v31  ;;  %v1576_v10 = vadd.f32 %v1572_v33, %v1532_v18 }
 0x2aa   : > { %v1651_v15 = vpop.xlane.xlu1 %1650 }
 0x2ab   : > { %1581 = vst.msk [vmem:[#allocation3 + $0x18] sm:$0xff] %vm1577_vm10, %v1576_v10  ;;  %v1664_v24 = vadd.f32 %v1651_v15, %v1584_v12 }
 0x2ac   : > { %v1641_v47 = vpop.xlane.xlu0 %1640 }
 0x2ad   : > { %1668 = vst.msk [vmem:[#allocation4 + $0x10] sm:$0xff] %vm1577_vm10, %v1664_v24  ;;  %v1663_v36 = vadd.f32 %v1641_v47, %v1583_v35  ;;  %1808 = sbr.rel (%p2658_p5) target bundleno = 925 (0x39d), region = 48 }
 0x2af   : > { %1667 = vst.msk [vmem:[#allocation4 + $0x8] sm:$0xff] %vm1577_vm10, %v1663_v36 }
 0x2b0   : > { %v1661_v37 = vpop.xlane.xlu0 %1660 }
 0x2b1   : > { %v1665_v8 = vadd.f32 %v1661_v37, %v1585_v7 }
 0x2b3   : > { %1669 = vst.msk [vmem:[#allocation4 + $0x18] sm:$0xff] %vm1577_vm10, %v1665_v8 }
 0x2b4   : > { %v1811_v39 = vld [vmem:[#allocation3 + $0x10] sm:$0xff]  ;;  %v2850_v49 = vmov 0   ;;  %v1809_v34 = vld [vmem:[#allocation3] sm:$0xff]  ;;  %v1812_v26 = vld [vmem:[#allocation3 + $0x18] sm:$0xff] }
 0x2b5   : > { %v1819_v40 = vld [vmem:[#allocation4 + $0x10] sm:$0xff]  ;;  %2823 = vset.pattern.permute.xlu1 %v2850_v49  ;;  %2822 = vset.pattern.permute.xlu0 %v2850_v49  ;;  %v1815_v16 = vmul.f32 0.001953125, %v1811_v39  ;;  %v1817_v29 = vld [vmem:[#allocation4] sm:$0xff]  ;;  %v1813_v41 = vmul.f32 0.001953125, %v1809_v34  ;;  %v1816_v46 = vmul.f32 0.001953125, %v1812_v26  ;;  %v1810_v38 = vld [vmem:[#allocation3 + $0x8] sm:$0xff] }
 0x2b6   : > { %v1823_v6 = vmul.f32 0.001953125, %v1819_v40  ;;  %v1821_v42 = vmul.f32 0.001953125, %v1817_v29  ;;  %v1818_v48 = vld [vmem:[#allocation4 + $0x8] sm:$0xff]  ;;  %v1814_v23 = vmul.f32 0.001953125, %v1810_v38  ;;  %v1839_v1 = vld [vmem:[%s3974_s2 + $0x10] sm:$0xff]  ;;  %v1837_v2 = vld [vmem:[%s3974_s2] sm:$0xff] }
 0x2b7   : > { %v1827_v30 = vmul.f32 %v1815_v16, %v1815_v16  ;;  %v1825_v13 = vmul.f32 %v1813_v41, %v1813_v41  ;;  %v1822_v53 = vmul.f32 0.001953125, %v1818_v48  ;;  %v1828_v32 = vmul.f32 %v1816_v46, %v1816_v46  ;;  %v1840_v51 = vld [vmem:[%s3974_s2 + $0x18] sm:$0xff]  ;;  %v1838_v56 = vld [vmem:[%s3974_s2 + $0x8] sm:$0xff]  ;;  %v1853_v57 = vld [vmem:[%s3975_s3] sm:$0xff] }
 0x2b8   : > { %v1826_v52 = vmul.f32 %v1814_v23, %v1814_v23  ;;  %v1854_v3 = vld [vmem:[%s3975_s3 + $0x8] sm:$0xff]  ;;  %v1856_v33 = vld [vmem:[%s3975_s3 + $0x18] sm:$0xff]  ;;  %v1855_v12 = vld [vmem:[%s3975_s3 + $0x10] sm:$0xff] }
 0x2b9   : > { %v1831_v50 = vsub.f32 %v1823_v6, %v1827_v30  ;;  %v1829_v54 = vsub.f32 %v1821_v42, %v1825_v13  ;;  %v3366_v35 = vld [vmem:[%s3977_s5] sm:$0xff]  ;;  %v3371_v24 = vld [vmem:[%s3977_s5 + $0x8] sm:$0xff]  ;;  %v3376_v47 = vld [vmem:[%s3977_s5 + $0x10] sm:$0xff] }
 0x2ba   : > { %v1820_v44 = vld [vmem:[#allocation4 + $0x18] sm:$0xff]  ;;  %v1830_v60 = vsub.f32 %v1822_v53, %v1826_v52  ;;  %v3386_v7 = vld [vmem:[%s3977_s5 + $0x20] ss:$144 sps:$4 sm:$0xff]   ;;  %v3406_v40 = vld [vmem:[%s3977_s5 + $0xa8] sm:$0xff]  ;;  %v1905_v49 = vunpack.c.l.bf16 %v3366_v35  ;;  %v1907_v6 = vunpack.c.l.bf16 %v3371_v24  ;;  %v1908_v34 = vunpack.c.h.bf16 %v3371_v24 }
 0x2bb   : > { %v1824_v43 = vmul.f32 0.001953125, %v1820_v44  ;;  %v1835_v55 = vmax.f32 %v1831_v50, 0.0  ;;  %v1833_v59 = vmax.f32 %v1829_v54, 0.0  ;;  %v3381_v36 = vld [vmem:[%s3977_s5 + $0x18] sm:$0xff]  ;;  %v3391_v37 = vld [vmem:[%s3977_s5 + $0x90] sm:$0xff]  ;;  %v3401_v39 = vld [vmem:[%s3977_s5 + $0xa0] sm:$0xff]  ;;  %v1909_v29 = vunpack.c.l.bf16 %v3376_v47 }
 0x2bc   : > { %v1834_v5 = vmax.f32 %v1830_v60, 0.0  ;;  %v3396_v8 = vld [vmem:[%s3977_s5 + $0x98] sm:$0xff]  ;;  %v1911_v42 = vunpack.c.l.bf16 %v3381_v36  ;;  %v1912_v26 = vunpack.c.h.bf16 %v3381_v36  ;;  %v3419_v44 = vld [vmem:[%s3977_s5 + $0x24] sm:$0xff]  ;;  %v1913_v30 = vunpack.c.l.bf16 %v3386_v7  ;;  %v3428_v48 = vld [vmem:[%s3977_s5 + $0x2c] sm:$0xff] }
 0x2bd   : > { %v1832_v58 = vsub.f32 %v1824_v43, %v1828_v32  ;;  %v1843_v27 = vadd.f32 1e-05, %v1835_v55  ;;  %v1841_v61 = vadd.f32 1e-05, %v1833_v59  ;;  %v1942_v43 = vunpack.c.h.bf16 %v3391_v37  ;;  %v3433_v13 = vld [vmem:[%s3977_s5 + $0x34] sm:$0xff]  ;;  %v3442_v54 = vld [vmem:[%s3977_s5 + $0x3c] sm:$0xff] }
 0x2be   : > { %v1842_v0 = vadd.f32 1e-05, %v1834_v5  ;;  %v1943_v38 = vunpack.c.l.bf16 %v3396_v8  ;;  %v1945_v53 = vunpack.c.l.bf16 %v3401_v39  ;;  %v1946_v50 = vunpack.c.h.bf16 %v3401_v39  ;;  %v3447_v52 = vld [vmem:[%s3977_s5 + $0x44] ss:$144 sps:$4 sm:$0xff]   ;;  %v3459_v60 = vld [vmem:[%s3977_s5 + $0xbc] sm:$0xff]  ;;  %v3471_v5 = vld [vmem:[%s3977_s5 + $0xcc] sm:$0xff] }
 0x2bf   : > { %v1836_v45 = vmax.f32 %v1832_v58, 0.0  ;;  %2824 = vrsqrt.f32 %v1843_v27  ;;  %v3452_v55 = vld [vmem:[%s3977_s5 + $0xb4] sm:$0xff]  ;;  %v3464_v27 = vld [vmem:[%s3977_s5 + $0xc4] sm:$0xff]  ;;  %v4022_v39 = vunpack.c.h.bf16 %v3419_v44 }
 0x2c0   : > { %2826 = vrsqrt.f32 %v1841_v61 }
 0x2c1   : > { %v1844_v62 = vadd.f32 1e-05, %v1836_v45 }
 0x2c3   : > { %2828 = vrsqrt.f32 %v1844_v62 }
 0x2c4   : > { %2830 = vrsqrt.f32 %v1842_v0 }
 0x2c9   : > { %v2825_v4 = vpop.eup %2824 }
 0x2ca   : > { %v2827_v11 = vpop.eup %2826  ;;  %v1851_v14 = vmul.f32 %v2825_v4, %v1839_v1  ;;  %v3591_v4 = vld [vmem:[%s3977_s5 + $0xf0] sm:$0xff] }
 0x2cb   : > { %v1849_v63 = vmul.f32 %v2827_v11, %v1837_v2  ;;  %4012 = vst [vmem:[#allocation15_spill] sm:$0xff] %v3591_v4 }
 0x2cc   : > { %1989 = vperm.xlu1 %2823, %v1851_v14   ;;  %v1859_v9 = vmul.f32 %v1851_v14, %v1815_v16  ;;  %v1906_v16 = vunpack.c.h.bf16 %v3366_v35  ;;  %v3586_v14 = vld [vmem:[%s3977_s5 + $0xe8] sm:$0xff] }
 0x2cd   : > { %v2829_v17 = vpop.eup %2828  ;;  %1979 = vperm.xlu0 %2822, %v1849_v63   ;;  %v1857_v21 = vmul.f32 %v1849_v63, %v1813_v41  ;;  %v1910_v41 = vunpack.c.h.bf16 %v3376_v47  ;;  %v1875_v63 = vld [vmem:[%s3977_s5 + $0x48] sm:$0xff]  ;;  %4011 = vst [vmem:[#allocation14_spill] sm:$0xff] %v3586_v14 }
 0x2ce   : > { %v2831_v19 = vpop.eup %2830  ;;  %v1852_v20 = vmul.f32 %v2829_v17, %v1840_v51  ;;  %v1863_v15 = vsub.f32 %v1855_v12, %v1859_v9  ;;  %v3489_v17 = vld [vmem:[%s3977_s5 + $0x74] sm:$0xff]  ;;  %v3527_v12 = vld [vmem:[%s3977_s5 + $0x10c] sm:$0xff]  ;;  %v3581_v9 = vld [vmem:[%s3977_s5 + $0xe0] sm:$0xff]  ;;  %v1923_v11 = vunpack.c.l.bf16 %v1875_v63  ;;  %v1924_v51 = vunpack.c.h.bf16 %v1875_v63 }
 0x2cf   : > { %v1850_v22 = vmul.f32 %v2831_v19, %v1838_v56  ;;  %v1861_v31 = vsub.f32 %v1853_v57, %v1857_v21  ;;  %v3484_v56 = vld [vmem:[%s3977_s5 + $0x6c] sm:$0xff]  ;;  %4004 = vst [vmem:[#allocation7_spill] sm:$0xff] %v3527_v12  ;;  %v3555_v19 = vld [vmem:[%s3977_s5 + $0x58] sm:$0xff]  ;;  %4010 = vst [vmem:[#allocation13_spill] sm:$0xff] %v3581_v9  ;;  %v4026_v63 = vunpack.c.h.bf16 %v3433_v13 }
 0x2d0   : > { %1994 = vperm.xlu1 %2823, %v1852_v20   ;;  %v1860_v28 = vmul.f32 %v1852_v20, %v1816_v46  ;;  %v1941_v46 = vunpack.c.l.bf16 %v3391_v37  ;;  %v1876_v21 = vld [vmem:[%s3977_s5 + $0x50] sm:$0xff]  ;;  %4006 = vst [vmem:[#allocation9_spill] sm:$0xff] %v3555_v19  ;;  %v3574_v20 = vld [vmem:[%s3977_s5 + $0xd8] sm:$0xff]  ;;  %v4018_v37 = vunpack.c.l.bf16 %v3406_v40 }
 0x2d1   : > { %v1858_v25 = vmul.f32 %v1850_v22, %v1814_v23  ;;  %1984 = vperm.xlu0 %2822, %v1850_v22   ;;  %v1944_v23 = vunpack.c.h.bf16 %v3396_v8  ;;  %v3498_v22 = vld [vmem:[%s3977_s5 + $0x7c] sm:$0xff]  ;;  %4009 = vst [vmem:[#allocation12_spill] sm:$0xff] %v3574_v20  ;;  %v1925_v57 = vunpack.c.l.bf16 %v1876_v21  ;;  %v1926_v2 = vunpack.c.h.bf16 %v1876_v21 }
 0x2d2   : > { %v1864_v10 = vsub.f32 %v1856_v33, %v1860_v28  ;;  %v3522_v33 = vld [vmem:[%s3977_s5 + $0x104] sm:$0xff]  ;;  %v4020_v8 = vunpack.c.h.bf16 %v3386_v7 }
 0x2d3   : > { %v1862_v18 = vsub.f32 %v1854_v3, %v1858_v25  ;;  %v3503_v3 = vld [vmem:[%s3977_s5 + $0x84] sm:$0xff]  ;;  %4003 = vst [vmem:[#allocation6_spill] sm:$0xff] %v3522_v33 }
 0x2d4   : > { %v3564_v25 = vld [vmem:[%s3977_s5 + $0x60] sm:$0xff]  ;;  %v3569_v28 = vld [vmem:[%s3977_s5 + $0x68] ss:$144 sps:$4 sm:$0xff]  }
 0x2d5   : > { %2076 = vperm.xlu1 %2823, %v1862_v18   ;;  %2071 = vperm.xlu0 %2822, %v1861_v31   ;;  %v3512_v18 = vld [vmem:[%s3977_s5 + $0x8c] ss:$144 sps:$4 sm:$0xff]   ;;  %4007 = vst [vmem:[#allocation10_spill] sm:$0xff] %v3564_v25  ;;  %4008 = vst [vmem:[#allocation11_spill] sm:$0xff] %v3569_v28 }
 0x2d6   : > { %v3517_v31 = vld [vmem:[%s3977_s5 + $0xfc] sm:$0xff] }
 0x2d7   : > { %4002 = vst [vmem:[#allocation5_spill] sm:$0xff] %v3517_v31 }
 0x2d9   : > { %2086 = vperm.xlu1 %2823, %v1864_v10   ;;  %2081 = vperm.xlu0 %2822, %v1863_v15   ;;  %v3532_v10 = vld [vmem:[%s3977_s5 + $0x114] sm:$0xff] }
 0x2da   : > { %4005 = vst [vmem:[#allocation8_spill] sm:$0xff] %v3532_v10 }
 0x34b   : > { %v3603_v32 = vpop.permute.xlu1 %1989 }
 0x34c   : > { %4013 = vst [vmem:[#allocation16_spill] sm:$0xff] %v3603_v32  ;;  %v1980_v15 = vpop.permute.xlu0 %1979  ;;  %v3610_v45 = vmul.f32 %v3603_v32, %v1923_v11  ;;  %v3613_v59 = vmul.f32 %v3603_v32, %v1924_v51  ;;  %v3616_v58 = vmul.f32 %v3603_v32, %v1925_v57  ;;  %v3619_v21 = vmul.f32 %v3603_v32, %v1926_v2 }
 0x34d   : > { %v3623_v0 = vmul.f32 %v1980_v15, %v1905_v49  ;;  %v3627_v61 = vmul.f32 %v1980_v15, %v1906_v16  ;;  %v3631_v11 = vmul.f32 %v1980_v15, %v1907_v6  ;;  %v3635_v51 = vmul.f32 %v1980_v15, %v1908_v34 }
 0x34e   : > { %4014 = vst [vmem:[#allocation17_spill] sm:$0xff] %v3610_v45  ;;  %4015 = vst [vmem:[#allocation18_spill] sm:$0xff] %v3613_v59  ;;  %v3639_v2 = vmul.f32 %v1980_v15, %v1909_v29  ;;  %v3643_v49 = vmul.f32 %v1980_v15, %v1910_v41  ;;  %v3647_v35 = vmul.f32 %v1980_v15, %v1911_v42  ;;  %v4023_v57 = vunpack.c.l.bf16 %v3428_v48 }
 0x34f   : > { %4016 = vst [vmem:[#allocation19_spill] sm:$0xff] %v3616_v58  ;;  %4017 = vst [vmem:[#allocation20_spill] sm:$0xff] %v3619_v21  ;;  %v3651_v16 = vmul.f32 %v1980_v15, %v1912_v26  ;;  %v3655_v24 = vmul.f32 %v1980_v15, %v1913_v30  ;;  %v3659_v6 = vmul.f32 %v1980_v15, %v1941_v46  ;;  %v3669_v29 = vpop.permute.xlu1 %1994  ;;  %v4019_v46 = vunpack.c.h.bf16 %v3406_v40 }
 0x350   : > { %v3663_v47 = vmul.f32 %v1980_v15, %v1942_v43  ;;  %v3667_v34 = vmul.f32 %v1980_v15, %v1943_v38  ;;  %v3673_v36 = vmul.f32 %v1980_v15, %v1944_v23  ;;  %v3677_v41 = vmul.f32 %v1980_v15, %v1945_v53  ;;  %v1985_v30 = vpop.permute.xlu0 %1984 }
 0x351   : > { %v3681_v42 = vmul.f32 %v1980_v15, %v1946_v50  ;;  %v3685_v26 = vmul.f32 %v1980_v15, %v4018_v37  ;;  %v3689_v43 = vmul.f32 %v1980_v15, %v4019_v46  ;;  %v3693_v38 = vmul.f32 %v1980_v15, %v4020_v8 }
 0x352   : > { %v4021_v23 = vunpack.c.l.bf16 %v3419_v44  ;;  %v2007_v50 = vmul.f32 %v1985_v30, %v4022_v39  ;;  %v2008_v62 = vmul.f32 %v1985_v30, %v4023_v57  ;;  %v4024_v37 = vunpack.c.h.bf16 %v3428_v48 }
 0x353   : > { %v4025_v40 = vunpack.c.l.bf16 %v3433_v13  ;;  %v2011_v7 = vmul.f32 %v1985_v30, %v4026_v63  ;;  %v4027_v15 = vunpack.c.l.bf16 %v3442_v54  ;;  %v4029_v44 = vunpack.c.l.bf16 %v3447_v52 }
 0x354   : > { %v2006_v53 = vmul.f32 %v1985_v30, %v4021_v23  ;;  %v2009_v1 = vmul.f32 %v1985_v30, %v4024_v37  ;;  %v4028_v23 = vunpack.c.h.bf16 %v3442_v54  ;;  %v4030_v57 = vunpack.c.l.bf16 %v3452_v55  ;;  %v2077_v48 = vpop.permute.xlu1 %2076 }
 0x355   : > { %v2010_v46 = vmul.f32 %v1985_v30, %v4025_v40  ;;  %v2012_v8 = vmul.f32 %v1985_v30, %v4027_v15  ;;  %v2014_v39 = vmul.f32 %v1985_v30, %v4029_v44  ;;  %v4031_v37 = vunpack.c.h.bf16 %v3452_v55 }
 0x356   : > { %v2013_v21 = vmul.f32 %v1985_v30, %v4028_v23  ;;  %v2042_v58 = vmul.f32 %v1985_v30, %v4030_v57  ;;  %v4032_v40 = vunpack.c.l.bf16 %v3459_v60  ;;  %v4033_v63 = vunpack.c.h.bf16 %v3459_v60 }
 0x357   : > { %v2043_v59 = vmul.f32 %v1985_v30, %v4031_v37  ;;  %v4034_v15 = vunpack.c.l.bf16 %v3464_v27  ;;  %v4035_v23 = vunpack.c.h.bf16 %v3464_v27  ;;  %v4036_v44 = vunpack.c.l.bf16 %v3471_v5 }
 0x358   : > { %v2044_v13 = vmul.f32 %v1985_v30, %v4032_v40  ;;  %v2045_v45 = vmul.f32 %v1985_v30, %v4033_v63  ;;  %v4037_v57 = vunpack.c.h.bf16 %v3471_v5  ;;  %v4038_v55 = vunpack.c.h.bf16 %v3447_v52 }
 0x359   : > { %v2046_v54 = vmul.f32 %v1985_v30, %v4034_v15  ;;  %v2047_v4 = vmul.f32 %v1985_v30, %v4035_v23  ;;  %v2048_v14 = vmul.f32 %v1985_v30, %v4036_v44  ;;  %v2098_v20 = vadd.f32 %v2077_v48, %v2006_v53 }
 0x35a   : > { %v2049_v9 = vmul.f32 %v1985_v30, %v4037_v57  ;;  %v2050_v37 = vmul.f32 %v1985_v30, %v4038_v55  ;;  %v2099_v40 = vadd.f32 %v2077_v48, %v2007_v50  ;;  %v2100_v28 = vadd.f32 %v2077_v48, %v2008_v62 }
 0x35b   : > { %v2101_v60 = vadd.f32 %v2077_v48, %v2009_v1  ;;  %v2102_v63 = vadd.f32 %v2077_v48, %v2010_v46  ;;  %v2103_v25 = vadd.f32 %v2077_v48, %v2011_v7  ;;  %v2104_v32 = vadd.f32 %v2077_v48, %v2012_v8 }
 0x35c   : > { %v2105_v15 = vadd.f32 %v2077_v48, %v2013_v21  ;;  %v2106_v19 = vadd.f32 %v2077_v48, %v2014_v39  ;;  %v2134_v27 = vadd.f32 %v2077_v48, %v2042_v58  ;;  %v2135_v23 = vadd.f32 %v2077_v48, %v2043_v59 }
 0x35d   : > { %v2136_v10 = vadd.f32 %v2077_v48, %v2044_v13  ;;  %v2137_v12 = vadd.f32 %v2077_v48, %v2045_v45  ;;  %v2138_v44 = vadd.f32 %v2077_v48, %v2046_v54  ;;  %v2139_v33 = vadd.f32 %v2077_v48, %v2047_v4 }
 0x35e   : > { %v2140_v5 = vadd.f32 %v2077_v48, %v2048_v14  ;;  %v2141_v57 = vadd.f32 %v2077_v48, %v2049_v9  ;;  %v2142_v31 = vadd.f32 %v2077_v48, %v2050_v37  ;;  %v2170_v52 = vmax.f32 %v2098_v20, 0.0  ;;  %v2072_v9 = vpop.permute.xlu0 %2071 }
 0x35f   : > { %v2171_v30 = vmax.f32 %v2099_v40, 0.0  ;;  %v2172_v53 = vmax.f32 %v2100_v28, 0.0  ;;  %v2173_v50 = vmax.f32 %v2101_v60, 0.0  ;;  %v2174_v62 = vmax.f32 %v2102_v63, 0.0 }
 0x360   : > { %v2175_v1 = vmax.f32 %v2103_v25, 0.0  ;;  %v2176_v46 = vmax.f32 %v2104_v32, 0.0  ;;  %v2177_v7 = vmax.f32 %v2105_v15, 0.0  ;;  %v2178_v8 = vmax.f32 %v2106_v19, 0.0 }
 0x361   : > { %v2206_v21 = vmax.f32 %v2134_v27, 0.0  ;;  %v2207_v39 = vmax.f32 %v2135_v23, 0.0  ;;  %v2208_v58 = vmax.f32 %v2136_v10, 0.0  ;;  %v2209_v59 = vmax.f32 %v2137_v12, 0.0 }
 0x362   : > { %v2210_v13 = vmax.f32 %v2138_v44, 0.0  ;;  %v2211_v45 = vmax.f32 %v2139_v33, 0.0  ;;  %v2212_v54 = vmax.f32 %v2140_v5, 0.0  ;;  %v2213_v4 = vmax.f32 %v2141_v57, 0.0 }
 0x363   : > { %v2214_v14 = vmax.f32 %v2142_v31, 0.0  ;;  %v2727_v48 = vpack.c.bf16 %v2171_v30, %v2170_v52  ;;  %v2728_v20 = vpack.c.bf16 %v2173_v50, %v2172_v53  ;;  %v2729_v55 = vpack.c.bf16 %v2175_v1, %v2174_v62 }
 0x364   : > { %v2730_v28 = vpack.c.bf16 %v2177_v7, %v2176_v46  ;;  %v2731_v37 = vpack.c.bf16 %v2178_v8, %v2178_v8  ;;  %v2747_v40 = vpack.c.bf16 %v2207_v39, %v2206_v21  ;;  %v2748_v25 = vpack.c.bf16 %v2209_v59, %v2208_v58 }
 0x365   : > { %v2749_v32 = vpack.c.bf16 %v2211_v45, %v2210_v13  ;;  %v2750_v60 = vpack.c.bf16 %v2213_v4, %v2212_v54  ;;  %v2751_v19 = vpack.c.bf16 %v2214_v14, %v2214_v14  ;;  %2462 = vst [vmem:[%s3977_s5 + $0x24] sm:$0xff] %v2727_v48  ;;  %2463 = vst [vmem:[%s3977_s5 + $0x2c] sm:$0xff] %v2728_v20  ;;  %v4039_v14 = vunpack.c.l.bf16 %v3484_v56 }
 0x366   : > { %2464 = vst [vmem:[%s3977_s5 + $0x34] sm:$0xff] %v2729_v55  ;;  %2465 = vst [vmem:[%s3977_s5 + $0x3c] sm:$0xff] %v2730_v28  ;;  %v2089_v31 = vadd.f32 %v2072_v9, %v3623_v0  ;;  %v2090_v33 = vadd.f32 %v2072_v9, %v3627_v61  ;;  %v2091_v0 = vadd.f32 %v2072_v9, %v3631_v11  ;;  %v4040_v48 = vunpack.c.h.bf16 %v3484_v56 }
 0x367   : > { %2466 = vst [vmem:[%s3977_s5 + $0x44] sm:$0xf] %v2731_v37  ;;  %2482 = vst [vmem:[%s3977_s5 + $0xb4] sm:$0xff] %v2747_v40  ;;  %v2092_v61 = vadd.f32 %v2072_v9, %v3635_v51  ;;  %v2093_v12 = vadd.f32 %v2072_v9, %v3639_v2  ;;  %v2094_v10 = vadd.f32 %v2072_v9, %v3643_v49  ;;  %v4041_v55 = vunpack.c.l.bf16 %v3489_v17 }
 0x368   : > { %2483 = vst [vmem:[%s3977_s5 + $0xbc] sm:$0xff] %v2748_v25  ;;  %2484 = vst [vmem:[%s3977_s5 + $0xc4] sm:$0xff] %v2749_v32  ;;  %v2095_v63 = vadd.f32 %v2072_v9, %v3647_v35  ;;  %v2096_v15 = vadd.f32 %v2072_v9, %v3651_v16  ;;  %v2097_v11 = vadd.f32 %v2072_v9, %v3655_v24  ;;  %v2161_v57 = vmax.f32 %v2089_v31, 0.0 }
 0x369   : > { %2485 = vst [vmem:[%s3977_s5 + $0xcc] sm:$0xff] %v2750_v60  ;;  %2486 = vst [vmem:[%s3977_s5 + $0xd4] sm:$0xf] %v2751_v19  ;;  %v2125_v51 = vadd.f32 %v2072_v9, %v3659_v6  ;;  %v2126_v2 = vadd.f32 %v2072_v9, %v3663_v47  ;;  %v2127_v49 = vadd.f32 %v2072_v9, %v3667_v34  ;;  %v2162_v24 = vmax.f32 %v2090_v33, 0.0 }
 0x36a   : > { %v2128_v27 = vadd.f32 %v2072_v9, %v3673_v36  ;;  %v2129_v23 = vadd.f32 %v2072_v9, %v3677_v41  ;;  %v2130_v44 = vadd.f32 %v2072_v9, %v3681_v42  ;;  %v2131_v5 = vadd.f32 %v2072_v9, %v3685_v26 }
 0x36b   : > { %v2132_v35 = vadd.f32 %v2072_v9, %v3689_v43  ;;  %v2133_v16 = vadd.f32 %v2072_v9, %v3693_v38  ;;  %v2163_v52 = vmax.f32 %v2091_v0, 0.0  ;;  %v2164_v6 = vmax.f32 %v2092_v61, 0.0  ;;  %v2087_v0 = vpop.permute.xlu1 %2086 }
 0x36c   : > { %v2165_v30 = vmax.f32 %v2093_v12, 0.0  ;;  %v2166_v47 = vmax.f32 %v2094_v10, 0.0  ;;  %v2167_v53 = vmax.f32 %v2095_v63, 0.0  ;;  %v2168_v34 = vmax.f32 %v2096_v15, 0.0  ;;  %v4048_v10 = vld [vmem:[#allocation5_spill] sm:$0xff] }
 0x36d   : > { %v2169_v50 = vmax.f32 %v2097_v11, 0.0  ;;  %v2197_v36 = vmax.f32 %v2125_v51, 0.0  ;;  %v2198_v62 = vmax.f32 %v2126_v2, 0.0  ;;  %v2199_v41 = vmax.f32 %v2127_v49, 0.0  ;;  %v4051_v51 = vld [vmem:[#allocation6_spill] sm:$0xff] }
 0x36e   : > { %v2200_v1 = vmax.f32 %v2128_v27, 0.0  ;;  %v2201_v42 = vmax.f32 %v2129_v23, 0.0  ;;  %v2202_v46 = vmax.f32 %v2130_v44, 0.0  ;;  %v2203_v26 = vmax.f32 %v2131_v5, 0.0  ;;  %v4054_v23 = vld [vmem:[#allocation7_spill] sm:$0xff] }
 0x36f   : > { %v2204_v7 = vmax.f32 %v2132_v35, 0.0  ;;  %v2205_v43 = vmax.f32 %v2133_v16, 0.0  ;;  %v2722_v8 = vpack.c.bf16 %v2162_v24, %v2161_v57  ;;  %v2723_v38 = vpack.c.bf16 %v2164_v6, %v2163_v52  ;;  %v4057_v57 = vld [vmem:[#allocation8_spill] sm:$0xff] }
 0x370   : > { %v2724_v21 = vpack.c.bf16 %v2166_v47, %v2165_v30  ;;  %v2725_v39 = vpack.c.bf16 %v2168_v34, %v2167_v53  ;;  %v2726_v58 = vpack.c.bf16 %v2169_v50, %v2169_v50  ;;  %v2742_v59 = vpack.c.bf16 %v2198_v62, %v2197_v36 }
 0x371   : > { %v2743_v13 = vpack.c.bf16 %v2200_v1, %v2199_v41  ;;  %v2744_v45 = vpack.c.bf16 %v2202_v46, %v2201_v42  ;;  %v2745_v54 = vpack.c.bf16 %v2204_v7, %v2203_v26  ;;  %v2746_v4 = vpack.c.bf16 %v2205_v43, %v2205_v43  ;;  %2457 = vst [vmem:[%s3977_s5] sm:$0xff] %v2722_v8 }
 0x372   : > { %2458 = vst [vmem:[%s3977_s5 + $0x8] sm:$0xff] %v2723_v38  ;;  %2459 = vst [vmem:[%s3977_s5 + $0x10] sm:$0xff] %v2724_v21  ;;  %v2024_v9 = vmul.f32 %v3669_v29, %v4039_v14  ;;  %v2025_v20 = vmul.f32 %v3669_v29, %v4040_v48  ;;  %v2026_v28 = vmul.f32 %v3669_v29, %v4041_v55  ;;  %v4042_v37 = vunpack.c.h.bf16 %v3489_v17 }
 0x373   : > { %2460 = vst [vmem:[%s3977_s5 + $0x18] sm:$0xff] %v2725_v39  ;;  %2461 = vst [vmem:[%s3977_s5 + $0x20] sm:$0xf] %v2726_v58  ;;  %v4043_v56 = vunpack.c.l.bf16 %v3498_v22  ;;  %v4044_v25 = vunpack.c.h.bf16 %v3498_v22  ;;  %v4045_v60 = vunpack.c.l.bf16 %v3503_v3  ;;  %v4046_v31 = vunpack.c.h.bf16 %v3503_v3 }
 0x374   : > { %2477 = vst [vmem:[%s3977_s5 + $0x90] sm:$0xff] %v2742_v59  ;;  %v2027_v40 = vmul.f32 %v3669_v29, %v4042_v37  ;;  %2478 = vst [vmem:[%s3977_s5 + $0x98] sm:$0xff] %v2743_v13  ;;  %v4047_v61 = vunpack.c.l.bf16 %v3512_v18  ;;  %v4049_v63 = vunpack.c.l.bf16 %v4048_v10  ;;  %v4050_v22 = vunpack.c.h.bf16 %v4048_v10 }
 0x375   : > { %2479 = vst [vmem:[%s3977_s5 + $0xa0] sm:$0xff] %v2744_v45  ;;  %2480 = vst [vmem:[%s3977_s5 + $0xa8] sm:$0xff] %v2745_v54  ;;  %v2028_v17 = vmul.f32 %v3669_v29, %v4043_v56  ;;  %v2029_v32 = vmul.f32 %v3669_v29, %v4044_v25  ;;  %v2030_v19 = vmul.f32 %v3669_v29, %v4045_v60  ;;  %v4052_v2 = vunpack.c.l.bf16 %v4051_v51 }
 0x376   : > { %2481 = vst [vmem:[%s3977_s5 + $0xb0] sm:$0xf] %v2746_v4  ;;  %v2031_v33 = vmul.f32 %v3669_v29, %v4046_v31  ;;  %v2032_v12 = vmul.f32 %v3669_v29, %v4047_v61  ;;  %v2060_v15 = vmul.f32 %v3669_v29, %v4049_v63  ;;  %v2061_v11 = vmul.f32 %v3669_v29, %v4050_v22 }
 0x377   : > { %v2062_v49 = vmul.f32 %v3669_v29, %v4052_v2  ;;  %v4053_v3 = vunpack.c.h.bf16 %v4051_v51  ;;  %v4055_v44 = vunpack.c.l.bf16 %v4054_v23  ;;  %v4056_v35 = vunpack.c.h.bf16 %v4054_v23  ;;  %v4063_v2 = vld [vmem:[#allocation16_spill] sm:$0xff]  ;;  %v4065_v23 = vld [vmem:[#allocation10_spill] sm:$0xff] }
 0x378   : > { %v4058_v24 = vunpack.c.l.bf16 %v4057_v57  ;;  %v4059_v6 = vunpack.c.h.bf16 %v4057_v57  ;;  %v4060_v47 = vunpack.c.h.bf16 %v3512_v18  ;;  %v2116_v34 = vadd.f32 %v2087_v0, %v2024_v9  ;;  %v2082_v57 = vpop.permute.xlu0 %2081 }
 0x379   : > { %v2063_v27 = vmul.f32 %v3669_v29, %v4053_v3  ;;  %v2064_v5 = vmul.f32 %v3669_v29, %v4055_v44  ;;  %v2065_v16 = vmul.f32 %v3669_v29, %v4056_v35  ;;  %v2117_v50 = vadd.f32 %v2087_v0, %v2025_v20 }
 0x37a   : > { %v2066_v52 = vmul.f32 %v3669_v29, %v4058_v24  ;;  %v2067_v30 = vmul.f32 %v3669_v29, %v4059_v6  ;;  %v2068_v53 = vmul.f32 %v3669_v29, %v4060_v47  ;;  %v2118_v36 = vadd.f32 %v2087_v0, %v2026_v28  ;;  %v4068_v24 = vld [vmem:[#allocation11_spill] sm:$0xff] }
 0x37b   : > { %v2119_v62 = vadd.f32 %v2087_v0, %v2027_v40  ;;  %v2120_v41 = vadd.f32 %v2087_v0, %v2028_v17  ;;  %v2121_v1 = vadd.f32 %v2087_v0, %v2029_v32  ;;  %v2122_v42 = vadd.f32 %v2087_v0, %v2030_v19 }
 0x37c   : > { %v2123_v46 = vadd.f32 %v2087_v0, %v2031_v33  ;;  %v2124_v26 = vadd.f32 %v2087_v0, %v2032_v12  ;;  %v2152_v7 = vadd.f32 %v2087_v0, %v2060_v15  ;;  %v2153_v43 = vadd.f32 %v2087_v0, %v2061_v11  ;;  %v4061_v11 = vld [vmem:[#allocation9_spill] sm:$0xff] }
 0x37d   : > { %v2154_v8 = vadd.f32 %v2087_v0, %v2062_v49  ;;  %v2155_v38 = vadd.f32 %v2087_v0, %v2063_v27  ;;  %v2156_v21 = vadd.f32 %v2087_v0, %v2064_v5  ;;  %v2157_v39 = vadd.f32 %v2087_v0, %v2065_v16 }
 0x37e   : > { %v2158_v58 = vadd.f32 %v2087_v0, %v2066_v52  ;;  %v2159_v59 = vadd.f32 %v2087_v0, %v2067_v30  ;;  %v2160_v18 = vadd.f32 %v2087_v0, %v2068_v53  ;;  %v2188_v13 = vmax.f32 %v2116_v34, 0.0  ;;  %v4070_v30 = vld [vmem:[#allocation12_spill] sm:$0xff] }
 0x37f   : > { %v2189_v29 = vmax.f32 %v2117_v50, 0.0  ;;  %v2190_v45 = vmax.f32 %v2118_v36, 0.0  ;;  %v2191_v54 = vmax.f32 %v2119_v62, 0.0  ;;  %v2192_v4 = vmax.f32 %v2120_v41, 0.0  ;;  %v4073_v36 = vld [vmem:[#allocation13_spill] sm:$0xff] }
 0x380   : > { %v2193_v14 = vmax.f32 %v2121_v1, 0.0  ;;  %v2194_v9 = vmax.f32 %v2122_v42, 0.0  ;;  %v2195_v48 = vmax.f32 %v2123_v46, 0.0  ;;  %v2196_v20 = vmax.f32 %v2124_v26, 0.0  ;;  %v4076_v46 = vld [vmem:[#allocation14_spill] sm:$0xff] }
 0x381   : > { %v2224_v55 = vmax.f32 %v2152_v7, 0.0  ;;  %v2225_v28 = vmax.f32 %v2153_v43, 0.0  ;;  %v2226_v37 = vmax.f32 %v2154_v8, 0.0  ;;  %v2227_v40 = vmax.f32 %v2155_v38, 0.0  ;;  %v4079_v38 = vld [vmem:[#allocation15_spill] sm:$0xff] }
 0x382   : > { %v2228_v56 = vmax.f32 %v2156_v21, 0.0  ;;  %v2229_v17 = vmax.f32 %v2157_v39, 0.0  ;;  %v2230_v25 = vmax.f32 %v2158_v58, 0.0  ;;  %v2231_v32 = vmax.f32 %v2159_v59, 0.0 }
 0x383   : > { %v2232_v60 = vmax.f32 %v2160_v18, 0.0  ;;  %v2737_v19 = vpack.c.bf16 %v2189_v29, %v2188_v13  ;;  %v2738_v31 = vpack.c.bf16 %v2191_v54, %v2190_v45  ;;  %v2739_v33 = vpack.c.bf16 %v2193_v14, %v2192_v4  ;;  %v4083_v29 = vld [vmem:[#allocation17_spill] sm:$0xff]  ;;  %v4084_v54 = vld [vmem:[#allocation18_spill] sm:$0xff]  ;;  %v4085_v14 = vld [vmem:[#allocation19_spill] sm:$0xff] }
 0x384   : > { %v2740_v0 = vpack.c.bf16 %v2195_v48, %v2194_v9  ;;  %v2741_v61 = vpack.c.bf16 %v2196_v20, %v2196_v20  ;;  %v2757_v12 = vpack.c.bf16 %v2225_v28, %v2224_v55  ;;  %v2758_v10 = vpack.c.bf16 %v2227_v40, %v2226_v37  ;;  %v4086_v48 = vld [vmem:[#allocation20_spill] sm:$0xff] }
 0x385   : > { %v2759_v63 = vpack.c.bf16 %v2229_v17, %v2228_v56  ;;  %v2760_v15 = vpack.c.bf16 %v2231_v32, %v2230_v25  ;;  %v2761_v22 = vpack.c.bf16 %v2232_v60, %v2232_v60  ;;  %2472 = vst [vmem:[%s3977_s5 + $0x6c] sm:$0xff] %v2737_v19  ;;  %2473 = vst [vmem:[%s3977_s5 + $0x74] sm:$0xff] %v2738_v31  ;;  %v4062_v51 = vunpack.c.l.bf16 %v4061_v11 }
 0x386   : > { %2474 = vst [vmem:[%s3977_s5 + $0x7c] sm:$0xff] %v2739_v33  ;;  %2475 = vst [vmem:[%s3977_s5 + $0x84] sm:$0xff] %v2740_v0  ;;  %v4064_v3 = vunpack.c.h.bf16 %v4061_v11  ;;  %v4066_v44 = vunpack.c.l.bf16 %v4065_v23  ;;  %v4067_v35 = vunpack.c.h.bf16 %v4065_v23  ;;  %v4069_v52 = vunpack.c.l.bf16 %v4068_v24 }
 0x387   : > { %2476 = vst [vmem:[%s3977_s5 + $0x8c] sm:$0xf] %v2741_v61  ;;  %2492 = vst [vmem:[%s3977_s5 + $0xfc] sm:$0xff] %v2757_v12  ;;  %v2019_v49 = vmul.f32 %v4063_v2, %v4062_v51  ;;  %v4071_v47 = vunpack.c.l.bf16 %v4070_v30  ;;  %v4072_v34 = vunpack.c.h.bf16 %v4070_v30  ;;  %v4074_v62 = vunpack.c.l.bf16 %v4073_v36 }
 0x388   : > { %v2020_v27 = vmul.f32 %v4063_v2, %v4064_v3  ;;  %v2021_v5 = vmul.f32 %v4063_v2, %v4066_v44  ;;  %v2022_v16 = vmul.f32 %v4063_v2, %v4067_v35  ;;  %2493 = vst [vmem:[%s3977_s5 + $0x104] sm:$0xff] %v2758_v10  ;;  %2494 = vst [vmem:[%s3977_s5 + $0x10c] sm:$0xff] %v2759_v63  ;;  %v4075_v1 = vunpack.c.h.bf16 %v4073_v36 }
 0x389   : > { %2495 = vst [vmem:[%s3977_s5 + $0x114] sm:$0xff] %v2760_v15  ;;  %2496 = vst [vmem:[%s3977_s5 + $0x11c] sm:$0xf] %v2761_v22  ;;  %v2023_v6 = vmul.f32 %v4063_v2, %v4069_v52  ;;  %v2051_v53 = vmul.f32 %v4063_v2, %v4071_v47  ;;  %v2052_v50 = vmul.f32 %v4063_v2, %v4072_v34  ;;  %v4077_v26 = vunpack.c.l.bf16 %v4076_v46 }
 0x38a   : > { %v2053_v41 = vmul.f32 %v4063_v2, %v4074_v62  ;;  %v2054_v42 = vmul.f32 %v4063_v2, %v4075_v1  ;;  %v4078_v43 = vunpack.c.h.bf16 %v4076_v46  ;;  %v4080_v21 = vunpack.c.l.bf16 %v4079_v38 }
 0x38b   : > { %v2055_v7 = vmul.f32 %v4063_v2, %v4077_v26  ;;  %v4081_v58 = vunpack.c.h.bf16 %v4079_v38  ;;  %v4082_v18 = vunpack.c.h.bf16 %v4068_v24  ;;  %v2107_v45 = vadd.f32 %v2082_v57, %v4083_v29 }
 0x38c   : > { %v2056_v8 = vmul.f32 %v4063_v2, %v4078_v43  ;;  %v2057_v39 = vmul.f32 %v4063_v2, %v4080_v21  ;;  %v2108_v4 = vadd.f32 %v2082_v57, %v4084_v54  ;;  %v2109_v9 = vadd.f32 %v2082_v57, %v4085_v14 }
 0x38d   : > { %v2058_v59 = vmul.f32 %v4063_v2, %v4081_v58  ;;  %v2059_v13 = vmul.f32 %v4063_v2, %v4082_v18  ;;  %v2110_v20 = vadd.f32 %v2082_v57, %v4086_v48  ;;  %v2111_v55 = vadd.f32 %v2082_v57, %v2019_v49 }
 0x38e   : > { %v2112_v28 = vadd.f32 %v2082_v57, %v2020_v27  ;;  %v2113_v37 = vadd.f32 %v2082_v57, %v2021_v5  ;;  %v2114_v40 = vadd.f32 %v2082_v57, %v2022_v16  ;;  %v2115_v56 = vadd.f32 %v2082_v57, %v2023_v6 }
 0x38f   : > { %v2143_v17 = vadd.f32 %v2082_v57, %v2051_v53  ;;  %v2144_v25 = vadd.f32 %v2082_v57, %v2052_v50  ;;  %v2145_v32 = vadd.f32 %v2082_v57, %v2053_v41  ;;  %v2146_v60 = vadd.f32 %v2082_v57, %v2054_v42 }
 0x390   : > { %v2147_v19 = vadd.f32 %v2082_v57, %v2055_v7  ;;  %v2148_v31 = vadd.f32 %v2082_v57, %v2056_v8  ;;  %v2149_v33 = vadd.f32 %v2082_v57, %v2057_v39  ;;  %v2150_v0 = vadd.f32 %v2082_v57, %v2058_v59 }
 0x391   : > { %v2151_v61 = vadd.f32 %v2082_v57, %v2059_v13  ;;  %v2179_v12 = vmax.f32 %v2107_v45, 0.0  ;;  %v2180_v10 = vmax.f32 %v2108_v4, 0.0  ;;  %v2181_v63 = vmax.f32 %v2109_v9, 0.0 }
 0x392   : > { %v2182_v15 = vmax.f32 %v2110_v20, 0.0  ;;  %v2183_v22 = vmax.f32 %v2111_v55, 0.0  ;;  %v2184_v11 = vmax.f32 %v2112_v28, 0.0  ;;  %v2185_v51 = vmax.f32 %v2113_v37, 0.0 }
 0x393   : > { %v2186_v2 = vmax.f32 %v2114_v40, 0.0  ;;  %v2187_v49 = vmax.f32 %v2115_v56, 0.0  ;;  %v2215_v3 = vmax.f32 %v2143_v17, 0.0  ;;  %v2216_v27 = vmax.f32 %v2144_v25, 0.0 }
 0x394   : > { %v2217_v23 = vmax.f32 %v2145_v32, 0.0  ;;  %v2218_v44 = vmax.f32 %v2146_v60, 0.0  ;;  %v2219_v5 = vmax.f32 %v2147_v19, 0.0  ;;  %v2220_v35 = vmax.f32 %v2148_v31, 0.0 }
 0x395   : > { %v2221_v16 = vmax.f32 %v2149_v33, 0.0  ;;  %v2222_v24 = vmax.f32 %v2150_v0, 0.0  ;;  %v2223_v52 = vmax.f32 %v2151_v61, 0.0  ;;  %v2732_v6 = vpack.c.bf16 %v2180_v10, %v2179_v12 }
 0x396   : > { %v2733_v57 = vpack.c.bf16 %v2182_v15, %v2181_v63  ;;  %v2734_v30 = vpack.c.bf16 %v2184_v11, %v2183_v22  ;;  %v2735_v47 = vpack.c.bf16 %v2186_v2, %v2185_v51  ;;  %v2736_v53 = vpack.c.bf16 %v2187_v49, %v2187_v49 }
 0x397   : > { %v2752_v34 = vpack.c.bf16 %v2216_v27, %v2215_v3  ;;  %v2753_v50 = vpack.c.bf16 %v2218_v44, %v2217_v23  ;;  %v2754_v36 = vpack.c.bf16 %v2220_v35, %v2219_v5  ;;  %v2755_v62 = vpack.c.bf16 %v2222_v24, %v2221_v16  ;;  %2467 = vst [vmem:[%s3977_s5 + $0x48] sm:$0xff] %v2732_v6 }
 0x398   : > { %v2756_v41 = vpack.c.bf16 %v2223_v52, %v2223_v52  ;;  %2468 = vst [vmem:[%s3977_s5 + $0x50] sm:$0xff] %v2733_v57  ;;  %2469 = vst [vmem:[%s3977_s5 + $0x58] sm:$0xff] %v2734_v30 }
 0x399   : > { %2470 = vst [vmem:[%s3977_s5 + $0x60] sm:$0xff] %v2735_v47  ;;  %2471 = vst [vmem:[%s3977_s5 + $0x68] sm:$0xf] %v2736_v53 }
 0x39a   : > { %2487 = vst [vmem:[%s3977_s5 + $0xd8] sm:$0xff] %v2752_v34  ;;  %2488 = vst [vmem:[%s3977_s5 + $0xe0] sm:$0xff] %v2753_v50 }
 0x39b   : > { %2489 = vst [vmem:[%s3977_s5 + $0xe8] sm:$0xff] %v2754_v36  ;;  %2490 = vst [vmem:[%s3977_s5 + $0xf0] sm:$0xff] %v2755_v62 }
 0x39c   : > { %2491 = vst [vmem:[%s3977_s5 + $0xf8] sm:$0xf] %v2756_v41 }
 0x39d PF: > { %s15_s18 = sadd.s32 1, %s2838_s18  }
 0x39e   : > { %p12_p6 = scmp.ge.s32.totalorder %s15_s18, 4  }
 0x3a0   :  { %14 = sbr.rel (!%p12_p6) target bundleno = 1 (0x1), region = 75 }

// kernel: _lambda_.12
= control target key start
LH: loop header
LB: loop body
LE: loop exit
PB: predicated region body
PF: predicated region fallthrough
CT: control target
= control target key end

     0   :  { %s2045_s21 = smov 0   ;;  %s2656_s0 = inlined_call_operand.vmem [shape: bf16[2,32,512], index: 0, kind: input, shape index: {}]   ;;  %s2657_s1 = inlined_call_operand.vmem [shape: bf16[32,288], index: 1, kind: input, shape index: {}]   ;;  %s2658_s2 = inlined_call_operand.vmem [shape: f32[32,1], index: 2, kind: input, shape index: {}]   ;;  %s2659_s3 = inlined_call_operand.vmem [shape: f32[32,1], index: 3, kind: input, shape index: {}]   ;;  %s2660_s4 = inlined_call_operand.vmem [shape: f32[1,384], index: 4, kind: input, shape index: {}]   ;;  %s2661_s5 = inlined_call_operand.vmem [shape: bf16[2,32,384], index: 5, kind: input, shape index: {}]   ;;  %s2662_s6 = inlined_call_operand.vmem [shape: bf16[2,32,384], index: 6, kind: output, shape index: {}]  }
   0x1 LB: > { %s2051_s22 = sadd.s32 4294967295, %s1997_s21   ;;  %p1754_p0 = scmp.ge.s32.totalorder %s1997_s21, 1  ;;  %s1997_s21 = sphi %s2045_s21, %s16_s21  }
   0x2   : > { %p207_p1 = scmp.lt.s32.totalorder %s1997_s21, 3 }
   0x4   : > { %p208_p2 = pnand %p1754_p0, %p207_p1 }
   0x5   : > { %p232_p3 = scmp.lt.s32.totalorder (!%p208_p2), %s2051_s22, 1  ;;  %p1757_p4 = scmp.ne.s32.totalorder (!%p208_p2), %s2051_s22, 0 }
   0x6   : > { %211 = sbr.rel (%p208_p2) target bundleno = 844 (0x34c), region = 44 }
   0xd   : > { %s233_s23 = scalar_select %p232_p3, %s2051_s22, 1 }
   0xe   : > { %241 = sbr.rel (%p1757_p4) target bundleno = 21 (0x15), region = 48  ;;  %vm242_vm0 = vcmask (!%p1757_p4), 7168   ;;  %v1999_v0 = vmov (!%p1757_p4), 0.0  }
   0xf   : > { %s1866_s24 = sshll.u32 %s233_s23, 6  ;;  %243 = vst.msk [vmem:[#allocation3] sm:$0xff] (!%p1757_p4), %vm242_vm0, %v1999_v0  ;;  %244 = vst.msk [vmem:[#allocation3 + $0x8] sm:$0xff] (!%p1757_p4), %vm242_vm0, %v1999_v0 }
  0x10   : > { %s2060_s27 = scalar_lea.vmem %s2656_s0, %s1866_s24  ;;  %245 = vst.msk [vmem:[#allocation3 + $0x10] sm:$0xff] (!%p1757_p4), %vm242_vm0, %v1999_v0  ;;  %246 = vst.msk [vmem:[#allocation3 + $0x18] sm:$0xff] (!%p1757_p4), %vm242_vm0, %v1999_v0 }
  0x11   : > { %247 = vst.msk [vmem:[#allocation4] sm:$0xff] (!%p1757_p4), %vm242_vm0, %v1999_v0  ;;  %248 = vst.msk [vmem:[#allocation4 + $0x8] sm:$0xff] (!%p1757_p4), %vm242_vm0, %v1999_v0 }
  0x12   : > { %249 = vst.msk [vmem:[#allocation4 + $0x10] sm:$0xff] (!%p1757_p4), %vm242_vm0, %v1999_v0  ;;  %250 = vst.msk [vmem:[#allocation4 + $0x18] sm:$0xff] (!%p1757_p4), %vm242_vm0, %v1999_v0 }
  0x15 PF: > { %v2064_v1 = vld [vmem:[%s2060_s27 + $0x4] ss:$16 sps:$4 sm:$0xff]   ;;  %v2067_v2 = vld [vmem:[%s2060_s27] ss:$16 sps:$4 sm:$0xff]   ;;  %s2000_s28 = smov 127   ;;  %s2001_s29 = smov 126  }
  0x16   : > { %339 = vrot.lane.b32.xlu0 %v2064_v1, %s2000_s28  ;;  %v2072_v3 = vld [vmem:[%s2060_s27 + $0x8] ss:$16 sps:$4 sm:$0xff]   ;;  %996 = vmatprep.subr.bf16.mxu0 %v2064_v1  ;;  %v2078_v4 = vld [vmem:[%s2060_s27 + $0x24] ss:$16 sps:$4 sm:$0xff]   ;;  %v2085_v6 = vld [vmem:[%s2060_s27 + $0x20] ss:$16 sps:$4 sm:$0xff]  }
  0x17   : > { %337 = vrot.lane.b32.xlu1 %v2067_v2, %s2000_s28  ;;  %997 = vmatpush1.bf16.msra.mxu0 %v2067_v2  ;;  %v2082_v5 = vld [vmem:[%s2060_s27 + $0x28] ss:$16 sps:$4 sm:$0xff]   ;;  %s2002_s30 = smov 90   ;;  %s2003_s7 = smov 110   ;;  %v2004_v7 = vmov 0   ;;  %vm353_vm1 = vcmask 1039360  }
  0x18   : > { %998 = vmatprep.subr.bf16.mxu0 %v2078_v4  ;;  %1081 = vmatprep.mubr.bf16.mxu1 %v2004_v7  ;;  %v1969_v8 = vld [vmem:[%s2060_s27 + $0xc] ss:$16 sps:$4 sm:$0xff]   ;;  %s2005_s8 = smov 109   ;;  %s2006_s9 = smov 108   ;;  %v2160_v10 = vld [vmem:[%s2657_s1 + $0x4] ss:$12 sps:$4 sm:$0xff]  }
  0x19   : > { %v1970_v9 = vld [vmem:[%s2060_s27 + $0x2c] ss:$16 sps:$4 sm:$0xff]   ;;  %s2007_s10 = smov 92   ;;  %s2008_s11 = smov 91   ;;  %1028 = vmatprep.mubr.bf16.mxu0 %v2160_v10  ;;  %vm428_vm2 = vcmask 1031168   ;;  %vm878_vm3 = vcmask 736256  }
  0x1a   : > { %341 = vrot.lane.b32.xlu0 %v2072_v3, %s2000_s28  ;;  %v2207_v41 = vld [vmem:[%s2657_s1 + $0x8] ss:$12 sps:$4 sm:$0xff]   ;;  %vm503_vm4 = vcmask 900096   ;;  %vm989_vm5 = vcmask 261120   ;;  %vm578_vm6 = vcmask 891904   ;;  %vm653_vm7 = vcmask 883712  }
  0x1b   : > { %347 = vrot.lane.b32.xlu1 %v2078_v4, %s2000_s28  ;;  %999 = vmatpush1.bf16.msra.mxu0 %v2085_v6  ;;  %v2220_v48 = vld [vmem:[%s2657_s1 + $0x20] ss:$12 sps:$4 sm:$0xff]   ;;  %v1972_v49 = vld [vmem:[%s2060_s27 + $0x8] ss:$16 sps:$4 sm:$0xff]   ;;  %vm728_vm8 = vcmask 752640   ;;  %vm803_vm9 = vcmask 744448  }
  0x1c   : > { %v1973_v58 = vld [vmem:[%s2060_s27 + $0x28] ss:$16 sps:$4 sm:$0xff]   ;;  %vm1253_vm10 = vcmask 7168   ;;  %p1847_p5 = scmp.ne.s32.totalorder %s2051_s22, 1 }
  0x1e   : > { %349 = vrot.lane.b32.xlu0 %v2082_v5, %s2000_s28 }
  0x1f   : > { %345 = vrot.lane.b32.xlu1 %v2085_v6, %s2000_s28 }
  0x22   : > { %414 = vrot.lane.b32.xlu0 %v2064_v1, %s2001_s29 }
  0x23   : > { %416 = vrot.lane.b32.xlu1 %v2072_v3, %s2001_s29 }
  0x26   : > { %412 = vrot.lane.b32.xlu0 %v2067_v2, %s2001_s29 }
  0x27   : > { %864 = vrot.lane.b32.xlu1 %v2064_v1, %s2002_s30 }
  0x2a   : > { %866 = vrot.lane.b32.xlu0 %v2072_v3, %s2002_s30 }
  0x2b   : > { %862 = vrot.lane.b32.xlu1 %v2067_v2, %s2002_s30 }
  0x2e   : > { %422 = vrot.lane.b32.xlu0 %v2078_v4, %s2001_s29 }
  0x2f   : > { %424 = vrot.lane.b32.xlu1 %v2082_v5, %s2001_s29 }
  0x32   : > { %420 = vrot.lane.b32.xlu0 %v2085_v6, %s2001_s29 }
  0x33   : > { %872 = vrot.lane.b32.xlu1 %v2078_v4, %s2002_s30 }
  0x36   : > { %874 = vrot.lane.b32.xlu0 %v2082_v5, %s2002_s30 }
  0x37   : > { %870 = vrot.lane.b32.xlu1 %v2085_v6, %s2002_s30 }
  0x3a   : > { %489 = vrot.lane.b32.xlu0 %v2064_v1, %s2003_s7 }
  0x3b   : > { %491 = vrot.lane.b32.xlu1 %v2072_v3, %s2003_s7 }
  0x3e   : > { %487 = vrot.lane.b32.xlu0 %v2067_v2, %s2003_s7 }
  0x3f   : > { %566 = vrot.lane.b32.xlu1 %v2072_v3, %s2005_s8 }
  0x42   : > { %568 = vrot.lane.b32.xlu0 %v1969_v8, %s2005_s8 }
  0x43   : > { %497 = vrot.lane.b32.xlu1 %v2078_v4, %s2003_s7 }
  0x46   : > { %499 = vrot.lane.b32.xlu0 %v2082_v5, %s2003_s7 }
  0x47   : > { %495 = vrot.lane.b32.xlu1 %v2085_v6, %s2003_s7 }
  0x4a   : > { %574 = vrot.lane.b32.xlu0 %v2082_v5, %s2005_s8 }
  0x4b   : > { %576 = vrot.lane.b32.xlu1 %v1970_v9, %s2005_s8 }
  0x4e   : > { %564 = vrot.lane.b32.xlu0 %v2064_v1, %s2005_s8 }
  0x4f   : > { %562 = vrot.lane.b32.xlu1 %v2067_v2, %s2005_s8 }
  0x52   : > { %641 = vrot.lane.b32.xlu0 %v2072_v3, %s2006_s9 }
  0x53   : > { %643 = vrot.lane.b32.xlu1 %v1969_v8, %s2006_s9 }
  0x56   : > { %343 = vrot.lane.b32.xlu0 %v1969_v8, %s2000_s28 }
  0x57   : > { %572 = vrot.lane.b32.xlu1 %v2078_v4, %s2005_s8 }
  0x5a   : > { %570 = vrot.lane.b32.xlu0 %v2085_v6, %s2005_s8 }
  0x5b   : > { %649 = vrot.lane.b32.xlu1 %v2082_v5, %s2006_s9 }
  0x5e   : > { %651 = vrot.lane.b32.xlu0 %v1970_v9, %s2006_s9 }
  0x5f   : > { %351 = vrot.lane.b32.xlu1 %v1970_v9, %s2000_s28  ;;  %s1875_s28 = smul.u32 48, %s2051_s22 }
  0x62   : > { %639 = vrot.lane.b32.xlu0 %v2064_v1, %s2006_s9 }
  0x63   : > { %637 = vrot.lane.b32.xlu1 %v2067_v2, %s2006_s9 }
  0x66   : > { %716 = vrot.lane.b32.xlu0 %v2072_v3, %s2007_s10 }
  0x67   : > { %718 = vrot.lane.b32.xlu1 %v1969_v8, %s2007_s10 }
  0x6a   : > { %418 = vrot.lane.b32.xlu0 %v1969_v8, %s2001_s29 }
  0x6b   : > { %647 = vrot.lane.b32.xlu1 %v2078_v4, %s2006_s9 }
  0x6e   : > { %645 = vrot.lane.b32.xlu0 %v2085_v6, %s2006_s9 }
  0x6f   : > { %724 = vrot.lane.b32.xlu1 %v2082_v5, %s2007_s10 }
  0x72   : > { %726 = vrot.lane.b32.xlu0 %v1970_v9, %s2007_s10 }
  0x73   : > { %426 = vrot.lane.b32.xlu1 %v1970_v9, %s2001_s29 }
  0x76   : > { %714 = vrot.lane.b32.xlu0 %v2064_v1, %s2007_s10 }
  0x77   : > { %712 = vrot.lane.b32.xlu1 %v2067_v2, %s2007_s10 }
  0x7a   : > { %791 = vrot.lane.b32.xlu0 %v2072_v3, %s2008_s11 }
  0x7b   : > { %793 = vrot.lane.b32.xlu1 %v1969_v8, %s2008_s11 }
  0x7e   : > { %493 = vrot.lane.b32.xlu0 %v1969_v8, %s2003_s7 }
  0x7f   : > { %722 = vrot.lane.b32.xlu1 %v2078_v4, %s2007_s10 }
  0x82   : > { %720 = vrot.lane.b32.xlu0 %v2085_v6, %s2007_s10 }
  0x83   : > { %799 = vrot.lane.b32.xlu1 %v2082_v5, %s2008_s11 }
  0x86   : > { %801 = vrot.lane.b32.xlu0 %v1970_v9, %s2008_s11 }
  0x87   : > { %501 = vrot.lane.b32.xlu1 %v1970_v9, %s2003_s7  ;;  %s2298_s7 = scalar_lea.vmem %s2662_s6, %s1875_s28 }
  0x88   : > { %v340_v11 = vpop.permute.xlu0 %339 }
  0x89   : > { %v338_v12 = vpop.permute.xlu1 %337 }
  0x8a   : > { %789 = vrot.lane.b32.xlu0 %v2064_v1, %s2008_s11  ;;  %v354_v16 = vsel %vm353_vm1, %v338_v12, %v340_v11 }
  0x8b   : > { %787 = vrot.lane.b32.xlu1 %v2067_v2, %s2008_s11 }
  0x8c   : > { %v2170_v13 = vpop.permute.xlu0 %341 }
  0x8d   : > { %v348_v14 = vpop.permute.xlu1 %347  ;;  %v355_v15 = vsel %vm353_vm1, %v340_v11, %v2170_v13 }
  0x8e   : > { %797 = vrot.lane.b32.xlu0 %v2078_v4, %s2008_s11  ;;  %1000 = vmatprep.subr.bf16.mxu0 %v355_v15 }
  0x8f   : > { %795 = vrot.lane.b32.xlu1 %v2085_v6, %s2008_s11  ;;  %1001 = vmatpush1.bf16.msra.mxu0 %v354_v16 }
  0x90   : > { %v2177_v17 = vpop.permute.xlu0 %349 }
  0x91   : > { %v346_v18 = vpop.permute.xlu1 %345  ;;  %v358_v19 = vsel %vm353_vm1, %v348_v14, %v2177_v17 }
  0x92   : > { %868 = vrot.lane.b32.xlu0 %v1969_v8, %s2002_s30  ;;  %1002 = vmatprep.subr.bf16.mxu0 %v358_v19  ;;  %v357_v20 = vsel %vm353_vm1, %v346_v18, %v348_v14 }
  0x93   : > { %876 = vrot.lane.b32.xlu1 %v1970_v9, %s2002_s30  ;;  %1003 = vmatpush1.bf16.msra.mxu0 %v357_v20 }
  0x94   : > { %v415_v21 = vpop.permute.xlu0 %414 }
  0x95   : > { %v2184_v22 = vpop.permute.xlu1 %416 }
  0x96   : > { %v430_v23 = vsel %vm428_vm2, %v415_v21, %v2184_v22 }
  0x97   : > { %1004 = vmatprep.subr.bf16.mxu0 %v430_v23 }
  0x98   : > { %v413_v24 = vpop.permute.xlu0 %412 }
  0x99   : > { %v865_v25 = vpop.permute.xlu1 %864  ;;  %v429_v26 = vsel %vm428_vm2, %v413_v24, %v415_v21 }
  0x9a   : > { %1005 = vmatpush1.bf16.msra.mxu0 %v429_v26 }
  0x9c   : > { %v2189_v27 = vpop.permute.xlu0 %866 }
  0x9d   : > { %v863_v28 = vpop.permute.xlu1 %862  ;;  %v880_v29 = vsel %vm878_vm3, %v865_v25, %v2189_v27 }
  0x9e   : > { %1049 = vmatprep.subr.bf16.mxu1 %v880_v29  ;;  %v879_v30 = vsel %vm878_vm3, %v863_v28, %v865_v25 }
  0x9f   : > { %1050 = vmatpush1.bf16.msra.mxu1 %v879_v30 }
  0xa0   : > { %v423_v31 = vpop.permute.xlu0 %422 }
  0xa1   : > { %v2194_v32 = vpop.permute.xlu1 %424 }
  0xa2   : > { %v433_v33 = vsel %vm428_vm2, %v423_v31, %v2194_v32 }
  0xa3   : > { %1006 = vmatprep.subr.bf16.mxu0 %v433_v33 }
  0xa4   : > { %v421_v34 = vpop.permute.xlu0 %420 }
  0xa5   : > { %v873_v35 = vpop.permute.xlu1 %872  ;;  %v432_v36 = vsel %vm428_vm2, %v421_v34, %v423_v31 }
  0xa6   : > { %1007 = vmatpush1.bf16.msra.mxu0 %v432_v36 }
  0xa8   : > { %v2199_v37 = vpop.permute.xlu0 %874 }
  0xa9   : > { %v871_v38 = vpop.permute.xlu1 %870  ;;  %v883_v39 = vsel %vm878_vm3, %v873_v35, %v2199_v37 }
  0xaa   : > { %1051 = vmatprep.subr.bf16.mxu1 %v883_v39  ;;  %v882_v40 = vsel %vm878_vm3, %v871_v38, %v873_v35 }
  0xab   : > { %1052 = vmatpush1.bf16.msra.mxu1 %v882_v40 }
  0xac   : > { %v490_v42 = vpop.permute.xlu0 %489 }
  0xad   : > { %v2209_v43 = vpop.permute.xlu1 %491 }
  0xae   : > { %v505_v44 = vsel %vm503_vm4, %v490_v42, %v2209_v43  ;;  %1834 = vmatmul.mubr.msk.bf16.vlgmr.msra.gmra.mrb[0].mxu1 %vm989_vm5, %v2207_v41 }
  0xaf   : > { %1008 = vmatprep.subr.bf16.mxu0 %v505_v44  ;;  %1091 = vmatprep.mubr.bf16.mxu1 %v2004_v7 }
  0xb0   : > { %v488_v45 = vpop.permute.xlu0 %487 }
  0xb1   : > { %v567_v46 = vpop.permute.xlu1 %566  ;;  %v504_v47 = vsel %vm503_vm4, %v488_v45, %v490_v42 }
  0xb2   : > { %1009 = vmatpush1.bf16.msra.mxu0 %v504_v47 }
  0xb4   : > { %v569_v50 = vpop.permute.xlu0 %568 }
  0xb5   : > { %v498_v51 = vpop.permute.xlu1 %497  ;;  %v581_v52 = vsel %vm578_vm6, %v567_v46, %v569_v50 }
  0xb6   : > { %1892 = vmatprep.subr.bf16.mxu1 %v581_v52  ;;  %1835 = vmatmul.mubr.msk.bf16.gmra.mrb[4].mxu1 %vm989_vm5, %v2220_v48 }
  0xb7   : > { %1893 = vmatpush3.bf16.msra.mxu1 %v1972_v49  ;;  %1134 = vmatprep.mubr.bf16.mxu1 %v2160_v10 }
  0xb8   : > { %v2227_v53 = vpop.permute.xlu0 %499 }
  0xb9   : > { %v496_v54 = vpop.permute.xlu1 %495  ;;  %v508_v55 = vsel %vm503_vm4, %v498_v51, %v2227_v53 }
  0xba   : > { %1010 = vmatprep.subr.bf16.mxu0 %v508_v55  ;;  %v507_v56 = vsel %vm503_vm4, %v496_v54, %v498_v51 }
  0xbb   : > { %1011 = vmatpush1.bf16.msra.mxu0 %v507_v56 }
  0xbc   : > { %v575_v57 = vpop.permute.xlu0 %574 }
  0xbd   : > { %v577_v59 = vpop.permute.xlu1 %576 }
  0xbe   : > { %v584_v60 = vsel %vm578_vm6, %v575_v57, %v577_v59 }
  0xbf   : > { %1894 = vmatprep.subr.bf16.mxu1 %v584_v60 }
  0xc0   : > { %v565_v61 = vpop.permute.xlu0 %564  ;;  %1895 = vmatpush3.bf16.msra.mxu1 %v1973_v58 }
  0xc1   : > { %v563_v62 = vpop.permute.xlu1 %562  ;;  %v580_v63 = vsel %vm578_vm6, %v565_v61, %v567_v46 }
  0xc2   : > { %1012 = vmatprep.subr.bf16.mxu0 %v580_v63  ;;  %v579_v0 = vsel %vm578_vm6, %v563_v62, %v565_v61 }
  0xc3   : > { %1013 = vmatpush1.bf16.msra.mxu0 %v579_v0 }
  0xc4   : > { %v642_v1 = vpop.permute.xlu0 %641 }
  0xc5   : > { %v644_v2 = vpop.permute.xlu1 %643 }
  0xc6   : > { %v656_v3 = vsel %vm653_vm7, %v642_v1, %v644_v2 }
  0xc7   : > { %1896 = vmatprep.subr.bf16.mxu1 %v656_v3 }
  0xc8   : > { %v344_v4 = vpop.permute.xlu0 %343 }
  0xc9   : > { %v356_v5 = vsel %vm353_vm1, %v2170_v13, %v344_v4  ;;  %v573_v6 = vpop.permute.xlu1 %572 }
  0xca   : > { %v583_v7 = vsel %vm578_vm6, %v573_v6, %v575_v57  ;;  %1897 = vmatpush3.bf16.msra.mxu1 %v356_v5  ;;  %v1978_v57 = vld [vmem:[%s2657_s1 + $0x1c] ss:$12 sps:$4 sm:$0xff]  }
  0xcb   : > { %1014 = vmatprep.subr.bf16.mxu0 %v583_v7 }
  0xcc   : > { %v571_v8 = vpop.permute.xlu0 %570 }
  0xcd   : > { %v650_v9 = vpop.permute.xlu1 %649  ;;  %v582_v10 = vsel %vm578_vm6, %v571_v8, %v573_v6 }
  0xce   : > { %1015 = vmatpush1.bf16.msra.mxu0 %v582_v10 }
  0xd0   : > { %v652_v11 = vpop.permute.xlu0 %651 }
  0xd1   : > { %v352_v12 = vpop.permute.xlu1 %351  ;;  %v659_v14 = vsel %vm653_vm7, %v650_v9, %v652_v11 }
  0xd2   : > { %v359_v15 = vsel %vm353_vm1, %v2177_v17, %v352_v12  ;;  %1898 = vmatprep.subr.bf16.mxu1 %v659_v14 }
  0xd3   : > { %1899 = vmatpush3.bf16.msra.mxu1 %v359_v15 }
  0xd4   : > { %v640_v13 = vpop.permute.xlu0 %639 }
  0xd5   : > { %v638_v16 = vpop.permute.xlu1 %637  ;;  %v655_v18 = vsel %vm653_vm7, %v640_v13, %v642_v1  ;;  %v1980_v1 = vld [vmem:[%s2657_s1 + $0x18] ss:$12 sps:$4 sm:$0xff]  }
  0xd6   : > { %1016 = vmatprep.subr.bf16.mxu0 %v655_v18  ;;  %v654_v19 = vsel %vm653_vm7, %v638_v16, %v640_v13 }
  0xd7   : > { %1017 = vmatpush1.bf16.msra.mxu0 %v654_v19 }
  0xd8   : > { %v717_v20 = vpop.permute.xlu0 %716 }
  0xd9   : > { %v719_v21 = vpop.permute.xlu1 %718 }
  0xda   : > { %v731_v23 = vsel %vm728_vm8, %v717_v20, %v719_v21 }
  0xdb   : > { %1900 = vmatprep.subr.bf16.mxu1 %v731_v23 }
  0xdc   : > { %v419_v24 = vpop.permute.xlu0 %418 }
  0xdd   : > { %v431_v17 = vsel %vm428_vm2, %v2184_v22, %v419_v24  ;;  %v648_v25 = vpop.permute.xlu1 %647 }
  0xde   : > { %v658_v26 = vsel %vm653_vm7, %v648_v25, %v650_v9  ;;  %1901 = vmatpush3.bf16.msra.mxu1 %v431_v17 }
  0xdf   : > { %1018 = vmatprep.subr.bf16.mxu0 %v658_v26 }
  0xe0   : > { %v646_v28 = vpop.permute.xlu0 %645 }
  0xe1   : > { %v725_v29 = vpop.permute.xlu1 %724  ;;  %v657_v30 = vsel %vm653_vm7, %v646_v28, %v648_v25 }
  0xe2   : > { %1019 = vmatpush1.bf16.msra.mxu0 %v657_v30 }
  0xe4   : > { %v727_v31 = vpop.permute.xlu0 %726 }
  0xe5   : > { %v427_v33 = vpop.permute.xlu1 %426  ;;  %v734_v34 = vsel %vm728_vm8, %v725_v29, %v727_v31 }
  0xe6   : > { %v434_v35 = vsel %vm428_vm2, %v2194_v32, %v427_v33  ;;  %1902 = vmatprep.subr.bf16.mxu1 %v734_v34 }
  0xe7   : > { %1903 = vmatpush3.bf16.msra.mxu1 %v434_v35 }
  0xe8   : > { %v715_v22 = vpop.permute.xlu0 %714 }
  0xe9   : > { %v713_v36 = vpop.permute.xlu1 %712  ;;  %v730_v38 = vsel %vm728_vm8, %v715_v22, %v717_v20 }
  0xea   : > { %1020 = vmatprep.subr.bf16.mxu0 %v730_v38  ;;  %v729_v39 = vsel %vm728_vm8, %v713_v36, %v715_v22 }
  0xeb   : > { %1021 = vmatpush1.bf16.msra.mxu0 %v729_v39 }
  0xec   : > { %v792_v40 = vpop.permute.xlu0 %791 }
  0xed   : > { %v794_v42 = vpop.permute.xlu1 %793 }
  0xee   : > { %v806_v44 = vsel %vm803_vm9, %v792_v40, %v794_v42 }
  0xef   : > { %1904 = vmatprep.subr.bf16.mxu1 %v806_v44 }
  0xf0   : > { %v494_v45 = vpop.permute.xlu0 %493 }
  0xf1   : > { %v506_v32 = vsel %vm503_vm4, %v2209_v43, %v494_v45  ;;  %v723_v46 = vpop.permute.xlu1 %722  ;;  %v1975_v43 = vld [vmem:[%s2657_s1] ss:$12 sps:$4 sm:$0xff]  }
  0xf2   : > { %v733_v47 = vsel %vm728_vm8, %v723_v46, %v725_v29  ;;  %1905 = vmatpush3.bf16.msra.mxu1 %v506_v32 }
  0xf3   : > { %1022 = vmatprep.subr.bf16.mxu0 %v733_v47 }
  0xf4   : > { %v721_v49 = vpop.permute.xlu0 %720 }
  0xf5   : > { %v800_v50 = vpop.permute.xlu1 %799  ;;  %v732_v51 = vsel %vm728_vm8, %v721_v49, %v723_v46 }
  0xf6   : > { %1023 = vmatpush1.bf16.msra.mxu0 %v732_v51 }
  0xf8   : > { %v802_v52 = vpop.permute.xlu0 %801 }
  0xf9   : > { %v502_v54 = vpop.permute.xlu1 %501  ;;  %v809_v55 = vsel %vm803_vm9, %v800_v50, %v802_v52 }
  0xfa   : > { %v509_v56 = vsel %vm503_vm4, %v2227_v53, %v502_v54  ;;  %1906 = vmatprep.subr.bf16.mxu1 %v809_v55 }
  0xfb   : > { %1907 = vmatpush3.bf16.msra.mxu1 %v509_v56 }
  0xfc   : > { %v790_v58 = vpop.permute.xlu0 %789 }
  0xfd   : > { %v788_v59 = vpop.permute.xlu1 %787  ;;  %v805_v60 = vsel %vm803_vm9, %v790_v58, %v792_v40 }
  0xfe   : > { %1024 = vmatprep.subr.bf16.mxu0 %v805_v60  ;;  %1135 = vmatmul.mubr.bf16.vlgmr.msra.gmra.mrb[8].mxu1 %v1975_v43  ;;  %v804_v61 = vsel %vm803_vm9, %v788_v59, %v790_v58 }
  0xff   : > { %1025 = vmatpush1.bf16.msra.mxu0 %v804_v61  ;;  %1142 = vmatprep.mubr.bf16.mxu1 %v1978_v57 }
 0x100   : > { %v798_v53 = vpop.permute.xlu0 %797 }
 0x101   : > { %v796_v62 = vpop.permute.xlu1 %795  ;;  %v808_v63 = vsel %vm803_vm9, %v798_v53, %v800_v50 }
 0x102   : > { %1026 = vmatprep.subr.bf16.mxu0 %v808_v63  ;;  %v807_v0 = vsel %vm803_vm9, %v796_v62, %v798_v53 }
 0x103   : > { %1027 = vmatpush1.bf16.msra.mxu0 %v807_v0 }
 0x104   : > { %v869_v2 = vpop.permute.xlu0 %868 }
 0x105   : > { %v877_v3 = vpop.permute.xlu1 %876  ;;  %v881_v4 = vsel %vm878_vm3, %v2189_v27, %v869_v2 }
 0x106   : > { %1029 = vmatmul.mubr.bf16.vlgmr.msra.gmra.mrb[0].mxu0 %v1975_v43  ;;  %1143 = vmatmul.mubr.bf16.gmra.mrb[12].mxu1 %v1980_v1  ;;  %v884_v5 = vsel %vm878_vm3, %v2199_v37, %v877_v3  ;;  %v1202_v37 = vlaneseq }
 0x107   : > { %1924 = vmatprep.subr.bf16.mxu1 %v881_v4  ;;  %1038 = vmatprep.mubr.bf16.mxu0 %v1978_v57 }
 0x108   : > { %1925 = vmatpush3.bf16.msra.mxu1 %v881_v4  ;;  %1928 = vmatprep.mubr.msk.bf16.mxu1 %vm989_vm5, %v2207_v41  ;;  %v1203_v14 = vshrl.u32 %v1202_v37, 7 }
 0x109   : > { %1926 = vmatprep.subr.bf16.mxu1 %v884_v5 }
 0x10a   : > { %v1204_v18 = vsub.s32 0, %v1203_v14  ;;  %v1208_v20 = vsub.s32 1, %v1203_v14  ;;  %v1212_v46 = vsub.s32 2, %v1203_v14 }
 0x10c   : > { %1927 = vmatpush3.bf16.msra.mxu1 %v884_v5 }
 0x10e   : > { %1039 = vmatmul.mubr.bf16.gmra.mrb[4].mxu0 %v1980_v1 }
 0x10f   : > { %1929 = vmatmul.mubr.msk.bf16.vlgmr.msra.gmra.mrb[16].mxu1 %vm989_vm5, %v2220_v48  ;;  %v1200_v48 = vld [vmem:[%s2660_s4] sm:$0x7] }
 0x110   : > { %v1205_v23 = vrot.slane %v1200_v48, %v1204_v18  ;;  %v2293_v17 = vrot.slane %v1200_v48, %v1208_v20  ;;  %v1213_v63 = vrot.slane %v1200_v48, %v1212_v46 }
 0x181   : > { %v1083_v6 = vpop.f32.mrb[0].mxu1 }
 0x182   : > { %v1085_v7 = vpop.f32.mrb[1].mxu1 }
 0x183   : > { %v1087_v27 = vpop.f32.mrb[2].mxu1 }
 0x184   : > { %v1089_v8 = vpop.f32.mrb[3].mxu1 }
 0x189   : > { %v1093_v9 = vpop.f32.mrb[4].mxu1 }
 0x18a   : > { %v1095_v10 = vpop.f32.mrb[5].mxu1 }
 0x18b   : > { %v1097_v11 = vpop.f32.mrb[6].mxu1 }
 0x18c   : > { %v2285_v12 = vpop.f32.mrb[7].mxu1 }
 0x1d1   : > { %v1908_v15 = vpop.f32.mrb[8].mxu1 }
 0x1d2   : > { %v1909_v41 = vpop.f32.mrb[9].mxu1 }
 0x1d3   : > { %v1910_v13 = vadd.f32 %v1909_v41, %v1908_v15  ;;  %v1911_v16 = vpop.f32.mrb[10].mxu1 }
 0x1d4   : > { %v1912_v19 = vpop.f32.mrb[11].mxu1 }
 0x1d5   : > { %v2290_v21 = vadd.f32 %v1912_v19, %v1911_v16 }
 0x1d9   : > { %v1030_v24 = vpop.f32.mrb[0].mxu0  ;;  %v1914_v25 = vpop.f32.mrb[12].mxu1 }
 0x1da   : > { %v1084_v26 = vadd.f32 %v1083_v6, %v1030_v24  ;;  %v1032_v28 = vpop.f32.mrb[1].mxu0  ;;  %v1915_v29 = vpop.f32.mrb[13].mxu1 }
 0x1db   : > { %v1086_v30 = vadd.f32 %v1085_v7, %v1032_v28  ;;  %v1034_v31 = vpop.f32.mrb[2].mxu0  ;;  %v1916_v33 = vadd.f32 %v1915_v29, %v1914_v25  ;;  %v1917_v34 = vpop.f32.mrb[14].mxu1 }
 0x1dc   : > { %v1217_v35 = vmul.f32 %v1205_v23, %v1084_v26  ;;  %v1088_v22 = vadd.f32 %v1087_v27, %v1034_v31  ;;  %v1036_v36 = vpop.f32.mrb[3].mxu0  ;;  %v1918_v38 = vpop.f32.mrb[15].mxu1 }
 0x1dd   : > { %v1218_v39 = vmul.f32 %v2293_v17, %v1086_v30  ;;  %v1867_v40 = vpack.c.bf16 %v1086_v30, %v1084_v26  ;;  %v1090_v42 = vadd.f32 %v1089_v8, %v1036_v36  ;;  %v1919_v44 = vadd.f32 %v1918_v38, %v1917_v34 }
 0x1de   : > { %v1262_v45 = vmul.f32 %v1217_v35, %v1084_v26  ;;  %v1220_v32 = vmul.f32 %v1205_v23, %v1088_v22 }
 0x1df   : > { %v1263_v47 = vmul.f32 %v1218_v39, %v1086_v30  ;;  %1341 = vst [vmem:[%s2298_s7] sm:$0xff] %v1867_v40  ;;  %v1221_v49 = vmul.f32 %v2293_v17, %v1090_v42  ;;  %v1869_v50 = vpack.c.bf16 %v1090_v42, %v1088_v22  ;;  %v1233_v51 = vadd.f32 %v1218_v39, %v1217_v35 }
 0x1e0   : > { %v1265_v52 = vmul.f32 %v1220_v32, %v1088_v22 }
 0x1e1   : > { %v1266_v54 = vmul.f32 %v1221_v49, %v1090_v42  ;;  %1343 = vst [vmem:[%s2298_s7 + $0xc] sm:$0xff] %v1869_v50  ;;  %v1040_v55 = vpop.f32.mrb[4].mxu0  ;;  %v1237_v56 = vadd.f32 %v1221_v49, %v1220_v32  ;;  %v1274_v43 = vadd.f32 %v1263_v47, %v1262_v45  ;;  %v1230_v32 = vld [vmem:[#allocation3 + $0x8] sm:$0xff] }
 0x1e2   : > { %v1094_v57 = vadd.f32 %v1093_v9, %v1040_v55  ;;  %v1930_v58 = vpop.f32.mrb[16].mxu1  ;;  %v1042_v59 = vpop.f32.mrb[5].mxu0  ;;  %v1259_v49 = vld [vmem:[#allocation4 + $0x8] sm:$0xff] }
 0x1e3   : > { %v1194_v60 = vadd.f32 %v1930_v58, %v1916_v33  ;;  %v1096_v61 = vadd.f32 %v1095_v10, %v1042_v59  ;;  %v1185_v53 = vpop.f32.mrb[17].mxu1  ;;  %v1044_v62 = vpop.f32.mrb[6].mxu0  ;;  %v1278_v0 = vadd.f32 %v1266_v54, %v1265_v52  ;;  %v1258_v52 = vld [vmem:[#allocation4] sm:$0xff]  ;;  %v1260_v58 = vld [vmem:[#allocation4 + $0x10] sm:$0xff] }
 0x1e4   : > { %v1223_v1 = vmul.f32 %v1205_v23, %v1094_v57  ;;  %v1186_v2 = vadd.f32 %v1910_v13, %v1185_v53  ;;  %v1098_v3 = vadd.f32 %v1097_v11, %v1044_v62  ;;  %v1931_v4 = vpop.f32.mrb[18].mxu1  ;;  %v1046_v5 = vpop.f32.mrb[7].mxu0 }
 0x1e5   : > { %v1872_v6 = vpack.c.bf16 %v1194_v60, %v1194_v60  ;;  %v1224_v7 = vmul.f32 %v2293_v17, %v1096_v61  ;;  %v1871_v27 = vpack.c.bf16 %v1096_v61, %v1094_v57  ;;  %v1197_v8 = vadd.f32 %v1931_v4, %v1919_v44  ;;  %v1188_v9 = vpop.f32.mrb[19].mxu1  ;;  %v1229_v44 = vld [vmem:[#allocation3] sm:$0xff] }
 0x1e6   : > { %v1268_v10 = vmul.f32 %v1223_v1, %v1094_v57  ;;  %v1868_v37 = vpack.c.bf16 %v1186_v2, %v1186_v2  ;;  %v1226_v14 = vmul.f32 %v1205_v23, %v1098_v3  ;;  %v1100_v15 = vadd.f32 %v2285_v12, %v1046_v5 }
 0x1e7   : > { %1346 = vst [vmem:[%s2298_s7 + $0x20] sm:$0xf] %v1872_v6  ;;  %v1269_v41 = vmul.f32 %v1224_v7, %v1096_v61  ;;  %1345 = vst [vmem:[%s2298_s7 + $0x18] sm:$0xff] %v1871_v27  ;;  %v1874_v11 = vpack.c.bf16 %v1197_v8, %v1197_v8  ;;  %v1189_v13 = vadd.f32 %v2290_v21, %v1188_v9  ;;  %v1232_v61 = vld [vmem:[#allocation3 + $0x18] sm:$0xff]  ;;  %v2009_v5 = vmov (!%p1847_p5), 0  }
 0x1e8   : > { %v1219_v16 = vmul.f32 %v1213_v63, %v1186_v2  ;;  %1342 = vst [vmem:[%s2298_s7 + $0x8] sm:$0xf] %v1868_v37  ;;  %v1271_v18 = vmul.f32 %v1226_v14, %v1098_v3  ;;  %v1227_v19 = vmul.f32 %v2293_v17, %v1100_v15  ;;  %v1873_v48 = vpack.c.bf16 %v1100_v15, %v1098_v3 }
 0x1e9   : > { %v1225_v20 = vmul.f32 %v1213_v63, %v1194_v60  ;;  %1348 = vst [vmem:[%s2298_s7 + $0x2c] sm:$0xf] %v1874_v11  ;;  %v1870_v24 = vpack.c.bf16 %v1189_v13, %v1189_v13  ;;  %v1222_v25 = vmul.f32 %v1213_v63, %v1189_v13  ;;  %v1241_v28 = vadd.f32 %v1224_v7, %v1223_v1 }
 0x1ea   : > { %v1234_v23 = vadd.f32 %v1233_v51, %v1219_v16  ;;  %v1264_v12 = vmul.f32 %v1219_v16, %v1186_v2  ;;  %v1272_v26 = vmul.f32 %v1227_v19, %v1100_v15  ;;  %1347 = vst [vmem:[%s2298_s7 + $0x24] sm:$0xff] %v1873_v48  ;;  %v1282_v30 = vadd.f32 %v1269_v41, %v1268_v10 }
 0x1eb   : > { %v1270_v29 = vmul.f32 %v1225_v20, %v1194_v60  ;;  %1344 = vst [vmem:[%s2298_s7 + $0x14] sm:$0xf] %v1870_v24  ;;  %v1238_v21 = vadd.f32 %v1237_v56, %v1222_v25  ;;  %v1267_v31 = vmul.f32 %v1222_v25, %v1189_v13  ;;  %v1228_v34 = vmul.f32 %v1213_v63, %v1197_v8  ;;  %v1231_v56 = vld [vmem:[#allocation3 + $0x10] sm:$0xff] }
 0x1ec   : > { %1235 = vadd.xlane.f32.xlu0 %v1234_v23  ;;  %v1275_v33 = vadd.f32 %v1274_v43, %v1264_v12  ;;  %v1242_v35 = vadd.f32 %v1241_v28, %v1225_v20  ;;  %v1245_v22 = vadd.f32 %v1227_v19, %v1226_v14  ;;  %v1286_v36 = vadd.f32 %v1272_v26, %v1271_v18 }
 0x1ed   : > { %v1283_v17 = vadd.f32 %v1282_v30, %v1270_v29  ;;  %1239 = vadd.xlane.f32.xlu1 %v1238_v21  ;;  %v1279_v38 = vadd.f32 %v1278_v0, %v1267_v31  ;;  %v1273_v39 = vmul.f32 %v1228_v34, %v1197_v8  ;;  %v1261_v0 = vld [vmem:[#allocation4 + $0x18] sm:$0xff]  ;;  %1981 = vset.pattern.permute.xlu0 (!%p1847_p5), %v2009_v5 }
 0x1ee   : > { %v1246_v40 = vadd.f32 %v1245_v22, %v1228_v34  ;;  %1982 = vset.pattern.permute.xlu1 (!%p1847_p5), %v2009_v5  ;;  %v1381_v22 = vld [vmem:[%s2658_s2] sm:$0xff] (!%p1847_p5) }
 0x1ef   : > { %v1287_v42 = vadd.f32 %v1286_v36, %v1273_v39 }
 0x1f0   : > { %1280 = vadd.xlane.f32.xlu0 %v1279_v38  ;;  %v1384_v38 = vld [vmem:[%s2658_s2 + $0x18] sm:$0xff] (!%p1847_p5) }
 0x1f1   : > { %1276 = vadd.xlane.f32.xlu1 %v1275_v33 }
 0x1f4   : > { %1243 = vadd.xlane.f32.xlu0 %v1242_v35 }
 0x1f5   : > { %1284 = vadd.xlane.f32.xlu1 %v1283_v17  ;;  %v1383_v17 = vld [vmem:[%s2658_s2 + $0x10] sm:$0xff] (!%p1847_p5) }
 0x1f8   : > { %1247 = vadd.xlane.f32.xlu0 %v1246_v40 }
 0x1fc   : > { %1288 = vadd.xlane.f32.xlu0 %v1287_v42  ;;  %v1382_v42 = vld [vmem:[%s2658_s2 + $0x8] sm:$0xff] (!%p1847_p5) }
 0x279   : > { %v1236_v45 = vpop.xlane.xlu0 %1235 }
 0x27a   : > { %v1249_v46 = vadd.f32 %v1236_v45, %v1229_v44  ;;  %v1240_v47 = vpop.xlane.xlu1 %1239 }
 0x27b   : > { %v1250_v50 = vadd.f32 %v1240_v47, %v1230_v32 }
 0x27c   : > { %1254 = vst.msk [vmem:[#allocation3] sm:$0xff] %vm1253_vm10, %v1249_v46 }
 0x27d   : > { %v1281_v51 = vpop.xlane.xlu0 %1280  ;;  %1255 = vst.msk [vmem:[#allocation3 + $0x8] sm:$0xff] %vm1253_vm10, %v1250_v50  ;;  %v1398_v50 = vld [vmem:[%s2659_s3 + $0x8] sm:$0xff] (!%p1847_p5) }
 0x27e   : > { %v1291_v54 = vadd.f32 %v1281_v51, %v1259_v49  ;;  %v1277_v55 = vpop.xlane.xlu1 %1276  ;;  %v1397_v51 = vld [vmem:[%s2659_s3] sm:$0xff] (!%p1847_p5) }
 0x27f   : > { %v1290_v43 = vadd.f32 %v1277_v55, %v1258_v52 }
 0x280   : > { %1295 = vst.msk [vmem:[#allocation4 + $0x8] sm:$0xff] %vm1253_vm10, %v1291_v54 }
 0x281   : > { %v1244_v57 = vpop.xlane.xlu0 %1243  ;;  %1294 = vst.msk [vmem:[#allocation4] sm:$0xff] %vm1253_vm10, %v1290_v43 }
 0x282   : > { %v1251_v59 = vadd.f32 %v1244_v57, %v1231_v56  ;;  %v1285_v60 = vpop.xlane.xlu1 %1284  ;;  %v1400_v57 = vld [vmem:[%s2659_s3 + $0x18] sm:$0xff] (!%p1847_p5) }
 0x283   : > { %v1292_v53 = vadd.f32 %v1285_v60, %v1260_v58  ;;  %v1353_v27 = vld [vmem:[#allocation3] sm:$0xff] (!%p1847_p5)  ;;  %v1399_v58 = vld [vmem:[%s2659_s3 + $0x10] sm:$0xff] (!%p1847_p5) }
 0x284   : > { %1256 = vst.msk [vmem:[#allocation3 + $0x10] sm:$0xff] %vm1253_vm10, %v1251_v59  ;;  %v1357_v9 = vmul.f32 (!%p1847_p5), 0.001953125, %v1353_v27  ;;  %v1354_v13 = vld [vmem:[#allocation3 + $0x8] sm:$0xff] (!%p1847_p5) }
 0x285   : > { %v1248_v62 = vpop.xlane.xlu0 %1247  ;;  %1296 = vst.msk [vmem:[#allocation4 + $0x10] sm:$0xff] %vm1253_vm10, %v1292_v53  ;;  %v1358_v19 = vmul.f32 (!%p1847_p5), 0.001953125, %v1354_v13  ;;  %v2355_v53 = vld [vmem:[%s2662_s6 + $0x8] ss:$48 sps:$4 sm:$0xff] (!%p1847_p5)  }
 0x286   : > { %v1252_v63 = vadd.f32 %v1248_v62, %v1232_v61  ;;  %1352 = sbr.rel (%p1847_p5) target bundleno = 844 (0x34c), region = 52  ;;  %v1369_v18 = vmul.f32 (!%p1847_p5), %v1357_v9, %v1357_v9  ;;  %v2350_v61 = vld [vmem:[%s2662_s6] sm:$0xff] (!%p1847_p5)  ;;  %v2360_v62 = vld [vmem:[%s2662_s6 + $0x30] sm:$0xff] (!%p1847_p5)  ;;  %v2394_v27 = vld [vmem:[%s2662_s6 + $0x48] sm:$0xff] (!%p1847_p5) }
 0x287   : > { %v1362_v16 = vld [vmem:[#allocation4 + $0x8] sm:$0xff] (!%p1847_p5)  ;;  %v1370_v25 = vmul.f32 (!%p1847_p5), %v1358_v19, %v1358_v19  ;;  %v1437_v5 = vunpack.c.l.bf16 (!%p1847_p5), %v2360_v62 }
 0x288   : > { %1257 = vst.msk [vmem:[#allocation3 + $0x18] sm:$0xff] %vm1253_vm10, %v1252_v63  ;;  %v1361_v8 = vld [vmem:[#allocation4] sm:$0xff] (!%p1847_p5)  ;;  %v1366_v48 = vmul.f32 (!%p1847_p5), 0.001953125, %v1362_v16  ;;  %v2365_v63 = vld [vmem:[%s2662_s6 + $0xc] sm:$0xff] (!%p1847_p5) }
 0x289   : > { %v1289_v1 = vpop.xlane.xlu0 %1288  ;;  %v1365_v10 = vmul.f32 (!%p1847_p5), 0.001953125, %v1361_v8  ;;  %v1438_v8 = vunpack.c.h.bf16 (!%p1847_p5), %v2360_v62 }
 0x28a   : > { %v1293_v2 = vadd.f32 %v1289_v1, %v1261_v0  ;;  %v1374_v29 = vsub.f32 (!%p1847_p5), %v1366_v48, %v1370_v25  ;;  %v2370_v0 = vld [vmem:[%s2662_s6 + $0x14] ss:$48 sps:$4 sm:$0xff] (!%p1847_p5)   ;;  %v2375_v1 = vld [vmem:[%s2662_s6 + $0x3c] sm:$0xff] (!%p1847_p5) }
 0x28b   : > { %v1355_v3 = vld [vmem:[#allocation3 + $0x10] sm:$0xff] (!%p1847_p5)  ;;  %v1373_v23 = vsub.f32 (!%p1847_p5), %v1365_v10, %v1369_v18  ;;  %v1428_v10 = vunpack.c.l.bf16 (!%p1847_p5), %v2365_v63  ;;  %v1440_v13 = vunpack.c.l.bf16 (!%p1847_p5), %v2375_v1  ;;  %v1441_v16 = vunpack.c.h.bf16 (!%p1847_p5), %v2375_v1  ;;  %v2427_v48 = vld [vmem:[%s2662_s6 + $0x2c] ss:$48 sps:$4 sm:$0xff] (!%p1847_p5)  }
 0x28c   : > { %1297 = vst.msk [vmem:[#allocation4 + $0x18] sm:$0xff] %vm1253_vm10, %v1293_v2  ;;  %v1363_v4 = vld [vmem:[#allocation4 + $0x10] sm:$0xff] (!%p1847_p5)  ;;  %v1359_v6 = vmul.f32 (!%p1847_p5), 0.001953125, %v1355_v3  ;;  %v1378_v33 = vmax.f32 (!%p1847_p5), %v1374_v29, 0.0  ;;  %v1425_v2 = vunpack.c.l.bf16 (!%p1847_p5), %v2350_v61  ;;  %v1426_v3 = vunpack.c.h.bf16 (!%p1847_p5), %v2350_v61 }
 0x28d   : > { %v1367_v7 = vmul.f32 0.001953125, %v1363_v4  ;;  %v1377_v28 = vmax.f32 %v1373_v23, 0.0  ;;  %v1427_v4 = vunpack.c.l.bf16 %v2355_v53  ;;  %v1442_v18 = vunpack.c.h.bf16 %v2370_v0 }
 0x28e   : > { %v1371_v15 = vmul.f32 %v1359_v6, %v1359_v6  ;;  %v1386_v35 = vadd.f32 1e-05, %v1378_v33  ;;  %v2455_v33 = vld [vmem:[%s2661_s5 + $0x30] sm:$0xff] }
 0x28f   : > { %v1356_v37 = vld [vmem:[#allocation3 + $0x18] sm:$0xff]  ;;  %v1385_v31 = vadd.f32 1e-05, %v1377_v28 }
 0x290   : > { %v1360_v41 = vmul.f32 0.001953125, %v1356_v37  ;;  %v1375_v20 = vsub.f32 %v1367_v7, %v1371_v15  ;;  %v2389_v7 = vld [vmem:[%s2662_s6 + $0x20] ss:$48 sps:$4 sm:$0xff]   ;;  %v1429_v37 = vunpack.c.h.bf16 %v2365_v63  ;;  %v2408_v15 = vld [vmem:[%s2661_s5 + $0x14] ss:$48 sps:$4 sm:$0xff]  }
 0x291   : > { %v1433_v25 = vunpack.c.l.bf16 %v2389_v7  ;;  %v1558_v29 = vunpack.c.l.bf16 %v2408_v15 }
 0x292   : > { %v1372_v24 = vmul.f32 %v1360_v41, %v1360_v41  ;;  %v1379_v12 = vmax.f32 %v1375_v20, 0.0  ;;  %v2432_v20 = vld [vmem:[%s2662_s6 + $0x54] sm:$0xff] }
 0x293   : > { %v1364_v14 = vld [vmem:[#allocation4 + $0x18] sm:$0xff] }
 0x294   : > { %v1368_v11 = vmul.f32 0.001953125, %v1364_v14  ;;  %v1387_v30 = vadd.f32 1e-05, %v1379_v12  ;;  %v2403_v14 = vld [vmem:[%s2661_s5 + $0xc] sm:$0xff]  ;;  %v1443_v12 = vunpack.c.l.bf16 %v2394_v27 }
 0x295   : > { %v1557_v28 = vunpack.c.h.bf16 %v2403_v14 }
 0x296   : > { %v1376_v26 = vsub.f32 %v1368_v11, %v1372_v24  ;;  %1983 = vrsqrt.f32 %v1387_v30  ;;  %v1430_v11 = vunpack.c.l.bf16 %v2370_v0 }
 0x297   : > { %1985 = vrsqrt.f32 %v1385_v31  ;;  %v2450_v31 = vld [vmem:[%s2661_s5 + $0x8] ss:$48 sps:$4 sm:$0xff]  }
 0x298   : > { %v1380_v21 = vmax.f32 %v1376_v26, 0.0  ;;  %v1556_v26 = vunpack.c.l.bf16 %v2403_v14 }
 0x29a   : > { %v1388_v34 = vadd.f32 1e-05, %v1380_v21  ;;  %v2445_v21 = vld [vmem:[%s2661_s5] sm:$0xff] }
 0x29c   : > { %1987 = vrsqrt.f32 %v1388_v34 }
 0x29d   : > { %1989 = vrsqrt.f32 %v1386_v35  ;;  %v1570_v35 = vunpack.c.h.bf16 %v2408_v15 }
 0x2a0   : > { %v1984_v36 = vpop.eup %1983 }
 0x2a1   : > { %v1986_v39 = vpop.eup %1985  ;;  %v1395_v40 = vmul.f32 %v1984_v36, %v1383_v17  ;;  %v1436_v36 = vunpack.c.l.bf16 %v2427_v48 }
 0x2a2   : > { %v1393_v45 = vmul.f32 %v1986_v39, %v1381_v22  ;;  %v1447_v39 = vunpack.c.h.bf16 %v2432_v20 }
 0x2a3   : > { %1461 = vperm.xlu1 %1982, %v1395_v40   ;;  %v1403_v55 = vmul.f32 %v1395_v40, %v1359_v6  ;;  %v2384_v6 = vld [vmem:[%s2662_s6 + $0x18] sm:$0xff]  ;;  %v1448_v40 = vunpack.c.h.bf16 %v2427_v48 }
 0x2a4   : > { %1451 = vperm.xlu0 %1981, %v1393_v45   ;;  %v1401_v47 = vmul.f32 %v1393_v45, %v1357_v9  ;;  %v1439_v9 = vunpack.c.h.bf16 %v2355_v53  ;;  %v1431_v24 = vunpack.c.l.bf16 %v2384_v6  ;;  %v1432_v23 = vunpack.c.h.bf16 %v2384_v6  ;;  %v2478_v45 = vld [vmem:[%s2661_s5 + $0x54] sm:$0xff] }
 0x2a5   : > { %v1407_v60 = vsub.f32 %v1399_v58, %v1403_v55  ;;  %v1445_v55 = vunpack.c.h.bf16 %v2389_v7 }
 0x2a6   : > { %v1988_v44 = vpop.eup %1987  ;;  %v1405_v43 = vsub.f32 %v1397_v51, %v1401_v47  ;;  %v1555_v47 = vunpack.c.l.bf16 %v2450_v31 }
 0x2a7   : > { %v1990_v32 = vpop.eup %1989  ;;  %v1396_v46 = vmul.f32 %v1988_v44, %v1384_v38  ;;  %v1446_v38 = vunpack.c.l.bf16 %v2432_v20  ;;  %v2473_v44 = vld [vmem:[%s2661_s5 + $0x2c] ss:$48 sps:$4 sm:$0xff]  }
 0x2a8   : > { %v1394_v49 = vmul.f32 %v1990_v32, %v1382_v42  ;;  %v2468_v42 = vld [vmem:[%s2661_s5 + $0x24] sm:$0xff]  ;;  %v1553_v32 = vunpack.c.l.bf16 %v2445_v21 }
 0x2a9   : > { %1466 = vperm.xlu1 %1982, %v1396_v46   ;;  %v1404_v54 = vmul.f32 %v1396_v46, %v1360_v41  ;;  %v2413_v41 = vld [vmem:[%s2661_s5 + $0x3c] sm:$0xff]  ;;  %v1554_v46 = vunpack.c.h.bf16 %v2445_v21  ;;  %v2664_v21 = vunpack.c.h.bf16 %v2455_v33 }
 0x2aa   : > { %v1402_v52 = vmul.f32 %v1394_v49, %v1358_v19  ;;  %1456 = vperm.xlu0 %1981, %v1394_v49   ;;  %v2422_v19 = vld [vmem:[%s2662_s6 + $0x24] sm:$0xff]  ;;  %v1568_v30 = vunpack.c.l.bf16 %v2413_v41  ;;  %v1569_v34 = vunpack.c.h.bf16 %v2413_v41 }
 0x2ab   : > { %v1408_v59 = vsub.f32 %v1400_v57, %v1404_v54  ;;  %v1434_v17 = vunpack.c.l.bf16 %v2422_v19  ;;  %v1435_v22 = vunpack.c.h.bf16 %v2422_v19  ;;  %v1444_v54 = vunpack.c.h.bf16 %v2394_v27 }
 0x2ac   : > { %v1406_v56 = vsub.f32 %v1398_v50, %v1402_v52  ;;  %v2487_v50 = vld [vmem:[%s2661_s5 + $0x18] sm:$0xff] }
 0x2ae   : > { %1500 = vperm.xlu1 %1982, %v1406_v56   ;;  %1495 = vperm.xlu0 %1981, %v1405_v43   ;;  %v2496_v56 = vld [vmem:[%s2661_s5 + $0x20] ss:$48 sps:$4 sm:$0xff]   ;;  %v2501_v43 = vld [vmem:[%s2661_s5 + $0x48] sm:$0xff] }
 0x2b2   : > { %1510 = vperm.xlu1 %1982, %v1408_v59   ;;  %1505 = vperm.xlu0 %1981, %v1407_v60  }
 0x322   : > { %v1462_v57 = vpop.permute.xlu1 %1461 }
 0x323   : > { %v1452_v7 = vpop.permute.xlu0 %1451  ;;  %v2515_v60 = vmul.f32 %v1462_v57, %v1431_v24  ;;  %v2517_v6 = vmul.f32 %v1462_v57, %v1432_v23  ;;  %v2519_v49 = vmul.f32 %v1462_v57, %v1433_v25  ;;  %v2521_v27 = vmul.f32 %v1462_v57, %v1443_v12 }
 0x324   : > { %v1469_v48 = vmul.f32 %v1452_v7, %v1425_v2  ;;  %v1470_v52 = vmul.f32 %v1452_v7, %v1426_v3  ;;  %v1471_v51 = vmul.f32 %v1452_v7, %v1427_v4  ;;  %v1481_v59 = vmul.f32 %v1452_v7, %v1437_v5 }
 0x325   : > { %v1482_v23 = vmul.f32 %v1452_v7, %v1438_v8  ;;  %v1483_v25 = vmul.f32 %v1452_v7, %v1439_v9  ;;  %v2535_v58 = vmul.f32 %v1462_v57, %v1444_v54  ;;  %v2537_v2 = vmul.f32 %v1462_v57, %v1445_v55 }
 0x328   : > { %v1467_v24 = vpop.permute.xlu1 %1466 }
 0x329   : > { %v1457_v12 = vpop.permute.xlu0 %1456  ;;  %v1478_v61 = vmul.f32 %v1467_v24, %v1434_v17  ;;  %v1479_v3 = vmul.f32 %v1467_v24, %v1435_v22  ;;  %v1480_v20 = vmul.f32 %v1467_v24, %v1436_v36  ;;  %v1490_v19 = vmul.f32 %v1467_v24, %v1446_v38 }
 0x32a   : > { %v1472_v4 = vmul.f32 %v1457_v12, %v1428_v10  ;;  %v1473_v5 = vmul.f32 %v1457_v12, %v1429_v37  ;;  %v1474_v62 = vmul.f32 %v1457_v12, %v1430_v11  ;;  %v1484_v53 = vmul.f32 %v1457_v12, %v1440_v13 }
 0x32b   : > { %v1485_v8 = vmul.f32 %v1457_v12, %v1441_v16  ;;  %v1486_v9 = vmul.f32 %v1457_v12, %v1442_v18  ;;  %v1491_v22 = vmul.f32 %v1467_v24, %v1447_v39  ;;  %v1492_v36 = vmul.f32 %v1467_v24, %v1448_v40 }
 0x32d   : > { %v1501_v17 = vpop.permute.xlu1 %1500  ;;  %v1496_v37 = vpop.permute.xlu0 %1495 }
 0x32e   : > { %v1516_v38 = vadd.f32 %v1501_v17, %v1472_v4  ;;  %v1517_v10 = vadd.f32 %v1501_v17, %v1473_v5  ;;  %v1518_v54 = vadd.f32 %v1501_v17, %v1474_v62  ;;  %v1528_v63 = vadd.f32 %v1501_v17, %v1484_v53 }
 0x32f   : > { %v1529_v55 = vadd.f32 %v1501_v17, %v1485_v8  ;;  %v1530_v57 = vadd.f32 %v1501_v17, %v1486_v9  ;;  %v1513_v11 = vadd.f32 %v1496_v37, %v1469_v48  ;;  %v1514_v7 = vadd.f32 %v1496_v37, %v1470_v52 }
 0x330   : > { %v1580_v13 = vadd.f32 %v1556_v26, %v1516_v38  ;;  %v1581_v1 = vadd.f32 %v1557_v28, %v1517_v10  ;;  %v1582_v0 = vadd.f32 %v1558_v29, %v1518_v54  ;;  %v1592_v16 = vadd.f32 %v1568_v30, %v1528_v63 }
 0x331   : > { %v1593_v18 = vadd.f32 %v1569_v34, %v1529_v55  ;;  %v1594_v39 = vadd.f32 %v1570_v35, %v1530_v57  ;;  %v1515_v40 = vadd.f32 %v1496_v37, %v1471_v51  ;;  %v1525_v52 = vadd.f32 %v1496_v37, %v1481_v59  ;;  %v1511_v15 = vpop.permute.xlu1 %1510 }
 0x332   : > { %v1604_v48 = vmax.f32 %v1580_v13, 0.0  ;;  %v1605_v24 = vmax.f32 %v1581_v1, 0.0  ;;  %v1606_v26 = vmax.f32 %v1582_v0, 0.0  ;;  %v1616_v12 = vmax.f32 %v1592_v16, 0.0 }
 0x333   : > { %v1617_v14 = vmax.f32 %v1593_v18, 0.0  ;;  %v1618_v28 = vmax.f32 %v1594_v39, 0.0  ;;  %v1526_v4 = vadd.f32 %v1496_v37, %v1482_v23  ;;  %v1527_v5 = vadd.f32 %v1496_v37, %v1483_v25 }
 0x334   : > { %v1878_v29 = vpack.c.bf16 %v1605_v24, %v1604_v48  ;;  %v1879_v62 = vpack.c.bf16 %v1606_v26, %v1606_v26  ;;  %v1577_v30 = vadd.f32 %v1553_v32, %v1513_v11  ;;  %v1578_v41 = vadd.f32 %v1554_v46, %v1514_v7  ;;  %v1506_v11 = vpop.permute.xlu0 %1505 }
 0x335   : > { %v1886_v34 = vpack.c.bf16 %v1617_v14, %v1616_v12  ;;  %v1887_v35 = vpack.c.bf16 %v1618_v28, %v1618_v28  ;;  %v1579_v51 = vadd.f32 %v1555_v47, %v1515_v40  ;;  %v2663_v59 = vunpack.c.l.bf16 %v2455_v33 }
 0x336   : > { %1707 = vst [vmem:[%s2662_s6 + $0xc] sm:$0xff] %v1878_v29  ;;  %1708 = vst [vmem:[%s2662_s6 + $0x14] sm:$0xf] %v1879_v62  ;;  %v1590_v32 = vadd.f32 %v2664_v21, %v1526_v4  ;;  %v2665_v46 = vunpack.c.h.bf16 %v2450_v31  ;;  %v1601_v25 = vmax.f32 %v1577_v30, 0.0  ;;  %v1602_v8 = vmax.f32 %v1578_v41, 0.0 }
 0x337   : > { %v1589_v53 = vadd.f32 %v2663_v59, %v1525_v52  ;;  %1715 = vst [vmem:[%s2662_s6 + $0x3c] sm:$0xff] %v1886_v34  ;;  %1716 = vst [vmem:[%s2662_s6 + $0x44] sm:$0xf] %v1887_v35  ;;  %v1603_v47 = vmax.f32 %v1579_v51, 0.0  ;;  %v1522_v17 = vadd.f32 %v1511_v15, %v1478_v61  ;;  %v1523_v38 = vadd.f32 %v1511_v15, %v1479_v3 }
 0x338   : > { %v1591_v23 = vadd.f32 %v2665_v46, %v1527_v5  ;;  %v1614_v10 = vmax.f32 %v1590_v32, 0.0  ;;  %v1876_v54 = vpack.c.bf16 %v1602_v8, %v1601_v25  ;;  %v1524_v63 = vadd.f32 %v1511_v15, %v1480_v20 }
 0x339   : > { %v1613_v9 = vmax.f32 %v1589_v53, 0.0  ;;  %v1877_v31 = vpack.c.bf16 %v1603_v47, %v1603_v47  ;;  %v1534_v37 = vadd.f32 %v1511_v15, %v1490_v19  ;;  %v1535_v55 = vadd.f32 %v1511_v15, %v1491_v22 }
 0x33a   : > { %v1615_v33 = vmax.f32 %v1591_v23, 0.0  ;;  %v1536_v57 = vadd.f32 %v1511_v15, %v1492_v36  ;;  %1705 = vst [vmem:[%s2662_s6] sm:$0xff] %v1876_v54  ;;  %v2666_v1 = vunpack.c.l.bf16 %v2468_v42  ;;  %v2667_v61 = vunpack.c.h.bf16 %v2468_v42 }
 0x33b   : > { %v1884_v7 = vpack.c.bf16 %v1614_v10, %v1613_v9  ;;  %1706 = vst [vmem:[%s2662_s6 + $0x8] sm:$0xf] %v1877_v31  ;;  %v2668_v19 = vunpack.c.l.bf16 %v2473_v44  ;;  %v2669_v22 = vunpack.c.l.bf16 %v2478_v45  ;;  %v2670_v16 = vunpack.c.h.bf16 %v2478_v45 }
 0x33c   : > { %v1885_v13 = vpack.c.bf16 %v1615_v33, %v1615_v33  ;;  %v1586_v0 = vadd.f32 %v2666_v1, %v1522_v17  ;;  %v1587_v3 = vadd.f32 %v2667_v61, %v1523_v38  ;;  %v2671_v39 = vunpack.c.h.bf16 %v2473_v44 }
 0x33d   : > { %v1588_v20 = vadd.f32 %v2668_v19, %v1524_v63  ;;  %v1598_v36 = vadd.f32 %v2669_v22, %v1534_v37  ;;  %v1599_v18 = vadd.f32 %v2670_v16, %v1535_v55  ;;  %1713 = vst [vmem:[%s2662_s6 + $0x30] sm:$0xff] %v1884_v7  ;;  %v1519_v48 = vadd.f32 %v1506_v11, %v2515_v60 }
 0x33e   : > { %v1600_v40 = vadd.f32 %v2671_v39, %v1536_v57  ;;  %1714 = vst [vmem:[%s2662_s6 + $0x38] sm:$0xf] %v1885_v13  ;;  %v1610_v42 = vmax.f32 %v1586_v0, 0.0  ;;  %v1611_v52 = vmax.f32 %v1587_v3, 0.0  ;;  %v1520_v24 = vadd.f32 %v1506_v11, %v2517_v6 }
 0x33f   : > { %v1612_v26 = vmax.f32 %v1588_v20, 0.0  ;;  %v1622_v45 = vmax.f32 %v1598_v36, 0.0  ;;  %v1623_v12 = vmax.f32 %v1599_v18, 0.0  ;;  %v1521_v28 = vadd.f32 %v1506_v11, %v2519_v49 }
 0x340   : > { %v1624_v14 = vmax.f32 %v1600_v40, 0.0  ;;  %v1882_v44 = vpack.c.bf16 %v1611_v52, %v1610_v42  ;;  %v1531_v4 = vadd.f32 %v1506_v11, %v2521_v27  ;;  %v1532_v5 = vadd.f32 %v1506_v11, %v2535_v58 }
 0x341   : > { %v1883_v29 = vpack.c.bf16 %v1612_v26, %v1612_v26  ;;  %v1890_v62 = vpack.c.bf16 %v1623_v12, %v1622_v45  ;;  %v1533_v41 = vadd.f32 %v1506_v11, %v2537_v2  ;;  %v2672_v60 = vunpack.c.l.bf16 %v2487_v50 }
 0x342   : > { %v1891_v30 = vpack.c.bf16 %v1624_v14, %v1624_v14  ;;  %1711 = vst [vmem:[%s2662_s6 + $0x24] sm:$0xff] %v1882_v44  ;;  %v2673_v15 = vunpack.c.h.bf16 %v2487_v50  ;;  %v2674_v49 = vunpack.c.l.bf16 %v2496_v56  ;;  %v2675_v58 = vunpack.c.l.bf16 %v2501_v43 }
 0x343   : > { %v1583_v6 = vadd.f32 %v2672_v60, %v1519_v48  ;;  %1712 = vst [vmem:[%s2662_s6 + $0x2c] sm:$0xf] %v1883_v29  ;;  %1719 = vst [vmem:[%s2662_s6 + $0x54] sm:$0xff] %v1890_v62  ;;  %v2676_v50 = vunpack.c.h.bf16 %v2501_v43  ;;  %v2677_v51 = vunpack.c.h.bf16 %v2496_v56 }
 0x344   : > { %v1584_v34 = vadd.f32 %v2673_v15, %v1520_v24  ;;  %v1585_v27 = vadd.f32 %v2674_v49, %v1521_v28  ;;  %v1595_v35 = vadd.f32 %v2675_v58, %v1531_v4  ;;  %1720 = vst [vmem:[%s2662_s6 + $0x5c] sm:$0xf] %v1891_v30 }
 0x345   : > { %v1596_v2 = vadd.f32 %v2676_v50, %v1532_v5  ;;  %v1597_v59 = vadd.f32 %v2677_v51, %v1533_v41  ;;  %v1607_v53 = vmax.f32 %v1583_v6, 0.0 }
 0x346   : > { %v1608_v21 = vmax.f32 %v1584_v34, 0.0  ;;  %v1609_v32 = vmax.f32 %v1585_v27, 0.0  ;;  %v1619_v46 = vmax.f32 %v1595_v35, 0.0 }
 0x347   : > { %v1620_v23 = vmax.f32 %v1596_v2, 0.0  ;;  %v1621_v25 = vmax.f32 %v1597_v59, 0.0 }
 0x348   : > { %v1880_v8 = vpack.c.bf16 %v1608_v21, %v1607_v53  ;;  %v1881_v47 = vpack.c.bf16 %v1609_v32, %v1609_v32 }
 0x349   : > { %v1888_v9 = vpack.c.bf16 %v1620_v23, %v1619_v46  ;;  %v1889_v17 = vpack.c.bf16 %v1621_v25, %v1621_v25 }
 0x34a   : > { %1709 = vst [vmem:[%s2662_s6 + $0x18] sm:$0xff] %v1880_v8  ;;  %1710 = vst [vmem:[%s2662_s6 + $0x20] sm:$0xf] %v1881_v47 }
 0x34b   : > { %1717 = vst [vmem:[%s2662_s6 + $0x48] sm:$0xff] %v1888_v9  ;;  %1718 = vst [vmem:[%s2662_s6 + $0x50] sm:$0xf] %v1889_v17 }
 0x34c PF: > { %s16_s21 = sadd.s32 1, %s1997_s21  }
 0x34d   : > { %p13_p6 = scmp.ge.s32.totalorder %s16_s21, 4  }
 0x34f   :  { %15 = sbr.rel (!%p13_p6) target bundleno = 1 (0x1), region = 79 }

// kernel: _lambda_.13
= control target key start
LH: loop header
LB: loop body
LE: loop exit
PB: predicated region body
PF: predicated region fallthrough
CT: control target
= control target key end

     0   :  { %s2605_s18 = smov 0   ;;  %s3605_s0 = inlined_call_operand.vmem [shape: bf16[2,32,512], index: 0, kind: input, shape index: {}]   ;;  %s3606_s1 = inlined_call_operand.vmem [shape: bf16[64,288], index: 1, kind: input, shape index: {}]   ;;  %s3607_s2 = inlined_call_operand.vmem [shape: f32[64,1], index: 2, kind: input, shape index: {}]   ;;  %s3608_s3 = inlined_call_operand.vmem [shape: f32[64,1], index: 3, kind: input, shape index: {}]   ;;  %s3609_s4 = inlined_call_operand.vmem [shape: f32[1,384], index: 4, kind: input, shape index: {}]   ;;  %s3610_s5 = inlined_call_operand.vmem [shape: bf16[2,64,384], index: 5, kind: output, shape index: {}]  }
   0x1 LB: > { %s2611_s19 = sadd.s32 4294967295, %s2562_s18   ;;  %p2219_p0 = scmp.ge.s32.totalorder %s2562_s18, 1  ;;  %s2562_s18 = sphi %s2605_s18, %s15_s18  }
   0x2   : > { %p182_p1 = scmp.lt.s32.totalorder %s2562_s18, 3 }
   0x4   : > { %p183_p2 = pnand %p2219_p0, %p182_p1 }
   0x5   : > { %p205_p3 = scmp.lt.s32.totalorder (!%p183_p2), %s2611_s19, 1  ;;  %p2222_p4 = scmp.ne.s32.totalorder (!%p183_p2), %s2611_s19, 0 }
   0x6   : > { %186 = sbr.rel (%p183_p2) target bundleno = 883 (0x373), region = 40 }
   0xd   : > { %s206_s20 = scalar_select %p205_p3, %s2611_s19, 1 }
   0xe   : > { %214 = sbr.rel (%p2222_p4) target bundleno = 23 (0x17), region = 44  ;;  %vm215_vm0 = vcmask (!%p2222_p4), 7168   ;;  %v2564_v0 = vmov (!%p2222_p4), 0.0  }
   0xf   : > { %s2365_s21 = sshll.u32 %s206_s20, 6  ;;  %216 = vst.msk [vmem:[#allocation3] sm:$0xff] (!%p2222_p4), %vm215_vm0, %v2564_v0  ;;  %217 = vst.msk [vmem:[#allocation3 + $0x8] sm:$0xff] (!%p2222_p4), %vm215_vm0, %v2564_v0 }
  0x10   : > { %s2620_s24 = scalar_lea.vmem %s3605_s0, %s2365_s21  ;;  %218 = vst.msk [vmem:[#allocation3 + $0x10] sm:$0xff] (!%p2222_p4), %vm215_vm0, %v2564_v0  ;;  %219 = vst.msk [vmem:[#allocation3 + $0x18] sm:$0xff] (!%p2222_p4), %vm215_vm0, %v2564_v0 }
  0x11   : > { %220 = vst.msk [vmem:[#allocation3 + $0x20] sm:$0xff] (!%p2222_p4), %vm215_vm0, %v2564_v0  ;;  %221 = vst.msk [vmem:[#allocation3 + $0x28] sm:$0xff] (!%p2222_p4), %vm215_vm0, %v2564_v0 }
  0x12   : > { %222 = vst.msk [vmem:[#allocation3 + $0x30] sm:$0xff] (!%p2222_p4), %vm215_vm0, %v2564_v0  ;;  %223 = vst.msk [vmem:[#allocation3 + $0x38] sm:$0xff] (!%p2222_p4), %vm215_vm0, %v2564_v0 }
  0x13   : > { %224 = vst.msk [vmem:[#allocation4] sm:$0xff] (!%p2222_p4), %vm215_vm0, %v2564_v0  ;;  %225 = vst.msk [vmem:[#allocation4 + $0x8] sm:$0xff] (!%p2222_p4), %vm215_vm0, %v2564_v0 }
  0x14   : > { %226 = vst.msk [vmem:[#allocation4 + $0x10] sm:$0xff] (!%p2222_p4), %vm215_vm0, %v2564_v0  ;;  %227 = vst.msk [vmem:[#allocation4 + $0x18] sm:$0xff] (!%p2222_p4), %vm215_vm0, %v2564_v0 }
  0x15   : > { %228 = vst.msk [vmem:[#allocation4 + $0x20] sm:$0xff] %vm215_vm0, %v2564_v0  ;;  %229 = vst.msk [vmem:[#allocation4 + $0x28] sm:$0xff] %vm215_vm0, %v2564_v0 }
  0x16   : > { %230 = vst.msk [vmem:[#allocation4 + $0x30] sm:$0xff] %vm215_vm0, %v2564_v0  ;;  %231 = vst.msk [vmem:[#allocation4 + $0x38] sm:$0xff] %vm215_vm0, %v2564_v0 }
  0x17 PF: > { %v2640_v1 = vld [vmem:[%s2620_s24 + $0x4] ss:$16 sps:$4 sm:$0xff]   ;;  %v2643_v2 = vld [vmem:[%s2620_s24] ss:$16 sps:$4 sm:$0xff]   ;;  %s2565_s25 = smov 127   ;;  %s2566_s26 = smov 90  }
  0x18   : > { %320 = vrot.lane.b32.xlu0 %v2640_v1, %s2565_s25  ;;  %v2648_v3 = vld [vmem:[%s2620_s24 + $0x8] ss:$16 sps:$4 sm:$0xff]   ;;  %1021 = vmatprep.subr.bf16.mxu0 %v2640_v1  ;;  %v2654_v4 = vld [vmem:[%s2620_s24 + $0x24] ss:$16 sps:$4 sm:$0xff]   ;;  %v2658_v5 = vld [vmem:[%s2620_s24 + $0x20] ss:$16 sps:$4 sm:$0xff]  }
  0x19   : > { %318 = vrot.lane.b32.xlu1 %v2643_v2, %s2565_s25  ;;  %1022 = vmatpush1.bf16.msra.mxu0 %v2643_v2  ;;  %v2515_v6 = vld [vmem:[%s2620_s24 + $0x28] ss:$16 sps:$4 sm:$0xff]   ;;  %s2567_s27 = smov 126   ;;  %v2568_v7 = vmov 0   ;;  %v2689_v8 = vld [vmem:[%s2620_s24 + $0xc] ss:$16 sps:$4 sm:$0xff]  }
  0x1a   : > { %1023 = vmatprep.subr.bf16.mxu0 %v2654_v4  ;;  %1126 = vmatprep.mubr.bf16.mxu1 %v2568_v7  ;;  %s2569_s28 = smov 109   ;;  %v2699_v9 = vld [vmem:[%s2620_s24 + $0x2c] ss:$16 sps:$4 sm:$0xff]   ;;  %s2570_s29 = smov 110   ;;  %v2738_v10 = vld [vmem:[%s3606_s1 + $0x4] ss:$12 sps:$4 sm:$0xff]  }
  0x1b   : > { %s2571_s30 = smov 108   ;;  %s2572_s6 = smov 92   ;;  %1053 = vmatprep.mubr.bf16.mxu0 %v2738_v10  ;;  %vm334_vm1 = vcmask 1039360   ;;  %vm859_vm2 = vcmask 736256   ;;  %v2783_v31 = vld [vmem:[%s3606_s1 + $0x8] ss:$12 sps:$4 sm:$0xff]  }
  0x1c   : > { %322 = vrot.lane.b32.xlu0 %v2648_v3, %s2565_s25  ;;  %s2573_s7 = smov 91   ;;  %vm409_vm3 = vcmask 1031168   ;;  %vm1008_vm4 = vcmask 261120   ;;  %vm559_vm5 = vcmask 891904   ;;  %v2798_v38 = vld [vmem:[%s3606_s1 + $0x20] ss:$12 sps:$4 sm:$0xff]  }
  0x1d   : > { %845 = vrot.lane.b32.xlu1 %v2640_v1, %s2566_s26  ;;  %1024 = vmatpush1.bf16.msra.mxu0 %v2658_v5  ;;  %v2521_v39 = vld [vmem:[%s2620_s24 + $0x8] ss:$16 sps:$4 sm:$0xff]   ;;  %vm484_vm6 = vcmask 900096   ;;  %v2828_v55 = vld [vmem:[%s3606_s1 + $0x50] ss:$12 sps:$4 sm:$0xff]   ;;  %vm634_vm7 = vcmask 883712  }
  0x1e   : > { %v2814_v47 = vld [vmem:[%s3606_s1 + $0x38] ss:$12 sps:$4 sm:$0xff]   ;;  %vm709_vm8 = vcmask 752640   ;;  %vm784_vm9 = vcmask 744448   ;;  %s2382_s11 = smul.u32 96, %s2611_s19  ;;  %vm1386_vm10 = vcmask 7168  }
  0x1f   : > { %v2522_v49 = vld [vmem:[%s2620_s24 + $0x28] ss:$16 sps:$4 sm:$0xff]   ;;  %p2330_p5 = scmp.ne.s32.totalorder %s2611_s19, 1 }
  0x20   : > { %847 = vrot.lane.b32.xlu0 %v2648_v3, %s2566_s26  ;;  %s2961_s14 = scalar_lea.vmem %s3610_s5, %s2382_s11 }
  0x21   : > { %843 = vrot.lane.b32.xlu1 %v2643_v2, %s2566_s26 }
  0x24   : > { %328 = vrot.lane.b32.xlu0 %v2654_v4, %s2565_s25 }
  0x25   : > { %330 = vrot.lane.b32.xlu1 %v2515_v6, %s2565_s25 }
  0x28   : > { %326 = vrot.lane.b32.xlu0 %v2658_v5, %s2565_s25 }
  0x29   : > { %853 = vrot.lane.b32.xlu1 %v2654_v4, %s2566_s26 }
  0x2c   : > { %855 = vrot.lane.b32.xlu0 %v2515_v6, %s2566_s26 }
  0x2d   : > { %851 = vrot.lane.b32.xlu1 %v2658_v5, %s2566_s26 }
  0x30   : > { %395 = vrot.lane.b32.xlu0 %v2640_v1, %s2567_s27 }
  0x31   : > { %397 = vrot.lane.b32.xlu1 %v2648_v3, %s2567_s27 }
  0x34   : > { %393 = vrot.lane.b32.xlu0 %v2643_v2, %s2567_s27 }
  0x35   : > { %547 = vrot.lane.b32.xlu1 %v2648_v3, %s2569_s28 }
  0x38   : > { %549 = vrot.lane.b32.xlu0 %v2689_v8, %s2569_s28 }
  0x39   : > { %403 = vrot.lane.b32.xlu1 %v2654_v4, %s2567_s27 }
  0x3c   : > { %405 = vrot.lane.b32.xlu0 %v2515_v6, %s2567_s27 }
  0x3d   : > { %401 = vrot.lane.b32.xlu1 %v2658_v5, %s2567_s27 }
  0x40   : > { %555 = vrot.lane.b32.xlu0 %v2515_v6, %s2569_s28 }
  0x41   : > { %557 = vrot.lane.b32.xlu1 %v2699_v9, %s2569_s28 }
  0x44   : > { %470 = vrot.lane.b32.xlu0 %v2640_v1, %s2570_s29 }
  0x45   : > { %472 = vrot.lane.b32.xlu1 %v2648_v3, %s2570_s29 }
  0x48   : > { %468 = vrot.lane.b32.xlu0 %v2643_v2, %s2570_s29 }
  0x49   : > { %622 = vrot.lane.b32.xlu1 %v2648_v3, %s2571_s30 }
  0x4c   : > { %624 = vrot.lane.b32.xlu0 %v2689_v8, %s2571_s30 }
  0x4d   : > { %324 = vrot.lane.b32.xlu1 %v2689_v8, %s2565_s25 }
  0x50   : > { %478 = vrot.lane.b32.xlu0 %v2654_v4, %s2570_s29 }
  0x51   : > { %480 = vrot.lane.b32.xlu1 %v2515_v6, %s2570_s29 }
  0x54   : > { %476 = vrot.lane.b32.xlu0 %v2658_v5, %s2570_s29 }
  0x55   : > { %630 = vrot.lane.b32.xlu1 %v2515_v6, %s2571_s30 }
  0x58   : > { %632 = vrot.lane.b32.xlu0 %v2699_v9, %s2571_s30 }
  0x59   : > { %332 = vrot.lane.b32.xlu1 %v2699_v9, %s2565_s25 }
  0x5c   : > { %545 = vrot.lane.b32.xlu0 %v2640_v1, %s2569_s28 }
  0x5d   : > { %543 = vrot.lane.b32.xlu1 %v2643_v2, %s2569_s28 }
  0x60   : > { %697 = vrot.lane.b32.xlu0 %v2648_v3, %s2572_s6 }
  0x61   : > { %699 = vrot.lane.b32.xlu1 %v2689_v8, %s2572_s6 }
  0x64   : > { %399 = vrot.lane.b32.xlu0 %v2689_v8, %s2567_s27 }
  0x65   : > { %553 = vrot.lane.b32.xlu1 %v2654_v4, %s2569_s28 }
  0x68   : > { %551 = vrot.lane.b32.xlu0 %v2658_v5, %s2569_s28 }
  0x69   : > { %705 = vrot.lane.b32.xlu1 %v2515_v6, %s2572_s6 }
  0x6c   : > { %707 = vrot.lane.b32.xlu0 %v2699_v9, %s2572_s6 }
  0x6d   : > { %407 = vrot.lane.b32.xlu1 %v2699_v9, %s2567_s27 }
  0x70   : > { %620 = vrot.lane.b32.xlu0 %v2640_v1, %s2571_s30 }
  0x71   : > { %618 = vrot.lane.b32.xlu1 %v2643_v2, %s2571_s30 }
  0x74   : > { %772 = vrot.lane.b32.xlu0 %v2648_v3, %s2573_s7 }
  0x75   : > { %774 = vrot.lane.b32.xlu1 %v2689_v8, %s2573_s7 }
  0x78   : > { %474 = vrot.lane.b32.xlu0 %v2689_v8, %s2570_s29 }
  0x79   : > { %628 = vrot.lane.b32.xlu1 %v2654_v4, %s2571_s30 }
  0x7c   : > { %626 = vrot.lane.b32.xlu0 %v2658_v5, %s2571_s30 }
  0x7d   : > { %780 = vrot.lane.b32.xlu1 %v2515_v6, %s2573_s7 }
  0x80   : > { %782 = vrot.lane.b32.xlu0 %v2699_v9, %s2573_s7 }
  0x81   : > { %482 = vrot.lane.b32.xlu1 %v2699_v9, %s2570_s29 }
  0x84   : > { %695 = vrot.lane.b32.xlu0 %v2640_v1, %s2572_s6 }
  0x85   : > { %693 = vrot.lane.b32.xlu1 %v2643_v2, %s2572_s6 }
  0x88   : > { %703 = vrot.lane.b32.xlu0 %v2654_v4, %s2572_s6 }
  0x89   : > { %701 = vrot.lane.b32.xlu1 %v2658_v5, %s2572_s6 }
  0x8a   : > { %v321_v11 = vpop.permute.xlu0 %320 }
  0x8b   : > { %v319_v12 = vpop.permute.xlu1 %318 }
  0x8c   : > { %770 = vrot.lane.b32.xlu0 %v2640_v1, %s2573_s7  ;;  %v335_v16 = vsel %vm334_vm1, %v319_v12, %v321_v11 }
  0x8d   : > { %768 = vrot.lane.b32.xlu1 %v2643_v2, %s2573_s7 }
  0x8e   : > { %v2754_v13 = vpop.permute.xlu0 %322 }
  0x8f   : > { %v846_v14 = vpop.permute.xlu1 %845  ;;  %v336_v15 = vsel %vm334_vm1, %v321_v11, %v2754_v13 }
  0x90   : > { %778 = vrot.lane.b32.xlu0 %v2654_v4, %s2573_s7  ;;  %1025 = vmatprep.subr.bf16.mxu0 %v336_v15 }
  0x91   : > { %776 = vrot.lane.b32.xlu1 %v2658_v5, %s2573_s7  ;;  %1026 = vmatpush1.bf16.msra.mxu0 %v335_v16 }
  0x92   : > { %v2761_v17 = vpop.permute.xlu0 %847 }
  0x93   : > { %v844_v18 = vpop.permute.xlu1 %843  ;;  %v861_v19 = vsel %vm859_vm2, %v846_v14, %v2761_v17 }
  0x94   : > { %849 = vrot.lane.b32.xlu0 %v2689_v8, %s2566_s26  ;;  %1094 = vmatprep.subr.bf16.mxu1 %v861_v19  ;;  %v860_v20 = vsel %vm859_vm2, %v844_v18, %v846_v14 }
  0x95   : > { %857 = vrot.lane.b32.xlu1 %v2699_v9, %s2566_s26  ;;  %1095 = vmatpush1.bf16.msra.mxu1 %v860_v20 }
  0x96   : > { %v329_v21 = vpop.permute.xlu0 %328 }
  0x97   : > { %v2770_v22 = vpop.permute.xlu1 %330 }
  0x98   : > { %v339_v23 = vsel %vm334_vm1, %v329_v21, %v2770_v22 }
  0x99   : > { %1027 = vmatprep.subr.bf16.mxu0 %v339_v23 }
  0x9a   : > { %v327_v24 = vpop.permute.xlu0 %326 }
  0x9b   : > { %v854_v25 = vpop.permute.xlu1 %853  ;;  %v338_v26 = vsel %vm334_vm1, %v327_v24, %v329_v21 }
  0x9c   : > { %1028 = vmatpush1.bf16.msra.mxu0 %v338_v26 }
  0x9e   : > { %v2775_v27 = vpop.permute.xlu0 %855 }
  0x9f   : > { %v852_v28 = vpop.permute.xlu1 %851  ;;  %v864_v29 = vsel %vm859_vm2, %v854_v25, %v2775_v27 }
  0xa0   : > { %1096 = vmatprep.subr.bf16.mxu1 %v864_v29  ;;  %v863_v30 = vsel %vm859_vm2, %v852_v28, %v854_v25 }
  0xa1   : > { %1097 = vmatpush1.bf16.msra.mxu1 %v863_v30 }
  0xa2   : > { %v396_v32 = vpop.permute.xlu0 %395 }
  0xa3   : > { %v2785_v33 = vpop.permute.xlu1 %397 }
  0xa4   : > { %v411_v34 = vsel %vm409_vm3, %v396_v32, %v2785_v33  ;;  %2305 = vmatmul.mubr.msk.bf16.vlgmr.msra.gmra.mrb[0].mxu1 %vm1008_vm4, %v2783_v31 }
  0xa5   : > { %1029 = vmatprep.subr.bf16.mxu0 %v411_v34  ;;  %1136 = vmatprep.mubr.bf16.mxu1 %v2568_v7 }
  0xa6   : > { %v394_v35 = vpop.permute.xlu0 %393 }
  0xa7   : > { %v2792_v36 = vpop.permute.xlu1 %547  ;;  %v410_v37 = vsel %vm409_vm3, %v394_v35, %v396_v32 }
  0xa8   : > { %1030 = vmatpush1.bf16.msra.mxu0 %v410_v37 }
  0xaa   : > { %v550_v40 = vpop.permute.xlu0 %549 }
  0xab   : > { %v404_v41 = vpop.permute.xlu1 %403  ;;  %v562_v42 = vsel %vm559_vm5, %v2792_v36, %v550_v40 }
  0xac   : > { %2415 = vmatprep.subr.bf16.mxu1 %v562_v42  ;;  %2306 = vmatmul.mubr.msk.bf16.gmra.mrb[4].mxu1 %vm1008_vm4, %v2798_v38 }
  0xad   : > { %2416 = vmatpush3.bf16.msra.mxu1 %v2521_v39  ;;  %1146 = vmatprep.mubr.bf16.mxu1 %v2568_v7 }
  0xae   : > { %v2806_v43 = vpop.permute.xlu0 %405 }
  0xaf   : > { %v402_v44 = vpop.permute.xlu1 %401  ;;  %v414_v45 = vsel %vm409_vm3, %v404_v41, %v2806_v43 }
  0xb0   : > { %1031 = vmatprep.subr.bf16.mxu0 %v414_v45  ;;  %v413_v46 = vsel %vm409_vm3, %v402_v44, %v404_v41 }
  0xb1   : > { %1032 = vmatpush1.bf16.msra.mxu0 %v413_v46 }
  0xb2   : > { %v556_v48 = vpop.permute.xlu0 %555 }
  0xb3   : > { %v558_v50 = vpop.permute.xlu1 %557 }
  0xb4   : > { %v565_v51 = vsel %vm559_vm5, %v556_v48, %v558_v50  ;;  %2307 = vmatmul.mubr.msk.bf16.gmra.mrb[8].mxu1 %vm1008_vm4, %v2814_v47  ;;  %v2526_v50 = vld [vmem:[%s3606_s1] ss:$12 sps:$4 sm:$0xff]  }
  0xb5   : > { %2417 = vmatprep.subr.bf16.mxu1 %v565_v51  ;;  %1156 = vmatprep.mubr.bf16.mxu1 %v2568_v7  ;;  %v2529_v51 = vld [vmem:[%s3606_s1 + $0x1c] ss:$12 sps:$4 sm:$0xff]  }
  0xb6   : > { %v471_v52 = vpop.permute.xlu0 %470  ;;  %2418 = vmatpush3.bf16.msra.mxu1 %v2522_v49 }
  0xb7   : > { %v2821_v53 = vpop.permute.xlu1 %472 }
  0xb8   : > { %v486_v54 = vsel %vm484_vm6, %v471_v52, %v2821_v53 }
  0xb9   : > { %1033 = vmatprep.subr.bf16.mxu0 %v486_v54 }
  0xba   : > { %v469_v56 = vpop.permute.xlu0 %468 }
  0xbb   : > { %v623_v57 = vpop.permute.xlu1 %622  ;;  %v485_v58 = vsel %vm484_vm6, %v469_v56, %v471_v52 }
  0xbc   : > { %1034 = vmatpush1.bf16.msra.mxu0 %v485_v58  ;;  %2308 = vmatmul.mubr.msk.bf16.gmra.mrb[12].mxu1 %vm1008_vm4, %v2828_v55 }
  0xbd   : > { %1199 = vmatprep.mubr.bf16.mxu1 %v2738_v10 }
  0xbe   : > { %v625_v59 = vpop.permute.xlu0 %624 }
  0xbf   : > { %v325_v60 = vpop.permute.xlu1 %324  ;;  %v637_v61 = vsel %vm634_vm7, %v623_v57, %v625_v59 }
  0xc0   : > { %v337_v62 = vsel %vm334_vm1, %v2754_v13, %v325_v60  ;;  %2419 = vmatprep.subr.bf16.mxu1 %v637_v61  ;;  %v2531_v61 = vld [vmem:[%s3606_s1 + $0x18] ss:$12 sps:$4 sm:$0xff]  }
  0xc1   : > { %2420 = vmatpush3.bf16.msra.mxu1 %v337_v62  ;;  %v2532_v62 = vld [vmem:[%s3606_s1 + $0x34] ss:$12 sps:$4 sm:$0xff]  }
  0xc2   : > { %v479_v63 = vpop.permute.xlu0 %478 }
  0xc3   : > { %v2837_v0 = vpop.permute.xlu1 %480 }
  0xc4   : > { %v489_v1 = vsel %vm484_vm6, %v479_v63, %v2837_v0 }
  0xc5   : > { %1035 = vmatprep.subr.bf16.mxu0 %v489_v1 }
  0xc6   : > { %v477_v2 = vpop.permute.xlu0 %476 }
  0xc7   : > { %v631_v3 = vpop.permute.xlu1 %630  ;;  %v488_v4 = vsel %vm484_vm6, %v477_v2, %v479_v63 }
  0xc8   : > { %1036 = vmatpush1.bf16.msra.mxu0 %v488_v4 }
  0xca   : > { %v633_v5 = vpop.permute.xlu0 %632 }
  0xcb   : > { %v333_v6 = vpop.permute.xlu1 %332  ;;  %v640_v7 = vsel %vm634_vm7, %v631_v3, %v633_v5 }
  0xcc   : > { %v340_v8 = vsel %vm334_vm1, %v2770_v22, %v333_v6  ;;  %2421 = vmatprep.subr.bf16.mxu1 %v640_v7  ;;  %v2534_v7 = vld [vmem:[%s3606_s1 + $0x30] ss:$12 sps:$4 sm:$0xff]  }
  0xcd   : > { %2422 = vmatpush3.bf16.msra.mxu1 %v340_v8 }
  0xce   : > { %v546_v9 = vpop.permute.xlu0 %545 }
  0xcf   : > { %v544_v10 = vpop.permute.xlu1 %543  ;;  %v561_v11 = vsel %vm559_vm5, %v546_v9, %v2792_v36 }
  0xd0   : > { %1037 = vmatprep.subr.bf16.mxu0 %v561_v11  ;;  %v560_v12 = vsel %vm559_vm5, %v544_v10, %v546_v9  ;;  %v2535_v9 = vld [vmem:[%s3606_s1 + $0x4c] ss:$12 sps:$4 sm:$0xff]  }
  0xd1   : > { %1038 = vmatpush1.bf16.msra.mxu0 %v560_v12 }
  0xd2   : > { %v698_v13 = vpop.permute.xlu0 %697 }
  0xd3   : > { %v700_v14 = vpop.permute.xlu1 %699 }
  0xd4   : > { %v712_v15 = vsel %vm709_vm8, %v698_v13, %v700_v14 }
  0xd5   : > { %2423 = vmatprep.subr.bf16.mxu1 %v712_v15 }
  0xd6   : > { %v400_v16 = vpop.permute.xlu0 %399 }
  0xd7   : > { %v412_v18 = vsel %vm409_vm3, %v2785_v33, %v400_v16  ;;  %v554_v19 = vpop.permute.xlu1 %553 }
  0xd8   : > { %v564_v20 = vsel %vm559_vm5, %v554_v19, %v556_v48  ;;  %2424 = vmatpush3.bf16.msra.mxu1 %v412_v18 }
  0xd9   : > { %1039 = vmatprep.subr.bf16.mxu0 %v564_v20 }
  0xda   : > { %v552_v21 = vpop.permute.xlu0 %551 }
  0xdb   : > { %v706_v22 = vpop.permute.xlu1 %705  ;;  %v563_v23 = vsel %vm559_vm5, %v552_v21, %v554_v19 }
  0xdc   : > { %1040 = vmatpush1.bf16.msra.mxu0 %v563_v23 }
  0xde   : > { %v708_v24 = vpop.permute.xlu0 %707 }
  0xdf   : > { %v408_v25 = vpop.permute.xlu1 %407  ;;  %v715_v26 = vsel %vm709_vm8, %v706_v22, %v708_v24 }
  0xe0   : > { %v415_v28 = vsel %vm409_vm3, %v2806_v43, %v408_v25  ;;  %2425 = vmatprep.subr.bf16.mxu1 %v715_v26 }
  0xe1   : > { %2426 = vmatpush3.bf16.msra.mxu1 %v415_v28 }
  0xe2   : > { %v621_v29 = vpop.permute.xlu0 %620 }
  0xe3   : > { %v619_v30 = vpop.permute.xlu1 %618  ;;  %v636_v32 = vsel %vm634_vm7, %v621_v29, %v623_v57 }
  0xe4   : > { %1041 = vmatprep.subr.bf16.mxu0 %v636_v32  ;;  %v635_v33 = vsel %vm634_vm7, %v619_v30, %v621_v29  ;;  %v1299_v30 = vlaneseq }
  0xe5   : > { %1042 = vmatpush1.bf16.msra.mxu0 %v635_v33 }
  0xe6   : > { %v773_v34 = vpop.permute.xlu0 %772 }
  0xe7   : > { %v775_v35 = vpop.permute.xlu1 %774 }
  0xe8   : > { %v787_v36 = vsel %vm784_vm9, %v773_v34, %v775_v35 }
  0xe9   : > { %2427 = vmatprep.subr.bf16.mxu1 %v787_v36 }
  0xea   : > { %v475_v37 = vpop.permute.xlu0 %474 }
  0xeb   : > { %v487_v39 = vsel %vm484_vm6, %v2821_v53, %v475_v37  ;;  %v629_v40 = vpop.permute.xlu1 %628 }
  0xec   : > { %v639_v41 = vsel %vm634_vm7, %v629_v40, %v631_v3  ;;  %2428 = vmatpush3.bf16.msra.mxu1 %v487_v39 }
  0xed   : > { %1043 = vmatprep.subr.bf16.mxu0 %v639_v41 }
  0xee   : > { %v627_v42 = vpop.permute.xlu0 %626 }
  0xef   : > { %v781_v43 = vpop.permute.xlu1 %780  ;;  %v638_v44 = vsel %vm634_vm7, %v627_v42, %v629_v40  ;;  %v2943_v42 = vld [vmem:[%s3609_s4] sm:$0x7] }
  0xf0   : > { %1044 = vmatpush1.bf16.msra.mxu0 %v638_v44 }
  0xf2   : > { %v783_v45 = vpop.permute.xlu0 %782 }
  0xf3   : > { %v483_v46 = vpop.permute.xlu1 %482  ;;  %v790_v48 = vsel %vm784_vm9, %v781_v43, %v783_v45 }
  0xf4   : > { %v490_v49 = vsel %vm484_vm6, %v2837_v0, %v483_v46  ;;  %2429 = vmatprep.subr.bf16.mxu1 %v790_v48 }
  0xf5   : > { %2430 = vmatpush3.bf16.msra.mxu1 %v490_v49 }
  0xf6   : > { %v696_v52 = vpop.permute.xlu0 %695 }
  0xf7   : > { %v694_v53 = vpop.permute.xlu1 %693  ;;  %v711_v54 = vsel %vm709_vm8, %v696_v52, %v698_v13  ;;  %v2537_v13 = vld [vmem:[%s3606_s1 + $0x48] ss:$12 sps:$4 sm:$0xff]  }
  0xf8   : > { %1045 = vmatprep.subr.bf16.mxu0 %v711_v54  ;;  %1200 = vmatmul.mubr.bf16.vlgmr.msra.gmra.mrb[16].mxu1 %v2526_v50  ;;  %v710_v56 = vsel %vm709_vm8, %v694_v53, %v696_v52 }
  0xf9   : > { %1046 = vmatpush1.bf16.msra.mxu0 %v710_v56  ;;  %1207 = vmatprep.mubr.bf16.mxu1 %v2529_v51 }
  0xfa   : > { %v704_v57 = vpop.permute.xlu0 %703 }
  0xfb   : > { %v702_v58 = vpop.permute.xlu1 %701  ;;  %v714_v59 = vsel %vm709_vm8, %v704_v57, %v706_v22 }
  0xfc   : > { %1047 = vmatprep.subr.bf16.mxu0 %v714_v59  ;;  %v713_v60 = vsel %vm709_vm8, %v702_v58, %v704_v57 }
  0xfd   : > { %1048 = vmatpush1.bf16.msra.mxu0 %v713_v60 }
  0xfe   : > { %v771_v63 = vpop.permute.xlu0 %770 }
  0xff   : > { %v769_v0 = vpop.permute.xlu1 %768  ;;  %v786_v1 = vsel %vm784_vm9, %v771_v63, %v773_v34  ;;  %v2935_v34 = vshrl.u32 %v1299_v30, 7 }
 0x100   : > { %1049 = vmatprep.subr.bf16.mxu0 %v786_v1  ;;  %1208 = vmatmul.mubr.bf16.gmra.mrb[20].mxu1 %v2531_v61  ;;  %v785_v2 = vsel %vm784_vm9, %v769_v0, %v771_v63 }
 0x101   : > { %1050 = vmatpush1.bf16.msra.mxu0 %v785_v2  ;;  %1215 = vmatprep.mubr.bf16.mxu1 %v2532_v62  ;;  %v1301_v40 = vsub.s32 0, %v2935_v34 }
 0x102   : > { %v779_v3 = vpop.permute.xlu0 %778 }
 0x103   : > { %v777_v4 = vpop.permute.xlu1 %776  ;;  %v789_v5 = vsel %vm784_vm9, %v779_v3, %v781_v43  ;;  %v1305_v43 = vsub.s32 1, %v2935_v34  ;;  %v2949_v45 = vrot.slane %v2943_v42, %v1301_v40 }
 0x104   : > { %1051 = vmatprep.subr.bf16.mxu0 %v789_v5  ;;  %v788_v6 = vsel %vm784_vm9, %v777_v4, %v779_v3 }
 0x105   : > { %1052 = vmatpush1.bf16.msra.mxu0 %v788_v6  ;;  %v2953_v48 = vrot.slane %v2943_v42, %v1305_v43 }
 0x106   : > { %v850_v8 = vpop.permute.xlu0 %849 }
 0x107   : > { %v858_v10 = vpop.permute.xlu1 %857  ;;  %v862_v11 = vsel %vm859_vm2, %v2761_v17, %v850_v8 }
 0x108   : > { %1054 = vmatmul.mubr.bf16.vlgmr.msra.gmra.mrb[0].mxu0 %v2526_v50  ;;  %1216 = vmatmul.mubr.bf16.gmra.mrb[24].mxu1 %v2534_v7  ;;  %v865_v12 = vsel %vm859_vm2, %v2775_v27, %v858_v10 }
 0x109   : > { %2461 = vmatprep.subr.bf16.mxu1 %v862_v11  ;;  %1063 = vmatprep.mubr.bf16.mxu0 %v2529_v51 }
 0x10a   : > { %2462 = vmatpush3.bf16.msra.mxu1 %v862_v11  ;;  %1223 = vmatprep.mubr.bf16.mxu1 %v2535_v9 }
 0x10b   : > { %2463 = vmatprep.subr.bf16.mxu1 %v865_v12 }
 0x10e   : > { %2464 = vmatpush3.bf16.msra.mxu1 %v865_v12 }
 0x110   : > { %1064 = vmatmul.mubr.bf16.gmra.mrb[4].mxu0 %v2531_v61  ;;  %1224 = vmatmul.mubr.bf16.gmra.mrb[28].mxu1 %v2537_v13 }
 0x111   : > { %1073 = vmatprep.mubr.bf16.mxu0 %v2532_v62  ;;  %2465 = vmatprep.mubr.msk.bf16.mxu1 %vm1008_vm4, %v2783_v31 }
 0x118   : > { %1074 = vmatmul.mubr.bf16.gmra.mrb[8].mxu0 %v2534_v7  ;;  %2466 = vmatmul.mubr.msk.bf16.vlgmr.msra.gmra.mrb[32].mxu1 %vm1008_vm4, %v2798_v38 }
 0x119   : > { %1083 = vmatprep.mubr.bf16.mxu0 %v2535_v9  ;;  %2469 = vmatprep.mubr.msk.bf16.mxu1 %vm1008_vm4, %v2814_v47 }
 0x120   : > { %1084 = vmatmul.mubr.bf16.gmra.mrb[12].mxu0 %v2537_v13  ;;  %2470 = vmatmul.mubr.msk.bf16.gmra.mrb[36].mxu1 %vm1008_vm4, %v2828_v55 }
 0x177   : > { %v1128_v17 = vpop.f32.mrb[0].mxu1 }
 0x178   : > { %v1130_v27 = vpop.f32.mrb[1].mxu1 }
 0x179   : > { %v1132_v14 = vpop.f32.mrb[2].mxu1 }
 0x17a   : > { %v1134_v15 = vpop.f32.mrb[3].mxu1 }
 0x17f   : > { %v2907_v16 = vpop.f32.mrb[4].mxu1 }
 0x180   : > { %v2909_v18 = vpop.f32.mrb[5].mxu1 }
 0x181   : > { %v2911_v31 = vpop.f32.mrb[6].mxu1 }
 0x182   : > { %v2913_v19 = vpop.f32.mrb[7].mxu1 }
 0x187   : > { %v2915_v38 = vpop.f32.mrb[8].mxu1 }
 0x188   : > { %v2917_v20 = vpop.f32.mrb[9].mxu1 }
 0x189   : > { %v2919_v47 = vpop.f32.mrb[10].mxu1 }
 0x18a   : > { %v2921_v21 = vpop.f32.mrb[11].mxu1 }
 0x18f   : > { %v2923_v55 = vpop.f32.mrb[12].mxu1 }
 0x190   : > { %v2925_v22 = vpop.f32.mrb[13].mxu1 }
 0x191   : > { %v2927_v23 = vpop.f32.mrb[14].mxu1 }
 0x192   : > { %v2929_v24 = vpop.f32.mrb[15].mxu1 }
 0x1cb   : > { %v2431_v25 = vpop.f32.mrb[16].mxu1 }
 0x1cc   : > { %v2432_v26 = vpop.f32.mrb[17].mxu1 }
 0x1cd   : > { %v2931_v28 = vadd.f32 %v2432_v26, %v2431_v25  ;;  %v2434_v29 = vpop.f32.mrb[18].mxu1 }
 0x1ce   : > { %v2435_v32 = vpop.f32.mrb[19].mxu1 }
 0x1cf   : > { %v2933_v33 = vadd.f32 %v2435_v32, %v2434_v29 }
 0x1d3   : > { %v2437_v35 = vpop.f32.mrb[20].mxu1 }
 0x1d4   : > { %v2438_v36 = vpop.f32.mrb[21].mxu1 }
 0x1d5   : > { %v2937_v37 = vadd.f32 %v2438_v36, %v2437_v35  ;;  %v2440_v39 = vpop.f32.mrb[22].mxu1 }
 0x1d6   : > { %v2441_v41 = vpop.f32.mrb[23].mxu1 }
 0x1d7   : > { %v2946_v44 = vadd.f32 %v2441_v41, %v2440_v39 }
 0x1db   : > { %v1055_v46 = vpop.f32.mrb[0].mxu0  ;;  %v2443_v49 = vpop.f32.mrb[24].mxu1 }
 0x1dc   : > { %v1129_v50 = vadd.f32 %v1128_v17, %v1055_v46  ;;  %v1057_v51 = vpop.f32.mrb[1].mxu0  ;;  %v2444_v52 = vpop.f32.mrb[25].mxu1 }
 0x1dd   : > { %v1131_v53 = vadd.f32 %v1130_v27, %v1057_v51  ;;  %v1059_v54 = vpop.f32.mrb[2].mxu0  ;;  %v2955_v56 = vadd.f32 %v2444_v52, %v2443_v49  ;;  %v2446_v57 = vpop.f32.mrb[26].mxu1  ;;  %v1309_v49 = vsub.s32 2, %v2935_v34 }
 0x1de   : > { %v1314_v58 = vmul.f32 %v2949_v45, %v1129_v50  ;;  %v1133_v59 = vadd.f32 %v1132_v14, %v1059_v54  ;;  %v1061_v60 = vpop.f32.mrb[3].mxu0  ;;  %v2447_v61 = vpop.f32.mrb[27].mxu1 }
 0x1df   : > { %v1315_v62 = vmul.f32 %v2953_v48, %v1131_v53  ;;  %v2366_v63 = vpack.c.bf16 %v1131_v53, %v1129_v50  ;;  %v1135_v0 = vadd.f32 %v1134_v15, %v1061_v60  ;;  %v2964_v1 = vadd.f32 %v2447_v61, %v2446_v57 }
 0x1e0   : > { %v1403_v2 = vmul.f32 %v1314_v58, %v1129_v50  ;;  %v1317_v3 = vmul.f32 %v2949_v45, %v1133_v59 }
 0x1e1   : > { %v1404_v4 = vmul.f32 %v1315_v62, %v1131_v53  ;;  %1558 = vst [vmem:[%s2961_s14] sm:$0xff] %v2366_v63  ;;  %v1318_v5 = vmul.f32 %v2953_v48, %v1135_v0  ;;  %v2368_v6 = vpack.c.bf16 %v1135_v0, %v1133_v59  ;;  %v2969_v7 = vadd.f32 %v1315_v62, %v1314_v58 }
 0x1e2   : > { %v1406_v8 = vmul.f32 %v1317_v3, %v1133_v59 }
 0x1e3   : > { %v1407_v9 = vmul.f32 %v1318_v5, %v1135_v0  ;;  %1560 = vst [vmem:[%s2961_s14 + $0xc] sm:$0xff] %v2368_v6  ;;  %v1065_v10 = vpop.f32.mrb[4].mxu0  ;;  %v2449_v11 = vpop.f32.mrb[28].mxu1  ;;  %v2972_v12 = vadd.f32 %v1318_v5, %v1317_v3  ;;  %v2974_v13 = vadd.f32 %v1404_v4, %v1403_v2  ;;  %v3000_v4 = vrot.slane %v2943_v42, %v1309_v49 }
 0x1e4   : > { %v1139_v17 = vadd.f32 %v2907_v16, %v1065_v10  ;;  %v1067_v27 = vpop.f32.mrb[5].mxu0  ;;  %v2450_v14 = vpop.f32.mrb[29].mxu1 }
 0x1e5   : > { %v1141_v15 = vadd.f32 %v2909_v18, %v1067_v27  ;;  %v1069_v25 = vpop.f32.mrb[6].mxu0  ;;  %v2978_v26 = vadd.f32 %v2450_v14, %v2449_v11  ;;  %v2452_v29 = vpop.f32.mrb[30].mxu1  ;;  %v2980_v30 = vadd.f32 %v1407_v9, %v1406_v8 }
 0x1e6   : > { %v1320_v32 = vmul.f32 %v2949_v45, %v1139_v17  ;;  %v1143_v35 = vadd.f32 %v2911_v31, %v1069_v25  ;;  %v1071_v36 = vpop.f32.mrb[7].mxu0  ;;  %v2453_v39 = vpop.f32.mrb[31].mxu1 }
 0x1e7   : > { %v1321_v16 = vmul.f32 %v2953_v48, %v1141_v15  ;;  %v2370_v40 = vpack.c.bf16 %v1141_v15, %v1139_v17  ;;  %v1145_v41 = vadd.f32 %v2913_v19, %v1071_v36  ;;  %v2986_v18 = vadd.f32 %v2453_v39, %v2452_v29 }
 0x1e8   : > { %v1409_v43 = vmul.f32 %v1320_v32, %v1139_v17  ;;  %v1323_v46 = vmul.f32 %v2949_v45, %v1143_v35 }
 0x1e9   : > { %v1410_v50 = vmul.f32 %v1321_v16, %v1141_v15  ;;  %1562 = vst [vmem:[%s2961_s14 + $0x18] sm:$0xff] %v2370_v40  ;;  %v1324_v51 = vmul.f32 %v2953_v48, %v1145_v41  ;;  %v2372_v31 = vpack.c.bf16 %v1145_v41, %v1143_v35  ;;  %v1354_v52 = vadd.f32 %v1321_v16, %v1320_v32 }
 0x1ea   : > { %v1412_v53 = vmul.f32 %v1323_v46, %v1143_v35 }
 0x1eb   : > { %v1413_v54 = vmul.f32 %v1324_v51, %v1145_v41  ;;  %1564 = vst [vmem:[%s2961_s14 + $0x24] sm:$0xff] %v2372_v31  ;;  %v1075_v57 = vpop.f32.mrb[8].mxu0  ;;  %v2467_v58 = vpop.f32.mrb[32].mxu1  ;;  %v1435_v59 = vadd.f32 %v1410_v50, %v1409_v43  ;;  %v1358_v19 = vadd.f32 %v1324_v51, %v1323_v46 }
 0x1ec   : > { %v1149_v60 = vadd.f32 %v2915_v38, %v1075_v57  ;;  %v1275_v61 = vadd.f32 %v2467_v58, %v2937_v37  ;;  %v1077_v62 = vpop.f32.mrb[9].mxu0  ;;  %v1266_v63 = vpop.f32.mrb[33].mxu1 }
 0x1ed   : > { %v1151_v34 = vadd.f32 %v2917_v20, %v1077_v62  ;;  %v2997_v0 = vadd.f32 %v2931_v28, %v1266_v63  ;;  %v1079_v2 = vpop.f32.mrb[10].mxu0  ;;  %v2468_v3 = vpop.f32.mrb[34].mxu1  ;;  %v3002_v5 = vadd.f32 %v1413_v54, %v1412_v53 }
 0x1ee   : > { %v3005_v6 = vmul.f32 %v2949_v45, %v1149_v60  ;;  %v2371_v38 = vpack.c.bf16 %v1275_v61, %v1275_v61  ;;  %v1153_v37 = vadd.f32 %v2919_v47, %v1079_v2  ;;  %v3009_v20 = vadd.f32 %v2468_v3, %v2946_v44  ;;  %v1081_v28 = vpop.f32.mrb[11].mxu0  ;;  %v1269_v8 = vpop.f32.mrb[35].mxu1 }
 0x1ef   : > { %v3012_v9 = vmul.f32 %v2953_v48, %v1151_v34  ;;  %v2374_v42 = vpack.c.bf16 %v1151_v34, %v1149_v60  ;;  %v2367_v10 = vpack.c.bf16 %v2997_v0, %v2997_v0  ;;  %v1155_v11 = vadd.f32 %v2921_v21, %v1081_v28 }
 0x1f0   : > { %v3018_v17 = vmul.f32 %v3005_v6, %v1149_v60  ;;  %1563 = vst [vmem:[%s2961_s14 + $0x20] sm:$0xf] %v2371_v38  ;;  %v3022_v47 = vmul.f32 %v2949_v45, %v1153_v37  ;;  %v2373_v44 = vpack.c.bf16 %v3009_v20, %v3009_v20  ;;  %v3027_v27 = vadd.f32 %v2933_v33, %v1269_v8 }
 0x1f1   : > { %v3030_v14 = vmul.f32 %v3012_v9, %v1151_v34  ;;  %1566 = vst [vmem:[%s2961_s14 + $0x30] sm:$0xff] %v2374_v42  ;;  %1559 = vst [vmem:[%s2961_s14 + $0x8] sm:$0xf] %v2367_v10  ;;  %v3035_v21 = vmul.f32 %v2953_v48, %v1155_v11  ;;  %v2376_v15 = vpack.c.bf16 %v1155_v11, %v1153_v37 }
 0x1f2   : > { %v1322_v25 = vmul.f32 %v3000_v4, %v1275_v61  ;;  %v3039_v29 = vmul.f32 %v3022_v47, %v1153_v37  ;;  %1565 = vst [vmem:[%s2961_s14 + $0x2c] sm:$0xf] %v2373_v44  ;;  %v2369_v33 = vpack.c.bf16 %v3027_v27, %v3027_v27  ;;  %v1316_v32 = vmul.f32 %v3000_v4, %v2997_v0 }
 0x1f3   : > { %v1319_v35 = vmul.f32 %v3000_v4, %v3027_v27  ;;  %v3049_v36 = vmul.f32 %v3035_v21, %v1155_v11  ;;  %1568 = vst [vmem:[%s2961_s14 + $0x3c] sm:$0xff] %v2376_v15  ;;  %v1085_v16 = vpop.f32.mrb[12].mxu0  ;;  %v2471_v40 = vpop.f32.mrb[36].mxu1  ;;  %v1325_v43 = vmul.f32 %v3000_v4, %v3009_v20  ;;  %v1362_v11 = vadd.f32 %v3012_v9, %v3005_v6 }
 0x1f4   : > { %v1355_v39 = vadd.f32 %v1354_v52, %v1322_v25  ;;  %v1411_v41 = vmul.f32 %v1322_v25, %v1275_v61  ;;  %1561 = vst [vmem:[%s2961_s14 + $0x14] sm:$0xf] %v2369_v33  ;;  %v1159_v46 = vadd.f32 %v2923_v55, %v1085_v16  ;;  %v1291_v49 = vadd.f32 %v2471_v40, %v2978_v26  ;;  %v1282_v50 = vpop.f32.mrb[37].mxu1  ;;  %v1087_v51 = vpop.f32.mrb[13].mxu0 }
 0x1f5   : > { %v1347_v31 = vadd.f32 %v2969_v7, %v1316_v32  ;;  %v1351_v53 = vadd.f32 %v2972_v12, %v1319_v35  ;;  %v1283_v52 = vadd.f32 %v2955_v56, %v1282_v50  ;;  %v1161_v57 = vadd.f32 %v2925_v22, %v1087_v51  ;;  %v1089_v58 = vpop.f32.mrb[14].mxu0  ;;  %v2472_v60 = vpop.f32.mrb[38].mxu1  ;;  %v1338_v51 = vld [vmem:[#allocation3] sm:$0xff] }
 0x1f6   : > { %1356 = vadd.xlane.f32.xlu0 %v1355_v39  ;;  %v1436_v54 = vadd.f32 %v1435_v59, %v1411_v41  ;;  %v1359_v61 = vadd.f32 %v1358_v19, %v1325_v43  ;;  %v1332_v55 = vmul.f32 %v2949_v45, %v1159_v46  ;;  %v2379_v26 = vpack.c.bf16 %v1291_v49, %v1291_v49  ;;  %v1285_v12 = vpop.f32.mrb[39].mxu1  ;;  %v1091_v63 = vpop.f32.mrb[15].mxu0 }
 0x1f7   : > { %v1163_v62 = vadd.f32 %v2927_v23, %v1089_v58  ;;  %v1294_v7 = vadd.f32 %v2472_v60, %v2986_v18  ;;  %v2375_v34 = vpack.c.bf16 %v1283_v52, %v1283_v52  ;;  %v1333_v56 = vmul.f32 %v2953_v48, %v1161_v57  ;;  %v1341_v58 = vld [vmem:[#allocation3 + $0x18] sm:$0xff] }
 0x1f8   : > { %1437 = vadd.xlane.f32.xlu1 %v1436_v54  ;;  %v2378_v22 = vpack.c.bf16 %v1161_v57, %v1159_v46  ;;  %v1286_v59 = vadd.f32 %v2964_v1, %v1285_v12  ;;  %v1421_v19 = vmul.f32 %v1332_v55, %v1159_v46  ;;  %1571 = vst [vmem:[%s2961_s14 + $0x50] sm:$0xf] %v2379_v26 }
 0x1f9   : > { %v1335_v2 = vmul.f32 %v2949_v45, %v1163_v62  ;;  %v2381_v3 = vpack.c.bf16 %v1294_v7, %v1294_v7  ;;  %v1165_v23 = vadd.f32 %v2929_v24, %v1091_v63  ;;  %1567 = vst [vmem:[%s2961_s14 + $0x38] sm:$0xf] %v2375_v34  ;;  %v1422_v18 = vmul.f32 %v1333_v56, %v1161_v57  ;;  %v1342_v34 = vld [vmem:[#allocation3 + $0x20] sm:$0xff] }
 0x1fa   : > { %1570 = vst [vmem:[%s2961_s14 + $0x48] sm:$0xff] %v2378_v22  ;;  %v2377_v38 = vpack.c.bf16 %v1286_v59, %v1286_v59  ;;  %1348 = vadd.xlane.f32.xlu0 %v1347_v31  ;;  %v1405_v37 = vmul.f32 %v1316_v32, %v2997_v0  ;;  %v1414_v28 = vmul.f32 %v1325_v43, %v3009_v20 }
 0x1fb   : > { %v1424_v8 = vmul.f32 %v1335_v2, %v1163_v62  ;;  %1573 = vst [vmem:[%s2961_s14 + $0x5c] sm:$0xf] %v2381_v3  ;;  %v1336_v1 = vmul.f32 %v2953_v48, %v1165_v23  ;;  %v2380_v42 = vpack.c.bf16 %v1165_v23, %v1163_v62  ;;  %v1328_v45 = vmul.f32 %v3000_v4, %v1283_v52  ;;  %v1344_v3 = vld [vmem:[#allocation3 + $0x30] sm:$0xff] }
 0x1fc   : > { %1569 = vst [vmem:[%s2961_s14 + $0x44] sm:$0xf] %v2377_v38  ;;  %1352 = vadd.xlane.f32.xlu1 %v1351_v53  ;;  %v1428_v24 = vadd.f32 %v2974_v13, %v1405_v37  ;;  %v1440_v10 = vadd.f32 %v3002_v5, %v1414_v28  ;;  %v1408_v0 = vmul.f32 %v1319_v35, %v3027_v27  ;;  %v1343_v38 = vld [vmem:[#allocation3 + $0x28] sm:$0xff] }
 0x1fd   : > { %v1425_v44 = vmul.f32 %v1336_v1, %v1165_v23  ;;  %1572 = vst [vmem:[%s2961_s14 + $0x54] sm:$0xff] %v2380_v42  ;;  %v1334_v20 = vmul.f32 %v3000_v4, %v1291_v49  ;;  %v1370_v15 = vadd.f32 %v1333_v56, %v1332_v55  ;;  %v1331_v48 = vmul.f32 %v3000_v4, %v1286_v59  ;;  %v1395_v55 = vld [vmem:[#allocation4] sm:$0xff] }
 0x1fe   : > { %1360 = vadd.xlane.f32.xlu0 %v1359_v61  ;;  %v1363_v25 = vadd.f32 %v1362_v11, %v1328_v45  ;;  %v1432_v33 = vadd.f32 %v2980_v30, %v1408_v0  ;;  %v1366_v13 = vadd.f32 %v3035_v21, %v3022_v47  ;;  %v1417_v5 = vmul.f32 %v1328_v45, %v1283_v52  ;;  %v1339_v52 = vld [vmem:[#allocation3 + $0x8] sm:$0xff]  ;;  %v1345_v45 = vld [vmem:[#allocation3 + $0x38] sm:$0xff]  ;;  %v1401_v11 = vld [vmem:[#allocation4 + $0x30] sm:$0xff] }
 0x1ff   : > { %v1371_v32 = vadd.f32 %v1370_v15, %v1334_v20  ;;  %v1443_v6 = vadd.f32 %v3030_v14, %v3018_v17  ;;  %v1337_v9 = vmul.f32 %v3000_v4, %v1294_v7  ;;  %v1374_v27 = vadd.f32 %v1336_v1, %v1335_v2  ;;  %v1340_v4 = vld [vmem:[#allocation3 + $0x10] sm:$0xff] }
 0x200   : > { %1429 = vadd.xlane.f32.xlu1 %v1428_v24  ;;  %v1367_v35 = vadd.f32 %v1366_v13, %v1331_v48  ;;  %v1423_v39 = vmul.f32 %v1334_v20, %v1291_v49  ;;  %v1451_v16 = vadd.f32 %v1422_v18, %v1421_v19  ;;  %v1420_v40 = vmul.f32 %v1331_v48, %v1286_v59  ;;  %v1397_v49 = vld [vmem:[#allocation4 + $0x10] sm:$0xff]  ;;  %v1396_v59 = vld [vmem:[#allocation4 + $0x8] sm:$0xff] }
 0x201   : > { %v1444_v41 = vadd.f32 %v1443_v6, %v1417_v5  ;;  %v1375_v43 = vadd.f32 %v1374_v27, %v1337_v9  ;;  %v1447_v30 = vadd.f32 %v3049_v36, %v3039_v29  ;;  %v1426_v21 = vmul.f32 %v1337_v9, %v1294_v7  ;;  %v1398_v7 = vld [vmem:[#allocation4 + $0x18] sm:$0xff]  ;;  %v1400_v20 = vld [vmem:[#allocation4 + $0x28] sm:$0xff] }
 0x202   : > { %1441 = vadd.xlane.f32.xlu0 %v1440_v10  ;;  %v1452_v47 = vadd.f32 %v1451_v16, %v1423_v39  ;;  %v1455_v46 = vadd.f32 %v1425_v44, %v1424_v8  ;;  %v1399_v8 = vld [vmem:[#allocation4 + $0x20] sm:$0xff] }
 0x203   : > { %v1448_v50 = vadd.f32 %v1447_v30, %v1420_v40 }
 0x204   : > { %1364 = vadd.xlane.f32.xlu1 %v1363_v25  ;;  %v1456_v17 = vadd.f32 %v1455_v46, %v1426_v21 }
 0x206   : > { %1433 = vadd.xlane.f32.xlu0 %v1432_v33  ;;  %v1402_v33 = vld [vmem:[#allocation4 + $0x38] sm:$0xff] }
 0x208   : > { %1372 = vadd.xlane.f32.xlu1 %v1371_v32 }
 0x20a   : > { %1368 = vadd.xlane.f32.xlu0 %v1367_v35 }
 0x20c   : > { %1445 = vadd.xlane.f32.xlu1 %v1444_v41 }
 0x20e   : > { %1376 = vadd.xlane.f32.xlu0 %v1375_v43 }
 0x210   : > { %1453 = vadd.xlane.f32.xlu1 %v1452_v47 }
 0x212   : > { %1449 = vadd.xlane.f32.xlu0 %v1448_v50 }
 0x216   : > { %1457 = vadd.xlane.f32.xlu0 %v1456_v17 }
 0x283   : > { %v1357_v14 = vpop.xlane.xlu0 %1356 }
 0x284   : > { %v1380_v29 = vadd.f32 %v1357_v14, %v1340_v4 }
 0x285   : > { %v1438_v36 = vpop.xlane.xlu1 %1437 }
 0x286   : > { %1389 = vst.msk [vmem:[#allocation3 + $0x10] sm:$0xff] %vm1386_vm10, %v1380_v29  ;;  %v1461_v31 = vadd.f32 %v1438_v36, %v1397_v49 }
 0x287   : > { %v1349_v53 = vpop.xlane.xlu0 %1348 }
 0x288   : > { %1469 = vst.msk [vmem:[#allocation4 + $0x10] sm:$0xff] %vm1386_vm10, %v1461_v31  ;;  %v1378_v54 = vadd.f32 %v1349_v53, %v1338_v51 }
 0x289   : > { %v1353_v57 = vpop.xlane.xlu1 %1352 }
 0x28a   : > { %1387 = vst.msk [vmem:[#allocation3] sm:$0xff] %vm1386_vm10, %v1378_v54  ;;  %v1379_v60 = vadd.f32 %v1353_v57, %v1339_v52 }
 0x28b   : > { %v1361_v61 = vpop.xlane.xlu0 %1360 }
 0x28c   : > { %1388 = vst.msk [vmem:[#allocation3 + $0x8] sm:$0xff] %vm1386_vm10, %v1379_v60  ;;  %v1381_v26 = vadd.f32 %v1361_v61, %v1341_v58 }
 0x28d   : > { %v1430_v62 = vpop.xlane.xlu1 %1429 }
 0x28e   : > { %1390 = vst.msk [vmem:[#allocation3 + $0x18] sm:$0xff] %vm1386_vm10, %v1381_v26  ;;  %v1459_v12 = vadd.f32 %v1430_v62, %v1395_v55 }
 0x28f   : > { %v1442_v63 = vpop.xlane.xlu0 %1441 }
 0x290   : > { %1467 = vst.msk [vmem:[#allocation4] sm:$0xff] %vm1386_vm10, %v1459_v12  ;;  %v1462_v56 = vadd.f32 %v1442_v63, %v1398_v7 }
 0x291   : > { %v1365_v22 = vpop.xlane.xlu1 %1364 }
 0x292   : > { %1470 = vst.msk [vmem:[#allocation4 + $0x18] sm:$0xff] %vm1386_vm10, %v1462_v56  ;;  %v1382_v19 = vadd.f32 %v1365_v22, %v1342_v34 }
 0x293   : > { %v1434_v2 = vpop.xlane.xlu0 %1433 }
 0x294   : > { %1391 = vst.msk [vmem:[#allocation3 + $0x20] sm:$0xff] %vm1386_vm10, %v1382_v19  ;;  %v1460_v23 = vadd.f32 %v1434_v2, %v1396_v59 }
 0x295   : > { %v1373_v18 = vpop.xlane.xlu1 %1372 }
 0x296   : > { %1468 = vst.msk [vmem:[#allocation4 + $0x8] sm:$0xff] %vm1386_vm10, %v1460_v23  ;;  %v1384_v37 = vadd.f32 %v1373_v18, %v1344_v3 }
 0x297   : > { %v1369_v28 = vpop.xlane.xlu0 %1368 }
 0x298   : > { %1393 = vst.msk [vmem:[#allocation3 + $0x30] sm:$0xff] %vm1386_vm10, %v1384_v37  ;;  %v1383_v1 = vadd.f32 %v1369_v28, %v1343_v38 }
 0x299   : > { %v1446_v42 = vpop.xlane.xlu1 %1445 }
 0x29a   : > { %1392 = vst.msk [vmem:[#allocation3 + $0x28] sm:$0xff] %vm1386_vm10, %v1383_v1  ;;  %v1463_v24 = vadd.f32 %v1446_v42, %v1399_v8 }
 0x29b   : > { %v1377_v10 = vpop.xlane.xlu0 %1376 }
 0x29c   : > { %1471 = vst.msk [vmem:[#allocation4 + $0x20] sm:$0xff] %vm1386_vm10, %v1463_v24  ;;  %v1385_v0 = vadd.f32 %v1377_v10, %v1345_v45 }
 0x29d   : > { %v1454_v44 = vpop.xlane.xlu1 %1453 }
 0x29e   : > { %1394 = vst.msk [vmem:[#allocation3 + $0x38] sm:$0xff] %vm1386_vm10, %v1385_v0  ;;  %v1465_v15 = vadd.f32 %v1454_v44, %v1401_v11 }
 0x29f   : > { %v1450_v48 = vpop.xlane.xlu0 %1449 }
 0x2a0   : > { %1473 = vst.msk [vmem:[#allocation4 + $0x30] sm:$0xff] %vm1386_vm10, %v1465_v15  ;;  %v1464_v25 = vadd.f32 %v1450_v48, %v1400_v20  ;;  %1577 = sbr.rel (%p2330_p5) target bundleno = 883 (0x373), region = 48 }
 0x2a2   : > { %1472 = vst.msk [vmem:[#allocation4 + $0x28] sm:$0xff] %vm1386_vm10, %v1464_v25 }
 0x2a3   : > { %v1458_v13 = vpop.xlane.xlu0 %1457 }
 0x2a4   : > { %v1466_v5 = vadd.f32 %v1458_v13, %v1402_v33 }
 0x2a6   : > { %1474 = vst.msk [vmem:[#allocation4 + $0x38] sm:$0xff] %vm1386_vm10, %v1466_v5 }
 0x2a7   : > { %v1580_v32 = vld [vmem:[#allocation3 + $0x10] sm:$0xff]  ;;  %v2574_v9 = vmov 0   ;;  %v1578_v39 = vld [vmem:[#allocation3] sm:$0xff]  ;;  %v1581_v43 = vld [vmem:[#allocation3 + $0x18] sm:$0xff] }
 0x2a8   : > { %v1596_v6 = vld [vmem:[#allocation4 + $0x10] sm:$0xff]  ;;  %2539 = vset.pattern.permute.xlu1 %v2574_v9  ;;  %2538 = vset.pattern.permute.xlu0 %v2574_v9  ;;  %v3110_v27 = vmul.f32 0.0078125, %v1580_v32  ;;  %v1594_v16 = vld [vmem:[#allocation4] sm:$0xff]  ;;  %v3112_v40 = vmul.f32 0.0078125, %v1578_v39  ;;  %v1597_v30 = vld [vmem:[#allocation4 + $0x18] sm:$0xff]  ;;  %v3116_v21 = vmul.f32 0.0078125, %v1581_v43 }
 0x2a9   : > { %v1604_v35 = vmul.f32 0.0078125, %v1596_v6  ;;  %v1602_v41 = vmul.f32 0.0078125, %v1594_v16  ;;  %v1605_v46 = vmul.f32 0.0078125, %v1597_v30  ;;  %v1579_v50 = vld [vmem:[#allocation3 + $0x8] sm:$0xff]  ;;  %v1582_v54 = vld [vmem:[#allocation3 + $0x20] sm:$0xff]  ;;  %v1585_v26 = vld [vmem:[#allocation3 + $0x38] sm:$0xff] }
 0x2aa   : > { %v1612_v47 = vmul.f32 %v3110_v27, %v3110_v27  ;;  %v1595_v17 = vld [vmem:[#allocation4 + $0x8] sm:$0xff]  ;;  %v1610_v4 = vmul.f32 %v3112_v40, %v3112_v40  ;;  %v3120_v14 = vmul.f32 0.0078125, %v1579_v50  ;;  %v1613_v31 = vmul.f32 %v3116_v21, %v3116_v21  ;;  %v1598_v57 = vld [vmem:[#allocation4 + $0x20] sm:$0xff]  ;;  %v1584_v56 = vld [vmem:[#allocation3 + $0x30] sm:$0xff] }
 0x2ab   : > { %v1603_v49 = vmul.f32 0.0078125, %v1595_v17  ;;  %v1583_v29 = vld [vmem:[#allocation3 + $0x28] sm:$0xff]  ;;  %v3128_v61 = vmul.f32 0.0078125, %v1582_v54  ;;  %v1606_v55 = vmul.f32 0.0078125, %v1598_v57  ;;  %v3132_v34 = vmul.f32 0.0078125, %v1585_v26  ;;  %v1600_v37 = vld [vmem:[#allocation4 + $0x30] sm:$0xff] }
 0x2ac   : > { %v1599_v36 = vld [vmem:[#allocation4 + $0x28] sm:$0xff]  ;;  %v1620_v51 = vsub.f32 %v1604_v35, %v1612_v47  ;;  %v3124_v53 = vmul.f32 0.0078125, %v1583_v29  ;;  %v1618_v58 = vsub.f32 %v1602_v41, %v1610_v4  ;;  %v1611_v60 = vmul.f32 %v3120_v14, %v3120_v14  ;;  %v1636_v32 = vld [vmem:[%s3607_s2 + $0x10] sm:$0xff]  ;;  %v1634_v9 = vld [vmem:[%s3607_s2] sm:$0xff] }
 0x2ad   : > { %v1607_v52 = vmul.f32 0.0078125, %v1599_v36  ;;  %v1601_v62 = vld [vmem:[#allocation4 + $0x38] sm:$0xff]  ;;  %v1621_v12 = vsub.f32 %v1605_v46, %v1613_v31  ;;  %v1614_v19 = vmul.f32 %v3128_v61, %v3128_v61  ;;  %v1617_v38 = vmul.f32 %v3132_v34, %v3132_v34  ;;  %v1635_v43 = vld [vmem:[%s3607_s2 + $0x8] sm:$0xff]  ;;  %v1638_v36 = vld [vmem:[%s3607_s2 + $0x20] sm:$0xff] }
 0x2ae   : > { %v1628_v7 = vmax.f32 %v1620_v51, 0.0  ;;  %v1615_v63 = vmul.f32 %v3124_v53, %v3124_v53  ;;  %v1626_v22 = vmax.f32 %v1618_v58, 0.0  ;;  %v1619_v59 = vsub.f32 %v1603_v49, %v1611_v60  ;;  %v1637_v39 = vld [vmem:[%s3607_s2 + $0x18] sm:$0xff]  ;;  %v1639_v49 = vld [vmem:[%s3607_s2 + $0x28] sm:$0xff]  ;;  %v1640_v57 = vld [vmem:[%s3607_s2 + $0x30] sm:$0xff] }
 0x2af   : > { %v1609_v2 = vmul.f32 0.0078125, %v1601_v62  ;;  %v1629_v23 = vmax.f32 %v1621_v12, 0.0  ;;  %v1622_v1 = vsub.f32 %v1606_v55, %v1614_v19  ;;  %v3138_v42 = vmul.f32 0.0078125, %v1584_v56  ;;  %v1641_v54 = vld [vmem:[%s3607_s2 + $0x38] sm:$0xff]  ;;  %v1666_v12 = vld [vmem:[%s3608_s3] sm:$0xff] }
 0x2b0   : > { %v1644_v3 = vadd.f32 1e-05, %v1628_v7  ;;  %v1623_v18 = vsub.f32 %v1607_v52, %v1615_v63  ;;  %v1642_v28 = vadd.f32 1e-05, %v1626_v22  ;;  %v1627_v8 = vmax.f32 %v1619_v59, 0.0  ;;  %v1667_v7 = vld [vmem:[%s3608_s3 + $0x8] sm:$0xff] }
 0x2b1   : > { %v1645_v45 = vadd.f32 1e-05, %v1629_v23  ;;  %v1625_v10 = vsub.f32 %v1609_v2, %v1617_v38  ;;  %v1630_v0 = vmax.f32 %v1622_v1, 0.0  ;;  %v1608_v44 = vmul.f32 0.0078125, %v1600_v37  ;;  %v1668_v59 = vld [vmem:[%s3608_s3 + $0x10] sm:$0xff]  ;;  %v1670_v23 = vld [vmem:[%s3608_s3 + $0x20] sm:$0xff] }
 0x2b2   : > { %2540 = vrsqrt.f32 %v1644_v3  ;;  %v1631_v24 = vmax.f32 %v1623_v18, 0.0  ;;  %v1643_v11 = vadd.f32 1e-05, %v1627_v8  ;;  %v1616_v48 = vmul.f32 %v3138_v42, %v3138_v42 }
 0x2b3   : > { %2542 = vrsqrt.f32 %v1642_v28  ;;  %v1633_v15 = vmax.f32 %v1625_v10, 0.0  ;;  %v1646_v25 = vadd.f32 1e-05, %v1630_v0  ;;  %v3221_v10 = vld [vmem:[%s3610_s5] sm:$0xff] }
 0x2b4   : > { %2544 = vrsqrt.f32 %v1645_v45  ;;  %v1647_v20 = vadd.f32 1e-05, %v1631_v24  ;;  %v1624_v13 = vsub.f32 %v1608_v44, %v1616_v48  ;;  %v3206_v45 = vld [vmem:[%s3610_s5 + $0x8] ss:$24 sps:$4 sm:$0xff]  }
 0x2b5   : > { %2546 = vrsqrt.f32 %v1643_v11  ;;  %v1649_v33 = vadd.f32 1e-05, %v1633_v15  ;;  %v3216_v24 = vld [vmem:[%s3610_s5 + $0x68] ss:$24 sps:$4 sm:$0xff]  }
 0x2b6   : > { %2548 = vrsqrt.f32 %v1647_v20  ;;  %v1632_v5 = vmax.f32 %v1624_v13, 0.0  ;;  %v3226_v11 = vld [vmem:[%s3610_s5 + $0x60] sm:$0xff]  ;;  %v1730_v20 = vunpack.c.h.bf16 %v3206_v45 }
 0x2b7   : > { %2550 = vrsqrt.f32 %v1646_v25  ;;  %v3235_v48 = vld [vmem:[%s3610_s5 + $0x24] sm:$0xff]  ;;  %v3240_v25 = vld [vmem:[%s3610_s5 + $0x14] ss:$24 sps:$4 sm:$0xff]  }
 0x2b8   : > { %2552 = vrsqrt.f32 %v1649_v33  ;;  %v1648_v6 = vadd.f32 1e-05, %v1632_v5  ;;  %v3245_v33 = vld [vmem:[%s3610_s5 + $0x84] sm:$0xff]  ;;  %v1754_v5 = vunpack.c.h.bf16 %v3216_v24 }
 0x2ba   : > { %2554 = vrsqrt.f32 %v1648_v6  ;;  %v1723_v6 = vunpack.c.h.bf16 %v3221_v10 }
 0x2bc   : > { %v2541_v35 = vpop.eup %2540 }
 0x2bd   : > { %v2543_v16 = vpop.eup %2542  ;;  %v1660_v41 = vmul.f32 %v2541_v35, %v1636_v32  ;;  %v1722_v32 = vunpack.c.l.bf16 %v3221_v10  ;;  %v3259_v35 = vld [vmem:[%s3610_s5 + $0xc] sm:$0xff] }
 0x2be   : > { %v2545_v30 = vpop.eup %2544  ;;  %v1658_v47 = vmul.f32 %v2543_v16, %v1634_v9  ;;  %v3254_v9 = vld [vmem:[%s3610_s5 + $0x74] ss:$24 sps:$4 sm:$0xff]   ;;  %v1746_v16 = vunpack.c.l.bf16 %v3226_v11 }
 0x2bf   : > { %v2547_v46 = vpop.eup %2546  ;;  %1782 = vperm.xlu1 %2539, %v1660_v41   ;;  %v1661_v50 = vmul.f32 %v2545_v30, %v1637_v39  ;;  %v1676_v22 = vmul.f32 %v1660_v41, %v3110_v27  ;;  %v1671_v27 = vld [vmem:[%s3608_s3 + $0x28] sm:$0xff]  ;;  %v1724_v39 = vunpack.c.l.bf16 %v3206_v45  ;;  %v1747_v41 = vunpack.c.h.bf16 %v3226_v11 }
 0x2c0   : > { %v2549_v17 = vpop.eup %2548  ;;  %1772 = vperm.xlu0 %2538, %v1658_v47   ;;  %v1659_v4 = vmul.f32 %v2547_v46, %v1635_v43  ;;  %v1674_v26 = vmul.f32 %v1658_v47, %v3112_v40  ;;  %v1669_v40 = vld [vmem:[%s3608_s3 + $0x18] sm:$0xff]  ;;  %v1748_v43 = vunpack.c.l.bf16 %v3216_v24  ;;  %v3268_v30 = vld [vmem:[%s3610_s5 + $0x6c] sm:$0xff]  ;;  %v1731_v47 = vunpack.c.l.bf16 %v3235_v48 }
 0x2c1   : > { %v2551_v29 = vpop.eup %2550  ;;  %v1663_v51 = vmul.f32 %v2549_v17, %v1639_v49  ;;  %v1677_v56 = vmul.f32 %v1661_v50, %v3116_v21  ;;  %v1684_v3 = vsub.f32 %v1668_v59, %v1676_v22  ;;  %v3282_v49 = vld [vmem:[%s3610_s5 + $0x38] ss:$12 sps:$4 sm:$0xff]   ;;  %v3613_v45 = vunpack.c.h.bf16 %v3240_v25 }
 0x2c2   : > { %v2553_v31 = vpop.eup %2552  ;;  %v1662_v52 = vmul.f32 %v2551_v29, %v1638_v36  ;;  %v1675_v55 = vmul.f32 %v1659_v4, %v3120_v14  ;;  %v1682_v14 = vsub.f32 %v1666_v12, %v1674_v26  ;;  %v3287_v29 = vld [vmem:[%s3610_s5 + $0x9c] sm:$0xff]  ;;  %v1756_v36 = vunpack.c.h.bf16 %v3245_v33  ;;  %v3319_v22 = vld [vmem:[%s3610_s5 + $0x54] sm:$0xff] }
 0x2c3   : > { %1787 = vperm.xlu1 %2539, %v1661_v50   ;;  %v1665_v60 = vmul.f32 %v2553_v31, %v1641_v54  ;;  %v1685_v19 = vsub.f32 %v1669_v40, %v1677_v56  ;;  %v1679_v2 = vmul.f32 %v1663_v51, %v3124_v53  ;;  %v1673_v53 = vld [vmem:[%s3608_s3 + $0x38] sm:$0xff]  ;;  %v1725_v31 = vunpack.c.l.bf16 %v3259_v35 }
 0x2c4   : > { %1777 = vperm.xlu0 %2538, %v1659_v4   ;;  %v2555_v58 = vpop.eup %2554  ;;  %v1683_v63 = vsub.f32 %v1667_v7, %v1675_v55  ;;  %v1678_v21 = vmul.f32 %v1662_v52, %v3128_v61  ;;  %v1672_v61 = vld [vmem:[%s3608_s3 + $0x30] sm:$0xff]  ;;  %v3277_v4 = vld [vmem:[%s3610_s5 + $0x3c] sm:$0xff]  ;;  %v3296_v54 = vld [vmem:[%s3610_s5 + $0x98] ss:$12 sps:$4 sm:$0xff]   ;;  %v1750_v55 = vunpack.c.h.bf16 %v3268_v30  ;;  %v1751_v26 = vunpack.c.l.bf16 %v3254_v9 }
 0x2c5   : > { %v1664_v62 = vmul.f32 %v2555_v58, %v1640_v57  ;;  %v1687_v18 = vsub.f32 %v1671_v27, %v1679_v2  ;;  %v1681_v38 = vmul.f32 %v1665_v60, %v3132_v34  ;;  %v3201_v34 = vld [vmem:[%s3610_s5 + $0x18] sm:$0xff]  ;;  %v3301_v57 = vld [vmem:[%s3610_s5 + $0x30] sm:$0xff]  ;;  %v1727_v58 = vunpack.c.l.bf16 %v3240_v25 }
 0x2c6   : > { %v1686_v37 = vsub.f32 %v1670_v23, %v1678_v21  ;;  %v1728_v0 = vunpack.c.l.bf16 %v3201_v34  ;;  %v1729_v44 = vunpack.c.h.bf16 %v3201_v34  ;;  %v1737_v7 = vunpack.c.l.bf16 %v3277_v4  ;;  %v3329_v40 = vld [vmem:[%s3610_s5 + $0xb4] sm:$0xff]  ;;  %v3338_v21 = vld [vmem:[%s3610_s5 + $0xb0] ss:$12 sps:$4 sm:$0xff]   ;;  %v3343_v23 = vld [vmem:[%s3610_s5 + $0x48] sm:$0xff] }
 0x2c7   : > { %1797 = vperm.xlu1 %2539, %v1663_v51   ;;  %v1680_v28 = vmul.f32 %v1664_v62, %v3138_v42  ;;  %v1689_v8 = vsub.f32 %v1673_v53, %v1681_v38  ;;  %v3211_v42 = vld [vmem:[%s3610_s5 + $0x78] sm:$0xff]  ;;  %v1757_v51 = vunpack.c.h.bf16 %v3254_v9  ;;  %v1738_v12 = vunpack.c.h.bf16 %v3277_v4 }
 0x2c8   : > { %1792 = vperm.xlu0 %2538, %v1662_v52   ;;  %v1752_v15 = vunpack.c.l.bf16 %v3211_v42  ;;  %v1753_v13 = vunpack.c.h.bf16 %v3211_v42  ;;  %v1726_v52 = vunpack.c.h.bf16 %v3259_v35  ;;  %v1761_v56 = vunpack.c.l.bf16 %v3287_v29 }
 0x2c9   : > { %v1688_v1 = vsub.f32 %v1672_v61, %v1680_v28  ;;  %v1763_v2 = vunpack.c.h.bf16 %v3296_v54  ;;  %v1735_v27 = vunpack.c.h.bf16 %v3301_v57  ;;  %v1736_v38 = vunpack.c.l.bf16 %v3282_v49  ;;  %v3352_v61 = vld [vmem:[%s3610_s5 + $0xa8] sm:$0xff] }
 0x2ca   : > { %v1760_v28 = vunpack.c.l.bf16 %v3296_v54  ;;  %v1767_v35 = vunpack.c.l.bf16 %v3329_v40  ;;  %v1769_v4 = vunpack.c.h.bf16 %v3338_v21  ;;  %v1765_v17 = vunpack.c.h.bf16 %v3352_v61 }
 0x2cb   : > { %1807 = vperm.xlu1 %2539, %v1665_v60   ;;  %v1749_v60 = vunpack.c.l.bf16 %v3268_v30  ;;  %v1768_v30 = vunpack.c.h.bf16 %v3329_v40 }
 0x2cc   : > { %1802 = vperm.xlu0 %2538, %v1664_v62   ;;  %v3310_v62 = vld [vmem:[%s3610_s5 + $0x90] sm:$0xff] }
 0x2cd   : > { %v1759_v53 = vunpack.c.h.bf16 %v3310_v62 }
 0x2cf   : > { %1865 = vperm.xlu1 %2539, %v1683_v63   ;;  %v1739_v63 = vunpack.c.h.bf16 %v3282_v49  ;;  %v1740_v49 = vunpack.c.l.bf16 %v3343_v23 }
 0x2d0   : > { %1860 = vperm.xlu0 %2538, %v1682_v14   ;;  %v3324_v14 = vld [vmem:[%s3610_s5 + $0x50] ss:$12 sps:$4 sm:$0xff]  }
 0x2d1   : > { %v1745_v9 = vunpack.c.h.bf16 %v3324_v14 }
 0x2d3   : > { %1875 = vperm.xlu1 %2539, %v1685_v19   ;;  %v1762_v19 = vunpack.c.h.bf16 %v3287_v29  ;;  %v1741_v29 = vunpack.c.h.bf16 %v3343_v23 }
 0x2d4   : > { %1870 = vperm.xlu0 %2538, %v1684_v3   ;;  %v1734_v3 = vunpack.c.l.bf16 %v3301_v57  ;;  %v1742_v57 = vunpack.c.l.bf16 %v3324_v14 }
 0x2d7   : > { %1885 = vperm.xlu1 %2539, %v1687_v18  }
 0x2d8   : > { %1880 = vperm.xlu0 %2538, %v1686_v37   ;;  %v1758_v37 = vunpack.c.l.bf16 %v3310_v62  ;;  %v1764_v62 = vunpack.c.l.bf16 %v3352_v61 }
 0x2db   : > { %1895 = vperm.xlu1 %2539, %v1689_v8   ;;  %v1743_v8 = vunpack.c.l.bf16 %v3319_v22 }
 0x2dc   : > { %1890 = vperm.xlu0 %2538, %v1688_v1   ;;  %v1744_v1 = vunpack.c.h.bf16 %v3319_v22  ;;  %v1766_v22 = vunpack.c.l.bf16 %v3338_v21 }
 0x33e   : > { %v1783_v59 = vpop.permute.xlu1 %1782 }
 0x33f   : > { %v1773_v18 = vpop.permute.xlu0 %1772  ;;  %v3368_v50 = vmul.f32 %v1783_v59, %v1728_v0  ;;  %v3372_v40 = vmul.f32 %v1783_v59, %v1729_v44  ;;  %v3376_v23 = vmul.f32 %v1783_v59, %v1730_v20  ;;  %v3380_v14 = vmul.f32 %v1783_v59, %v1752_v15 }
 0x340   : > { %v3384_v21 = vmul.f32 %v1783_v59, %v1753_v13  ;;  %v3388_v0 = vmul.f32 %v1783_v59, %v1754_v5  ;;  %v1810_v34 = vmul.f32 %v1773_v18, %v1722_v32  ;;  %v1811_v44 = vmul.f32 %v1773_v18, %v1723_v6 }
 0x341   : > { %v1812_v20 = vmul.f32 %v1773_v18, %v1724_v39  ;;  %v1834_v15 = vmul.f32 %v1773_v18, %v1746_v16  ;;  %v1835_v42 = vmul.f32 %v1773_v18, %v1747_v41  ;;  %v1836_v13 = vmul.f32 %v1773_v18, %v1748_v43 }
 0x342   : > { %v1788_v54 = vpop.permute.xlu1 %1787  ;;  %3611 = vst [vmem:[#allocation5_spill] sm:$0xff] %v3388_v0  ;;  %v3612_v32 = vunpack.c.h.bf16 %v3235_v48  ;;  %v3614_v39 = vunpack.c.l.bf16 %v3245_v33 }
 0x343   : > { %v1778_v46 = vpop.permute.xlu0 %1777  ;;  %v3404_v5 = vmul.f32 %v1788_v54, %v1731_v47  ;;  %v3412_v6 = vmul.f32 %v1788_v54, %v3613_v45  ;;  %v3418_v41 = vmul.f32 %v1788_v54, %v1756_v36  ;;  %v3420_v24 = vmul.f32 %v1788_v54, %v1757_v51 }
 0x344   : > { %v3408_v10 = vmul.f32 %v1788_v54, %v3612_v32  ;;  %v3416_v16 = vmul.f32 %v1788_v54, %v3614_v39  ;;  %v1813_v43 = vmul.f32 %v1778_v46, %v1725_v31  ;;  %v1814_v47 = vmul.f32 %v1778_v46, %v1726_v52 }
 0x345   : > { %v1815_v18 = vmul.f32 %v1778_v46, %v1727_v58  ;;  %v1837_v48 = vmul.f32 %v1778_v46, %v1749_v60  ;;  %v1838_v61 = vmul.f32 %v1778_v46, %v1750_v55  ;;  %v1839_v32 = vmul.f32 %v1778_v46, %v1751_v26 }
 0x346   : > { %v1798_v11 = vpop.permute.xlu1 %1797 }
 0x347   : > { %v1793_v59 = vpop.permute.xlu0 %1792  ;;  %v3422_v0 = vmul.f32 %v1798_v11, %v1737_v7  ;;  %v3424_v25 = vmul.f32 %v1798_v11, %v1738_v12  ;;  %v3426_v45 = vmul.f32 %v1798_v11, %v1739_v63  ;;  %v3428_v33 = vmul.f32 %v1798_v11, %v1761_v56 }
 0x348   : > { %v3430_v39 = vmul.f32 %v1798_v11, %v1762_v19  ;;  %v3432_v36 = vmul.f32 %v1798_v11, %v1763_v2  ;;  %v3434_v51 = vmul.f32 %v1793_v59, %v1734_v3  ;;  %v3436_v31 = vmul.f32 %v1793_v59, %v1735_v27 }
 0x349   : > { %v3438_v58 = vmul.f32 %v1793_v59, %v1736_v38  ;;  %v3440_v46 = vmul.f32 %v1793_v59, %v1758_v37  ;;  %v3442_v60 = vmul.f32 %v1793_v59, %v1759_v53  ;;  %v3444_v55 = vmul.f32 %v1793_v59, %v1760_v28 }
 0x34a   : > { %v1808_v52 = vpop.permute.xlu1 %1807 }
 0x34b   : > { %v1803_v26 = vpop.permute.xlu0 %1802  ;;  %v3446_v7 = vmul.f32 %v1808_v52, %v1743_v8  ;;  %v3448_v12 = vmul.f32 %v1808_v52, %v1744_v1  ;;  %v3450_v63 = vmul.f32 %v1808_v52, %v1745_v9  ;;  %v3452_v56 = vmul.f32 %v1808_v52, %v1767_v35 }
 0x34c   : > { %v3454_v19 = vmul.f32 %v1808_v52, %v1768_v30  ;;  %v3456_v2 = vmul.f32 %v1808_v52, %v1769_v4  ;;  %v3458_v3 = vmul.f32 %v1803_v26, %v1740_v49  ;;  %v3460_v27 = vmul.f32 %v1803_v26, %v1741_v29 }
 0x34d   : > { %v3462_v37 = vmul.f32 %v1803_v26, %v1742_v57  ;;  %v3464_v53 = vmul.f32 %v1803_v26, %v1764_v62  ;;  %v3466_v28 = vmul.f32 %v1803_v26, %v1765_v17  ;;  %v3468_v8 = vmul.f32 %v1803_v26, %v1766_v22 }
 0x34e   : > { %3615 = vst [vmem:[#allocation6_spill] sm:$0xff] %v3460_v27  ;;  %v1866_v38 = vpop.permute.xlu1 %1865 }
 0x34f   : > { %3616 = vst [vmem:[#allocation7_spill] sm:$0xff] %v3462_v37  ;;  %3617 = vst [vmem:[#allocation8_spill] sm:$0xff] %v3464_v53  ;;  %v1901_v1 = vadd.f32 %v1866_v38, %v1813_v43  ;;  %v1902_v9 = vadd.f32 %v1866_v38, %v1814_v47  ;;  %v1903_v35 = vadd.f32 %v1866_v38, %v1815_v18  ;;  %v1861_v54 = vpop.permute.xlu0 %1860 }
 0x350   : > { %3618 = vst [vmem:[#allocation9_spill] sm:$0xff] %v3466_v28  ;;  %3619 = vst [vmem:[#allocation10_spill] sm:$0xff] %v3468_v8  ;;  %v1925_v30 = vadd.f32 %v1866_v38, %v1837_v48  ;;  %v1926_v4 = vadd.f32 %v1866_v38, %v1838_v61  ;;  %v1927_v11 = vadd.f32 %v1866_v38, %v1839_v32 }
 0x351   : > { %v1898_v49 = vadd.f32 %v1861_v54, %v1810_v34  ;;  %v1899_v59 = vadd.f32 %v1861_v54, %v1811_v44  ;;  %v1949_v29 = vmax.f32 %v1901_v1, 0.0  ;;  %v1950_v52 = vmax.f32 %v1902_v9, 0.0 }
 0x352   : > { %v1951_v27 = vmax.f32 %v1903_v35, 0.0  ;;  %v1973_v57 = vmax.f32 %v1925_v30, 0.0  ;;  %v1974_v37 = vmax.f32 %v1926_v4, 0.0  ;;  %v1975_v62 = vmax.f32 %v1927_v11, 0.0  ;;  %v1876_v47 = vpop.permute.xlu1 %1875 }
 0x353   : > { %v1900_v53 = vadd.f32 %v1861_v54, %v1812_v20  ;;  %v1922_v17 = vadd.f32 %v1861_v54, %v1834_v15  ;;  %v2385_v28 = vpack.c.bf16 %v1950_v52, %v1949_v29  ;;  %v1923_v26 = vadd.f32 %v1861_v54, %v1835_v42  ;;  %v1871_v38 = vpop.permute.xlu0 %1870  ;;  %v3620_v29 = vld [vmem:[#allocation5_spill] sm:$0xff] }
 0x354   : > { %v2386_v22 = vpack.c.bf16 %v1951_v27, %v1951_v27  ;;  %v1924_v43 = vadd.f32 %v1861_v54, %v1836_v13  ;;  %v2401_v18 = vpack.c.bf16 %v1974_v37, %v1973_v57  ;;  %v2402_v48 = vpack.c.bf16 %v1975_v62, %v1975_v62 }
 0x355   : > { %v1946_v8 = vmax.f32 %v1898_v49, 0.0  ;;  %v1947_v61 = vmax.f32 %v1899_v59, 0.0  ;;  %2156 = vst [vmem:[%s3610_s5 + $0xc] sm:$0xff] %v2385_v28  ;;  %v1948_v34 = vmax.f32 %v1900_v53, 0.0  ;;  %v1970_v44 = vmax.f32 %v1922_v17, 0.0 }
 0x356   : > { %2157 = vst [vmem:[%s3610_s5 + $0x14] sm:$0xf] %v2386_v22  ;;  %v1971_v20 = vmax.f32 %v1923_v26, 0.0  ;;  %v1972_v15 = vmax.f32 %v1924_v43, 0.0  ;;  %2172 = vst [vmem:[%s3610_s5 + $0x6c] sm:$0xff] %v2401_v18  ;;  %v1907_v13 = vadd.f32 %v1876_v47, %v3404_v5  ;;  %v1908_v32 = vadd.f32 %v1876_v47, %v3408_v10  ;;  %v1886_v57 = vpop.permute.xlu1 %1885 }
 0x357   : > { %2173 = vst [vmem:[%s3610_s5 + $0x74] sm:$0xf] %v2402_v48  ;;  %v2383_v42 = vpack.c.bf16 %v1947_v61, %v1946_v8  ;;  %v1909_v27 = vadd.f32 %v1876_v47, %v3412_v6  ;;  %v2384_v37 = vpack.c.bf16 %v1948_v34, %v1948_v34  ;;  %v1931_v1 = vadd.f32 %v1876_v47, %v3416_v16  ;;  %v1881_v48 = vpop.permute.xlu0 %1880 }
 0x358   : > { %v2399_v53 = vpack.c.bf16 %v1971_v20, %v1970_v44  ;;  %v2400_v28 = vpack.c.bf16 %v1972_v15, %v1972_v15  ;;  %v1932_v9 = vadd.f32 %v1876_v47, %v3418_v41  ;;  %v1933_v8 = vadd.f32 %v1876_v47, %v3420_v24 }
 0x359   : > { %2154 = vst [vmem:[%s3610_s5] sm:$0xff] %v2383_v42  ;;  %v1955_v35 = vmax.f32 %v1907_v13, 0.0  ;;  %v1956_v5 = vmax.f32 %v1908_v32, 0.0  ;;  %2155 = vst [vmem:[%s3610_s5 + $0x8] sm:$0xf] %v2384_v37  ;;  %v1957_v10 = vmax.f32 %v1909_v27, 0.0  ;;  %v1979_v6 = vmax.f32 %v1931_v1, 0.0 }
 0x35a   : > { %2170 = vst [vmem:[%s3610_s5 + $0x60] sm:$0xff] %v2399_v53  ;;  %2171 = vst [vmem:[%s3610_s5 + $0x68] sm:$0xf] %v2400_v28  ;;  %v1904_v16 = vadd.f32 %v1871_v38, %v3368_v50  ;;  %v1905_v41 = vadd.f32 %v1871_v38, %v3372_v40  ;;  %v1980_v24 = vmax.f32 %v1932_v9, 0.0  ;;  %v1981_v30 = vmax.f32 %v1933_v8, 0.0  ;;  %v1896_v9 = vpop.permute.xlu1 %1895 }
 0x35b   : > { %v2389_v54 = vpack.c.bf16 %v1956_v5, %v1955_v35  ;;  %v1906_v4 = vadd.f32 %v1871_v38, %v3376_v23  ;;  %v2390_v11 = vpack.c.bf16 %v1957_v10, %v1957_v10  ;;  %v1928_v49 = vadd.f32 %v1871_v38, %v3380_v14 }
 0x35c   : > { %v1929_v59 = vadd.f32 %v1871_v38, %v3384_v21  ;;  %v1930_v52 = vadd.f32 %v1871_v38, %v3620_v29  ;;  %v2405_v62 = vpack.c.bf16 %v1980_v24, %v1979_v6  ;;  %v2406_v17 = vpack.c.bf16 %v1981_v30, %v1981_v30 }
 0x35d   : > { %2160 = vst [vmem:[%s3610_s5 + $0x24] sm:$0xff] %v2389_v54  ;;  %v1952_v50 = vmax.f32 %v1904_v16, 0.0  ;;  %v1953_v40 = vmax.f32 %v1905_v41, 0.0  ;;  %2161 = vst [vmem:[%s3610_s5 + $0x2c] sm:$0xf] %v2390_v11  ;;  %v1954_v23 = vmax.f32 %v1906_v4, 0.0  ;;  %v1913_v43 = vadd.f32 %v1886_v57, %v3422_v0  ;;  %v1891_v41 = vpop.permute.xlu0 %1890 }
 0x35e   : > { %v1976_v22 = vmax.f32 %v1928_v49, 0.0  ;;  %v1977_v14 = vmax.f32 %v1929_v59, 0.0  ;;  %v1978_v26 = vmax.f32 %v1930_v52, 0.0  ;;  %2176 = vst [vmem:[%s3610_s5 + $0x84] sm:$0xff] %v2405_v62  ;;  %2177 = vst [vmem:[%s3610_s5 + $0x8c] sm:$0xf] %v2406_v17  ;;  %v1914_v47 = vadd.f32 %v1886_v57, %v3424_v25 }
 0x35f   : > { %v2387_v21 = vpack.c.bf16 %v1953_v40, %v1952_v50  ;;  %v1915_v18 = vadd.f32 %v1886_v57, %v3426_v45  ;;  %v2388_v61 = vpack.c.bf16 %v1954_v23, %v1954_v23  ;;  %v1937_v20 = vadd.f32 %v1886_v57, %v3428_v33  ;;  %v3622_v62 = vld [vmem:[#allocation7_spill] sm:$0xff]  ;;  %v3623_v40 = vld [vmem:[#allocation8_spill] sm:$0xff] }
 0x360   : > { %v2403_v34 = vpack.c.bf16 %v1977_v14, %v1976_v22  ;;  %v2404_v44 = vpack.c.bf16 %v1978_v26, %v1978_v26  ;;  %v1938_v15 = vadd.f32 %v1886_v57, %v3430_v39  ;;  %v1939_v42 = vadd.f32 %v1886_v57, %v3432_v36  ;;  %v3624_v22 = vld [vmem:[#allocation9_spill] sm:$0xff]  ;;  %v3625_v26 = vld [vmem:[#allocation10_spill] sm:$0xff] }
 0x361   : > { %2158 = vst [vmem:[%s3610_s5 + $0x18] sm:$0xff] %v2387_v21  ;;  %v1961_v13 = vmax.f32 %v1913_v43, 0.0  ;;  %v1962_v0 = vmax.f32 %v1914_v47, 0.0  ;;  %2159 = vst [vmem:[%s3610_s5 + $0x20] sm:$0xf] %v2388_v61  ;;  %v1963_v25 = vmax.f32 %v1915_v18, 0.0  ;;  %v1910_v33 = vadd.f32 %v1881_v48, %v3434_v51 }
 0x362   : > { %2174 = vst [vmem:[%s3610_s5 + $0x78] sm:$0xff] %v2403_v34  ;;  %2175 = vst [vmem:[%s3610_s5 + $0x80] sm:$0xf] %v2404_v44  ;;  %v1985_v45 = vmax.f32 %v1937_v20, 0.0  ;;  %v1911_v39 = vadd.f32 %v1881_v48, %v3436_v31  ;;  %v1986_v36 = vmax.f32 %v1938_v15, 0.0  ;;  %v1987_v32 = vmax.f32 %v1939_v42, 0.0 }
 0x363   : > { %v2393_v27 = vpack.c.bf16 %v1962_v0, %v1961_v13  ;;  %v1912_v38 = vadd.f32 %v1881_v48, %v3438_v58  ;;  %v2394_v37 = vpack.c.bf16 %v1963_v25, %v1963_v25  ;;  %v1934_v53 = vadd.f32 %v1881_v48, %v3440_v46 }
 0x364   : > { %v1935_v28 = vadd.f32 %v1881_v48, %v3442_v60  ;;  %v1936_v1 = vadd.f32 %v1881_v48, %v3444_v55  ;;  %v2409_v8 = vpack.c.bf16 %v1986_v36, %v1985_v45  ;;  %v2410_v35 = vpack.c.bf16 %v1987_v32, %v1987_v32 }
 0x365   : > { %2164 = vst [vmem:[%s3610_s5 + $0x3c] sm:$0xff] %v2393_v27  ;;  %v1958_v51 = vmax.f32 %v1910_v33, 0.0  ;;  %v1959_v31 = vmax.f32 %v1911_v39, 0.0  ;;  %2165 = vst [vmem:[%s3610_s5 + $0x44] sm:$0xf] %v2394_v37  ;;  %v1960_v58 = vmax.f32 %v1912_v38, 0.0  ;;  %v1919_v55 = vadd.f32 %v1896_v9, %v3446_v7 }
 0x366   : > { %v1982_v5 = vmax.f32 %v1934_v53, 0.0  ;;  %v1983_v46 = vmax.f32 %v1935_v28, 0.0  ;;  %v1984_v10 = vmax.f32 %v1936_v1, 0.0  ;;  %2180 = vst [vmem:[%s3610_s5 + $0x9c] sm:$0xff] %v2409_v8  ;;  %2181 = vst [vmem:[%s3610_s5 + $0xa4] sm:$0xf] %v2410_v35  ;;  %v1920_v6 = vadd.f32 %v1896_v9, %v3448_v12 }
 0x367   : > { %v2391_v60 = vpack.c.bf16 %v1959_v31, %v1958_v51  ;;  %v1921_v16 = vadd.f32 %v1896_v9, %v3450_v63  ;;  %v2392_v24 = vpack.c.bf16 %v1960_v58, %v1960_v58  ;;  %v1943_v4 = vadd.f32 %v1896_v9, %v3452_v56 }
 0x368   : > { %v2407_v30 = vpack.c.bf16 %v1983_v46, %v1982_v5  ;;  %v2408_v54 = vpack.c.bf16 %v1984_v10, %v1984_v10  ;;  %v1944_v11 = vadd.f32 %v1896_v9, %v3454_v19  ;;  %v1945_v49 = vadd.f32 %v1896_v9, %v3456_v2  ;;  %v3621_v19 = vld [vmem:[#allocation6_spill] sm:$0xff] }
 0x369   : > { %2162 = vst [vmem:[%s3610_s5 + $0x30] sm:$0xff] %v2391_v60  ;;  %v1967_v59 = vmax.f32 %v1919_v55, 0.0  ;;  %v1968_v7 = vmax.f32 %v1920_v6, 0.0  ;;  %2163 = vst [vmem:[%s3610_s5 + $0x38] sm:$0xf] %v2392_v24  ;;  %v1969_v12 = vmax.f32 %v1921_v16, 0.0  ;;  %v1916_v56 = vadd.f32 %v1891_v41, %v3458_v3 }
 0x36a   : > { %2178 = vst [vmem:[%s3610_s5 + $0x90] sm:$0xff] %v2407_v30  ;;  %2179 = vst [vmem:[%s3610_s5 + $0x98] sm:$0xf] %v2408_v54  ;;  %v1991_v63 = vmax.f32 %v1943_v4, 0.0  ;;  %v1917_v2 = vadd.f32 %v1891_v41, %v3621_v19  ;;  %v1992_v29 = vmax.f32 %v1944_v11, 0.0  ;;  %v1993_v52 = vmax.f32 %v1945_v49, 0.0 }
 0x36b   : > { %v2397_v57 = vpack.c.bf16 %v1968_v7, %v1967_v59  ;;  %v1918_v17 = vadd.f32 %v1891_v41, %v3622_v62  ;;  %v2398_v50 = vpack.c.bf16 %v1969_v12, %v1969_v12  ;;  %v1940_v23 = vadd.f32 %v1891_v41, %v3623_v40 }
 0x36c   : > { %v1941_v14 = vadd.f32 %v1891_v41, %v3624_v22  ;;  %v1942_v21 = vadd.f32 %v1891_v41, %v3625_v26  ;;  %v2413_v43 = vpack.c.bf16 %v1992_v29, %v1991_v63  ;;  %v2414_v47 = vpack.c.bf16 %v1993_v52, %v1993_v52 }
 0x36d   : > { %2168 = vst [vmem:[%s3610_s5 + $0x54] sm:$0xff] %v2397_v57  ;;  %v1964_v3 = vmax.f32 %v1916_v56, 0.0  ;;  %v1965_v18 = vmax.f32 %v1917_v2, 0.0  ;;  %2169 = vst [vmem:[%s3610_s5 + $0x5c] sm:$0xf] %v2398_v50  ;;  %v1966_v48 = vmax.f32 %v1918_v17, 0.0 }
 0x36e   : > { %v1988_v61 = vmax.f32 %v1940_v23, 0.0  ;;  %v1989_v34 = vmax.f32 %v1941_v14, 0.0  ;;  %v1990_v44 = vmax.f32 %v1942_v21, 0.0  ;;  %2184 = vst [vmem:[%s3610_s5 + $0xb4] sm:$0xff] %v2413_v43  ;;  %2185 = vst [vmem:[%s3610_s5 + $0xbc] sm:$0xf] %v2414_v47 }
 0x36f   : > { %v2395_v20 = vpack.c.bf16 %v1965_v18, %v1964_v3  ;;  %v2396_v15 = vpack.c.bf16 %v1966_v48, %v1966_v48 }
 0x370   : > { %v2411_v42 = vpack.c.bf16 %v1989_v34, %v1988_v61  ;;  %v2412_v13 = vpack.c.bf16 %v1990_v44, %v1990_v44 }
 0x371   : > { %2166 = vst [vmem:[%s3610_s5 + $0x48] sm:$0xff] %v2395_v20  ;;  %2167 = vst [vmem:[%s3610_s5 + $0x50] sm:$0xf] %v2396_v15 }
 0x372   : > { %2182 = vst [vmem:[%s3610_s5 + $0xa8] sm:$0xff] %v2411_v42  ;;  %2183 = vst [vmem:[%s3610_s5 + $0xb0] sm:$0xf] %v2412_v13 }
 0x373 PF: > { %s15_s18 = sadd.s32 1, %s2562_s18  }
 0x374   : > { %p12_p6 = scmp.ge.s32.totalorder %s15_s18, 4  }
 0x376   :  { %14 = sbr.rel (!%p12_p6) target bundleno = 1 (0x1), region = 75 }

// kernel: _lambda_.15
= control target key start
LH: loop header
LB: loop body
LE: loop exit
PB: predicated region body
PF: predicated region fallthrough
CT: control target
= control target key end

     0   :  { %vm47_vm0 = vcmask 523264   ;;  %s552_s0 = inlined_call_operand.vmem [shape: bf16[2,64,64], index: 0, kind: input, shape index: {}]   ;;  %s553_s1 = inlined_call_operand.vmem [shape: f32[64,10], index: 1, kind: input, shape index: {}]   ;;  %s554_s2 = inlined_call_operand.vmem [shape: f32[1,10], index: 2, kind: input, shape index: {}]   ;;  %s555_s3 = inlined_call_operand.hbm [shape: f32[2,10], index: 3, kind: output, shape index: {}]  }
   0x1   :  { %v364_v0 = vld [vmem:[%s552_s0 + $0x20] sm:$0xff]   ;;  %v365_v6 = vld [vmem:[%s552_s0 + $0x28] sm:$0xff]  }
   0x2   :  { %v330_v1 = vld [vmem:[%s552_s0] sm:$0xff]   ;;  %v347_v2 = vunpack.c.l.bf16 %v364_v0  ;;  %v348_v4 = vunpack.c.h.bf16 %v364_v0  ;;  %v361_v7 = vld [vmem:[%s552_s0 + $0x8] sm:$0xff]  }
   0x3   :  { %v331_v3 = vunpack.c.l.bf16 %v330_v1  ;;  %v332_v5 = vunpack.c.h.bf16 %v330_v1 }
   0x4   :  { %8 = vsyncpa [#allocation3], 0  ;;  %v72_v8 = vsel %vm47_vm0, %v347_v2, 0.0  ;;  %v75_v10 = vsel %vm47_vm0, %v348_v4, 0.0  ;;  %v351_v12 = vunpack.c.l.bf16 %v365_v6  ;;  %v335_v13 = vunpack.c.l.bf16 %v361_v7  ;;  %v366_v18 = vld [vmem:[%s552_s0 + $0x30] sm:$0xff]   ;;  %v367_v28 = vld [vmem:[%s552_s0 + $0x38] sm:$0xff]  }
   0x5   :  { %v48_v9 = vsel %vm47_vm0, %v331_v3, 0.0  ;;  %73 = vadd.xlane.f32.xlu1 %v72_v8  ;;  %v51_v11 = vsel %vm47_vm0, %v332_v5, 0.0  ;;  %v352_v16 = vunpack.c.h.bf16 %v365_v6  ;;  %v336_v17 = vunpack.c.h.bf16 %v361_v7  ;;  %v362_v19 = vld [vmem:[%s552_s0 + $0x10] sm:$0xff]   ;;  %v363_v29 = vld [vmem:[%s552_s0 + $0x18] sm:$0xff]   ;;  %v112_v40 = vld [vmem:[%s553_s1] sm:$0xff]  ;;  %s439_s17 = smov [#allocation2]  }
   0x6   :  { %49 = vadd.xlane.f32.xlu0 %v48_v9  ;;  %v78_v14 = vsel %vm47_vm0, %v351_v12, 0.0  ;;  %v54_v15 = vsel %vm47_vm0, %v335_v13, 0.0  ;;  %v355_v22 = vunpack.c.l.bf16 %v366_v18  ;;  %v339_v23 = vunpack.c.l.bf16 %v362_v19  ;;  %v113_v41 = vld [vmem:[%s553_s1 + $0x8] sm:$0xff]  ;;  %v114_v44 = vld [vmem:[%s553_s1 + $0x10] sm:$0xff]  ;;  %v115_v45 = vld [vmem:[%s553_s1 + $0x18] sm:$0xff]  ;;  %s319_s18 = sshll.u32 %s439_s17, 4  ;;  %s320_s18 = int_to_ptr.vmem [resolvable:$true] %s319_s18 }
   0x7   :  { %v81_v20 = vsel %vm47_vm0, %v352_v16, 0.0  ;;  %v57_v21 = vsel %vm47_vm0, %v336_v17, 0.0  ;;  %v356_v26 = vunpack.c.h.bf16 %v366_v18  ;;  %v340_v27 = vunpack.c.h.bf16 %v362_v19  ;;  %v116_v47 = vld [vmem:[%s553_s1 + $0x20] sm:$0xff]  ;;  %v117_v48 = vld [vmem:[%s553_s1 + $0x28] sm:$0xff]  ;;  %v118_v50 = vld [vmem:[%s553_s1 + $0x30] sm:$0xff]  ;;  %s412_s19 = scalar_lea.vmem %s320_s18, 32  ;;  %p417_p1 = scmp.lt.s32.totalorder %s320_s18, %s320_s18 }
   0x8   :  { %v84_v24 = vsel %vm47_vm0, %v355_v22, 0.0  ;;  %v60_v25 = vsel %vm47_vm0, %v339_v23, 0.0  ;;  %v359_v32 = vunpack.c.l.bf16 %v367_v28  ;;  %v343_v33 = vunpack.c.l.bf16 %v363_v29  ;;  %v119_v51 = vld [vmem:[%s553_s1 + $0x38] sm:$0xff]  ;;  %p413_p0 = scmp.ne.s32.totalorder %s320_s18, %s412_s19  ;;  %p418_p2 = scmp.lt.s32.totalorder %s412_s19, %s412_s19 }
   0x9   :  { %76 = vadd.xlane.f32.xlu1 %v75_v10  ;;  %v87_v30 = vsel %vm47_vm0, %v356_v26, 0.0  ;;  %v63_v31 = vsel %vm47_vm0, %v340_v27, 0.0  ;;  %v360_v36 = vunpack.c.h.bf16 %v367_v28  ;;  %v344_v37 = vunpack.c.h.bf16 %v363_v29 }
   0xa   :  { %52 = vadd.xlane.f32.xlu0 %v51_v11  ;;  %v90_v34 = vsel %vm47_vm0, %v359_v32, 0.0  ;;  %v66_v35 = vsel %vm47_vm0, %v343_v33, 0.0  ;;  %v397_v42 = vpack.c.bf16 %v113_v41, %v112_v40  ;;  %v436_v43 = vmov 0.0|0.0   ;;  %p419_p3 = por %p418_p2, %p417_p1 }
   0xb   :  { %v93_v38 = vsel %vm47_vm0, %v360_v36, 0.0  ;;  %v69_v39 = vsel %vm47_vm0, %v344_v37, 0.0  ;;  %396 = vmatprep.subr.bf16.mxu0 %v436_v43  ;;  %v400_v46 = vpack.c.bf16 %v115_v45, %v114_v44  ;;  %v403_v49 = vpack.c.bf16 %v117_v48, %v116_v47 }
   0xc   :  { %398 = vmatpush3.bf16.msra.mxu0 %v397_v42  ;;  %v406_v52 = vpack.c.bf16 %v119_v51, %v118_v50  ;;  %vm437_vm1 = vmmov 0   ;;  %v438_v53 = vmov 0.0   ;;  %v143_v58 = vlaneseq  ;;  %p420_p4 = pnand %p419_p3, %p413_p0 }
   0xd   :  { %79 = vadd.xlane.f32.xlu1 %v78_v14  ;;  %399 = vmatprep.subr.bf16.mxu0 %v436_v43  ;;  %vm154_vm2 = vcmask 130112   ;;  %vm161_vm3 = vcmask 195712   ;;  %vm168_vm4 = vcmask 261312   ;;  %vm175_vm5 = vcmask 326912  }
   0xe   :  { %55 = vadd.xlane.f32.xlu0 %v54_v15  ;;  %393 = vmatprep.mubr.msk.f32.mxu0 %vm437_vm1, %v438_v53  ;;  %v144_v61 = vand.u32 127, %v143_v58  ;;  %v146_v62 = vshrl.u32 %v143_v58, 7  ;;  %vm182_vm6 = vcmask 392512   ;;  %vm189_vm7 = vcmask 458112  }
   0xf   :  { %vm196_vm8 = vcmask 523712   ;;  %vm237_vm9 = vcmask 1041409   ;;  %vm311_vm10 = vcmask 74752  }
  0x10   :  { %401 = vmatpush3.bf16.msra.mxu0 %v400_v46  ;;  %v149_v1 = vadd.s32 4294967288, %v144_v61  ;;  %v156_v2 = vadd.s32 4294967280, %v144_v61  ;;  %v163_v3 = vadd.s32 4294967272, %v144_v61  ;;  %v170_v4 = vadd.s32 4294967264, %v144_v61 }
  0x11   :  { %82 = vadd.xlane.f32.xlu1 %v81_v20  ;;  %402 = vmatprep.subr.bf16.mxu0 %v436_v43  ;;  %v147_v5 = vsub.s32 %v144_v61, %v146_v62  ;;  %v177_v10 = vadd.s32 4294967256, %v144_v61  ;;  %v184_v12 = vadd.s32 4294967248, %v144_v61  ;;  %v191_v28 = vadd.s32 4294967240, %v144_v61 }
  0x12   :  { %58 = vadd.xlane.f32.xlu0 %v57_v21  ;;  %v152_v8 = vsub.s32 %v149_v1, %v146_v62  ;;  %v159_v9 = vsub.s32 %v156_v2, %v146_v62  ;;  %v166_v11 = vsub.s32 %v163_v3, %v146_v62  ;;  %v173_v15 = vsub.s32 %v170_v4, %v146_v62 }
  0x13   :  { %v187_v27 = vsub.s32 %v184_v12, %v146_v62  ;;  %v194_v45 = vsub.s32 %v191_v28, %v146_v62 }
  0x14   :  { %404 = vmatpush3.bf16.msra.mxu0 %v403_v49 }
  0x15   :  { %85 = vadd.xlane.f32.xlu1 %v84_v24  ;;  %405 = vmatprep.subr.bf16.mxu0 %v436_v43  ;;  %v180_v24 = vsub.s32 %v177_v10, %v146_v62 }
  0x16   :  { %61 = vadd.xlane.f32.xlu0 %v60_v25 }
  0x18   :  { %407 = vmatpush3.bf16.msra.mxu0 %v406_v52 }
  0x19   :  { %88 = vadd.xlane.f32.xlu1 %v87_v30 }
  0x1a   :  { %64 = vadd.xlane.f32.xlu0 %v63_v31 }
  0x1d   :  { %91 = vadd.xlane.f32.xlu1 %v90_v34 }
  0x1e   :  { %67 = vadd.xlane.f32.xlu0 %v66_v35 }
  0x21   :  { %94 = vadd.xlane.f32.xlu1 %v93_v38 }
  0x22   :  { %70 = vadd.xlane.f32.xlu0 %v69_v39 }
  0x92   :  { %v74_v54 = vpop.xlane.xlu1 %73 }
  0x93   :  { %v50_v55 = vpop.xlane.xlu0 %49  ;;  %v104_v16 = vmul.f32 0.015625, %v74_v54 }
  0x94   :  { %v96_v17 = vmul.f32 0.015625, %v50_v55 }
  0x95   :  { %v201_v33 = vrot.slane %v104_v16, %v147_v5 }
  0x96   :  { %v77_v56 = vpop.xlane.xlu1 %76  ;;  %v148_v34 = vrot.slane %v96_v17, %v147_v5 }
  0x97   :  { %v53_v57 = vpop.xlane.xlu0 %52  ;;  %v105_v13 = vmul.f32 0.015625, %v77_v56 }
  0x98   :  { %v97_v14 = vmul.f32 0.015625, %v53_v57 }
  0x99   :  { %v205_v29 = vrot.slane %v105_v13, %v152_v8 }
  0x9a   :  { %v80_v59 = vpop.xlane.xlu1 %79  ;;  %v153_v30 = vrot.slane %v97_v14, %v152_v8 }
  0x9b   :  { %v56_v60 = vpop.xlane.xlu0 %55  ;;  %v106_v18 = vmul.f32 0.015625, %v80_v59  ;;  %v206_v46 = vsel %vm154_vm2, %v205_v29, %v201_v33 }
  0x9c   :  { %v98_v19 = vmul.f32 0.015625, %v56_v60  ;;  %v155_v47 = vsel %vm154_vm2, %v153_v30, %v148_v34 }
  0x9d   :  { %v210_v35 = vrot.slane %v106_v18, %v159_v9 }
  0x9e   :  { %v83_v63 = vpop.xlane.xlu1 %82  ;;  %v160_v36 = vrot.slane %v98_v19, %v159_v9 }
  0x9f   :  { %v59_v0 = vpop.xlane.xlu0 %58  ;;  %v107_v22 = vmul.f32 0.015625, %v83_v63  ;;  %v211_v50 = vsel %vm161_vm3, %v210_v35, %v206_v46 }
  0xa0   :  { %v99_v23 = vmul.f32 0.015625, %v59_v0  ;;  %v162_v51 = vsel %vm161_vm3, %v160_v36, %v155_v47 }
  0xa1   :  { %v215_v39 = vrot.slane %v107_v22, %v166_v11 }
  0xa2   :  { %v86_v6 = vpop.xlane.xlu1 %85  ;;  %v167_v40 = vrot.slane %v99_v23, %v166_v11 }
  0xa3   :  { %v62_v7 = vpop.xlane.xlu0 %61  ;;  %v108_v25 = vmul.f32 0.015625, %v86_v6  ;;  %v216_v56 = vsel %vm168_vm4, %v215_v39, %v211_v50 }
  0xa4   :  { %v100_v26 = vmul.f32 0.015625, %v62_v7  ;;  %v169_v57 = vsel %vm168_vm4, %v167_v40, %v162_v51  ;;  %v327_v7 = vld [vmem:[%s554_s2] ss:$0 sm:$0xff] }
  0xa5   :  { %v220_v43 = vrot.slane %v108_v25, %v173_v15 }
  0xa6   :  { %v89_v20 = vpop.xlane.xlu1 %88  ;;  %v174_v44 = vrot.slane %v100_v26, %v173_v15 }
  0xa7   :  { %v65_v21 = vpop.xlane.xlu0 %64  ;;  %v109_v31 = vmul.f32 0.015625, %v89_v20  ;;  %v221_v60 = vsel %vm175_vm5, %v220_v43, %v216_v56 }
  0xa8   :  { %v101_v32 = vmul.f32 0.015625, %v65_v21  ;;  %v176_v61 = vsel %vm175_vm5, %v174_v44, %v169_v57 }
  0xa9   :  { %v225_v48 = vrot.slane %v109_v31, %v180_v24 }
  0xaa   :  { %v92_v37 = vpop.xlane.xlu1 %91  ;;  %v181_v49 = vrot.slane %v101_v32, %v180_v24 }
  0xab   :  { %v68_v38 = vpop.xlane.xlu0 %67  ;;  %v110_v41 = vmul.f32 0.015625, %v92_v37  ;;  %v226_v62 = vsel %vm182_vm6, %v225_v48, %v221_v60 }
  0xac   :  { %v102_v42 = vmul.f32 0.015625, %v68_v38  ;;  %v183_v63 = vsel %vm182_vm6, %v181_v49, %v176_v61 }
  0xad   :  { %v230_v52 = vrot.slane %v110_v41, %v187_v27 }
  0xae   :  { %v188_v53 = vrot.slane %v102_v42, %v187_v27  ;;  %v95_v54 = vpop.xlane.xlu1 %94 }
  0xaf   :  { %v71_v55 = vpop.xlane.xlu0 %70  ;;  %v111_v58 = vmul.f32 0.015625, %v95_v54  ;;  %v231_v2 = vsel %vm189_vm7, %v230_v52, %v226_v62 }
  0xb0   :  { %v103_v59 = vmul.f32 0.015625, %v71_v55  ;;  %v190_v3 = vsel %vm189_vm7, %v188_v53, %v183_v63 }
  0xb1   :  { %v235_v0 = vrot.slane %v111_v58, %v194_v45 }
  0xb2   :  { %v195_v1 = vrot.slane %v103_v59, %v194_v45 }
  0xb3   :  { %v236_v5 = vsel %vm196_vm8, %v235_v0, %v231_v2 }
  0xb4   :  { %v197_v4 = vsel %vm196_vm8, %v195_v1, %v190_v3 }
  0xb5   :  { %v238_v6 = vsel %vm237_vm9, %v236_v5, %v197_v4 }
  0xb6   :  { %394 = vmatmul.mubr.msk.f32.vlgmr.msra.gmra.mrb[0].mxu0 %vm47_vm0, %v238_v6 }
 0x189   :  { %v307_v8 = vpop.f32.mrb[0].mxu0 }
 0x18a   :  { %v308_v9 = vadd.f32 %v327_v7, %v307_v8  ;;  %v395_v10 = vpop.f32.mrb[1].mxu0 }
 0x18c   :  { %312 = vst.msk [vmem:[#allocation2] sm:$0x3] %vm311_vm10, %v308_v9 }
 0x18d   :  { %423 = shalt.err (!%p420_p4)
}
 0x18e   :  { %s424_s22 = scalar_lea.hbm %s555_s3, 32 }
 0x18f   :  { %p425_p5 = scmp.ne.s32.totalorder %s555_s3, %s424_s22  ;;  %p428_p6 = scmp.lt.u32.totalorder %s424_s22, %s555_s3 }
 0x191   :  { %p430_p7 = pnand %p428_p6, %p425_p5 }
 0x193   :  { %433 = shalt.err (!%p430_p7)
}
 0x194   :  { %322 = dma.vmem_to_hbm [thread:$0]  %s320_s18, 32, %s555_s3, [#allocation3]  }
 0x195   :  { %434 = dma.done.wait [#allocation3], 32  }
 0x196   :  { %435 = vsyncadd [#allocation3], 4294967264 }
 0x197   :  { %326 = vsyncpa [#allocation3], 1 }

// kernel: _lambda_.14
= control target key start
LH: loop header
LB: loop body
LE: loop exit
PB: predicated region body
PF: predicated region fallthrough
CT: control target
= control target key end

     0   :  { %s2344_s21 = smov 0   ;;  %s2845_s0 = inlined_call_operand.vmem [shape: bf16[2,64,256], index: 0, kind: input, shape index: {}]   ;;  %s2846_s1 = inlined_call_operand.vmem [shape: bf16[64,576], index: 1, kind: input, shape index: {}]   ;;  %s2847_s2 = inlined_call_operand.vmem [shape: f32[64,1], index: 2, kind: input, shape index: {}]   ;;  %s2848_s3 = inlined_call_operand.vmem [shape: f32[64,1], index: 3, kind: input, shape index: {}]   ;;  %s2849_s4 = inlined_call_operand.vmem [shape: f32[1,128], index: 4, kind: input, shape index: {}]   ;;  %s2850_s5 = inlined_call_operand.vmem [shape: bf16[2,64,128], index: 5, kind: input, shape index: {}]   ;;  %s2851_s6 = inlined_call_operand.vmem [shape: bf16[2,64,128], index: 6, kind: output, shape index: {}]  }
   0x1 LB: > { %s2350_s22 = sadd.s32 4294967295, %s2297_s21   ;;  %p1799_p0 = scmp.ge.s32.totalorder %s2297_s21, 1  ;;  %s2297_s21 = sphi %s2344_s21, %s16_s21  }
   0x2   : > { %p207_p1 = scmp.lt.s32.totalorder %s2297_s21, 3 }
   0x4   : > { %p208_p2 = pnand %p1799_p0, %p207_p1 }
   0x5   : > { %p232_p3 = scmp.lt.s32.totalorder (!%p208_p2), %s2350_s22, 1  ;;  %p1802_p4 = scmp.ne.s32.totalorder (!%p208_p2), %s2350_s22, 0 }
   0x6   : > { %211 = sbr.rel (%p208_p2) target bundleno = 854 (0x356), region = 44 }
   0xd   : > { %s233_s23 = scalar_select %p232_p3, %s2350_s22, 1 }
   0xe   : > { %241 = sbr.rel (%p1802_p4) target bundleno = 23 (0x17), region = 48  ;;  %vm242_vm0 = vcmask (!%p1802_p4), 7168   ;;  %v2299_v0 = vmov (!%p1802_p4), 0.0  }
   0xf   : > { %s1925_s24 = sshll.u32 %s233_s23, 6  ;;  %243 = vst.msk [vmem:[#allocation3] sm:$0xff] (!%p1802_p4), %vm242_vm0, %v2299_v0  ;;  %244 = vst.msk [vmem:[#allocation3 + $0x8] sm:$0xff] (!%p1802_p4), %vm242_vm0, %v2299_v0 }
  0x10   : > { %s2359_s27 = scalar_lea.vmem %s2845_s0, %s1925_s24  ;;  %245 = vst.msk [vmem:[#allocation3 + $0x10] sm:$0xff] (!%p1802_p4), %vm242_vm0, %v2299_v0  ;;  %246 = vst.msk [vmem:[#allocation3 + $0x18] sm:$0xff] (!%p1802_p4), %vm242_vm0, %v2299_v0 }
  0x11   : > { %247 = vst.msk [vmem:[#allocation3 + $0x20] sm:$0xff] (!%p1802_p4), %vm242_vm0, %v2299_v0  ;;  %248 = vst.msk [vmem:[#allocation3 + $0x28] sm:$0xff] (!%p1802_p4), %vm242_vm0, %v2299_v0 }
  0x12   : > { %249 = vst.msk [vmem:[#allocation3 + $0x30] sm:$0xff] (!%p1802_p4), %vm242_vm0, %v2299_v0  ;;  %250 = vst.msk [vmem:[#allocation3 + $0x38] sm:$0xff] (!%p1802_p4), %vm242_vm0, %v2299_v0 }
  0x13   : > { %251 = vst.msk [vmem:[#allocation4] sm:$0xff] (!%p1802_p4), %vm242_vm0, %v2299_v0  ;;  %252 = vst.msk [vmem:[#allocation4 + $0x8] sm:$0xff] (!%p1802_p4), %vm242_vm0, %v2299_v0 }
  0x14   : > { %253 = vst.msk [vmem:[#allocation4 + $0x10] sm:$0xff] (!%p1802_p4), %vm242_vm0, %v2299_v0  ;;  %254 = vst.msk [vmem:[#allocation4 + $0x18] sm:$0xff] (!%p1802_p4), %vm242_vm0, %v2299_v0 }
  0x15   : > { %255 = vst.msk [vmem:[#allocation4 + $0x20] sm:$0xff] %vm242_vm0, %v2299_v0  ;;  %256 = vst.msk [vmem:[#allocation4 + $0x28] sm:$0xff] %vm242_vm0, %v2299_v0 }
  0x16   : > { %257 = vst.msk [vmem:[#allocation4 + $0x30] sm:$0xff] %vm242_vm0, %v2299_v0  ;;  %258 = vst.msk [vmem:[#allocation4 + $0x38] sm:$0xff] %vm242_vm0, %v2299_v0 }
  0x17 PF: > { %v2379_v1 = vld [vmem:[%s2359_s27] ss:$8 sps:$4 sm:$0xff]   ;;  %v2382_v2 = vld [vmem:[%s2359_s27 + $0x4] ss:$8 sps:$4 sm:$0xff]   ;;  %s2300_s28 = smov 108   ;;  %s2301_s29 = smov 126  }
  0x18   : > { %680 = vrot.lane.b32.xlu1 %v2379_v1, %s2300_s28  ;;  %404 = vrot.lane.b32.xlu0 %v2379_v1, %s2301_s29  ;;  %v2389_v3 = vld [vmem:[%s2359_s27 + $0x14] ss:$8 sps:$4 sm:$0xff]   ;;  %v2392_v4 = vld [vmem:[%s2359_s27 + $0x10] ss:$8 sps:$4 sm:$0xff]   ;;  %s2302_s30 = smov 117   ;;  %s2303_s7 = smov 118  }
  0x19   : > { %v2403_v5 = vld [vmem:[%s2359_s27 + $0x24] ss:$8 sps:$4 sm:$0xff]   ;;  %v2406_v6 = vld [vmem:[%s2359_s27 + $0x20] ss:$8 sps:$4 sm:$0xff]   ;;  %v2415_v7 = vld [vmem:[%s2359_s27 + $0x34] ss:$8 sps:$4 sm:$0xff]  }
  0x1a   : > { %v2418_v8 = vld [vmem:[%s2359_s27 + $0x30] ss:$8 sps:$4 sm:$0xff]   ;;  %s2304_s8 = smov 107   ;;  %s2305_s9 = smov 127   ;;  %v2250_v10 = vld [vmem:[%s2846_s1 + $0xc] ss:$20 sps:$4 sm:$0xff]  }
  0x1b   : > { %s2306_s10 = smov 116   ;;  %v2247_v9 = vld [vmem:[%s2846_s1 + $0x4] ss:$20 sps:$4 sm:$0xff]   ;;  %1117 = vmatprep.mubr.bf16.mxu1 %v2250_v10  ;;  %s2307_s15 = smov 106   ;;  %vm420_vm1 = vcmask 1031168   ;;  %vm696_vm2 = vcmask 883712  }
  0x1c   : > { %682 = vrot.lane.b32.xlu1 %v2382_v2, %s2300_s28  ;;  %406 = vrot.lane.b32.xlu0 %v2382_v2, %s2301_s29  ;;  %v2241_v15 = vld [vmem:[%s2359_s27] ss:$8 sps:$4 sm:$0xff]   ;;  %vm558_vm3 = vcmask 957440   ;;  %v2242_v21 = vld [vmem:[%s2359_s27 + $0x10] ss:$8 sps:$4 sm:$0xff]   ;;  %vm489_vm4 = vcmask 965632  }
  0x1d   : > { %1052 = vmatprep.mubr.bf16.mxu0 %v2247_v9  ;;  %v2243_v31 = vld [vmem:[%s2359_s27 + $0x20] ss:$8 sps:$4 sm:$0xff]   ;;  %v2244_v41 = vld [vmem:[%s2359_s27 + $0x30] ss:$8 sps:$4 sm:$0xff]   ;;  %vm765_vm5 = vcmask 875520   ;;  %vm351_vm6 = vcmask 1039360  }
  0x1e   : > { %vm627_vm7 = vcmask 949248   ;;  %vm834_vm8 = vcmask 867328   ;;  %vm1007_vm9 = vcmask 523264   ;;  %vm1262_vm10 = vcmask 7168   ;;  %p1906_p5 = scmp.ne.s32.totalorder %s2350_s22, 1 }
  0x20   : > { %544 = vrot.lane.b32.xlu1 %v2382_v2, %s2302_s30  ;;  %542 = vrot.lane.b32.xlu0 %v2379_v1, %s2302_s30 }
  0x24   : > { %410 = vrot.lane.b32.xlu1 %v2389_v3, %s2301_s29  ;;  %408 = vrot.lane.b32.xlu0 %v2392_v4, %s2301_s29 }
  0x28   : > { %686 = vrot.lane.b32.xlu1 %v2389_v3, %s2300_s28  ;;  %684 = vrot.lane.b32.xlu0 %v2392_v4, %s2300_s28 }
  0x2c   : > { %548 = vrot.lane.b32.xlu1 %v2389_v3, %s2302_s30  ;;  %546 = vrot.lane.b32.xlu0 %v2392_v4, %s2302_s30 }
  0x30   : > { %414 = vrot.lane.b32.xlu1 %v2403_v5, %s2301_s29  ;;  %412 = vrot.lane.b32.xlu0 %v2406_v6, %s2301_s29 }
  0x34   : > { %690 = vrot.lane.b32.xlu1 %v2403_v5, %s2300_s28  ;;  %688 = vrot.lane.b32.xlu0 %v2406_v6, %s2300_s28 }
  0x38   : > { %552 = vrot.lane.b32.xlu1 %v2403_v5, %s2302_s30  ;;  %550 = vrot.lane.b32.xlu0 %v2406_v6, %s2302_s30 }
  0x3c   : > { %418 = vrot.lane.b32.xlu1 %v2415_v7, %s2301_s29  ;;  %416 = vrot.lane.b32.xlu0 %v2418_v8, %s2301_s29 }
  0x40   : > { %694 = vrot.lane.b32.xlu1 %v2415_v7, %s2300_s28  ;;  %692 = vrot.lane.b32.xlu0 %v2418_v8, %s2300_s28 }
  0x44   : > { %556 = vrot.lane.b32.xlu1 %v2415_v7, %s2302_s30  ;;  %554 = vrot.lane.b32.xlu0 %v2418_v8, %s2302_s30 }
  0x48   : > { %475 = vrot.lane.b32.xlu1 %v2382_v2, %s2303_s7  ;;  %473 = vrot.lane.b32.xlu0 %v2379_v1, %s2303_s7 }
  0x4c   : > { %751 = vrot.lane.b32.xlu1 %v2382_v2, %s2304_s8  ;;  %749 = vrot.lane.b32.xlu0 %v2379_v1, %s2304_s8 }
  0x50   : > { %337 = vrot.lane.b32.xlu1 %v2382_v2, %s2305_s9  ;;  %335 = vrot.lane.b32.xlu0 %v2379_v1, %s2305_s9 }
  0x54   : > { %613 = vrot.lane.b32.xlu1 %v2382_v2, %s2306_s10  ;;  %611 = vrot.lane.b32.xlu0 %v2379_v1, %s2306_s10 }
  0x58   : > { %479 = vrot.lane.b32.xlu1 %v2389_v3, %s2303_s7  ;;  %477 = vrot.lane.b32.xlu0 %v2392_v4, %s2303_s7 }
  0x5c   : > { %755 = vrot.lane.b32.xlu1 %v2389_v3, %s2304_s8  ;;  %753 = vrot.lane.b32.xlu0 %v2392_v4, %s2304_s8 }
  0x60   : > { %341 = vrot.lane.b32.xlu1 %v2389_v3, %s2305_s9  ;;  %339 = vrot.lane.b32.xlu0 %v2392_v4, %s2305_s9 }
  0x64   : > { %617 = vrot.lane.b32.xlu1 %v2389_v3, %s2306_s10  ;;  %615 = vrot.lane.b32.xlu0 %v2392_v4, %s2306_s10 }
  0x68   : > { %483 = vrot.lane.b32.xlu1 %v2403_v5, %s2303_s7  ;;  %481 = vrot.lane.b32.xlu0 %v2406_v6, %s2303_s7 }
  0x6c   : > { %759 = vrot.lane.b32.xlu1 %v2403_v5, %s2304_s8  ;;  %757 = vrot.lane.b32.xlu0 %v2406_v6, %s2304_s8 }
  0x70   : > { %345 = vrot.lane.b32.xlu1 %v2403_v5, %s2305_s9  ;;  %343 = vrot.lane.b32.xlu0 %v2406_v6, %s2305_s9 }
  0x74   : > { %621 = vrot.lane.b32.xlu1 %v2403_v5, %s2306_s10  ;;  %619 = vrot.lane.b32.xlu0 %v2406_v6, %s2306_s10 }
  0x78   : > { %487 = vrot.lane.b32.xlu1 %v2415_v7, %s2303_s7  ;;  %485 = vrot.lane.b32.xlu0 %v2418_v8, %s2303_s7 }
  0x7c   : > { %763 = vrot.lane.b32.xlu1 %v2415_v7, %s2304_s8  ;;  %761 = vrot.lane.b32.xlu0 %v2418_v8, %s2304_s8 }
  0x80   : > { %349 = vrot.lane.b32.xlu1 %v2415_v7, %s2305_s9  ;;  %347 = vrot.lane.b32.xlu0 %v2418_v8, %s2305_s9 }
  0x84   : > { %625 = vrot.lane.b32.xlu1 %v2415_v7, %s2306_s10  ;;  %623 = vrot.lane.b32.xlu0 %v2418_v8, %s2306_s10  ;;  %s1934_s10 = sshll.u32 %s2350_s22, 5 }
  0x85   : > { %s1353_s13 = scalar_lea.vmem %s2851_s6, %s1934_s10 }
  0x88   : > { %820 = vrot.lane.b32.xlu1 %v2382_v2, %s2307_s15  ;;  %818 = vrot.lane.b32.xlu0 %v2379_v1, %s2307_s15 }
  0x8a   : > { %v681_v11 = vpop.permute.xlu1 %680  ;;  %v405_v12 = vpop.permute.xlu0 %404 }
  0x8c   : > { %824 = vrot.lane.b32.xlu1 %v2389_v3, %s2307_s15  ;;  %822 = vrot.lane.b32.xlu0 %v2392_v4, %s2307_s15 }
  0x8e   : > { %v683_v13 = vpop.permute.xlu1 %682  ;;  %v407_v14 = vpop.permute.xlu0 %406 }
  0x8f   : > { %v421_v16 = vsel %vm420_vm1, %v405_v12, %v407_v14  ;;  %v697_v17 = vsel %vm696_vm2, %v681_v11, %v683_v13 }
  0x90   : > { %2099 = vmatprep.subr.bf16.mxu0 %v421_v16  ;;  %2139 = vmatprep.subr.bf16.mxu1 %v697_v17 }
  0x91   : > { %828 = vrot.lane.b32.xlu1 %v2403_v5, %s2307_s15  ;;  %826 = vrot.lane.b32.xlu0 %v2406_v6, %s2307_s15 }
  0x92   : > { %v545_v18 = vpop.permute.xlu1 %544  ;;  %v543_v19 = vpop.permute.xlu0 %542  ;;  %2100 = vmatpush3.bf16.msra.mxu0 %v2241_v15 }
  0x93   : > { %v559_v20 = vsel %vm558_vm3, %v543_v19, %v545_v18 }
  0x94   : > { %2140 = vmatpush3.bf16.msra.mxu1 %v559_v20 }
  0x95   : > { %832 = vrot.lane.b32.xlu1 %v2415_v7, %s2307_s15  ;;  %830 = vrot.lane.b32.xlu0 %v2418_v8, %s2307_s15 }
  0x96   : > { %v411_v22 = vpop.permute.xlu1 %410  ;;  %v409_v23 = vpop.permute.xlu0 %408 }
  0x97   : > { %v422_v24 = vsel %vm420_vm1, %v409_v23, %v411_v22 }
  0x98   : > { %2101 = vmatprep.subr.bf16.mxu0 %v422_v24 }
  0x99   : > { %2102 = vmatpush3.bf16.msra.mxu0 %v2242_v21 }
  0x9a   : > { %v687_v25 = vpop.permute.xlu1 %686  ;;  %v685_v26 = vpop.permute.xlu0 %684 }
  0x9b   : > { %v698_v27 = vsel %vm696_vm2, %v685_v26, %v687_v25 }
  0x9c   : > { %2141 = vmatprep.subr.bf16.mxu1 %v698_v27 }
  0x9e   : > { %v549_v28 = vpop.permute.xlu1 %548  ;;  %v547_v29 = vpop.permute.xlu0 %546 }
  0x9f   : > { %v560_v30 = vsel %vm558_vm3, %v547_v29, %v549_v28 }
  0xa0   : > { %2142 = vmatpush3.bf16.msra.mxu1 %v560_v30 }
  0xa2   : > { %v415_v32 = vpop.permute.xlu1 %414  ;;  %v413_v33 = vpop.permute.xlu0 %412 }
  0xa3   : > { %v423_v34 = vsel %vm420_vm1, %v413_v33, %v415_v32  ;;  %v2245_v32 = vld [vmem:[%s2846_s1] ss:$20 sps:$4 sm:$0xff]  }
  0xa4   : > { %2103 = vmatprep.subr.bf16.mxu0 %v423_v34  ;;  %v2251_v33 = vld [vmem:[%s2846_s1 + $0x2c] ss:$20 sps:$4 sm:$0xff]  }
  0xa5   : > { %2104 = vmatpush3.bf16.msra.mxu0 %v2243_v31 }
  0xa6   : > { %v691_v35 = vpop.permute.xlu1 %690  ;;  %v689_v36 = vpop.permute.xlu0 %688 }
  0xa7   : > { %v699_v37 = vsel %vm696_vm2, %v689_v36, %v691_v35 }
  0xa8   : > { %2143 = vmatprep.subr.bf16.mxu1 %v699_v37  ;;  %v2248_v37 = vld [vmem:[%s2846_s1 + $0x8] ss:$20 sps:$4 sm:$0xff]  }
  0xaa   : > { %v553_v38 = vpop.permute.xlu1 %552  ;;  %v551_v39 = vpop.permute.xlu0 %550 }
  0xab   : > { %v561_v40 = vsel %vm558_vm3, %v551_v39, %v553_v38 }
  0xac   : > { %2144 = vmatpush3.bf16.msra.mxu1 %v561_v40  ;;  %v2254_v40 = vld [vmem:[%s2846_s1 + $0x34] ss:$20 sps:$4 sm:$0xff]  }
  0xae   : > { %v419_v42 = vpop.permute.xlu1 %418  ;;  %v417_v43 = vpop.permute.xlu0 %416 }
  0xaf   : > { %v424_v44 = vsel %vm420_vm1, %v417_v43, %v419_v42  ;;  %v2253_v42 = vld [vmem:[%s2846_s1 + $0x28] ss:$20 sps:$4 sm:$0xff]  }
  0xb0   : > { %2105 = vmatprep.subr.bf16.mxu0 %v424_v44 }
  0xb1   : > { %2106 = vmatpush3.bf16.msra.mxu0 %v2244_v41 }
  0xb2   : > { %v695_v45 = vpop.permute.xlu1 %694  ;;  %v693_v46 = vpop.permute.xlu0 %692 }
  0xb3   : > { %v700_v47 = vsel %vm696_vm2, %v693_v46, %v695_v45  ;;  %v2257_v45 = vld [vmem:[%s2846_s1 + $0x54] ss:$20 sps:$4 sm:$0xff]  }
  0xb4   : > { %2145 = vmatprep.subr.bf16.mxu1 %v700_v47  ;;  %v2256_v47 = vld [vmem:[%s2846_s1 + $0x30] ss:$20 sps:$4 sm:$0xff]  }
  0xb6   : > { %v557_v48 = vpop.permute.xlu1 %556  ;;  %v555_v49 = vpop.permute.xlu0 %554 }
  0xb7   : > { %v562_v50 = vsel %vm558_vm3, %v555_v49, %v557_v48  ;;  %v2260_v48 = vld [vmem:[%s2846_s1 + $0x5c] ss:$20 sps:$4 sm:$0xff]  }
  0xb8   : > { %2146 = vmatpush3.bf16.msra.mxu1 %v562_v50  ;;  %v2259_v49 = vld [vmem:[%s2846_s1 + $0x50] ss:$20 sps:$4 sm:$0xff]  }
  0xba   : > { %v476_v51 = vpop.permute.xlu1 %475  ;;  %v474_v52 = vpop.permute.xlu0 %473 }
  0xbb   : > { %v490_v53 = vsel %vm489_vm4, %v474_v52, %v476_v51 }
  0xbc   : > { %2107 = vmatprep.subr.bf16.mxu0 %v490_v53  ;;  %v2263_v53 = vld [vmem:[%s2846_s1 + $0x7c] ss:$20 sps:$4 sm:$0xff]  }
  0xbe   : > { %v752_v54 = vpop.permute.xlu1 %751  ;;  %v750_v55 = vpop.permute.xlu0 %749 }
  0xbf   : > { %v766_v56 = vsel %vm765_vm5, %v750_v55, %v752_v54  ;;  %v2262_v54 = vld [vmem:[%s2846_s1 + $0x58] ss:$20 sps:$4 sm:$0xff]  }
  0xc0   : > { %2147 = vmatprep.subr.bf16.mxu1 %v766_v56 }
  0xc2   : > { %v338_v57 = vpop.permute.xlu1 %337  ;;  %v336_v58 = vpop.permute.xlu0 %335 }
  0xc3   : > { %v352_v59 = vsel %vm351_vm6, %v336_v58, %v338_v57  ;;  %v2266_v58 = vld [vmem:[%s2846_s1 + $0x84] ss:$20 sps:$4 sm:$0xff]  }
  0xc4   : > { %2108 = vmatpush3.bf16.msra.mxu0 %v352_v59  ;;  %v2265_v59 = vld [vmem:[%s2846_s1 + $0x78] ss:$20 sps:$4 sm:$0xff]  }
  0xc6   : > { %v614_v60 = vpop.permute.xlu1 %613  ;;  %v612_v61 = vpop.permute.xlu0 %611 }
  0xc7   : > { %v628_v62 = vsel %vm627_vm7, %v612_v61, %v614_v60  ;;  %v2269_v60 = vld [vmem:[%s2846_s1 + $0x10] ss:$20 sps:$4 sm:$0xff]   ;;  %v2268_v61 = vld [vmem:[%s2846_s1 + $0x80] ss:$20 sps:$4 sm:$0xff]  }
  0xc8   : > { %2148 = vmatpush3.bf16.msra.mxu1 %v628_v62  ;;  %v2271_v62 = vld [vmem:[%s2846_s1 + $0x60] ss:$20 sps:$4 sm:$0xff]  }
  0xca   : > { %v480_v63 = vpop.permute.xlu1 %479  ;;  %v478_v0 = vpop.permute.xlu0 %477 }
  0xcb   : > { %v491_v1 = vsel %vm489_vm4, %v478_v0, %v480_v63  ;;  %v2270_v63 = vld [vmem:[%s2846_s1 + $0x38] ss:$20 sps:$4 sm:$0xff]   ;;  %v2272_v0 = vld [vmem:[%s2846_s1 + $0x88] ss:$20 sps:$4 sm:$0xff]  }
  0xcc   : > { %2109 = vmatprep.subr.bf16.mxu0 %v491_v1 }
  0xce   : > { %v756_v2 = vpop.permute.xlu1 %755  ;;  %v754_v3 = vpop.permute.xlu0 %753 }
  0xcf   : > { %v767_v4 = vsel %vm765_vm5, %v754_v3, %v756_v2 }
  0xd0   : > { %2149 = vmatprep.subr.bf16.mxu1 %v767_v4 }
  0xd2   : > { %v342_v5 = vpop.permute.xlu1 %341  ;;  %v340_v6 = vpop.permute.xlu0 %339 }
  0xd3   : > { %v353_v7 = vsel %vm351_vm6, %v340_v6, %v342_v5 }
  0xd4   : > { %2110 = vmatpush3.bf16.msra.mxu0 %v353_v7 }
  0xd6   : > { %v618_v8 = vpop.permute.xlu1 %617  ;;  %v616_v9 = vpop.permute.xlu0 %615 }
  0xd7   : > { %v629_v10 = vsel %vm627_vm7, %v616_v9, %v618_v8 }
  0xd8   : > { %2150 = vmatpush3.bf16.msra.mxu1 %v629_v10 }
  0xda   : > { %v484_v11 = vpop.permute.xlu1 %483  ;;  %v482_v12 = vpop.permute.xlu0 %481 }
  0xdb   : > { %v492_v13 = vsel %vm489_vm4, %v482_v12, %v484_v11 }
  0xdc   : > { %2111 = vmatprep.subr.bf16.mxu0 %v492_v13 }
  0xde   : > { %v760_v14 = vpop.permute.xlu1 %759  ;;  %v758_v15 = vpop.permute.xlu0 %757 }
  0xdf   : > { %v768_v16 = vsel %vm765_vm5, %v758_v15, %v760_v14 }
  0xe0   : > { %2151 = vmatprep.subr.bf16.mxu1 %v768_v16 }
  0xe2   : > { %v346_v17 = vpop.permute.xlu1 %345  ;;  %v344_v18 = vpop.permute.xlu0 %343 }
  0xe3   : > { %v354_v19 = vsel %vm351_vm6, %v344_v18, %v346_v17 }
  0xe4   : > { %2112 = vmatpush3.bf16.msra.mxu0 %v354_v19 }
  0xe6   : > { %v622_v20 = vpop.permute.xlu1 %621  ;;  %v620_v21 = vpop.permute.xlu0 %619 }
  0xe7   : > { %v630_v22 = vsel %vm627_vm7, %v620_v21, %v622_v20 }
  0xe8   : > { %2152 = vmatpush3.bf16.msra.mxu1 %v630_v22 }
  0xea   : > { %v488_v23 = vpop.permute.xlu1 %487  ;;  %v486_v24 = vpop.permute.xlu0 %485 }
  0xeb   : > { %v493_v25 = vsel %vm489_vm4, %v486_v24, %v488_v23 }
  0xec   : > { %2113 = vmatprep.subr.bf16.mxu0 %v493_v25 }
  0xee   : > { %v764_v26 = vpop.permute.xlu1 %763  ;;  %v762_v27 = vpop.permute.xlu0 %761 }
  0xef   : > { %v769_v28 = vsel %vm765_vm5, %v762_v27, %v764_v26 }
  0xf0   : > { %2153 = vmatprep.subr.bf16.mxu1 %v769_v28 }
  0xf2   : > { %v350_v29 = vpop.permute.xlu1 %349  ;;  %v348_v30 = vpop.permute.xlu0 %347 }
  0xf3   : > { %v355_v31 = vsel %vm351_vm6, %v348_v30, %v350_v29 }
  0xf4   : > { %2114 = vmatpush3.bf16.msra.mxu0 %v355_v31 }
  0xf6   : > { %v626_v34 = vpop.permute.xlu1 %625  ;;  %v624_v35 = vpop.permute.xlu0 %623 }
  0xf7   : > { %1053 = vmatmul.mubr.bf16.vlgmr.msra.gmra.mrb[0].mxu0 %v2245_v32  ;;  %v631_v36 = vsel %vm627_vm7, %v624_v35, %v626_v34 }
  0xf8   : > { %2154 = vmatpush3.bf16.msra.mxu1 %v631_v36  ;;  %1060 = vmatprep.mubr.bf16.mxu0 %v2251_v33 }
  0xfa   : > { %v821_v38 = vpop.permute.xlu1 %820  ;;  %v819_v39 = vpop.permute.xlu0 %818 }
  0xfb   : > { %v835_v41 = vsel %vm834_vm8, %v819_v39, %v821_v38  ;;  %1118 = vmatmul.mubr.bf16.vlgmr.msra.gmra.mrb[0].mxu1 %v2248_v37 }
  0xfc   : > { %2187 = vmatprep.subr.bf16.mxu0 %v835_v41  ;;  %2203 = vmatprep.subr.bf16.mxu1 %v835_v41 }
  0xfd   : > { %2188 = vmatpush3.bf16.msra.mxu0 %v835_v41  ;;  %2207 = vmatpush3.bf16.msra.mxu1 %v835_v41 }
  0xfe   : > { %v825_v43 = vpop.permute.xlu1 %824  ;;  %v823_v44 = vpop.permute.xlu0 %822  ;;  %1125 = vmatprep.mubr.bf16.mxu1 %v2254_v40 }
  0xff   : > { %1061 = vmatmul.mubr.bf16.gmra.mrb[4].mxu0 %v2253_v42  ;;  %v836_v46 = vsel %vm834_vm8, %v823_v44, %v825_v43 }
 0x100   : > { %2189 = vmatprep.subr.bf16.mxu0 %v836_v46  ;;  %2204 = vmatprep.subr.bf16.mxu1 %v836_v46 }
 0x101   : > { %2190 = vmatpush3.bf16.msra.mxu0 %v836_v46  ;;  %2208 = vmatpush3.bf16.msra.mxu1 %v836_v46 }
 0x102   : > { %1068 = vmatprep.mubr.bf16.mxu0 %v2257_v45 }
 0x103   : > { %1126 = vmatmul.mubr.bf16.gmra.mrb[4].mxu1 %v2256_v47  ;;  %v829_v50 = vpop.permute.xlu1 %828  ;;  %v827_v51 = vpop.permute.xlu0 %826 }
 0x104   : > { %v837_v52 = vsel %vm834_vm8, %v827_v51, %v829_v50  ;;  %1133 = vmatprep.mubr.bf16.mxu1 %v2260_v48 }
 0x105   : > { %2191 = vmatprep.subr.bf16.mxu0 %v837_v52  ;;  %2205 = vmatprep.subr.bf16.mxu1 %v837_v52 }
 0x106   : > { %2192 = vmatpush3.bf16.msra.mxu0 %v837_v52  ;;  %2209 = vmatpush3.bf16.msra.mxu1 %v837_v52 }
 0x107   : > { %1069 = vmatmul.mubr.bf16.gmra.mrb[8].mxu0 %v2259_v49  ;;  %v833_v55 = vpop.permute.xlu1 %832  ;;  %v831_v56 = vpop.permute.xlu0 %830 }
 0x108   : > { %1076 = vmatprep.mubr.bf16.mxu0 %v2263_v53  ;;  %v838_v57 = vsel %vm834_vm8, %v831_v56, %v833_v55 }
 0x109   : > { %2193 = vmatprep.subr.bf16.mxu0 %v838_v57  ;;  %2206 = vmatprep.subr.bf16.mxu1 %v838_v57 }
 0x10a   : > { %2194 = vmatpush3.bf16.msra.mxu0 %v838_v57  ;;  %2210 = vmatpush3.bf16.msra.mxu1 %v838_v57  ;;  %v1895_v57 = vld [vmem:[%s2849_s4] ss:$0 sm:$0xff] }
 0x10b   : > { %1134 = vmatmul.mubr.bf16.gmra.mrb[8].mxu1 %v2262_v54 }
 0x10c   : > { %1141 = vmatprep.mubr.bf16.mxu1 %v2266_v58 }
 0x10f   : > { %1077 = vmatmul.mubr.bf16.gmra.mrb[12].mxu0 %v2265_v59 }
 0x110   : > { %2195 = vmatprep.mubr.msk.bf16.mxu0 %vm1007_vm9, %v2269_v60 }
 0x113   : > { %1142 = vmatmul.mubr.bf16.gmra.mrb[12].mxu1 %v2268_v61 }
 0x114   : > { %2199 = vmatprep.mubr.msk.bf16.mxu1 %vm1007_vm9, %v2271_v62 }
 0x117   : > { %2196 = vmatmul.mubr.msk.bf16.vlgmr.msra.gmra.mrb[16].mxu0 %vm1007_vm9, %v2270_v63 }
 0x11b   : > { %2200 = vmatmul.mubr.msk.bf16.vlgmr.msra.gmra.mrb[16].mxu1 %vm1007_vm9, %v2272_v0 }
 0x1ca   : > { %v2115_v1 = vpop.f32.mrb[0].mxu0 }
 0x1cb   : > { %v2116_v2 = vpop.f32.mrb[1].mxu0 }
 0x1cc   : > { %v2117_v3 = vadd.f32 %v2116_v2, %v2115_v1  ;;  %v2118_v4 = vpop.f32.mrb[2].mxu0 }
 0x1cd   : > { %v2119_v5 = vpop.f32.mrb[3].mxu0 }
 0x1ce   : > { %v2155_v6 = vpop.f32.mrb[0].mxu1  ;;  %v2120_v7 = vadd.f32 %v2119_v5, %v2118_v4 }
 0x1cf   : > { %v2156_v8 = vpop.f32.mrb[1].mxu1 }
 0x1d0   : > { %v2157_v9 = vadd.f32 %v2156_v8, %v2155_v6  ;;  %v2158_v10 = vpop.f32.mrb[2].mxu1 }
 0x1d1   : > { %v2159_v11 = vpop.f32.mrb[3].mxu1 }
 0x1d2   : > { %v2160_v12 = vadd.f32 %v2159_v11, %v2158_v10  ;;  %v2121_v13 = vpop.f32.mrb[4].mxu0  ;;  %v1120_v14 = vadd.f32 %v2157_v9, %v2117_v3 }
 0x1d3   : > { %v2122_v15 = vpop.f32.mrb[5].mxu0 }
 0x1d4   : > { %v2123_v16 = vadd.f32 %v2122_v15, %v2121_v13  ;;  %v2124_v17 = vpop.f32.mrb[6].mxu0  ;;  %v1123_v18 = vadd.f32 %v2160_v12, %v2120_v7 }
 0x1d5   : > { %v2125_v19 = vpop.f32.mrb[7].mxu0 }
 0x1d6   : > { %v2161_v20 = vpop.f32.mrb[4].mxu1  ;;  %v2126_v21 = vadd.f32 %v2125_v19, %v2124_v17 }
 0x1d7   : > { %v2162_v22 = vpop.f32.mrb[5].mxu1 }
 0x1d8   : > { %v2163_v23 = vadd.f32 %v2162_v22, %v2161_v20  ;;  %v2164_v24 = vpop.f32.mrb[6].mxu1 }
 0x1d9   : > { %v2165_v25 = vpop.f32.mrb[7].mxu1 }
 0x1da   : > { %v2166_v26 = vadd.f32 %v2165_v25, %v2164_v24  ;;  %v2127_v27 = vpop.f32.mrb[8].mxu0  ;;  %v1128_v28 = vadd.f32 %v2163_v23, %v2123_v16 }
 0x1db   : > { %v2128_v29 = vpop.f32.mrb[9].mxu0 }
 0x1dc   : > { %v2129_v30 = vadd.f32 %v2128_v29, %v2127_v27  ;;  %v2130_v31 = vpop.f32.mrb[10].mxu0  ;;  %v1131_v32 = vadd.f32 %v2166_v26, %v2126_v21 }
 0x1dd   : > { %v2131_v33 = vpop.f32.mrb[11].mxu0 }
 0x1de   : > { %v2167_v34 = vpop.f32.mrb[8].mxu1  ;;  %v2132_v35 = vadd.f32 %v2131_v33, %v2130_v31  ;;  %v1236_v33 = vld [vmem:[#allocation3 + $0x30] sm:$0xff] }
 0x1df   : > { %v2168_v36 = vpop.f32.mrb[9].mxu1 }
 0x1e0   : > { %v2169_v37 = vadd.f32 %v2168_v36, %v2167_v34  ;;  %v2170_v38 = vpop.f32.mrb[10].mxu1  ;;  %v1230_v34 = vld [vmem:[#allocation3] sm:$0xff] }
 0x1e1   : > { %v2171_v39 = vpop.f32.mrb[11].mxu1 }
 0x1e2   : > { %v2172_v40 = vadd.f32 %v2171_v39, %v2170_v38  ;;  %v2133_v41 = vpop.f32.mrb[12].mxu0  ;;  %v1136_v42 = vadd.f32 %v2169_v37, %v2129_v30  ;;  %v1232_v30 = vld [vmem:[#allocation3 + $0x10] sm:$0xff]  ;;  %v1234_v39 = vld [vmem:[#allocation3 + $0x20] sm:$0xff] }
 0x1e3   : > { %v2134_v43 = vpop.f32.mrb[13].mxu0 }
 0x1e4   : > { %v2135_v44 = vadd.f32 %v2134_v43, %v2133_v41  ;;  %v2136_v45 = vpop.f32.mrb[14].mxu0  ;;  %v1139_v46 = vadd.f32 %v2172_v40, %v2132_v35  ;;  %v1233_v40 = vld [vmem:[#allocation3 + $0x18] sm:$0xff] }
 0x1e5   : > { %v2137_v47 = vpop.f32.mrb[15].mxu0 }
 0x1e6   : > { %v2173_v48 = vpop.f32.mrb[12].mxu1  ;;  %v2138_v49 = vadd.f32 %v2137_v47, %v2136_v45  ;;  %v1273_v45 = vld [vmem:[#allocation4 + $0x10] sm:$0xff] }
 0x1e7   : > { %v2174_v50 = vpop.f32.mrb[13].mxu1 }
 0x1e8   : > { %v2175_v51 = vadd.f32 %v2174_v50, %v2173_v48  ;;  %v2176_v52 = vpop.f32.mrb[14].mxu1 }
 0x1e9   : > { %v2177_v53 = vpop.f32.mrb[15].mxu1 }
 0x1ea   : > { %v2178_v54 = vadd.f32 %v2177_v53, %v2176_v52  ;;  %v2197_v55 = vpop.f32.mrb[16].mxu0  ;;  %v1144_v56 = vadd.f32 %v2175_v51, %v2135_v44  ;;  %v1231_v51 = vld [vmem:[#allocation3 + $0x8] sm:$0xff] }
 0x1eb   : > { %v1193_v58 = vadd.f32 %v2197_v55, %v1128_v28  ;;  %v1184_v59 = vpop.f32.mrb[17].mxu0  ;;  %v1235_v52 = vld [vmem:[#allocation3 + $0x28] sm:$0xff] }
 0x1ec   : > { %v1185_v60 = vadd.f32 %v1184_v59, %v1120_v14  ;;  %v2198_v61 = vpop.f32.mrb[18].mxu0  ;;  %v1147_v62 = vadd.f32 %v2178_v54, %v2138_v49 }
 0x1ed   : > { %v1196_v63 = vadd.f32 %v2198_v61, %v1131_v32  ;;  %v1187_v0 = vpop.f32.mrb[19].mxu0  ;;  %v1224_v1 = vmul.f32 %v1895_v57, %v1193_v58 }
 0x1ee   : > { %v1188_v2 = vadd.f32 %v1187_v0, %v1123_v18  ;;  %v2201_v3 = vpop.f32.mrb[16].mxu1  ;;  %v1222_v13 = vmul.f32 %v1895_v57, %v1185_v60  ;;  %v1275_v0 = vld [vmem:[#allocation4 + $0x20] sm:$0xff] }
 0x1ef   : > { %v1959_v4 = vpack.c.bf16 %v1196_v63, %v1193_v58  ;;  %v1209_v5 = vadd.f32 %v2201_v3, %v1144_v56  ;;  %v1200_v6 = vpop.f32.mrb[17].mxu1  ;;  %1242 = vadd.xlane.f32.xlu0 %v1224_v1  ;;  %v1225_v18 = vmul.f32 %v1895_v57, %v1196_v63  ;;  %v1281_v19 = vmul.f32 %v1224_v1, %v1193_v58  ;;  %v1271_v58 = vld [vmem:[#allocation4] sm:$0xff] }
 0x1f0   : > { %v1954_v7 = vpack.c.bf16 %v1188_v2, %v1185_v60  ;;  %v1201_v8 = vadd.f32 %v1200_v6, %v1136_v42  ;;  %v2202_v9 = vpop.f32.mrb[18].mxu1  ;;  %v1223_v21 = vmul.f32 %v1895_v57, %v1188_v2  ;;  %v1279_v24 = vmul.f32 %v1222_v13, %v1185_v60  ;;  %v1277_v6 = vld [vmem:[#allocation4 + $0x30] sm:$0xff] }
 0x1f1   : > { %2075 = vst [vmem:[%s1353_s13 + $0x8] sm:$0xff] %v1959_v4   ;;  %v1212_v10 = vadd.f32 %v2202_v9, %v1147_v62  ;;  %v1203_v11 = vpop.f32.mrb[19].mxu1  ;;  %v1228_v12 = vmul.f32 %v1895_v57, %v1209_v5  ;;  %v1282_v23 = vmul.f32 %v1225_v18, %v1196_v63  ;;  %v1272_v63 = vld [vmem:[#allocation4 + $0x8] sm:$0xff] }
 0x1f2   : > { %1955 = vst [vmem:[%s1353_s13] sm:$0xff] %v1954_v7   ;;  %v1204_v14 = vadd.f32 %v1203_v11, %v1139_v46  ;;  %v1226_v17 = vmul.f32 %v1895_v57, %v1201_v8  ;;  %v1280_v25 = vmul.f32 %v1223_v21, %v1188_v2  ;;  %v1237_v46 = vld [vmem:[#allocation3 + $0x38] sm:$0xff] }
 0x1f3   : > { %v1969_v15 = vpack.c.bf16 %v1212_v10, %v1209_v5  ;;  %1250 = vadd.xlane.f32.xlu1 %v1228_v12  ;;  %1238 = vadd.xlane.f32.xlu0 %v1222_v13  ;;  %v1229_v20 = vmul.f32 %v1895_v57, %v1212_v10  ;;  %v1285_v28 = vmul.f32 %v1228_v12, %v1209_v5  ;;  %v1276_v5 = vld [vmem:[#allocation4 + $0x28] sm:$0xff]  ;;  %v1278_v11 = vld [vmem:[#allocation4 + $0x38] sm:$0xff] }
 0x1f4   : > { %v1964_v16 = vpack.c.bf16 %v1204_v14, %v1201_v8  ;;  %v1227_v22 = vmul.f32 %v1895_v57, %v1204_v14  ;;  %v1283_v26 = vmul.f32 %v1226_v17, %v1201_v8  ;;  %v1274_v57 = vld [vmem:[#allocation4 + $0x18] sm:$0xff] }
 0x1f5   : > { %2077 = vst [vmem:[%s1353_s13 + $0x18] sm:$0xff] %v1969_v15   ;;  %v1286_v29 = vmul.f32 %v1229_v20, %v1212_v10 }
 0x1f6   : > { %2076 = vst [vmem:[%s1353_s13 + $0x10] sm:$0xff] %v1964_v16   ;;  %v1284_v27 = vmul.f32 %v1227_v22, %v1204_v14  ;;  %v2308_v16 = vmov (!%p1906_p5), 0  }
 0x1f7   : > { %1246 = vadd.xlane.f32.xlu1 %v1226_v17  ;;  %1244 = vadd.xlane.f32.xlu0 %v1225_v18 }
 0x1f8   : > { %2274 = vset.pattern.permute.xlu1 (!%p1906_p5), %v2308_v16  ;;  %2273 = vset.pattern.permute.xlu0 (!%p1906_p5), %v2308_v16  ;;  %v1422_v16 = vld [vmem:[%s2847_s2] sm:$0xff] (!%p1906_p5) }
 0x1fb   : > { %1291 = vadd.xlane.f32.xlu1 %v1281_v19  ;;  %1252 = vadd.xlane.f32.xlu0 %v1229_v20 }
 0x1ff   : > { %1240 = vadd.xlane.f32.xlu1 %v1223_v21  ;;  %1248 = vadd.xlane.f32.xlu0 %v1227_v22 }
 0x203   : > { %1293 = vadd.xlane.f32.xlu0 %v1282_v23  ;;  %1287 = vadd.xlane.f32.xlu1 %v1279_v24 }
 0x207   : > { %1289 = vadd.xlane.f32.xlu0 %v1280_v25  ;;  %1295 = vadd.xlane.f32.xlu1 %v1283_v26 }
 0x20b   : > { %1297 = vadd.xlane.f32.xlu0 %v1284_v27  ;;  %1299 = vadd.xlane.f32.xlu1 %v1285_v28 }
 0x20f   : > { %1301 = vadd.xlane.f32.xlu0 %v1286_v29 }
 0x27c   : > { %v1243_v31 = vpop.xlane.xlu0 %1242 }
 0x27d   : > { %v1256_v32 = vadd.f32 %v1243_v31, %v1232_v30 }
 0x27f   : > { %1265 = vst.msk [vmem:[#allocation3 + $0x10] sm:$0xff] %vm1262_vm10, %v1256_v32 }
 0x280   : > { %v1251_v35 = vpop.xlane.xlu1 %1250  ;;  %v1239_v36 = vpop.xlane.xlu0 %1238 }
 0x281   : > { %v1260_v37 = vadd.f32 %v1251_v35, %v1236_v33  ;;  %v1254_v38 = vadd.f32 %v1239_v36, %v1230_v34 }
 0x283   : > { %1269 = vst.msk [vmem:[#allocation3 + $0x30] sm:$0xff] %vm1262_vm10, %v1260_v37  ;;  %1263 = vst.msk [vmem:[#allocation3] sm:$0xff] %vm1262_vm10, %v1254_v38 }
 0x284   : > { %v1247_v41 = vpop.xlane.xlu1 %1246  ;;  %v1245_v42 = vpop.xlane.xlu0 %1244 }
 0x285   : > { %v1258_v43 = vadd.f32 %v1247_v41, %v1234_v39  ;;  %v1257_v44 = vadd.f32 %v1245_v42, %v1233_v40 }
 0x286   : > { %v1368_v14 = vld [vmem:[#allocation3 + $0x10] sm:$0xff] (!%p1906_p5) }
 0x287   : > { %1267 = vst.msk [vmem:[#allocation3 + $0x20] sm:$0xff] %vm1262_vm10, %v1258_v43  ;;  %1266 = vst.msk [vmem:[#allocation3 + $0x18] sm:$0xff] %vm1262_vm10, %v1257_v44  ;;  %v2610_v17 = vmul.f32 (!%p1906_p5), 0.0078125, %v1368_v14  ;;  %v1424_v14 = vld [vmem:[%s2847_s2 + $0x10] sm:$0xff] (!%p1906_p5) }
 0x288   : > { %v1292_v47 = vpop.xlane.xlu1 %1291  ;;  %v1253_v48 = vpop.xlane.xlu0 %1252 }
 0x289   : > { %v1305_v49 = vadd.f32 %v1292_v47, %v1273_v45  ;;  %v1261_v50 = vadd.f32 %v1253_v48, %v1237_v46  ;;  %v1400_v25 = vmul.f32 (!%p1906_p5), %v2610_v17, %v2610_v17 }
 0x28a   : > { %v1366_v19 = vld [vmem:[#allocation3] sm:$0xff] (!%p1906_p5) }
 0x28b   : > { %1313 = vst.msk [vmem:[#allocation4 + $0x10] sm:$0xff] %vm1262_vm10, %v1305_v49  ;;  %1270 = vst.msk [vmem:[#allocation3 + $0x38] sm:$0xff] %vm1262_vm10, %v1261_v50  ;;  %v2612_v21 = vmul.f32 (!%p1906_p5), 0.0078125, %v1366_v19  ;;  %v1425_v19 = vld [vmem:[%s2847_s2 + $0x18] sm:$0xff] (!%p1906_p5) }
 0x28c   : > { %v1241_v53 = vpop.xlane.xlu1 %1240  ;;  %v1249_v54 = vpop.xlane.xlu0 %1248 }
 0x28d   : > { %v1255_v55 = vadd.f32 %v1241_v53, %v1231_v51  ;;  %v1259_v56 = vadd.f32 %v1249_v54, %v1235_v52  ;;  %v1398_v30 = vmul.f32 (!%p1906_p5), %v2612_v21, %v2612_v21  ;;  %v1372_v51 = vld [vmem:[#allocation3 + $0x30] sm:$0xff] (!%p1906_p5) }
 0x28e   : > { %v1369_v23 = vld [vmem:[#allocation3 + $0x18] sm:$0xff] (!%p1906_p5)  ;;  %v1370_v39 = vld [vmem:[#allocation3 + $0x20] sm:$0xff] (!%p1906_p5) }
 0x28f   : > { %1264 = vst.msk [vmem:[#allocation3 + $0x8] sm:$0xff] %vm1262_vm10, %v1255_v55  ;;  %1268 = vst.msk [vmem:[#allocation3 + $0x28] sm:$0xff] %vm1262_vm10, %v1259_v56  ;;  %v2616_v26 = vmul.f32 (!%p1906_p5), 0.0078125, %v1369_v23  ;;  %v2628_v43 = vmul.f32 (!%p1906_p5), 0.0078125, %v1370_v39  ;;  %v1423_v23 = vld [vmem:[%s2847_s2 + $0x8] sm:$0xff] (!%p1906_p5)  ;;  %v1429_v39 = vld [vmem:[%s2847_s2 + $0x38] sm:$0xff] (!%p1906_p5) }
 0x290   : > { %v1294_v59 = vpop.xlane.xlu0 %1293  ;;  %v1288_v60 = vpop.xlane.xlu1 %1287 }
 0x291   : > { %v1306_v61 = vadd.f32 %v1294_v59, %v1274_v57  ;;  %v1303_v62 = vadd.f32 %v1288_v60, %v1271_v58  ;;  %v1401_v36 = vmul.f32 (!%p1906_p5), %v2616_v26, %v2616_v26  ;;  %v1402_v54 = vmul.f32 (!%p1906_p5), %v2628_v43, %v2628_v43 }
 0x292   : > { %v1384_v15 = vld [vmem:[#allocation4 + $0x10] sm:$0xff] (!%p1906_p5)  ;;  %v1373_v45 = vld [vmem:[#allocation3 + $0x38] sm:$0xff] (!%p1906_p5) }
 0x293   : > { %1314 = vst.msk [vmem:[#allocation4 + $0x18] sm:$0xff] %vm1262_vm10, %v1306_v61  ;;  %1311 = vst.msk [vmem:[#allocation4] sm:$0xff] %vm1262_vm10, %v1303_v62  ;;  %v1392_v18 = vmul.f32 (!%p1906_p5), 0.0078125, %v1384_v15  ;;  %v2632_v50 = vmul.f32 (!%p1906_p5), 0.0078125, %v1373_v45 }
 0x294   : > { %v1290_v1 = vpop.xlane.xlu0 %1289  ;;  %v1296_v2 = vpop.xlane.xlu1 %1295 }
 0x295   : > { %v1304_v3 = vadd.f32 %v1290_v1, %v1272_v63  ;;  %v1307_v4 = vadd.f32 %v1296_v2, %v1275_v0  ;;  %v1408_v35 = vsub.f32 (!%p1906_p5), %v1392_v18, %v1400_v25  ;;  %v1405_v59 = vmul.f32 (!%p1906_p5), %v2632_v50, %v2632_v50 }
 0x296   : > { %v1367_v28 = vld [vmem:[#allocation3 + $0x8] sm:$0xff] (!%p1906_p5)  ;;  %v2638_v0 = vmul.f32 (!%p1906_p5), 0.0078125, %v1372_v51 }
 0x297   : > { %1312 = vst.msk [vmem:[#allocation4 + $0x8] sm:$0xff] %vm1262_vm10, %v1304_v3  ;;  %1315 = vst.msk [vmem:[#allocation4 + $0x20] sm:$0xff] %vm1262_vm10, %v1307_v4  ;;  %v2620_v31 = vmul.f32 (!%p1906_p5), 0.0078125, %v1367_v28  ;;  %v1371_v33 = vld [vmem:[#allocation3 + $0x28] sm:$0xff] (!%p1906_p5)  ;;  %v1416_v47 = vmax.f32 (!%p1906_p5), %v1408_v35, 0.0 }
 0x298   : > { %v1298_v7 = vpop.xlane.xlu0 %1297  ;;  %v1300_v8 = vpop.xlane.xlu1 %1299  ;;  %v2624_v37 = vmul.f32 (!%p1906_p5), 0.0078125, %v1371_v33 }
 0x299   : > { %v1308_v9 = vadd.f32 %v1298_v7, %v1276_v5  ;;  %v1309_v10 = vadd.f32 %v1300_v8, %v1277_v6  ;;  %1365 = sbr.rel (%p1906_p5) target bundleno = 854 (0x356), region = 52  ;;  %v1399_v42 = vmul.f32 (!%p1906_p5), %v2620_v31, %v2620_v31  ;;  %v1432_v56 = vadd.f32 (!%p1906_p5), 1e-05, %v1416_v47  ;;  %v1455_v47 = vld [vmem:[%s2848_s3 + $0x8] sm:$0xff] (!%p1906_p5) }
 0x29a   : > { %v1382_v20 = vld [vmem:[#allocation4] sm:$0xff] (!%p1906_p5)  ;;  %v1385_v24 = vld [vmem:[#allocation4 + $0x18] sm:$0xff] (!%p1906_p5)  ;;  %v1403_v49 = vmul.f32 (!%p1906_p5), %v2624_v37, %v2624_v37 }
 0x29b   : > { %1316 = vst.msk [vmem:[#allocation4 + $0x28] sm:$0xff] %vm1262_vm10, %v1308_v9  ;;  %1317 = vst.msk [vmem:[#allocation4 + $0x30] sm:$0xff] %vm1262_vm10, %v1309_v10  ;;  %v1390_v22 = vmul.f32 (!%p1906_p5), 0.0078125, %v1382_v20  ;;  %v1393_v27 = vmul.f32 (!%p1906_p5), 0.0078125, %v1385_v24  ;;  %2275 = vrsqrt.f32 (!%p1906_p5), %v1432_v56  ;;  %v1404_v9 = vmul.f32 (!%p1906_p5), %v2638_v0, %v2638_v0 }
 0x29c   : > { %v1302_v12 = vpop.xlane.xlu0 %1301 }
 0x29d   : > { %v1310_v13 = vadd.f32 %v1302_v12, %v1278_v11  ;;  %v1406_v41 = vsub.f32 (!%p1906_p5), %v1390_v22, %v1398_v30  ;;  %v1409_v48 = vsub.f32 (!%p1906_p5), %v1393_v27, %v1401_v36 }
 0x29e   : > { %v1383_v29 = vld [vmem:[#allocation4 + $0x8] sm:$0xff] (!%p1906_p5)  ;;  %v1386_v40 = vld [vmem:[#allocation4 + $0x20] sm:$0xff] (!%p1906_p5) }
 0x29f   : > { %1318 = vst.msk [vmem:[#allocation4 + $0x38] sm:$0xff] %vm1262_vm10, %v1310_v13  ;;  %v1391_v32 = vmul.f32 (!%p1906_p5), 0.0078125, %v1383_v29  ;;  %v1394_v44 = vmul.f32 (!%p1906_p5), 0.0078125, %v1386_v40  ;;  %v1414_v52 = vmax.f32 (!%p1906_p5), %v1406_v41, 0.0  ;;  %v1417_v57 = vmax.f32 (!%p1906_p5), %v1409_v48, 0.0  ;;  %v1428_v40 = vld [vmem:[%s2847_s2 + $0x30] sm:$0xff] (!%p1906_p5) }
 0x2a0   : > { %v1454_v48 = vld [vmem:[%s2848_s3] sm:$0xff] }
 0x2a1   : > { %v1407_v53 = vsub.f32 %v1391_v32, %v1399_v42  ;;  %v1430_v61 = vadd.f32 1e-05, %v1414_v52  ;;  %v1410_v63 = vsub.f32 %v1394_v44, %v1402_v54  ;;  %v1433_v1 = vadd.f32 1e-05, %v1417_v57  ;;  %v1427_v32 = vld [vmem:[%s2847_s2 + $0x28] sm:$0xff]  ;;  %v1458_v57 = vld [vmem:[%s2848_s3 + $0x20] sm:$0xff] }
 0x2a2   : > { %v1387_v34 = vld [vmem:[#allocation4 + $0x28] sm:$0xff]  ;;  %v1388_v60 = vld [vmem:[#allocation4 + $0x30] sm:$0xff] }
 0x2a3   : > { %v1395_v38 = vmul.f32 0.0078125, %v1387_v34  ;;  %v1415_v62 = vmax.f32 %v1407_v53, 0.0  ;;  %2277 = vrsqrt.f32 %v1430_v61  ;;  %v1418_v5 = vmax.f32 %v1410_v63, 0.0  ;;  %v1426_v34 = vld [vmem:[%s2847_s2 + $0x20] sm:$0xff]  ;;  %v1456_v53 = vld [vmem:[%s2848_s3 + $0x10] sm:$0xff] }
 0x2a4   : > { %v1396_v6 = vmul.f32 0.0078125, %v1388_v60  ;;  %2279 = vrsqrt.f32 %v1433_v1 }
 0x2a5   : > { %v1411_v58 = vsub.f32 %v1395_v38, %v1403_v49  ;;  %v1431_v4 = vadd.f32 1e-05, %v1415_v62  ;;  %v1434_v10 = vadd.f32 1e-05, %v1418_v5  ;;  %v2276_v18 = vpop.eup %2275  ;;  %v2081_v5 = vld [vmem:[%s2851_s6 + $0x20] sm:$0xff]  }
 0x2a6   : > { %v1389_v46 = vld [vmem:[#allocation4 + $0x38] sm:$0xff]  ;;  %v1412_v12 = vsub.f32 %v1396_v6, %v1404_v9  ;;  %v1448_v22 = vmul.f32 %v2276_v18, %v1424_v14 }
 0x2a7   : > { %v1397_v55 = vmul.f32 0.0078125, %v1389_v46  ;;  %v1419_v2 = vmax.f32 %v1411_v58, 0.0  ;;  %2281 = vrsqrt.f32 %v1431_v4  ;;  %v1972_v4 = vld [vmem:[%s2851_s6] sm:$0xff]   ;;  %v2731_v14 = vld [vmem:[%s2851_s6 + $0x18] sm:$0xff]  }
 0x2a8   : > { %v1420_v13 = vmax.f32 %v1412_v12, 0.0  ;;  %1522 = vperm.xlu1 %2274, %v1448_v22   ;;  %v1464_v52 = vmul.f32 %v1448_v22, %v2610_v17  ;;  %v1459_v17 = vld [vmem:[%s2848_s3 + $0x28] sm:$0xff]  ;;  %v1989_v12 = vunpack.c.l.bf16 %v2081_v5 }
 0x2a9   : > { %v1413_v3 = vsub.f32 %v1397_v55, %v1405_v59  ;;  %v1435_v7 = vadd.f32 1e-05, %v1419_v2  ;;  %v2701_v2 = vld [vmem:[%s2851_s6 + $0x8] sm:$0xff]  }
 0x2aa   : > { %v1436_v15 = vadd.f32 1e-05, %v1420_v13  ;;  %v1472_v56 = vsub.f32 %v1456_v53, %v1464_v52  ;;  %v1977_v9 = vunpack.c.l.bf16 %v2701_v2 }
 0x2ab   : > { %v1421_v8 = vmax.f32 %v1413_v3, 0.0  ;;  %2283 = vrsqrt.f32 %v1435_v7  ;;  %v2719_v7 = vld [vmem:[%s2851_s6 + $0x10] sm:$0xff]  }
 0x2ac   : > { %2285 = vrsqrt.f32 %v1434_v10 }
 0x2ad   : > { %v1437_v11 = vadd.f32 1e-05, %v1421_v8  ;;  %v2278_v20 = vpop.eup %2277  ;;  %v2724_v8 = vld [vmem:[%s2851_s6 + $0x30] sm:$0xff]  }
 0x2ae   : > { %v2280_v24 = vpop.eup %2279  ;;  %v1446_v25 = vmul.f32 %v2278_v20, %v1422_v16  ;;  %v1978_v16 = vunpack.c.h.bf16 %v2701_v2  ;;  %v1990_v20 = vunpack.c.h.bf16 %v2081_v5 }
 0x2af   : > { %2287 = vrsqrt.f32 %v1437_v11  ;;  %v1449_v28 = vmul.f32 %v2280_v24, %v1425_v19  ;;  %v1973_v11 = vunpack.c.l.bf16 %v1972_v4  ;;  %v1974_v19 = vunpack.c.h.bf16 %v1972_v4  ;;  %v2088_v24 = vld [vmem:[%s2850_s5 + $0x20] sm:$0xff]  }
 0x2b0   : > { %2289 = vrsqrt.f32 %v1436_v15  ;;  %1512 = vperm.xlu0 %2273, %v1446_v25   ;;  %v1462_v45 = vmul.f32 %v1446_v25, %v2612_v21  ;;  %v1457_v21 = vld [vmem:[%s2848_s3 + $0x18] sm:$0xff]  ;;  %v1982_v25 = vunpack.c.h.bf16 %v2719_v7 }
 0x2b1   : > { %v2282_v27 = vpop.eup %2281  ;;  %1527 = vperm.xlu1 %2274, %v1449_v28   ;;  %v1465_v51 = vmul.f32 %v1449_v28, %v2616_v26  ;;  %v2736_v15 = vld [vmem:[%s2851_s6 + $0x38] sm:$0xff]   ;;  %v1981_v28 = vunpack.c.l.bf16 %v2719_v7 }
 0x2b2   : > { %v1447_v30 = vmul.f32 %v2282_v27, %v1423_v23  ;;  %v2004_v23 = vld [vmem:[%s2850_s5] sm:$0xff]   ;;  %v1998_v27 = vunpack.c.h.bf16 %v2724_v8 }
 0x2b3   : > { %v1473_v54 = vsub.f32 %v1457_v21, %v1465_v51 }
 0x2b4   : > { %1517 = vperm.xlu0 %2273, %v1447_v30   ;;  %v1463_v44 = vmul.f32 %v1447_v30, %v2620_v31  ;;  %v1470_v31 = vsub.f32 %v1454_v48, %v1462_v45  ;;  %v2753_v30 = vld [vmem:[%s2850_s5 + $0x8] sm:$0xff]   ;;  %v2021_v45 = vunpack.c.l.bf16 %v2088_v24 }
 0x2b5   : > { %v2284_v29 = vpop.eup %2283  ;;  %v2009_v52 = vunpack.c.l.bf16 %v2753_v30 }
 0x2b6   : > { %v2286_v33 = vpop.eup %2285  ;;  %v1451_v35 = vmul.f32 %v2284_v29, %v1427_v32  ;;  %v1471_v49 = vsub.f32 %v1455_v47, %v1463_v44  ;;  %v1997_v29 = vunpack.c.l.bf16 %v2724_v8  ;;  %v2758_v32 = vld [vmem:[%s2850_s5 + $0x28] sm:$0xff]   ;;  %v2005_v44 = vunpack.c.l.bf16 %v2004_v23  ;;  %v2782_v47 = vld [vmem:[%s2850_s5 + $0x38] sm:$0xff]  }
 0x2b7   : > { %v1450_v38 = vmul.f32 %v2286_v33, %v1426_v34  ;;  %v1986_v33 = vunpack.c.h.bf16 %v2731_v14  ;;  %v2002_v34 = vunpack.c.h.bf16 %v2736_v15  ;;  %v2026_v51 = vunpack.c.h.bf16 %v2758_v32 }
 0x2b8   : > { %1537 = vperm.xlu1 %2274, %v1451_v35   ;;  %v1467_v55 = vmul.f32 %v1451_v35, %v2624_v37  ;;  %v1461_v37 = vld [vmem:[%s2848_s3 + $0x38] sm:$0xff]  ;;  %v1985_v35 = vunpack.c.l.bf16 %v2731_v14 }
 0x2b9   : > { %v2288_v36 = vpop.eup %2287  ;;  %1532 = vperm.xlu0 %2273, %v1450_v38   ;;  %v1466_v26 = vmul.f32 %v1450_v38, %v2628_v43  ;;  %v1460_v43 = vld [vmem:[%s2848_s3 + $0x30] sm:$0xff] }
 0x2ba   : > { %v2290_v41 = vpop.eup %2289  ;;  %v1453_v42 = vmul.f32 %v2288_v36, %v1429_v39  ;;  %v1475_v58 = vsub.f32 %v1459_v17, %v1467_v55  ;;  %v2001_v36 = vunpack.c.l.bf16 %v2736_v15  ;;  %v2767_v38 = vld [vmem:[%s2850_s5 + $0x10] sm:$0xff]  }
 0x2bb   : > { %v1452_v46 = vmul.f32 %v2290_v41, %v1428_v40  ;;  %v1474_v60 = vsub.f32 %v1458_v57, %v1466_v26  ;;  %v2772_v39 = vld [vmem:[%s2850_s5 + $0x30] sm:$0xff]   ;;  %v2006_v41 = vunpack.c.h.bf16 %v2004_v23  ;;  %v2014_v21 = vunpack.c.h.bf16 %v2767_v38 }
 0x2bc   : > { %1547 = vperm.xlu1 %2274, %v1453_v42   ;;  %v1469_v59 = vmul.f32 %v1453_v42, %v2632_v50  ;;  %v2022_v42 = vunpack.c.h.bf16 %v2088_v24  ;;  %v2030_v53 = vunpack.c.h.bf16 %v2772_v39  ;;  %v2029_v55 = vunpack.c.l.bf16 %v2772_v39 }
 0x2bd   : > { %1542 = vperm.xlu0 %2273, %v1452_v46   ;;  %v1468_v61 = vmul.f32 %v1452_v46, %v2638_v0  ;;  %v2708_v0 = vld [vmem:[%s2851_s6 + $0x28] sm:$0xff]   ;;  %v2777_v46 = vld [vmem:[%s2850_s5 + $0x18] sm:$0xff]   ;;  %v2034_v57 = vunpack.c.h.bf16 %v2782_v47 }
 0x2be   : > { %v1477_v62 = vsub.f32 %v1461_v37, %v1469_v59  ;;  %v1993_v10 = vunpack.c.l.bf16 %v2708_v0  ;;  %v1994_v18 = vunpack.c.h.bf16 %v2708_v0  ;;  %v2018_v26 = vunpack.c.h.bf16 %v2777_v46 }
 0x2bf   : > { %v1476_v63 = vsub.f32 %v1460_v43, %v1468_v61  ;;  %v2017_v37 = vunpack.c.l.bf16 %v2777_v46  ;;  %v2033_v61 = vunpack.c.l.bf16 %v2782_v47 }
 0x2c0   : > { %1573 = vperm.xlu1 %2274, %v1471_v49   ;;  %v2010_v49 = vunpack.c.h.bf16 %v2753_v30 }
 0x2c1   : > { %1568 = vperm.xlu0 %2273, %v1470_v31   ;;  %v2025_v31 = vunpack.c.l.bf16 %v2758_v32 }
 0x2c4   : > { %1583 = vperm.xlu1 %2274, %v1473_v54   ;;  %v2013_v54 = vunpack.c.l.bf16 %v2767_v38 }
 0x2c5   : > { %1578 = vperm.xlu0 %2273, %v1472_v56  }
 0x2c8   : > { %1593 = vperm.xlu1 %2274, %v1475_v58  }
 0x2c9   : > { %1588 = vperm.xlu0 %2273, %v1474_v60  }
 0x2cc   : > { %1603 = vperm.xlu1 %2274, %v1477_v62  }
 0x2cd   : > { %1598 = vperm.xlu0 %2273, %v1476_v63  }
 0x327   : > { %v1523_v1 = vpop.permute.xlu1 %1522 }
 0x328   : > { %v1552_v43 = vmul.f32 %v1977_v9, %v1523_v1  ;;  %v1560_v62 = vmul.f32 %v1993_v10, %v1523_v1 }
 0x32f   : > { %v1513_v50 = vpop.permute.xlu0 %1512 }
 0x330   : > { %v2703_v3 = vpop.permute.xlu1 %1527  ;;  %v1550_v58 = vmul.f32 %v1973_v11, %v1513_v50  ;;  %v1558_v59 = vmul.f32 %v1989_v12, %v1513_v50 }
 0x331   : > { %v1553_v4 = vmul.f32 %v1978_v16, %v2703_v3  ;;  %v1561_v5 = vmul.f32 %v1994_v18, %v2703_v3 }
 0x333   : > { %v1518_v6 = vpop.permute.xlu0 %1517 }
 0x334   : > { %v1551_v56 = vmul.f32 %v1974_v19, %v1518_v6  ;;  %v1559_v17 = vmul.f32 %v1990_v20, %v1518_v6 }
 0x337   : > { %v1538_v13 = vpop.permute.xlu1 %1537 }
 0x338   : > { %v1533_v22 = vpop.permute.xlu0 %1532  ;;  %v1555_v8 = vmul.f32 %v1982_v25, %v1538_v13  ;;  %v1563_v19 = vmul.f32 %v1998_v27, %v1538_v13 }
 0x339   : > { %v1554_v12 = vmul.f32 %v1981_v28, %v1533_v22  ;;  %v1562_v20 = vmul.f32 %v1997_v29, %v1533_v22 }
 0x33b   : > { %v1548_v40 = vpop.permute.xlu1 %1547 }
 0x33c   : > { %v2784_v48 = vpop.permute.xlu0 %1542  ;;  %v1557_v18 = vmul.f32 %v1986_v33, %v1548_v40 }
 0x33f   : > { %v1574_v60 = vpop.permute.xlu1 %1573 }
 0x340   : > { %v1607_v63 = vadd.f32 %v1574_v60, %v1551_v56  ;;  %v1615_v2 = vadd.f32 %v1574_v60, %v1559_v17  ;;  %v1569_v0 = vpop.permute.xlu0 %1568 }
 0x341   : > { %v1606_v6 = vadd.f32 %v1569_v0, %v1550_v58  ;;  %v1614_v7 = vadd.f32 %v1569_v0, %v1558_v59  ;;  %v1565_v58 = vmul.f32 %v2002_v34, %v1548_v40 }
 0x342   : > { %v1655_v11 = vadd.f32 %v2006_v41, %v1607_v63  ;;  %v1663_v50 = vadd.f32 %v2022_v42, %v1615_v2 }
 0x343   : > { %v1654_v23 = vadd.f32 %v2005_v44, %v1606_v6  ;;  %v1662_v24 = vadd.f32 %v2021_v45, %v1614_v7  ;;  %v1584_v30 = vpop.permute.xlu1 %1583 }
 0x344   : > { %v1671_v9 = vmax.f32 %v1655_v11, 0.0  ;;  %v1679_v1 = vmax.f32 %v1663_v50, 0.0  ;;  %v1609_v10 = vadd.f32 %v1584_v30, %v1553_v4  ;;  %v1617_v32 = vadd.f32 %v1584_v30, %v1561_v5  ;;  %v1579_v56 = vpop.permute.xlu0 %1578 }
 0x345   : > { %v1670_v17 = vmax.f32 %v1654_v23, 0.0  ;;  %v1678_v16 = vmax.f32 %v1662_v24, 0.0  ;;  %v1608_v60 = vadd.f32 %v1579_v56, %v1552_v43  ;;  %v1616_v3 = vadd.f32 %v1579_v56, %v1560_v62 }
 0x346   : > { %v1657_v25 = vadd.f32 %v2010_v49, %v1609_v10  ;;  %v1665_v13 = vadd.f32 %v2026_v51, %v1617_v32  ;;  %v1556_v51 = vmul.f32 %v1985_v35, %v2784_v48 }
 0x347   : > { %v2038_v27 = vpack.c.bf16 %v1671_v9, %v1670_v17  ;;  %v2058_v41 = vpack.c.bf16 %v1679_v1, %v1678_v16  ;;  %v1656_v28 = vadd.f32 %v2009_v52, %v1608_v60  ;;  %v1664_v22 = vadd.f32 %v2025_v31, %v1616_v3  ;;  %v1594_v29 = vpop.permute.xlu1 %1593 }
 0x348   : > { %v1673_v42 = vmax.f32 %v1657_v25, 0.0  ;;  %v1681_v44 = vmax.f32 %v1665_v13, 0.0  ;;  %v1611_v45 = vadd.f32 %v1594_v29, %v1555_v8  ;;  %v1619_v59 = vadd.f32 %v1594_v29, %v1563_v19  ;;  %v1589_v63 = vpop.permute.xlu0 %1588 }
 0x349   : > { %2039 = vst [vmem:[%s2851_s6] sm:$0xff] %v2038_v27   ;;  %2095 = vst [vmem:[%s2851_s6 + $0x20] sm:$0xff] %v2058_v41   ;;  %v1672_v33 = vmax.f32 %v1656_v28, 0.0  ;;  %v1680_v34 = vmax.f32 %v1664_v22, 0.0  ;;  %v1610_v40 = vadd.f32 %v1589_v63, %v1554_v12  ;;  %v1618_v49 = vadd.f32 %v1589_v63, %v1562_v20 }
 0x34a   : > { %v1564_v52 = vmul.f32 %v2001_v36, %v2784_v48  ;;  %v1659_v31 = vadd.f32 %v2014_v21, %v1611_v45  ;;  %v1667_v43 = vadd.f32 %v2030_v53, %v1619_v59 }
 0x34b   : > { %v2043_v62 = vpack.c.bf16 %v1673_v42, %v1672_v33  ;;  %v2063_v2 = vpack.c.bf16 %v1681_v44, %v1680_v34  ;;  %v1658_v0 = vadd.f32 %v2013_v54, %v1610_v40  ;;  %v1666_v4 = vadd.f32 %v2029_v55, %v1618_v49  ;;  %v1604_v5 = vpop.permute.xlu1 %1603 }
 0x34c   : > { %v1675_v6 = vmax.f32 %v1659_v31, 0.0  ;;  %v1683_v7 = vmax.f32 %v1667_v43, 0.0  ;;  %v1613_v8 = vadd.f32 %v1604_v5, %v1557_v18  ;;  %v1621_v14 = vadd.f32 %v1604_v5, %v1565_v58  ;;  %v1599_v35 = vpop.permute.xlu0 %1598 }
 0x34d   : > { %2092 = vst [vmem:[%s2851_s6 + $0x8] sm:$0xff] %v2043_v62   ;;  %2096 = vst [vmem:[%s2851_s6 + $0x28] sm:$0xff] %v2063_v2   ;;  %v1674_v15 = vmax.f32 %v1658_v0, 0.0  ;;  %v1682_v36 = vmax.f32 %v1666_v4, 0.0  ;;  %v1612_v38 = vadd.f32 %v1599_v35, %v1556_v51  ;;  %v1620_v48 = vadd.f32 %v1599_v35, %v1564_v52 }
 0x34e   : > { %v1661_v39 = vadd.f32 %v2018_v26, %v1613_v8  ;;  %v1669_v21 = vadd.f32 %v2034_v57, %v1621_v14 }
 0x34f   : > { %v2048_v53 = vpack.c.bf16 %v1675_v6, %v1674_v15  ;;  %v2068_v54 = vpack.c.bf16 %v1683_v7, %v1682_v36  ;;  %v1660_v55 = vadd.f32 %v2017_v37, %v1612_v38  ;;  %v1668_v19 = vadd.f32 %v2033_v61, %v1620_v48 }
 0x350   : > { %v1677_v11 = vmax.f32 %v1661_v39, 0.0  ;;  %v1685_v50 = vmax.f32 %v1669_v21, 0.0 }
 0x351   : > { %2093 = vst [vmem:[%s2851_s6 + $0x10] sm:$0xff] %v2048_v53   ;;  %2097 = vst [vmem:[%s2851_s6 + $0x30] sm:$0xff] %v2068_v54   ;;  %v1676_v26 = vmax.f32 %v1660_v55, 0.0  ;;  %v1684_v57 = vmax.f32 %v1668_v19, 0.0 }
 0x353   : > { %v2053_v12 = vpack.c.bf16 %v1677_v11, %v1676_v26  ;;  %v2073_v20 = vpack.c.bf16 %v1685_v50, %v1684_v57 }
 0x355   : > { %2094 = vst [vmem:[%s2851_s6 + $0x18] sm:$0xff] %v2053_v12   ;;  %2098 = vst [vmem:[%s2851_s6 + $0x38] sm:$0xff] %v2073_v20  }
 0x356 PF: > { %s16_s21 = sadd.s32 1, %s2297_s21  }
 0x357   : > { %p13_p6 = scmp.ge.s32.totalorder %s16_s21, 4  }
 0x359   :  { %15 = sbr.rel (!%p13_p6) target bundleno = 1 (0x1), region = 79 }

</bundles_post_ra>
